<compile_context>
chip_gen: v5e
topology: v5e:2x2
jax: 0.10.0
libtpu: 0.0.40
codegen_flags: <defaults>
</compile_context>

<pallas_src>
import functools
import math

import jax
import jax.numpy as jnp
from jax import lax
from jax.experimental import pallas as pl
from jax.experimental.pallas import tpu as pltpu


def _pick_mtile(M, cap=256):
    for t in (cap, 128, 64, 32, 16, 8):
        if t <= M and M % t == 0:
            return t
    return M


# --------------------- fused LayerNorm + matmul (+bias) ----------------------

def _ln_matmul_kernel(x_ref, g_ref, b_ref, w_ref, bias_ref, o_ref, *, eps):
    x = x_ref[...]                                        # (tm, K) f32
    mu = jnp.mean(x, axis=-1, keepdims=True)
    xc = x - mu
    var = jnp.mean(xc * xc, axis=-1, keepdims=True)
    xn = (xc * lax.rsqrt(var + eps)) * g_ref[...] + b_ref[...]
    acc = jnp.dot(xn.astype(jnp.bfloat16), w_ref[...],
                  preferred_element_type=jnp.float32)     # bf16 MXU, f32 acc
    o_ref[...] = (acc + bias_ref[...]).astype(o_ref.dtype)


def ln_matmul(x, gamma, beta, w_bf16, bias, eps):
    """out = LayerNorm(x) @ w + bias   (f32 in/out, bf16 MXU inputs)."""
    M, Kd = x.shape
    N = w_bf16.shape[1]
    tm = _pick_mtile(M)
    return pl.pallas_call(
        functools.partial(_ln_matmul_kernel, eps=eps),
        out_shape=jax.ShapeDtypeStruct((M, N), jnp.float32),
        grid=(M // tm,),
        in_specs=[
            pl.BlockSpec((tm, Kd), lambda i: (i, 0)),
            pl.BlockSpec((1, Kd), lambda i: (0, 0)),
            pl.BlockSpec((1, Kd), lambda i: (0, 0)),
            pl.BlockSpec((Kd, N), lambda i: (0, 0)),
            pl.BlockSpec((1, N), lambda i: (0, 0)),
        ],
        out_specs=pl.BlockSpec((tm, N), lambda i: (i, 0)),
        compiler_params=pltpu.CompilerParams(dimension_semantics=("parallel",)),
    )(x, gamma.reshape(1, Kd), beta.reshape(1, Kd), w_bf16,
      bias.reshape(1, N).astype(jnp.float32))


# ---------- fused out_norm + SiLU gate + out_proj + residual add ------------

def _gated_out_proj_kernel(y_ref, z_ref, g_ref, b_ref, w_ref, r_ref, o_ref,
                           *, eps):
    y = y_ref[...]
    mu = jnp.mean(y, axis=-1, keepdims=True)
    yc = y - mu
    var = jnp.mean(yc * yc, axis=-1, keepdims=True)
    yn = (yc * lax.rsqrt(var + eps)) * g_ref[...] + b_ref[...]
    z = z_ref[...]
    gated = yn * (z * (1.0 / (1.0 + jnp.exp(-z))))        # LN(y) * SiLU(z)
    acc = jnp.dot(gated.astype(jnp.bfloat16), w_ref[...],
                  preferred_element_type=jnp.float32)
    o_ref[...] = (acc + r_ref[...]).astype(o_ref.dtype)   # + residual (f32)


def gated_out_proj(y, z, gamma, beta, w_bf16, residual, eps):
    M, D = y.shape
    N = w_bf16.shape[1]
    tm = _pick_mtile(M)
    return pl.pallas_call(
        functools.partial(_gated_out_proj_kernel, eps=eps),
        out_shape=jax.ShapeDtypeStruct((M, N), jnp.float32),
        grid=(M // tm,),
        in_specs=[
            pl.BlockSpec((tm, D), lambda i: (i, 0)),
            pl.BlockSpec((tm, D), lambda i: (i, 0)),
            pl.BlockSpec((1, D), lambda i: (0, 0)),
            pl.BlockSpec((1, D), lambda i: (0, 0)),
            pl.BlockSpec((D, N), lambda i: (0, 0)),
            pl.BlockSpec((tm, N), lambda i: (i, 0)),
        ],
        out_specs=pl.BlockSpec((tm, N), lambda i: (i, 0)),
        compiler_params=pltpu.CompilerParams(dimension_semantics=("parallel",)),
    )(y, z, gamma.reshape(1, D), beta.reshape(1, D), w_bf16, residual)


# ------------------------- matmul + bias + residual --------------------------

def _mm_bias_res_kernel(x_ref, w_ref, b_ref, r_ref, o_ref):
    acc = jnp.dot(x_ref[...].astype(jnp.bfloat16), w_ref[...],
                  preferred_element_type=jnp.float32)
    o_ref[...] = (acc + b_ref[...] + r_ref[...]).astype(o_ref.dtype)


def matmul_bias_residual(x, w_bf16, bias, residual):
    M, Kd = x.shape
    N = w_bf16.shape[1]
    tm = _pick_mtile(M)
    return pl.pallas_call(
        _mm_bias_res_kernel,
        out_shape=jax.ShapeDtypeStruct((M, N), jnp.float32),
        grid=(M // tm,),
        in_specs=[
            pl.BlockSpec((tm, Kd), lambda i: (i, 0)),
            pl.BlockSpec((Kd, N), lambda i: (0, 0)),
            pl.BlockSpec((1, N), lambda i: (0, 0)),
            pl.BlockSpec((tm, N), lambda i: (i, 0)),
        ],
        out_specs=pl.BlockSpec((tm, N), lambda i: (i, 0)),
        compiler_params=pltpu.CompilerParams(dimension_semantics=("parallel",)),
    )(x, w_bf16, bias.reshape(1, N).astype(jnp.float32), residual)


# ------------- K-batched direction projection (x_proj + folded dt_proj) ------

def _bdir_proj_kernel(x_ref, w_ref, o_ref):
    o_ref[...] = jnp.dot(x_ref[...].astype(jnp.bfloat16), w_ref[...],
                         preferred_element_type=jnp.float32
                         ).astype(o_ref.dtype)


def batched_dir_proj(us_flat, w_comb_bf16):
    """us_flat: (K, M, D) f32,  w_comb_bf16: (K, D, Npad) -> (K, M, Npad)."""
    K, M, D = us_flat.shape
    Npad = w_comb_bf16.shape[-1]
    tm = _pick_mtile(M)
    return pl.pallas_call(
        _bdir_proj_kernel,
        out_shape=jax.ShapeDtypeStruct((K, M, Npad), jnp.float32),
        grid=(K, M // tm),
        in_specs=[
            pl.BlockSpec((None, tm, D), lambda k, i: (k, i, 0)),
            pl.BlockSpec((None, D, Npad), lambda k, i: (k, 0, 0)),
        ],
        out_specs=pl.BlockSpec((None, tm, Npad), lambda k, i: (k, i, 0)),
        compiler_params=pltpu.CompilerParams(
            dimension_semantics=("parallel", "parallel")),
    )(us_flat, w_comb_bf16)


# ------------------------ depthwise 3x3 conv + SiLU --------------------------

def _dwconv3x3_silu_kernel(xp_ref, w_ref, b_ref, o_ref, *, H, W):
    xp = xp_ref[...]            # (H+2, W+2, C), zero padded in wrapper
    w = w_ref[...]              # (9, C) depthwise taps, (kh, kw) row-major
    C = xp.shape[-1]
    acc = jnp.zeros((H, W, C), jnp.float32)
    for i in range(3):
        for j in range(3):
            acc = acc + xp[i:i + H, j:j + W, :] * w[i * 3 + j]
    acc = acc + b_ref[...]
    o_ref[...] = acc * (1.0 / (1.0 + jnp.exp(-acc)))      # fused SiLU


def dwconv3x3_silu(x, w9, bias):
    # TODO(synk): for large H/W, tile over row blocks with an in-kernel halo
    # instead of a full padded image block per batch (v7x VMEM headroom).
    B, H, W, C = x.shape
    xp = jnp.pad(x, ((0, 0), (1, 1), (1, 1), (0, 0)))
    return pl.pallas_call(
        functools.partial(_dwconv3x3_silu_kernel, H=H, W=W),
        out_shape=jax.ShapeDtypeStruct((B, H, W, C), jnp.float32),
        grid=(B,),
        in_specs=[
            pl.BlockSpec((None, H + 2, W + 2, C), lambda b: (b, 0, 0, 0)),
            pl.BlockSpec((9, C), lambda b: (0, 0)),
            pl.BlockSpec((1, C), lambda b: (0, 0)),
        ],
        out_specs=pl.BlockSpec((None, H, W, C), lambda b: (b, 0, 0, 0)),
        compiler_params=pltpu.CompilerParams(dimension_semantics=("parallel",)),
    )(xp, w9, bias.reshape(1, C))


# ------------------------- selective scan (4 directions) ---------------------

def _ssm_scan_kernel(u_ref, dl_ref, At_ref, Bs_ref, Cs_ref, D_ref, dtb_ref,
                     o_ref, dA_ref, h_ref):
    # Per (direction, batch) grid point.
    #   u_ref / dl_ref / o_ref : (L, C)     At_ref        : (N, C)
    #   Bs_ref / Cs_ref        : (L, N)     D_ref/dtb_ref : (1, C)
    #   dA_ref / h_ref         : (L, N*C) VMEM scratch (state n -> cols n*C:(n+1)*C)
    L, C = u_ref.shape
    N = At_ref.shape[0]
    u = u_ref[...]

    # ---- vectorized pre-pass (softplus / exp / B*dt*u off the serial chain) --
    raw = dl_ref[...] + dtb_ref[...]                           # (L, C)
    dt = jnp.where(raw > 20.0, raw,
                   jnp.log1p(jnp.exp(jnp.minimum(raw, 20.0))))  # safe softplus
    dtu = dt * u
    for n in range(N):                                   # static unroll, N = d_state
        a_n = At_ref[pl.ds(n, 1), :]                     # (1, C)
        b_n = Bs_ref[:, pl.ds(n, 1)]                     # (L, 1)
        dA_ref[:, pl.ds(n * C, C)] = jnp.exp(a_n * dt)   # exp(A_n * dt_t)
        h_ref[:, pl.ds(n * C, C)] = b_n * dtu            # B_{t,n} * dt_t * u_t

    # ---- serial recurrence: pure VPU mul+add on lane-dense (1, N*C) rows ----
    # TODO(synk): for large L, chunk the (L, N*C) precompute / state buffers.
    def body(t, h):
        h = dA_ref[pl.ds(t, 1), :] * h + h_ref[pl.ds(t, 1), :]
        h_ref[pl.ds(t, 1), :] = h                        # keep h_t for output pass
        return h

    lax.fori_loop(0, L, body, jnp.zeros((1, N * C), jnp.float32))

    # ---- vectorized output pass:  y_t = sum_n C_{t,n} h_{t,n,:} + D u_t -----
    y = D_ref[...] * u
    for n in range(N):
        y = y + Cs_ref[:, pl.ds(n, 1)] * h_ref[:, pl.ds(n * C, C)]
    o_ref[...] = y


def selective_scan_dirs(us, deltas, At, Bs, Cs, Ds, dtb):
    """us/deltas: (K,B,L,C); At: (K,N,C); Bs/Cs: (K,B,L,N); Ds/dtb: (K,1,C)."""
    K, B, L, C = us.shape
    N = At.shape[1]
    return pl.pallas_call(
        _ssm_scan_kernel,
        out_shape=jax.ShapeDtypeStruct((K, B, L, C), jnp.float32),
        grid=(K, B),
        in_specs=[
            pl.BlockSpec((None, None, L, C), lambda k, b: (k, b, 0, 0)),
            pl.BlockSpec((None, None, L, C), lambda k, b: (k, b, 0, 0)),
            pl.BlockSpec((None, N, C), lambda k, b: (k, 0, 0)),
            pl.BlockSpec((None, None, L, N), lambda k, b: (k, b, 0, 0)),
            pl.BlockSpec((None, None, L, N), lambda k, b: (k, b, 0, 0)),
            pl.BlockSpec((None, 1, C), lambda k, b: (k, 0, 0)),
            pl.BlockSpec((None, 1, C), lambda k, b: (k, 0, 0)),
        ],
        out_specs=pl.BlockSpec((None, None, L, C), lambda k, b: (k, b, 0, 0)),
        scratch_shapes=[pltpu.VMEM((L, N * C), jnp.float32),
                        pltpu.VMEM((L, N * C), jnp.float32)],
        compiler_params=pltpu.CompilerParams(
            dimension_semantics=("parallel", "parallel")),
    )(us, deltas, At, Bs, Cs, Ds, dtb)


# ------------------------------ VSSBlock glue --------------------------------

def vss_block_forward(x, p):
    B, H, W, C = x.shape
    L = H * W
    M = B * L
    d_inner = p["in_proj_w_bf16"].shape[1] // 2
    d_state = p["A_logs"].shape[-1]
    K = 4

    # ---------------- SS2D branch: x + SS2D(LN(x)) ----------------
    x_flat = x.reshape(M, C)
    # LayerNorm (eps=1e-6, VSSBlock default) fused with the in_proj matmul
    xz = ln_matmul(x_flat, p["norm_g"], p["norm_b"], p["in_proj_w_bf16"],
                   jnp.zeros((2 * d_inner,), jnp.float32), eps=1e-6)
    xd, z = xz[:, :d_inner], xz[:, d_inner:]
    x_conv = dwconv3x3_silu(xd.reshape(B, H, W, d_inner),
                            p["conv_w9"], p["conv_b"])

    # four scan directions (layout glue): (K, B, L, d_inner)
    u0 = x_conv.reshape(B, L, d_inner)                                # h-major
    u1 = jnp.transpose(x_conv, (0, 2, 1, 3)).reshape(B, L, d_inner)   # w-major
    us = jnp.stack([u0, u1, jnp.flip(u0, axis=1), jnp.flip(u1, axis=1)], axis=0)

    # batched per-direction projection; dt_proj is folded into x_proj, output
    # is a lane-dense 128-wide slab: [delta(d_inner) | B(N) | C(N) | pad]
    proj = batched_dir_proj(us.reshape(K, M, d_inner), p["dir_proj_w_bf16"])
    deltas = proj[:, :, :d_inner].reshape(K, B, L, d_inner)
    Bs = proj[:, :, d_inner:d_inner + d_state].reshape(K, B, L, d_state)
    Cs = proj[:, :, d_inner + d_state:d_inner + 2 * d_state].reshape(
        K, B, L, d_state)

    At = -jnp.exp(p["A_logs"]).reshape(K, d_inner, d_state)
    At = jnp.transpose(At, (0, 2, 1))                                 # (K, N, C)
    ys = selective_scan_dirs(us, deltas, At, Bs, Cs,
                             p["Ds"].reshape(K, 1, d_inner),
                             p["dt_projs_b"].reshape(K, 1, d_inner))

    # merge the 4 directional outputs back into h-major raster order
    def wh_to_hw(t):                       # (B, L=W*H, C) w-major -> h-major
        return jnp.transpose(t.reshape(B, W, H, d_inner),
                             (0, 2, 1, 3)).reshape(B, L, d_inner)
    y = (ys[0] + jnp.flip(ys[2], axis=1)
         + wh_to_hw(ys[1]) + wh_to_hw(jnp.flip(ys[3], axis=1)))
    y = y.reshape(M, d_inner)

    # out_norm (eps=1e-5, nn.LayerNorm default) + SiLU gate + out_proj + residual
    x1 = gated_out_proj(y, z, p["out_norm_g"], p["out_norm_b"],
                        p["out_proj_w_bf16"], x_flat, eps=1e-5)

    # ---------------- MLP branch: x1 + Mlp(LN(x1)) ----------------
    h1 = ln_matmul(x1, p["norm2_g"], p["norm2_b"], p["fc1_w_bf16"],
                   p["fc1_b"], eps=1e-6)
    # TODO(synk): exact erf-based GELU (nn.GELU default) kept in plain-JAX glue
    # to avoid relying on erf lowering inside Mosaic.
    h1 = jax.nn.gelu(h1, approximate=False)
    out = matmul_bias_residual(h1, p["fc2_w_bf16"], p["fc2_b"], x1)
    return out.reshape(B, H, W, C)


def init_params(key, d_model=32, d_state=16, ssm_ratio=2.0, mlp_ratio=4.0):
    d_inner = int(ssm_ratio * d_model)
    dt_rank = math.ceil(d_model / 16)
    K = 4
    mlp_hidden = int(d_model * mlp_ratio)
    keys = jax.random.split(key, 12)
    s = 0.02
    f32 = jnp.float32

    in_proj_w = s * jax.random.normal(keys[0], (d_model, 2 * d_inner), f32)
    # torch Linear weights: x_proj (dt_rank+2N, d_inner), dt_proj (d_inner, dt_rank)
    x_proj_w = s * jax.random.normal(keys[3], (K, dt_rank + 2 * d_state, d_inner), f32)
    dt_projs_w = s * jax.random.normal(keys[4], (K, d_inner, dt_rank), f32)
    out_proj_w = s * jax.random.normal(keys[6], (d_inner, d_model), f32)
    fc1_w = s * jax.random.normal(keys[7], (d_model, mlp_hidden), f32)
    fc2_w = s * jax.random.normal(keys[8], (mlp_hidden, d_model), f32)

    # Fold dt_proj into x_proj:  delta = u @ (dt_w @ x_proj[:dt_rank]).T,
    # B = u @ x_proj[dt_rank:dt_rank+N].T,  C = u @ x_proj[dt_rank+N:].T
    w_delta = jnp.einsum("kdr,krc->kcd", dt_projs_w, x_proj_w[:, :dt_rank, :])
    w_bc = jnp.transpose(x_proj_w[:, dt_rank:, :], (0, 2, 1))       # (K, d_inner, 2N)
    w_dir = jnp.concatenate([w_delta, w_bc], axis=-1)               # (K, d_inner, d_inner+2N)
    pad = (-w_dir.shape[-1]) % 128                                  # lane-dense output
    w_dir = jnp.pad(w_dir, ((0, 0), (0, 0), (0, pad)))

    return {
        "norm_g": jnp.ones((d_model,), f32),
        "norm_b": jnp.zeros((d_model,), f32),
        "in_proj_w_bf16": in_proj_w.astype(jnp.bfloat16),
        # depthwise taps: PyTorch (C,1,3,3) flattened (kh,kw) row-major per channel
        "conv_w9": s * jax.random.normal(keys[1], (9, d_inner), f32),
        "conv_b": s * jax.random.normal(keys[2], (d_inner,), f32),
        "dir_proj_w_bf16": w_dir.astype(jnp.bfloat16),
        "dt_projs_b": 0.01 * jax.random.normal(keys[5], (K, d_inner), f32),
        "A_logs": jnp.log(jnp.broadcast_to(
            jnp.arange(1, d_state + 1, dtype=f32), (K * d_inner, d_state))),
        "Ds": jnp.ones((K, d_inner), f32),
        "out_norm_g": jnp.ones((d_inner,), f32),
        "out_norm_b": jnp.zeros((d_inner,), f32),
        "out_proj_w_bf16": out_proj_w.astype(jnp.bfloat16),
        "norm2_g": jnp.ones((d_model,), f32),
        "norm2_b": jnp.zeros((d_model,), f32),
        "fc1_w_bf16": fc1_w.astype(jnp.bfloat16),
        "fc1_b": jnp.zeros((mlp_hidden,), f32),
        "fc2_w_bf16": fc2_w.astype(jnp.bfloat16),
        "fc2_b": jnp.zeros((d_model,), f32),
    }


if __name__ == "__main__":
    key = jax.random.PRNGKey(0)
    kx, kp = jax.random.split(key)
    B, H, W, C = 2, 8, 8, 32      # hidden_dim=32 -> d_inner=64, d_state=16, dt_rank=2
    x = jax.random.normal(kx, (B, H, W, C), dtype=jnp.float32)
    params = init_params(kp, d_model=C)
    out = jax.jit(vss_block_forward)(x, params)
    out = jax.block_until_ready(out)
    assert out.shape == (B, H, W, C)
    assert bool(jnp.all(jnp.isfinite(out)))
    print("KERNEL_OK")
</pallas_src>

<mosaic_0001>
module attributes {stable_mosaic.version = 11 : i64} {
  func.func @_ln_matmul_kernel(%arg0: i32, %arg1: memref<128x32xf32, #tpu.memory_space<vmem>>, %arg2: memref<1x32xf32, #tpu.memory_space<vmem>>, %arg3: memref<1x32xf32, #tpu.memory_space<vmem>>, %arg4: memref<32x128xbf16, #tpu.memory_space<vmem>>, %arg5: memref<1x128xf32, #tpu.memory_space<vmem>>, %arg6: memref<128x128xf32, #tpu.memory_space<vmem>>) attributes {dimension_semantics = [#tpu.dimension_semantics<parallel>], iteration_bounds = array<i64: 1>, scalar_prefetch = 0 : i64, scratch_operands = 0 : i64, tpu.core_type = #tpu.core_type<tc>, window_params = [{transform_indices = @transform_0, window_bounds = array<i64: 128, 32>}, {pipeline_mode = #tpu.pipeline_mode<synchronous>, transform_indices = @transform_1, window_bounds = array<i64: 1, 32>}, {pipeline_mode = #tpu.pipeline_mode<synchronous>, transform_indices = @transform_2, window_bounds = array<i64: 1, 32>}, {pipeline_mode = #tpu.pipeline_mode<synchronous>, transform_indices = @transform_3, window_bounds = array<i64: 32, 128>}, {pipeline_mode = #tpu.pipeline_mode<synchronous>, transform_indices = @transform_4, window_bounds = array<i64: 1, 128>}, {transform_indices = @transform_5, window_bounds = array<i64: 128, 128>}]} {
    %c0 = arith.constant 0 : index
    %c0_0 = arith.constant 0 : index
    %0 = vector.load %arg1[%c0, %c0_0] : memref<128x32xf32, #tpu.memory_space<vmem>>, vector<128x32xf32>
    %cst = arith.constant dense<0.000000e+00> : vector<128xf32>
    %1 = vector.multi_reduction <add>, %0, %cst [1] : vector<128x32xf32> to vector<128xf32>
    %2 = vector.shape_cast %1 : vector<128xf32> to vector<128x1xf32>
    %cst_1 = arith.constant 3.200000e+01 : f32
    %3 = vector.broadcast %cst_1 : f32 to vector<128x1xf32>
    %4 = arith.divf %2, %3 : vector<128x1xf32>
    %5 = vector.broadcast %4 : vector<128x1xf32> to vector<128x32xf32>
    %6 = arith.subf %0, %5 : vector<128x32xf32>
    %7 = arith.mulf %6, %6 : vector<128x32xf32>
    %cst_2 = arith.constant dense<0.000000e+00> : vector<128xf32>
    %8 = vector.multi_reduction <add>, %7, %cst_2 [1] : vector<128x32xf32> to vector<128xf32>
    %9 = vector.shape_cast %8 : vector<128xf32> to vector<128x1xf32>
    %cst_3 = arith.constant 3.200000e+01 : f32
    %10 = vector.broadcast %cst_3 : f32 to vector<128x1xf32>
    %11 = arith.divf %9, %10 : vector<128x1xf32>
    %cst_4 = arith.constant 9.99999997E-7 : f32
    %12 = vector.broadcast %cst_4 : f32 to vector<128x1xf32>
    %13 = arith.addf %11, %12 : vector<128x1xf32>
    %14 = math.rsqrt %13 : vector<128x1xf32>
    %15 = vector.broadcast %14 : vector<128x1xf32> to vector<128x32xf32>
    %16 = arith.mulf %6, %15 : vector<128x32xf32>
    %c0_5 = arith.constant 0 : index
    %c0_6 = arith.constant 0 : index
    %17 = vector.load %arg2[%c0_5, %c0_6] : memref<1x32xf32, #tpu.memory_space<vmem>>, vector<1x32xf32>
    %18 = vector.broadcast %17 : vector<1x32xf32> to vector<128x32xf32>
    %19 = arith.mulf %16, %18 : vector<128x32xf32>
    %c0_7 = arith.constant 0 : index
    %c0_8 = arith.constant 0 : index
    %20 = vector.load %arg3[%c0_7, %c0_8] : memref<1x32xf32, #tpu.memory_space<vmem>>, vector<1x32xf32>
    %21 = vector.broadcast %20 : vector<1x32xf32> to vector<128x32xf32>
    %22 = arith.addf %19, %21 : vector<128x32xf32>
    %23 = arith.truncf %22 : vector<128x32xf32> to vector<128x32xbf16>
    %c0_9 = arith.constant 0 : index
    %c0_10 = arith.constant 0 : index
    %24 = vector.load %arg4[%c0_9, %c0_10] : memref<32x128xbf16, #tpu.memory_space<vmem>>, vector<32x128xbf16>
    %cst_11 = arith.constant dense<0.000000e+00> : vector<128x128xf32>
    %25 = tpu.matmul %23, %24, %cst_11 {dimension_numbers = #tpu.dot_dimension_numbers<[1], [0], [0], [1], [0, 0, 1, 1], [], []>} : vector<128x32xbf16>, vector<32x128xbf16>, vector<128x128xf32> -> vector<128x128xf32>
    %c0_12 = arith.constant 0 : index
    %c0_13 = arith.constant 0 : index
    %26 = vector.load %arg5[%c0_12, %c0_13] : memref<1x128xf32, #tpu.memory_space<vmem>>, vector<1x128xf32>
    %27 = vector.broadcast %26 : vector<1x128xf32> to vector<128x128xf32>
    %28 = arith.addf %25, %27 : vector<128x128xf32>
    %c0_14 = arith.constant 0 : index
    %c0_15 = arith.constant 0 : index
    %29 = vector.load %arg6[%c0_14, %c0_15] : memref<128x128xf32, #tpu.memory_space<vmem>>, vector<128x128xf32>
    tpu.vector_store %arg6[%c0_14, %c0_15], %28 {strides = array<i32>} : memref<128x128xf32, #tpu.memory_space<vmem>>, vector<128x128xf32>,
    return
  }
  func.func @transform_0(%arg0: i32) -> (i32, i32) {
    %c0_i32 = arith.constant 0 : i32
    %c0_i32_0 = arith.constant 0 : i32
    return %arg0, %c0_i32 : i32, i32
  }
  func.func @transform_1(%arg0: i32) -> (i32, i32) {
    %c0_i32 = arith.constant 0 : i32
    %c0_i32_0 = arith.constant 0 : i32
    %c0_i32_1 = arith.constant 0 : i32
    return %c0_i32, %c0_i32_0 : i32, i32
  }
  func.func @transform_2(%arg0: i32) -> (i32, i32) {
    %c0_i32 = arith.constant 0 : i32
    %c0_i32_0 = arith.constant 0 : i32
    %c0_i32_1 = arith.constant 0 : i32
    return %c0_i32, %c0_i32_0 : i32, i32
  }
  func.func @transform_3(%arg0: i32) -> (i32, i32) {
    %c0_i32 = arith.constant 0 : i32
    %c0_i32_0 = arith.constant 0 : i32
    %c0_i32_1 = arith.constant 0 : i32
    return %c0_i32, %c0_i32_0 : i32, i32
  }
  func.func @transform_4(%arg0: i32) -> (i32, i32) {
    %c0_i32 = arith.constant 0 : i32
    %c0_i32_0 = arith.constant 0 : i32
    %c0_i32_1 = arith.constant 0 : i32
    return %c0_i32, %c0_i32_0 : i32, i32
  }
  func.func @transform_5(%arg0: i32) -> (i32, i32) {
    %c0_i32 = arith.constant 0 : i32
    %c0_i32_0 = arith.constant 0 : i32
    return %arg0, %c0_i32 : i32, i32
  }
}

module attributes {stable_mosaic.version = 11 : i64} {
  func.func @_dwconv3x3_silu_kernel(%arg0: i32, %arg1: memref<1x10x10x64xf32, #tpu.memory_space<vmem>>, %arg2: memref<9x64xf32, #tpu.memory_space<vmem>>, %arg3: memref<1x64xf32, #tpu.memory_space<vmem>>, %arg4: memref<1x8x8x64xf32, #tpu.memory_space<vmem>>) attributes {dimension_semantics = [#tpu.dimension_semantics<parallel>], iteration_bounds = array<i64: 2>, scalar_prefetch = 0 : i64, scratch_operands = 0 : i64, tpu.core_type = #tpu.core_type<tc>, window_params = [{transform_indices = @transform_0, window_bounds = array<i64: 1, 10, 10, 64>}, {pipeline_mode = #tpu.pipeline_mode<synchronous>, transform_indices = @transform_1, window_bounds = array<i64: 9, 64>}, {pipeline_mode = #tpu.pipeline_mode<synchronous>, transform_indices = @transform_2, window_bounds = array<i64: 1, 64>}, {transform_indices = @transform_3, window_bounds = array<i64: 1, 8, 8, 64>}]} {
    %c0 = arith.constant 0 : index
    %c0_0 = arith.constant 0 : index
    %c0_1 = arith.constant 0 : index
    %c0_2 = arith.constant 0 : index
    %0 = vector.load %arg1[%c0, %c0_0, %c0_1, %c0_2] : memref<1x10x10x64xf32, #tpu.memory_space<vmem>>, vector<1x10x10x64xf32>
    %1 = vector.shape_cast %0 : vector<1x10x10x64xf32> to vector<10x10x64xf32>
    %c0_3 = arith.constant 0 : index
    %c0_4 = arith.constant 0 : index
    %2 = vector.load %arg2[%c0_3, %c0_4] : memref<9x64xf32, #tpu.memory_space<vmem>>, vector<9x64xf32>
    %cst = arith.constant 0.000000e+00 : f32
    %3 = vector.broadcast %cst : f32 to vector<8x8x64xf32>
    %4 = vector.extract_strided_slice %1 {offsets = [0, 0, 0], sizes = [8, 8, 64], strides = [1, 1, 1]} : vector<10x10x64xf32> to vector<8x8x64xf32>
    %5 = vector.extract_strided_slice %2 {offsets = [0, 0], sizes = [1, 64], strides = [1, 1]} : vector<9x64xf32> to vector<1x64xf32>
    %6 = vector.shape_cast %5 : vector<1x64xf32> to vector<64xf32>
    %7 = vector.shape_cast %6 : vector<64xf32> to vector<1x1x64xf32>
    %8 = vector.broadcast %7 : vector<1x1x64xf32> to vector<8x8x64xf32>
    %9 = arith.mulf %4, %8 : vector<8x8x64xf32>
    %10 = arith.addf %3, %9 : vector<8x8x64xf32>
    %11 = vector.extract_strided_slice %1 {offsets = [0, 1, 0], sizes = [8, 8, 64], strides = [1, 1, 1]} : vector<10x10x64xf32> to vector<8x8x64xf32>
    %12 = vector.extract_strided_slice %2 {offsets = [1, 0], sizes = [1, 64], strides = [1, 1]} : vector<9x64xf32> to vector<1x64xf32>
    %13 = vector.shape_cast %12 : vector<1x64xf32> to vector<64xf32>
    %14 = vector.shape_cast %13 : vector<64xf32> to vector<1x1x64xf32>
    %15 = vector.broadcast %14 : vector<1x1x64xf32> to vector<8x8x64xf32>
    %16 = arith.mulf %11, %15 : vector<8x8x64xf32>
    %17 = arith.addf %10, %16 : vector<8x8x64xf32>
    %18 = vector.extract_strided_slice %1 {offsets = [0, 2, 0], sizes = [8, 8, 64], strides = [1, 1, 1]} : vector<10x10x64xf32> to vector<8x8x64xf32>
    %19 = vector.extract_strided_slice %2 {offsets = [2, 0], sizes = [1, 64], strides = [1, 1]} : vector<9x64xf32> to vector<1x64xf32>
    %20 = vector.shape_cast %19 : vector<1x64xf32> to vector<64xf32>
    %21 = vector.shape_cast %20 : vector<64xf32> to vector<1x1x64xf32>
    %22 = vector.broadcast %21 : vector<1x1x64xf32> to vector<8x8x64xf32>
    %23 = arith.mulf %18, %22 : vector<8x8x64xf32>
    %24 = arith.addf %17, %23 : vector<8x8x64xf32>
    %25 = vector.extract_strided_slice %1 {offsets = [1, 0, 0], sizes = [8, 8, 64], strides = [1, 1, 1]} : vector<10x10x64xf32> to vector<8x8x64xf32>
    %26 = vector.extract_strided_slice %2 {offsets = [3, 0], sizes = [1, 64], strides = [1, 1]} : vector<9x64xf32> to vector<1x64xf32>
    %27 = vector.shape_cast %26 : vector<1x64xf32> to vector<64xf32>
    %28 = vector.shape_cast %27 : vector<64xf32> to vector<1x1x64xf32>
    %29 = vector.broadcast %28 : vector<1x1x64xf32> to vector<8x8x64xf32>
    %30 = arith.mulf %25, %29 : vector<8x8x64xf32>
    %31 = arith.addf %24, %30 : vector<8x8x64xf32>
    %32 = vector.extract_strided_slice %1 {offsets = [1, 1, 0], sizes = [8, 8, 64], strides = [1, 1, 1]} : vector<10x10x64xf32> to vector<8x8x64xf32>
    %33 = vector.extract_strided_slice %2 {offsets = [4, 0], sizes = [1, 64], strides = [1, 1]} : vector<9x64xf32> to vector<1x64xf32>
    %34 = vector.shape_cast %33 : vector<1x64xf32> to vector<64xf32>
    %35 = vector.shape_cast %34 : vector<64xf32> to vector<1x1x64xf32>
    %36 = vector.broadcast %35 : vector<1x1x64xf32> to vector<8x8x64xf32>
    %37 = arith.mulf %32, %36 : vector<8x8x64xf32>
    %38 = arith.addf %31, %37 : vector<8x8x64xf32>
    %39 = vector.extract_strided_slice %1 {offsets = [1, 2, 0], sizes = [8, 8, 64], strides = [1, 1, 1]} : vector<10x10x64xf32> to vector<8x8x64xf32>
    %40 = vector.extract_strided_slice %2 {offsets = [5, 0], sizes = [1, 64], strides = [1, 1]} : vector<9x64xf32> to vector<1x64xf32>
    %41 = vector.shape_cast %40 : vector<1x64xf32> to vector<64xf32>
    %42 = vector.shape_cast %41 : vector<64xf32> to vector<1x1x64xf32>
    %43 = vector.broadcast %42 : vector<1x1x64xf32> to vector<8x8x64xf32>
    %44 = arith.mulf %39, %43 : vector<8x8x64xf32>
    %45 = arith.addf %38, %44 : vector<8x8x64xf32>
    %46 = vector.extract_strided_slice %1 {offsets = [2, 0, 0], sizes = [8, 8, 64], strides = [1, 1, 1]} : vector<10x10x64xf32> to vector<8x8x64xf32>
    %47 = vector.extract_strided_slice %2 {offsets = [6, 0], sizes = [1, 64], strides = [1, 1]} : vector<9x64xf32> to vector<1x64xf32>
    %48 = vector.shape_cast %47 : vector<1x64xf32> to vector<64xf32>
    %49 = vector.shape_cast %48 : vector<64xf32> to vector<1x1x64xf32>
    %50 = vector.broadcast %49 : vector<1x1x64xf32> to vector<8x8x64xf32>
    %51 = arith.mulf %46, %50 : vector<8x8x64xf32>
    %52 = arith.addf %45, %51 : vector<8x8x64xf32>
    %53 = vector.extract_strided_slice %1 {offsets = [2, 1, 0], sizes = [8, 8, 64], strides = [1, 1, 1]} : vector<10x10x64xf32> to vector<8x8x64xf32>
    %54 = vector.extract_strided_slice %2 {offsets = [7, 0], sizes = [1, 64], strides = [1, 1]} : vector<9x64xf32> to vector<1x64xf32>
    %55 = vector.shape_cast %54 : vector<1x64xf32> to vector<64xf32>
    %56 = vector.shape_cast %55 : vector<64xf32> to vector<1x1x64xf32>
    %57 = vector.broadcast %56 : vector<1x1x64xf32> to vector<8x8x64xf32>
    %58 = arith.mulf %53, %57 : vector<8x8x64xf32>
    %59 = arith.addf %52, %58 : vector<8x8x64xf32>
    %60 = vector.extract_strided_slice %1 {offsets = [2, 2, 0], sizes = [8, 8, 64], strides = [1, 1, 1]} : vector<10x10x64xf32> to vector<8x8x64xf32>
    %61 = vector.extract_strided_slice %2 {offsets = [8, 0], sizes = [1, 64], strides = [1, 1]} : vector<9x64xf32> to vector<1x64xf32>
    %62 = vector.shape_cast %61 : vector<1x64xf32> to vector<64xf32>
    %63 = vector.shape_cast %62 : vector<64xf32> to vector<1x1x64xf32>
    %64 = vector.broadcast %63 : vector<1x1x64xf32> to vector<8x8x64xf32>
    %65 = arith.mulf %60, %64 : vector<8x8x64xf32>
    %66 = arith.addf %59, %65 : vector<8x8x64xf32>
    %c0_5 = arith.constant 0 : index
    %c0_6 = arith.constant 0 : index
    %67 = vector.load %arg3[%c0_5, %c0_6] : memref<1x64xf32, #tpu.memory_space<vmem>>, vector<1x64xf32>
    %68 = vector.shape_cast %67 : vector<1x64xf32> to vector<1x1x64xf32>
    %69 = vector.broadcast %68 : vector<1x1x64xf32> to vector<8x8x64xf32>
    %70 = arith.addf %66, %69 : vector<8x8x64xf32>
    %cst_7 = arith.constant 0.000000e+00 : f32
    %71 = vector.broadcast %cst_7 : f32 to vector<8x8x64xf32>
    %72 = arith.subf %71, %70 : vector<8x8x64xf32>
    %73 = math.exp %72 : vector<8x8x64xf32>
    %cst_8 = arith.constant 1.000000e+00 : f32
    %74 = vector.broadcast %cst_8 : f32 to vector<8x8x64xf32>
    %75 = arith.addf %74, %73 : vector<8x8x64xf32>
    %cst_9 = arith.constant 1.000000e+00 : f32
    %76 = vector.broadcast %cst_9 : f32 to vector<8x8x64xf32>
    %77 = arith.divf %76, %75 : vector<8x8x64xf32>
    %78 = arith.mulf %70, %77 : vector<8x8x64xf32>
    %c0_10 = arith.constant 0 : index
    %c0_11 = arith.constant 0 : index
    %c0_12 = arith.constant 0 : index
    %c0_13 = arith.constant 0 : index
    %79 = vector.load %arg4[%c0_10, %c0_11, %c0_12, %c0_13] : memref<1x8x8x64xf32, #tpu.memory_space<vmem>>, vector<1x8x8x64xf32>
    %80 = vector.shape_cast %79 : vector<1x8x8x64xf32> to vector<8x8x64xf32>
    %81 = vector.shape_cast %78 : vector<8x8x64xf32> to vector<1x8x8x64xf32>
    tpu.vector_store %arg4[%c0_10, %c0_11, %c0_12, %c0_13], %81 {strides = array<i32>} : memref<1x8x8x64xf32, #tpu.memory_space<vmem>>, vector<1x8x8x64xf32>,
    return
  }
  func.func @transform_0(%arg0: i32) -> (i32, i32, i32, i32) {
    %c0_i32 = arith.constant 0 : i32
    %c0_i32_0 = arith.constant 0 : i32
    %c0_i32_1 = arith.constant 0 : i32
    %c0_i32_2 = arith.constant 0 : i32
    return %arg0, %c0_i32, %c0_i32_0, %c0_i32_1 : i32, i32, i32, i32
  }
  func.func @transform_1(%arg0: i32) -> (i32, i32) {
    %c0_i32 = arith.constant 0 : i32
    %c0_i32_0 = arith.constant 0 : i32
    %c0_i32_1 = arith.constant 0 : i32
    return %c0_i32, %c0_i32_0 : i32, i32
  }
  func.func @transform_2(%arg0: i32) -> (i32, i32) {
    %c0_i32 = arith.constant 0 : i32
    %c0_i32_0 = arith.constant 0 : i32
    %c0_i32_1 = arith.constant 0 : i32
    return %c0_i32, %c0_i32_0 : i32, i32
  }
  func.func @transform_3(%arg0: i32) -> (i32, i32, i32, i32) {
    %c0_i32 = arith.constant 0 : i32
    %c0_i32_0 = arith.constant 0 : i32
    %c0_i32_1 = arith.constant 0 : i32
    %c0_i32_2 = arith.constant 0 : i32
    return %arg0, %c0_i32, %c0_i32_0, %c0_i32_1 : i32, i32, i32, i32
  }
}

module attributes {stable_mosaic.version = 11 : i64} {
  func.func @_bdir_proj_kernel(%arg0: i32, %arg1: i32, %arg2: memref<1x128x64xf32, #tpu.memory_space<vmem>>, %arg3: memref<1x64x128xbf16, #tpu.memory_space<vmem>>, %arg4: memref<1x128x128xf32, #tpu.memory_space<vmem>>) attributes {dimension_semantics = [#tpu.dimension_semantics<parallel>, #tpu.dimension_semantics<parallel>], iteration_bounds = array<i64: 4, 1>, scalar_prefetch = 0 : i64, scratch_operands = 0 : i64, tpu.core_type = #tpu.core_type<tc>, window_params = [{transform_indices = @transform_0, window_bounds = array<i64: 1, 128, 64>}, {transform_indices = @transform_1, window_bounds = array<i64: 1, 64, 128>}, {transform_indices = @transform_2, window_bounds = array<i64: 1, 128, 128>}]} {
    %c0 = arith.constant 0 : index
    %c0_0 = arith.constant 0 : index
    %c0_1 = arith.constant 0 : index
    %0 = vector.load %arg2[%c0, %c0_0, %c0_1] : memref<1x128x64xf32, #tpu.memory_space<vmem>>, vector<1x128x64xf32>
    %1 = vector.shape_cast %0 : vector<1x128x64xf32> to vector<128x64xf32>
    %2 = arith.truncf %1 : vector<128x64xf32> to vector<128x64xbf16>
    %c0_2 = arith.constant 0 : index
    %c0_3 = arith.constant 0 : index
    %c0_4 = arith.constant 0 : index
    %3 = vector.load %arg3[%c0_2, %c0_3, %c0_4] : memref<1x64x128xbf16, #tpu.memory_space<vmem>>, vector<1x64x128xbf16>
    %4 = vector.shape_cast %3 : vector<1x64x128xbf16> to vector<64x128xbf16>
    %cst = arith.constant dense<0.000000e+00> : vector<128x128xf32>
    %5 = tpu.matmul %2, %4, %cst {dimension_numbers = #tpu.dot_dimension_numbers<[1], [0], [0], [1], [0, 0, 1, 1], [], []>} : vector<128x64xbf16>, vector<64x128xbf16>, vector<128x128xf32> -> vector<128x128xf32>
    %c0_5 = arith.constant 0 : index
    %c0_6 = arith.constant 0 : index
    %c0_7 = arith.constant 0 : index
    %6 = vector.load %arg4[%c0_5, %c0_6, %c0_7] : memref<1x128x128xf32, #tpu.memory_space<vmem>>, vector<1x128x128xf32>
    %7 = vector.shape_cast %6 : vector<1x128x128xf32> to vector<128x128xf32>
    %8 = vector.shape_cast %5 : vector<128x128xf32> to vector<1x128x128xf32>
    tpu.vector_store %arg4[%c0_5, %c0_6, %c0_7], %8 {strides = array<i32>} : memref<1x128x128xf32, #tpu.memory_space<vmem>>, vector<1x128x128xf32>,
    return
  }
  func.func @transform_0(%arg0: i32, %arg1: i32) -> (i32, i32, i32) {
    %c0_i32 = arith.constant 0 : i32
    %c0_i32_0 = arith.constant 0 : i32
    return %arg0, %arg1, %c0_i32 : i32, i32, i32
  }
  func.func @transform_1(%arg0: i32, %arg1: i32) -> (i32, i32, i32) {
    %c0_i32 = arith.constant 0 : i32
    %c0_i32_0 = arith.constant 0 : i32
    %c0_i32_1 = arith.constant 0 : i32
    return %arg0, %c0_i32, %c0_i32_0 : i32, i32, i32
  }
  func.func @transform_2(%arg0: i32, %arg1: i32) -> (i32, i32, i32) {
    %c0_i32 = arith.constant 0 : i32
    %c0_i32_0 = arith.constant 0 : i32
    return %arg0, %arg1, %c0_i32 : i32, i32, i32
  }
}

module attributes {stable_mosaic.version = 11 : i64} {
  func.func @_gated_out_proj_kernel(%arg0: i32, %arg1: memref<128x64xf32, #tpu.memory_space<vmem>>, %arg2: memref<128x64xf32, #tpu.memory_space<vmem>>, %arg3: memref<1x64xf32, #tpu.memory_space<vmem>>, %arg4: memref<1x64xf32, #tpu.memory_space<vmem>>, %arg5: memref<64x32xbf16, #tpu.memory_space<vmem>>, %arg6: memref<128x32xf32, #tpu.memory_space<vmem>>, %arg7: memref<128x32xf32, #tpu.memory_space<vmem>>) attributes {dimension_semantics = [#tpu.dimension_semantics<parallel>], iteration_bounds = array<i64: 1>, scalar_prefetch = 0 : i64, scratch_operands = 0 : i64, tpu.core_type = #tpu.core_type<tc>, window_params = [{transform_indices = @transform_0, window_bounds = array<i64: 128, 64>}, {transform_indices = @transform_1, window_bounds = array<i64: 128, 64>}, {pipeline_mode = #tpu.pipeline_mode<synchronous>, transform_indices = @transform_2, window_bounds = array<i64: 1, 64>}, {pipeline_mode = #tpu.pipeline_mode<synchronous>, transform_indices = @transform_3, window_bounds = array<i64: 1, 64>}, {pipeline_mode = #tpu.pipeline_mode<synchronous>, transform_indices = @transform_4, window_bounds = array<i64: 64, 32>}, {transform_indices = @transform_5, window_bounds = array<i64: 128, 32>}, {transform_indices = @transform_6, window_bounds = array<i64: 128, 32>}]} {
    %c0 = arith.constant 0 : index
    %c0_0 = arith.constant 0 : index
    %0 = vector.load %arg1[%c0, %c0_0] : memref<128x64xf32, #tpu.memory_space<vmem>>, vector<128x64xf32>
    %cst = arith.constant dense<0.000000e+00> : vector<128xf32>
    %1 = vector.multi_reduction <add>, %0, %cst [1] : vector<128x64xf32> to vector<128xf32>
    %2 = vector.shape_cast %1 : vector<128xf32> to vector<128x1xf32>
    %cst_1 = arith.constant 6.400000e+01 : f32
    %3 = vector.broadcast %cst_1 : f32 to vector<128x1xf32>
    %4 = arith.divf %2, %3 : vector<128x1xf32>
    %5 = vector.broadcast %4 : vector<128x1xf32> to vector<128x64xf32>
    %6 = arith.subf %0, %5 : vector<128x64xf32>
    %7 = arith.mulf %6, %6 : vector<128x64xf32>
    %cst_2 = arith.constant dense<0.000000e+00> : vector<128xf32>
    %8 = vector.multi_reduction <add>, %7, %cst_2 [1] : vector<128x64xf32> to vector<128xf32>
    %9 = vector.shape_cast %8 : vector<128xf32> to vector<128x1xf32>
    %cst_3 = arith.constant 6.400000e+01 : f32
    %10 = vector.broadcast %cst_3 : f32 to vector<128x1xf32>
    %11 = arith.divf %9, %10 : vector<128x1xf32>
    %cst_4 = arith.constant 9.99999974E-6 : f32
    %12 = vector.broadcast %cst_4 : f32 to vector<128x1xf32>
    %13 = arith.addf %11, %12 : vector<128x1xf32>
    %14 = math.rsqrt %13 : vector<128x1xf32>
    %15 = vector.broadcast %14 : vector<128x1xf32> to vector<128x64xf32>
    %16 = arith.mulf %6, %15 : vector<128x64xf32>
    %c0_5 = arith.constant 0 : index
    %c0_6 = arith.constant 0 : index
    %17 = vector.load %arg3[%c0_5, %c0_6] : memref<1x64xf32, #tpu.memory_space<vmem>>, vector<1x64xf32>
    %18 = vector.broadcast %17 : vector<1x64xf32> to vector<128x64xf32>
    %19 = arith.mulf %16, %18 : vector<128x64xf32>
    %c0_7 = arith.constant 0 : index
    %c0_8 = arith.constant 0 : index
    %20 = vector.load %arg4[%c0_7, %c0_8] : memref<1x64xf32, #tpu.memory_space<vmem>>, vector<1x64xf32>
    %21 = vector.broadcast %20 : vector<1x64xf32> to vector<128x64xf32>
    %22 = arith.addf %19, %21 : vector<128x64xf32>
    %c0_9 = arith.constant 0 : index
    %c0_10 = arith.constant 0 : index
    %23 = vector.load %arg2[%c0_9, %c0_10] : memref<128x64xf32, #tpu.memory_space<vmem>>, vector<128x64xf32>
    %cst_11 = arith.constant 0.000000e+00 : f32
    %24 = vector.broadcast %cst_11 : f32 to vector<128x64xf32>
    %25 = arith.subf %24, %23 : vector<128x64xf32>
    %26 = math.exp %25 : vector<128x64xf32>
    %cst_12 = arith.constant 1.000000e+00 : f32
    %27 = vector.broadcast %cst_12 : f32 to vector<128x64xf32>
    %28 = arith.addf %27, %26 : vector<128x64xf32>
    %cst_13 = arith.constant 1.000000e+00 : f32
    %29 = vector.broadcast %cst_13 : f32 to vector<128x64xf32>
    %30 = arith.divf %29, %28 : vector<128x64xf32>
    %31 = arith.mulf %23, %30 : vector<128x64xf32>
    %32 = arith.mulf %22, %31 : vector<128x64xf32>
    %33 = arith.truncf %32 : vector<128x64xf32> to vector<128x64xbf16>
    %c0_14 = arith.constant 0 : index
    %c0_15 = arith.constant 0 : index
    %34 = vector.load %arg5[%c0_14, %c0_15] : memref<64x32xbf16, #tpu.memory_space<vmem>>, vector<64x32xbf16>
    %cst_16 = arith.constant dense<0.000000e+00> : vector<128x32xf32>
    %35 = tpu.matmul %33, %34, %cst_16 {dimension_numbers = #tpu.dot_dimension_numbers<[1], [0], [0], [1], [0, 0, 1, 1], [], []>} : vector<128x64xbf16>, vector<64x32xbf16>, vector<128x32xf32> -> vector<128x32xf32>
    %c0_17 = arith.constant 0 : index
    %c0_18 = arith.constant 0 : index
    %36 = vector.load %arg6[%c0_17, %c0_18] : memref<128x32xf32, #tpu.memory_space<vmem>>, vector<128x32xf32>
    %37 = arith.addf %35, %36 : vector<128x32xf32>
    %c0_19 = arith.constant 0 : index
    %c0_20 = arith.constant 0 : index
    %38 = vector.load %arg7[%c0_19, %c0_20] : memref<128x32xf32, #tpu.memory_space<vmem>>, vector<128x32xf32>
    tpu.vector_store %arg7[%c0_19, %c0_20], %37 {strides = array<i32>} : memref<128x32xf32, #tpu.memory_space<vmem>>, vector<128x32xf32>,
    return
  }
  func.func @transform_0(%arg0: i32) -> (i32, i32) {
    %c0_i32 = arith.constant 0 : i32
    %c0_i32_0 = arith.constant 0 : i32
    return %arg0, %c0_i32 : i32, i32
  }
  func.func @transform_1(%arg0: i32) -> (i32, i32) {
    %c0_i32 = arith.constant 0 : i32
    %c0_i32_0 = arith.constant 0 : i32
    return %arg0, %c0_i32 : i32, i32
  }
  func.func @transform_2(%arg0: i32) -> (i32, i32) {
    %c0_i32 = arith.constant 0 : i32
    %c0_i32_0 = arith.constant 0 : i32
    %c0_i32_1 = arith.constant 0 : i32
    return %c0_i32, %c0_i32_0 : i32, i32
  }
  func.func @transform_3(%arg0: i32) -> (i32, i32) {
    %c0_i32 = arith.constant 0 : i32
    %c0_i32_0 = arith.constant 0 : i32
    %c0_i32_1 = arith.constant 0 : i32
    return %c0_i32, %c0_i32_0 : i32, i32
  }
  func.func @transform_4(%arg0: i32) -> (i32, i32) {
    %c0_i32 = arith.constant 0 : i32
    %c0_i32_0 = arith.constant 0 : i32
    %c0_i32_1 = arith.constant 0 : i32
    return %c0_i32, %c0_i32_0 : i32, i32
  }
  func.func @transform_5(%arg0: i32) -> (i32, i32) {
    %c0_i32 = arith.constant 0 : i32
    %c0_i32_0 = arith.constant 0 : i32
    return %arg0, %c0_i32 : i32, i32
  }
  func.func @transform_6(%arg0: i32) -> (i32, i32) {
    %c0_i32 = arith.constant 0 : i32
    %c0_i32_0 = arith.constant 0 : i32
    return %arg0, %c0_i32 : i32, i32
  }
}

module attributes {stable_mosaic.version = 11 : i64} {
  func.func @_ln_matmul_kernel(%arg0: i32, %arg1: memref<128x32xf32, #tpu.memory_space<vmem>>, %arg2: memref<1x32xf32, #tpu.memory_space<vmem>>, %arg3: memref<1x32xf32, #tpu.memory_space<vmem>>, %arg4: memref<32x128xbf16, #tpu.memory_space<vmem>>, %arg5: memref<1x128xf32, #tpu.memory_space<vmem>>, %arg6: memref<128x128xf32, #tpu.memory_space<vmem>>) attributes {dimension_semantics = [#tpu.dimension_semantics<parallel>], iteration_bounds = array<i64: 1>, scalar_prefetch = 0 : i64, scratch_operands = 0 : i64, tpu.core_type = #tpu.core_type<tc>, window_params = [{transform_indices = @transform_0, window_bounds = array<i64: 128, 32>}, {pipeline_mode = #tpu.pipeline_mode<synchronous>, transform_indices = @transform_1, window_bounds = array<i64: 1, 32>}, {pipeline_mode = #tpu.pipeline_mode<synchronous>, transform_indices = @transform_2, window_bounds = array<i64: 1, 32>}, {pipeline_mode = #tpu.pipeline_mode<synchronous>, transform_indices = @transform_3, window_bounds = array<i64: 32, 128>}, {pipeline_mode = #tpu.pipeline_mode<synchronous>, transform_indices = @transform_4, window_bounds = array<i64: 1, 128>}, {transform_indices = @transform_5, window_bounds = array<i64: 128, 128>}]} {
    %c0 = arith.constant 0 : index
    %c0_0 = arith.constant 0 : index
    %0 = vector.load %arg1[%c0, %c0_0] : memref<128x32xf32, #tpu.memory_space<vmem>>, vector<128x32xf32>
    %cst = arith.constant dense<0.000000e+00> : vector<128xf32>
    %1 = vector.multi_reduction <add>, %0, %cst [1] : vector<128x32xf32> to vector<128xf32>
    %2 = vector.shape_cast %1 : vector<128xf32> to vector<128x1xf32>
    %cst_1 = arith.constant 3.200000e+01 : f32
    %3 = vector.broadcast %cst_1 : f32 to vector<128x1xf32>
    %4 = arith.divf %2, %3 : vector<128x1xf32>
    %5 = vector.broadcast %4 : vector<128x1xf32> to vector<128x32xf32>
    %6 = arith.subf %0, %5 : vector<128x32xf32>
    %7 = arith.mulf %6, %6 : vector<128x32xf32>
    %cst_2 = arith.constant dense<0.000000e+00> : vector<128xf32>
    %8 = vector.multi_reduction <add>, %7, %cst_2 [1] : vector<128x32xf32> to vector<128xf32>
    %9 = vector.shape_cast %8 : vector<128xf32> to vector<128x1xf32>
    %cst_3 = arith.constant 3.200000e+01 : f32
    %10 = vector.broadcast %cst_3 : f32 to vector<128x1xf32>
    %11 = arith.divf %9, %10 : vector<128x1xf32>
    %cst_4 = arith.constant 9.99999997E-7 : f32
    %12 = vector.broadcast %cst_4 : f32 to vector<128x1xf32>
    %13 = arith.addf %11, %12 : vector<128x1xf32>
    %14 = math.rsqrt %13 : vector<128x1xf32>
    %15 = vector.broadcast %14 : vector<128x1xf32> to vector<128x32xf32>
    %16 = arith.mulf %6, %15 : vector<128x32xf32>
    %c0_5 = arith.constant 0 : index
    %c0_6 = arith.constant 0 : index
    %17 = vector.load %arg2[%c0_5, %c0_6] : memref<1x32xf32, #tpu.memory_space<vmem>>, vector<1x32xf32>
    %18 = vector.broadcast %17 : vector<1x32xf32> to vector<128x32xf32>
    %19 = arith.mulf %16, %18 : vector<128x32xf32>
    %c0_7 = arith.constant 0 : index
    %c0_8 = arith.constant 0 : index
    %20 = vector.load %arg3[%c0_7, %c0_8] : memref<1x32xf32, #tpu.memory_space<vmem>>, vector<1x32xf32>
    %21 = vector.broadcast %20 : vector<1x32xf32> to vector<128x32xf32>
    %22 = arith.addf %19, %21 : vector<128x32xf32>
    %23 = arith.truncf %22 : vector<128x32xf32> to vector<128x32xbf16>
    %c0_9 = arith.constant 0 : index
    %c0_10 = arith.constant 0 : index
    %24 = vector.load %arg4[%c0_9, %c0_10] : memref<32x128xbf16, #tpu.memory_space<vmem>>, vector<32x128xbf16>
    %cst_11 = arith.constant dense<0.000000e+00> : vector<128x128xf32>
    %25 = tpu.matmul %23, %24, %cst_11 {dimension_numbers = #tpu.dot_dimension_numbers<[1], [0], [0], [1], [0, 0, 1, 1], [], []>} : vector<128x32xbf16>, vector<32x128xbf16>, vector<128x128xf32> -> vector<128x128xf32>
    %c0_12 = arith.constant 0 : index
    %c0_13 = arith.constant 0 : index
    %26 = vector.load %arg5[%c0_12, %c0_13] : memref<1x128xf32, #tpu.memory_space<vmem>>, vector<1x128xf32>
    %27 = vector.broadcast %26 : vector<1x128xf32> to vector<128x128xf32>
    %28 = arith.addf %25, %27 : vector<128x128xf32>
    %c0_14 = arith.constant 0 : index
    %c0_15 = arith.constant 0 : index
    %29 = vector.load %arg6[%c0_14, %c0_15] : memref<128x128xf32, #tpu.memory_space<vmem>>, vector<128x128xf32>
    tpu.vector_store %arg6[%c0_14, %c0_15], %28 {strides = array<i32>} : memref<128x128xf32, #tpu.memory_space<vmem>>, vector<128x128xf32>,
    return
  }
  func.func @transform_0(%arg0: i32) -> (i32, i32) {
    %c0_i32 = arith.constant 0 : i32
    %c0_i32_0 = arith.constant 0 : i32
    return %arg0, %c0_i32 : i32, i32
  }
  func.func @transform_1(%arg0: i32) -> (i32, i32) {
    %c0_i32 = arith.constant 0 : i32
    %c0_i32_0 = arith.constant 0 : i32
    %c0_i32_1 = arith.constant 0 : i32
    return %c0_i32, %c0_i32_0 : i32, i32
  }
  func.func @transform_2(%arg0: i32) -> (i32, i32) {
    %c0_i32 = arith.constant 0 : i32
    %c0_i32_0 = arith.constant 0 : i32
    %c0_i32_1 = arith.constant 0 : i32
    return %c0_i32, %c0_i32_0 : i32, i32
  }
  func.func @transform_3(%arg0: i32) -> (i32, i32) {
    %c0_i32 = arith.constant 0 : i32
    %c0_i32_0 = arith.constant 0 : i32
    %c0_i32_1 = arith.constant 0 : i32
    return %c0_i32, %c0_i32_0 : i32, i32
  }
  func.func @transform_4(%arg0: i32) -> (i32, i32) {
    %c0_i32 = arith.constant 0 : i32
    %c0_i32_0 = arith.constant 0 : i32
    %c0_i32_1 = arith.constant 0 : i32
    return %c0_i32, %c0_i32_0 : i32, i32
  }
  func.func @transform_5(%arg0: i32) -> (i32, i32) {
    %c0_i32 = arith.constant 0 : i32
    %c0_i32_0 = arith.constant 0 : i32
    return %arg0, %c0_i32 : i32, i32
  }
}

module attributes {stable_mosaic.version = 11 : i64} {
  func.func @_ssm_scan_kernel(%arg0: i32, %arg1: i32, %arg2: memref<1x1x64x64xf32, #tpu.memory_space<vmem>>, %arg3: memref<1x1x64x64xf32, #tpu.memory_space<vmem>>, %arg4: memref<1x16x64xf32, #tpu.memory_space<vmem>>, %arg5: memref<1x1x64x16xf32, #tpu.memory_space<vmem>>, %arg6: memref<1x1x64x16xf32, #tpu.memory_space<vmem>>, %arg7: memref<1x1x64xf32, #tpu.memory_space<vmem>>, %arg8: memref<1x1x64xf32, #tpu.memory_space<vmem>>, %arg9: memref<1x1x64x64xf32, #tpu.memory_space<vmem>>, %arg10: memref<64x1024xf32, #tpu.memory_space<vmem>>, %arg11: memref<64x1024xf32, #tpu.memory_space<vmem>>) attributes {dimension_semantics = [#tpu.dimension_semantics<parallel>, #tpu.dimension_semantics<parallel>], iteration_bounds = array<i64: 4, 2>, scalar_prefetch = 0 : i64, scratch_operands = 2 : i64, tpu.core_type = #tpu.core_type<tc>, window_params = [{transform_indices = @transform_0, window_bounds = array<i64: 1, 1, 64, 64>}, {transform_indices = @transform_1, window_bounds = array<i64: 1, 1, 64, 64>}, {transform_indices = @transform_2, window_bounds = array<i64: 1, 16, 64>}, {transform_indices = @transform_3, window_bounds = array<i64: 1, 1, 64, 16>}, {transform_indices = @transform_4, window_bounds = array<i64: 1, 1, 64, 16>}, {transform_indices = @transform_5, window_bounds = array<i64: 1, 1, 64>}, {transform_indices = @transform_6, window_bounds = array<i64: 1, 1, 64>}, {transform_indices = @transform_7, window_bounds = array<i64: 1, 1, 64, 64>}]} {
    %c0 = arith.constant 0 : index
    %c0_0 = arith.constant 0 : index
    %c0_1 = arith.constant 0 : index
    %c0_2 = arith.constant 0 : index
    %0 = vector.load %arg2[%c0, %c0_0, %c0_1, %c0_2] : memref<1x1x64x64xf32, #tpu.memory_space<vmem>>, vector<1x1x64x64xf32>
    %1 = vector.shape_cast %0 : vector<1x1x64x64xf32> to vector<64x64xf32>
    %c0_3 = arith.constant 0 : index
    %c0_4 = arith.constant 0 : index
    %c0_5 = arith.constant 0 : index
    %c0_6 = arith.constant 0 : index
    %2 = vector.load %arg3[%c0_3, %c0_4, %c0_5, %c0_6] : memref<1x1x64x64xf32, #tpu.memory_space<vmem>>, vector<1x1x64x64xf32>
    %3 = vector.shape_cast %2 : vector<1x1x64x64xf32> to vector<64x64xf32>
    %c0_7 = arith.constant 0 : index
    %c0_8 = arith.constant 0 : index
    %c0_9 = arith.constant 0 : index
    %4 = vector.load %arg8[%c0_7, %c0_8, %c0_9] : memref<1x1x64xf32, #tpu.memory_space<vmem>>, vector<1x1x64xf32>
    %5 = vector.shape_cast %4 : vector<1x1x64xf32> to vector<1x64xf32>
    %6 = vector.broadcast %5 : vector<1x64xf32> to vector<64x64xf32>
    %7 = arith.addf %3, %6 : vector<64x64xf32>
    %cst = arith.constant 2.000000e+01 : f32
    %8 = vector.broadcast %cst : f32 to vector<64x64xf32>
    %9 = arith.cmpf ogt, %7, %8 : vector<64x64xf32>
    %cst_10 = arith.constant 2.000000e+01 : f32
    %10 = vector.broadcast %cst_10 : f32 to vector<64x64xf32>
    %11 = arith.minimumf %7, %10 : vector<64x64xf32>
    %12 = math.exp %11 : vector<64x64xf32>
    %13 = math.log1p %12 : vector<64x64xf32>
    %14 = arith.select %9, %7, %13 : vector<64x64xi1>, vector<64x64xf32>
    %15 = arith.mulf %14, %1 : vector<64x64xf32>
    %c0_11 = arith.constant 0 : index
    %c0_12 = arith.constant 0 : index
    %c0_13 = arith.constant 0 : index
    %16 = vector.load %arg4[%c0_11, %c0_12, %c0_13] : memref<1x16x64xf32, #tpu.memory_space<vmem>>, vector<1x1x64xf32>
    %17 = vector.shape_cast %16 : vector<1x1x64xf32> to vector<1x64xf32>
    %c0_14 = arith.constant 0 : index
    %c0_15 = arith.constant 0 : index
    %c0_16 = arith.constant 0 : index
    %c0_17 = arith.constant 0 : index
    %18 = vector.load %arg5[%c0_14, %c0_15, %c0_16, %c0_17] : memref<1x1x64x16xf32, #tpu.memory_space<vmem>>, vector<1x1x64x1xf32>
    %19 = vector.shape_cast %18 : vector<1x1x64x1xf32> to vector<64x1xf32>
    %20 = vector.broadcast %17 : vector<1x64xf32> to vector<64x64xf32>
    %21 = arith.mulf %20, %14 : vector<64x64xf32>
    %22 = math.exp %21 : vector<64x64xf32>
    %c0_18 = arith.constant 0 : index
    %c0_19 = arith.constant 0 : index
    %23 = vector.load %arg10[%c0_18, %c0_19] : memref<64x1024xf32, #tpu.memory_space<vmem>>, vector<64x64xf32>
    tpu.vector_store %arg10[%c0_18, %c0_19], %22 {strides = array<i32>} : memref<64x1024xf32, #tpu.memory_space<vmem>>, vector<64x64xf32>,
    %24 = vector.broadcast %19 : vector<64x1xf32> to vector<64x64xf32>
    %25 = arith.mulf %24, %15 : vector<64x64xf32>
    %c0_20 = arith.constant 0 : index
    %c0_21 = arith.constant 0 : index
    %26 = vector.load %arg11[%c0_20, %c0_21] : memref<64x1024xf32, #tpu.memory_space<vmem>>, vector<64x64xf32>
    tpu.vector_store %arg11[%c0_20, %c0_21], %25 {strides = array<i32>} : memref<64x1024xf32, #tpu.memory_space<vmem>>, vector<64x64xf32>,
    %c0_22 = arith.constant 0 : index
    %c1 = arith.constant 1 : index
    %c0_23 = arith.constant 0 : index
    %27 = vector.load %arg4[%c0_22, %c1, %c0_23] : memref<1x16x64xf32, #tpu.memory_space<vmem>>, vector<1x1x64xf32>
    %28 = vector.shape_cast %27 : vector<1x1x64xf32> to vector<1x64xf32>
    %c0_24 = arith.constant 0 : index
    %c0_25 = arith.constant 0 : index
    %c0_26 = arith.constant 0 : index
    %c1_27 = arith.constant 1 : index
    %29 = vector.load %arg5[%c0_24, %c0_25, %c0_26, %c1_27] : memref<1x1x64x16xf32, #tpu.memory_space<vmem>>, vector<1x1x64x1xf32>
    %30 = vector.shape_cast %29 : vector<1x1x64x1xf32> to vector<64x1xf32>
    %31 = vector.broadcast %28 : vector<1x64xf32> to vector<64x64xf32>
    %32 = arith.mulf %31, %14 : vector<64x64xf32>
    %33 = math.exp %32 : vector<64x64xf32>
    %c0_28 = arith.constant 0 : index
    %c64 = arith.constant 64 : index
    %34 = vector.load %arg10[%c0_28, %c64] : memref<64x1024xf32, #tpu.memory_space<vmem>>, vector<64x64xf32>
    tpu.vector_store %arg10[%c0_28, %c64], %33 {strides = array<i32>} : memref<64x1024xf32, #tpu.memory_space<vmem>>, vector<64x64xf32>,
    %35 = vector.broadcast %30 : vector<64x1xf32> to vector<64x64xf32>
    %36 = arith.mulf %35, %15 : vector<64x64xf32>
    %c0_29 = arith.constant 0 : index
    %c64_30 = arith.constant 64 : index
    %37 = vector.load %arg11[%c0_29, %c64_30] : memref<64x1024xf32, #tpu.memory_space<vmem>>, vector<64x64xf32>
    tpu.vector_store %arg11[%c0_29, %c64_30], %36 {strides = array<i32>} : memref<64x1024xf32, #tpu.memory_space<vmem>>, vector<64x64xf32>,
    %c0_31 = arith.constant 0 : index
    %c2 = arith.constant 2 : index
    %c0_32 = arith.constant 0 : index
    %38 = vector.load %arg4[%c0_31, %c2, %c0_32] : memref<1x16x64xf32, #tpu.memory_space<vmem>>, vector<1x1x64xf32>
    %39 = vector.shape_cast %38 : vector<1x1x64xf32> to vector<1x64xf32>
    %c0_33 = arith.constant 0 : index
    %c0_34 = arith.constant 0 : index
    %c0_35 = arith.constant 0 : index
    %c2_36 = arith.constant 2 : index
    %40 = vector.load %arg5[%c0_33, %c0_34, %c0_35, %c2_36] : memref<1x1x64x16xf32, #tpu.memory_space<vmem>>, vector<1x1x64x1xf32>
    %41 = vector.shape_cast %40 : vector<1x1x64x1xf32> to vector<64x1xf32>
    %42 = vector.broadcast %39 : vector<1x64xf32> to vector<64x64xf32>
    %43 = arith.mulf %42, %14 : vector<64x64xf32>
    %44 = math.exp %43 : vector<64x64xf32>
    %c0_37 = arith.constant 0 : index
    %c128 = arith.constant 128 : index
    %45 = vector.load %arg10[%c0_37, %c128] : memref<64x1024xf32, #tpu.memory_space<vmem>>, vector<64x64xf32>
    tpu.vector_store %arg10[%c0_37, %c128], %44 {strides = array<i32>} : memref<64x1024xf32, #tpu.memory_space<vmem>>, vector<64x64xf32>,
    %46 = vector.broadcast %41 : vector<64x1xf32> to vector<64x64xf32>
    %47 = arith.mulf %46, %15 : vector<64x64xf32>
    %c0_38 = arith.constant 0 : index
    %c128_39 = arith.constant 128 : index
    %48 = vector.load %arg11[%c0_38, %c128_39] : memref<64x1024xf32, #tpu.memory_space<vmem>>, vector<64x64xf32>
    tpu.vector_store %arg11[%c0_38, %c128_39], %47 {strides = array<i32>} : memref<64x1024xf32, #tpu.memory_space<vmem>>, vector<64x64xf32>,
    %c0_40 = arith.constant 0 : index
    %c3 = arith.constant 3 : index
    %c0_41 = arith.constant 0 : index
    %49 = vector.load %arg4[%c0_40, %c3, %c0_41] : memref<1x16x64xf32, #tpu.memory_space<vmem>>, vector<1x1x64xf32>
    %50 = vector.shape_cast %49 : vector<1x1x64xf32> to vector<1x64xf32>
    %c0_42 = arith.constant 0 : index
    %c0_43 = arith.constant 0 : index
    %c0_44 = arith.constant 0 : index
    %c3_45 = arith.constant 3 : index
    %51 = vector.load %arg5[%c0_42, %c0_43, %c0_44, %c3_45] : memref<1x1x64x16xf32, #tpu.memory_space<vmem>>, vector<1x1x64x1xf32>
    %52 = vector.shape_cast %51 : vector<1x1x64x1xf32> to vector<64x1xf32>
    %53 = vector.broadcast %50 : vector<1x64xf32> to vector<64x64xf32>
    %54 = arith.mulf %53, %14 : vector<64x64xf32>
    %55 = math.exp %54 : vector<64x64xf32>
    %c0_46 = arith.constant 0 : index
    %c192 = arith.constant 192 : index
    %56 = vector.load %arg10[%c0_46, %c192] : memref<64x1024xf32, #tpu.memory_space<vmem>>, vector<64x64xf32>
    tpu.vector_store %arg10[%c0_46, %c192], %55 {strides = array<i32>} : memref<64x1024xf32, #tpu.memory_space<vmem>>, vector<64x64xf32>,
    %57 = vector.broadcast %52 : vector<64x1xf32> to vector<64x64xf32>
    %58 = arith.mulf %57, %15 : vector<64x64xf32>
    %c0_47 = arith.constant 0 : index
    %c192_48 = arith.constant 192 : index
    %59 = vector.load %arg11[%c0_47, %c192_48] : memref<64x1024xf32, #tpu.memory_space<vmem>>, vector<64x64xf32>
    tpu.vector_store %arg11[%c0_47, %c192_48], %58 {strides = array<i32>} : memref<64x1024xf32, #tpu.memory_space<vmem>>, vector<64x64xf32>,
    %c0_49 = arith.constant 0 : index
    %c4 = arith.constant 4 : index
    %c0_50 = arith.constant 0 : index
    %60 = vector.load %arg4[%c0_49, %c4, %c0_50] : memref<1x16x64xf32, #tpu.memory_space<vmem>>, vector<1x1x64xf32>
    %61 = vector.shape_cast %60 : vector<1x1x64xf32> to vector<1x64xf32>
    %c0_51 = arith.constant 0 : index
    %c0_52 = arith.constant 0 : index
    %c0_53 = arith.constant 0 : index
    %c4_54 = arith.constant 4 : index
    %62 = vector.load %arg5[%c0_51, %c0_52, %c0_53, %c4_54] : memref<1x1x64x16xf32, #tpu.memory_space<vmem>>, vector<1x1x64x1xf32>
    %63 = vector.shape_cast %62 : vector<1x1x64x1xf32> to vector<64x1xf32>
    %64 = vector.broadcast %61 : vector<1x64xf32> to vector<64x64xf32>
    %65 = arith.mulf %64, %14 : vector<64x64xf32>
    %66 = math.exp %65 : vector<64x64xf32>
    %c0_55 = arith.constant 0 : index
    %c256 = arith.constant 256 : index
    %67 = vector.load %arg10[%c0_55, %c256] : memref<64x1024xf32, #tpu.memory_space<vmem>>, vector<64x64xf32>
    tpu.vector_store %arg10[%c0_55, %c256], %66 {strides = array<i32>} : memref<64x1024xf32, #tpu.memory_space<vmem>>, vector<64x64xf32>,
    %68 = vector.broadcast %63 : vector<64x1xf32> to vector<64x64xf32>
    %69 = arith.mulf %68, %15 : vector<64x64xf32>
    %c0_56 = arith.constant 0 : index
    %c256_57 = arith.constant 256 : index
    %70 = vector.load %arg11[%c0_56, %c256_57] : memref<64x1024xf32, #tpu.memory_space<vmem>>, vector<64x64xf32>
    tpu.vector_store %arg11[%c0_56, %c256_57], %69 {strides = array<i32>} : memref<64x1024xf32, #tpu.memory_space<vmem>>, vector<64x64xf32>,
    %c0_58 = arith.constant 0 : index
    %c5 = arith.constant 5 : index
    %c0_59 = arith.constant 0 : index
    %71 = vector.load %arg4[%c0_58, %c5, %c0_59] : memref<1x16x64xf32, #tpu.memory_space<vmem>>, vector<1x1x64xf32>
    %72 = vector.shape_cast %71 : vector<1x1x64xf32> to vector<1x64xf32>
    %c0_60 = arith.constant 0 : index
    %c0_61 = arith.constant 0 : index
    %c0_62 = arith.constant 0 : index
    %c5_63 = arith.constant 5 : index
    %73 = vector.load %arg5[%c0_60, %c0_61, %c0_62, %c5_63] : memref<1x1x64x16xf32, #tpu.memory_space<vmem>>, vector<1x1x64x1xf32>
    %74 = vector.shape_cast %73 : vector<1x1x64x1xf32> to vector<64x1xf32>
    %75 = vector.broadcast %72 : vector<1x64xf32> to vector<64x64xf32>
    %76 = arith.mulf %75, %14 : vector<64x64xf32>
    %77 = math.exp %76 : vector<64x64xf32>
    %c0_64 = arith.constant 0 : index
    %c320 = arith.constant 320 : index
    %78 = vector.load %arg10[%c0_64, %c320] : memref<64x1024xf32, #tpu.memory_space<vmem>>, vector<64x64xf32>
    tpu.vector_store %arg10[%c0_64, %c320], %77 {strides = array<i32>} : memref<64x1024xf32, #tpu.memory_space<vmem>>, vector<64x64xf32>,
    %79 = vector.broadcast %74 : vector<64x1xf32> to vector<64x64xf32>
    %80 = arith.mulf %79, %15 : vector<64x64xf32>
    %c0_65 = arith.constant 0 : index
    %c320_66 = arith.constant 320 : index
    %81 = vector.load %arg11[%c0_65, %c320_66] : memref<64x1024xf32, #tpu.memory_space<vmem>>, vector<64x64xf32>
    tpu.vector_store %arg11[%c0_65, %c320_66], %80 {strides = array<i32>} : memref<64x1024xf32, #tpu.memory_space<vmem>>, vector<64x64xf32>,
    %c0_67 = arith.constant 0 : index
    %c6 = arith.constant 6 : index
    %c0_68 = arith.constant 0 : index
    %82 = vector.load %arg4[%c0_67, %c6, %c0_68] : memref<1x16x64xf32, #tpu.memory_space<vmem>>, vector<1x1x64xf32>
    %83 = vector.shape_cast %82 : vector<1x1x64xf32> to vector<1x64xf32>
    %c0_69 = arith.constant 0 : index
    %c0_70 = arith.constant 0 : index
    %c0_71 = arith.constant 0 : index
    %c6_72 = arith.constant 6 : index
    %84 = vector.load %arg5[%c0_69, %c0_70, %c0_71, %c6_72] : memref<1x1x64x16xf32, #tpu.memory_space<vmem>>, vector<1x1x64x1xf32>
    %85 = vector.shape_cast %84 : vector<1x1x64x1xf32> to vector<64x1xf32>
    %86 = vector.broadcast %83 : vector<1x64xf32> to vector<64x64xf32>
    %87 = arith.mulf %86, %14 : vector<64x64xf32>
    %88 = math.exp %87 : vector<64x64xf32>
    %c0_73 = arith.constant 0 : index
    %c384 = arith.constant 384 : index
    %89 = vector.load %arg10[%c0_73, %c384] : memref<64x1024xf32, #tpu.memory_space<vmem>>, vector<64x64xf32>
    tpu.vector_store %arg10[%c0_73, %c384], %88 {strides = array<i32>} : memref<64x1024xf32, #tpu.memory_space<vmem>>, vector<64x64xf32>,
    %90 = vector.broadcast %85 : vector<64x1xf32> to vector<64x64xf32>
    %91 = arith.mulf %90, %15 : vector<64x64xf32>
    %c0_74 = arith.constant 0 : index
    %c384_75 = arith.constant 384 : index
    %92 = vector.load %arg11[%c0_74, %c384_75] : memref<64x1024xf32, #tpu.memory_space<vmem>>, vector<64x64xf32>
    tpu.vector_store %arg11[%c0_74, %c384_75], %91 {strides = array<i32>} : memref<64x1024xf32, #tpu.memory_space<vmem>>, vector<64x64xf32>,
    %c0_76 = arith.constant 0 : index
    %c7 = arith.constant 7 : index
    %c0_77 = arith.constant 0 : index
    %93 = vector.load %arg4[%c0_76, %c7, %c0_77] : memref<1x16x64xf32, #tpu.memory_space<vmem>>, vector<1x1x64xf32>
    %94 = vector.shape_cast %93 : vector<1x1x64xf32> to vector<1x64xf32>
    %c0_78 = arith.constant 0 : index
    %c0_79 = arith.constant 0 : index
    %c0_80 = arith.constant 0 : index
    %c7_81 = arith.constant 7 : index
    %95 = vector.load %arg5[%c0_78, %c0_79, %c0_80, %c7_81] : memref<1x1x64x16xf32, #tpu.memory_space<vmem>>, vector<1x1x64x1xf32>
    %96 = vector.shape_cast %95 : vector<1x1x64x1xf32> to vector<64x1xf32>
    %97 = vector.broadcast %94 : vector<1x64xf32> to vector<64x64xf32>
    %98 = arith.mulf %97, %14 : vector<64x64xf32>
    %99 = math.exp %98 : vector<64x64xf32>
    %c0_82 = arith.constant 0 : index
    %c448 = arith.constant 448 : index
    %100 = vector.load %arg10[%c0_82, %c448] : memref<64x1024xf32, #tpu.memory_space<vmem>>, vector<64x64xf32>
    tpu.vector_store %arg10[%c0_82, %c448], %99 {strides = array<i32>} : memref<64x1024xf32, #tpu.memory_space<vmem>>, vector<64x64xf32>,
    %101 = vector.broadcast %96 : vector<64x1xf32> to vector<64x64xf32>
    %102 = arith.mulf %101, %15 : vector<64x64xf32>
    %c0_83 = arith.constant 0 : index
    %c448_84 = arith.constant 448 : index
    %103 = vector.load %arg11[%c0_83, %c448_84] : memref<64x1024xf32, #tpu.memory_space<vmem>>, vector<64x64xf32>
    tpu.vector_store %arg11[%c0_83, %c448_84], %102 {strides = array<i32>} : memref<64x1024xf32, #tpu.memory_space<vmem>>, vector<64x64xf32>,
    %c0_85 = arith.constant 0 : index
    %c8 = arith.constant 8 : index
    %c0_86 = arith.constant 0 : index
    %104 = vector.load %arg4[%c0_85, %c8, %c0_86] : memref<1x16x64xf32, #tpu.memory_space<vmem>>, vector<1x1x64xf32>
    %105 = vector.shape_cast %104 : vector<1x1x64xf32> to vector<1x64xf32>
    %c0_87 = arith.constant 0 : index
    %c0_88 = arith.constant 0 : index
    %c0_89 = arith.constant 0 : index
    %c8_90 = arith.constant 8 : index
    %106 = vector.load %arg5[%c0_87, %c0_88, %c0_89, %c8_90] : memref<1x1x64x16xf32, #tpu.memory_space<vmem>>, vector<1x1x64x1xf32>
    %107 = vector.shape_cast %106 : vector<1x1x64x1xf32> to vector<64x1xf32>
    %108 = vector.broadcast %105 : vector<1x64xf32> to vector<64x64xf32>
    %109 = arith.mulf %108, %14 : vector<64x64xf32>
    %110 = math.exp %109 : vector<64x64xf32>
    %c0_91 = arith.constant 0 : index
    %c512 = arith.constant 512 : index
    %111 = vector.load %arg10[%c0_91, %c512] : memref<64x1024xf32, #tpu.memory_space<vmem>>, vector<64x64xf32>
    tpu.vector_store %arg10[%c0_91, %c512], %110 {strides = array<i32>} : memref<64x1024xf32, #tpu.memory_space<vmem>>, vector<64x64xf32>,
    %112 = vector.broadcast %107 : vector<64x1xf32> to vector<64x64xf32>
    %113 = arith.mulf %112, %15 : vector<64x64xf32>
    %c0_92 = arith.constant 0 : index
    %c512_93 = arith.constant 512 : index
    %114 = vector.load %arg11[%c0_92, %c512_93] : memref<64x1024xf32, #tpu.memory_space<vmem>>, vector<64x64xf32>
    tpu.vector_store %arg11[%c0_92, %c512_93], %113 {strides = array<i32>} : memref<64x1024xf32, #tpu.memory_space<vmem>>, vector<64x64xf32>,
    %c0_94 = arith.constant 0 : index
    %c9 = arith.constant 9 : index
    %c0_95 = arith.constant 0 : index
    %115 = vector.load %arg4[%c0_94, %c9, %c0_95] : memref<1x16x64xf32, #tpu.memory_space<vmem>>, vector<1x1x64xf32>
    %116 = vector.shape_cast %115 : vector<1x1x64xf32> to vector<1x64xf32>
    %c0_96 = arith.constant 0 : index
    %c0_97 = arith.constant 0 : index
    %c0_98 = arith.constant 0 : index
    %c9_99 = arith.constant 9 : index
    %117 = vector.load %arg5[%c0_96, %c0_97, %c0_98, %c9_99] : memref<1x1x64x16xf32, #tpu.memory_space<vmem>>, vector<1x1x64x1xf32>
    %118 = vector.shape_cast %117 : vector<1x1x64x1xf32> to vector<64x1xf32>
    %119 = vector.broadcast %116 : vector<1x64xf32> to vector<64x64xf32>
    %120 = arith.mulf %119, %14 : vector<64x64xf32>
    %121 = math.exp %120 : vector<64x64xf32>
    %c0_100 = arith.constant 0 : index
    %c576 = arith.constant 576 : index
    %122 = vector.load %arg10[%c0_100, %c576] : memref<64x1024xf32, #tpu.memory_space<vmem>>, vector<64x64xf32>
    tpu.vector_store %arg10[%c0_100, %c576], %121 {strides = array<i32>} : memref<64x1024xf32, #tpu.memory_space<vmem>>, vector<64x64xf32>,
    %123 = vector.broadcast %118 : vector<64x1xf32> to vector<64x64xf32>
    %124 = arith.mulf %123, %15 : vector<64x64xf32>
    %c0_101 = arith.constant 0 : index
    %c576_102 = arith.constant 576 : index
    %125 = vector.load %arg11[%c0_101, %c576_102] : memref<64x1024xf32, #tpu.memory_space<vmem>>, vector<64x64xf32>
    tpu.vector_store %arg11[%c0_101, %c576_102], %124 {strides = array<i32>} : memref<64x1024xf32, #tpu.memory_space<vmem>>, vector<64x64xf32>,
    %c0_103 = arith.constant 0 : index
    %c10 = arith.constant 10 : index
    %c0_104 = arith.constant 0 : index
    %126 = vector.load %arg4[%c0_103, %c10, %c0_104] : memref<1x16x64xf32, #tpu.memory_space<vmem>>, vector<1x1x64xf32>
    %127 = vector.shape_cast %126 : vector<1x1x64xf32> to vector<1x64xf32>
    %c0_105 = arith.constant 0 : index
    %c0_106 = arith.constant 0 : index
    %c0_107 = arith.constant 0 : index
    %c10_108 = arith.constant 10 : index
    %128 = vector.load %arg5[%c0_105, %c0_106, %c0_107, %c10_108] : memref<1x1x64x16xf32, #tpu.memory_space<vmem>>, vector<1x1x64x1xf32>
    %129 = vector.shape_cast %128 : vector<1x1x64x1xf32> to vector<64x1xf32>
    %130 = vector.broadcast %127 : vector<1x64xf32> to vector<64x64xf32>
    %131 = arith.mulf %130, %14 : vector<64x64xf32>
    %132 = math.exp %131 : vector<64x64xf32>
    %c0_109 = arith.constant 0 : index
    %c640 = arith.constant 640 : index
    %133 = vector.load %arg10[%c0_109, %c640] : memref<64x1024xf32, #tpu.memory_space<vmem>>, vector<64x64xf32>
    tpu.vector_store %arg10[%c0_109, %c640], %132 {strides = array<i32>} : memref<64x1024xf32, #tpu.memory_space<vmem>>, vector<64x64xf32>,
    %134 = vector.broadcast %129 : vector<64x1xf32> to vector<64x64xf32>
    %135 = arith.mulf %134, %15 : vector<64x64xf32>
    %c0_110 = arith.constant 0 : index
    %c640_111 = arith.constant 640 : index
    %136 = vector.load %arg11[%c0_110, %c640_111] : memref<64x1024xf32, #tpu.memory_space<vmem>>, vector<64x64xf32>
    tpu.vector_store %arg11[%c0_110, %c640_111], %135 {strides = array<i32>} : memref<64x1024xf32, #tpu.memory_space<vmem>>, vector<64x64xf32>,
    %c0_112 = arith.constant 0 : index
    %c11 = arith.constant 11 : index
    %c0_113 = arith.constant 0 : index
    %137 = vector.load %arg4[%c0_112, %c11, %c0_113] : memref<1x16x64xf32, #tpu.memory_space<vmem>>, vector<1x1x64xf32>
    %138 = vector.shape_cast %137 : vector<1x1x64xf32> to vector<1x64xf32>
    %c0_114 = arith.constant 0 : index
    %c0_115 = arith.constant 0 : index
    %c0_116 = arith.constant 0 : index
    %c11_117 = arith.constant 11 : index
    %139 = vector.load %arg5[%c0_114, %c0_115, %c0_116, %c11_117] : memref<1x1x64x16xf32, #tpu.memory_space<vmem>>, vector<1x1x64x1xf32>
    %140 = vector.shape_cast %139 : vector<1x1x64x1xf32> to vector<64x1xf32>
    %141 = vector.broadcast %138 : vector<1x64xf32> to vector<64x64xf32>
    %142 = arith.mulf %141, %14 : vector<64x64xf32>
    %143 = math.exp %142 : vector<64x64xf32>
    %c0_118 = arith.constant 0 : index
    %c704 = arith.constant 704 : index
    %144 = vector.load %arg10[%c0_118, %c704] : memref<64x1024xf32, #tpu.memory_space<vmem>>, vector<64x64xf32>
    tpu.vector_store %arg10[%c0_118, %c704], %143 {strides = array<i32>} : memref<64x1024xf32, #tpu.memory_space<vmem>>, vector<64x64xf32>,
    %145 = vector.broadcast %140 : vector<64x1xf32> to vector<64x64xf32>
    %146 = arith.mulf %145, %15 : vector<64x64xf32>
    %c0_119 = arith.constant 0 : index
    %c704_120 = arith.constant 704 : index
    %147 = vector.load %arg11[%c0_119, %c704_120] : memref<64x1024xf32, #tpu.memory_space<vmem>>, vector<64x64xf32>
    tpu.vector_store %arg11[%c0_119, %c704_120], %146 {strides = array<i32>} : memref<64x1024xf32, #tpu.memory_space<vmem>>, vector<64x64xf32>,
    %c0_121 = arith.constant 0 : index
    %c12 = arith.constant 12 : index
    %c0_122 = arith.constant 0 : index
    %148 = vector.load %arg4[%c0_121, %c12, %c0_122] : memref<1x16x64xf32, #tpu.memory_space<vmem>>, vector<1x1x64xf32>
    %149 = vector.shape_cast %148 : vector<1x1x64xf32> to vector<1x64xf32>
    %c0_123 = arith.constant 0 : index
    %c0_124 = arith.constant 0 : index
    %c0_125 = arith.constant 0 : index
    %c12_126 = arith.constant 12 : index
    %150 = vector.load %arg5[%c0_123, %c0_124, %c0_125, %c12_126] : memref<1x1x64x16xf32, #tpu.memory_space<vmem>>, vector<1x1x64x1xf32>
    %151 = vector.shape_cast %150 : vector<1x1x64x1xf32> to vector<64x1xf32>
    %152 = vector.broadcast %149 : vector<1x64xf32> to vector<64x64xf32>
    %153 = arith.mulf %152, %14 : vector<64x64xf32>
    %154 = math.exp %153 : vector<64x64xf32>
    %c0_127 = arith.constant 0 : index
    %c768 = arith.constant 768 : index
    %155 = vector.load %arg10[%c0_127, %c768] : memref<64x1024xf32, #tpu.memory_space<vmem>>, vector<64x64xf32>
    tpu.vector_store %arg10[%c0_127, %c768], %154 {strides = array<i32>} : memref<64x1024xf32, #tpu.memory_space<vmem>>, vector<64x64xf32>,
    %156 = vector.broadcast %151 : vector<64x1xf32> to vector<64x64xf32>
    %157 = arith.mulf %156, %15 : vector<64x64xf32>
    %c0_128 = arith.constant 0 : index
    %c768_129 = arith.constant 768 : index
    %158 = vector.load %arg11[%c0_128, %c768_129] : memref<64x1024xf32, #tpu.memory_space<vmem>>, vector<64x64xf32>
    tpu.vector_store %arg11[%c0_128, %c768_129], %157 {strides = array<i32>} : memref<64x1024xf32, #tpu.memory_space<vmem>>, vector<64x64xf32>,
    %c0_130 = arith.constant 0 : index
    %c13 = arith.constant 13 : index
    %c0_131 = arith.constant 0 : index
    %159 = vector.load %arg4[%c0_130, %c13, %c0_131] : memref<1x16x64xf32, #tpu.memory_space<vmem>>, vector<1x1x64xf32>
    %160 = vector.shape_cast %159 : vector<1x1x64xf32> to vector<1x64xf32>
    %c0_132 = arith.constant 0 : index
    %c0_133 = arith.constant 0 : index
    %c0_134 = arith.constant 0 : index
    %c13_135 = arith.constant 13 : index
    %161 = vector.load %arg5[%c0_132, %c0_133, %c0_134, %c13_135] : memref<1x1x64x16xf32, #tpu.memory_space<vmem>>, vector<1x1x64x1xf32>
    %162 = vector.shape_cast %161 : vector<1x1x64x1xf32> to vector<64x1xf32>
    %163 = vector.broadcast %160 : vector<1x64xf32> to vector<64x64xf32>
    %164 = arith.mulf %163, %14 : vector<64x64xf32>
    %165 = math.exp %164 : vector<64x64xf32>
    %c0_136 = arith.constant 0 : index
    %c832 = arith.constant 832 : index
    %166 = vector.load %arg10[%c0_136, %c832] : memref<64x1024xf32, #tpu.memory_space<vmem>>, vector<64x64xf32>
    tpu.vector_store %arg10[%c0_136, %c832], %165 {strides = array<i32>} : memref<64x1024xf32, #tpu.memory_space<vmem>>, vector<64x64xf32>,
    %167 = vector.broadcast %162 : vector<64x1xf32> to vector<64x64xf32>
    %168 = arith.mulf %167, %15 : vector<64x64xf32>
    %c0_137 = arith.constant 0 : index
    %c832_138 = arith.constant 832 : index
    %169 = vector.load %arg11[%c0_137, %c832_138] : memref<64x1024xf32, #tpu.memory_space<vmem>>, vector<64x64xf32>
    tpu.vector_store %arg11[%c0_137, %c832_138], %168 {strides = array<i32>} : memref<64x1024xf32, #tpu.memory_space<vmem>>, vector<64x64xf32>,
    %c0_139 = arith.constant 0 : index
    %c14 = arith.constant 14 : index
    %c0_140 = arith.constant 0 : index
    %170 = vector.load %arg4[%c0_139, %c14, %c0_140] : memref<1x16x64xf32, #tpu.memory_space<vmem>>, vector<1x1x64xf32>
    %171 = vector.shape_cast %170 : vector<1x1x64xf32> to vector<1x64xf32>
    %c0_141 = arith.constant 0 : index
    %c0_142 = arith.constant 0 : index
    %c0_143 = arith.constant 0 : index
    %c14_144 = arith.constant 14 : index
    %172 = vector.load %arg5[%c0_141, %c0_142, %c0_143, %c14_144] : memref<1x1x64x16xf32, #tpu.memory_space<vmem>>, vector<1x1x64x1xf32>
    %173 = vector.shape_cast %172 : vector<1x1x64x1xf32> to vector<64x1xf32>
    %174 = vector.broadcast %171 : vector<1x64xf32> to vector<64x64xf32>
    %175 = arith.mulf %174, %14 : vector<64x64xf32>
    %176 = math.exp %175 : vector<64x64xf32>
    %c0_145 = arith.constant 0 : index
    %c896 = arith.constant 896 : index
    %177 = vector.load %arg10[%c0_145, %c896] : memref<64x1024xf32, #tpu.memory_space<vmem>>, vector<64x64xf32>
    tpu.vector_store %arg10[%c0_145, %c896], %176 {strides = array<i32>} : memref<64x1024xf32, #tpu.memory_space<vmem>>, vector<64x64xf32>,
    %178 = vector.broadcast %173 : vector<64x1xf32> to vector<64x64xf32>
    %179 = arith.mulf %178, %15 : vector<64x64xf32>
    %c0_146 = arith.constant 0 : index
    %c896_147 = arith.constant 896 : index
    %180 = vector.load %arg11[%c0_146, %c896_147] : memref<64x1024xf32, #tpu.memory_space<vmem>>, vector<64x64xf32>
    tpu.vector_store %arg11[%c0_146, %c896_147], %179 {strides = array<i32>} : memref<64x1024xf32, #tpu.memory_space<vmem>>, vector<64x64xf32>,
    %c0_148 = arith.constant 0 : index
    %c15 = arith.constant 15 : index
    %c0_149 = arith.constant 0 : index
    %181 = vector.load %arg4[%c0_148, %c15, %c0_149] : memref<1x16x64xf32, #tpu.memory_space<vmem>>, vector<1x1x64xf32>
    %182 = vector.shape_cast %181 : vector<1x1x64xf32> to vector<1x64xf32>
    %c0_150 = arith.constant 0 : index
    %c0_151 = arith.constant 0 : index
    %c0_152 = arith.constant 0 : index
    %c15_153 = arith.constant 15 : index
    %183 = vector.load %arg5[%c0_150, %c0_151, %c0_152, %c15_153] : memref<1x1x64x16xf32, #tpu.memory_space<vmem>>, vector<1x1x64x1xf32>
    %184 = vector.shape_cast %183 : vector<1x1x64x1xf32> to vector<64x1xf32>
    %185 = vector.broadcast %182 : vector<1x64xf32> to vector<64x64xf32>
    %186 = arith.mulf %185, %14 : vector<64x64xf32>
    %187 = math.exp %186 : vector<64x64xf32>
    %c0_154 = arith.constant 0 : index
    %c960 = arith.constant 960 : index
    %188 = vector.load %arg10[%c0_154, %c960] : memref<64x1024xf32, #tpu.memory_space<vmem>>, vector<64x64xf32>
    tpu.vector_store %arg10[%c0_154, %c960], %187 {strides = array<i32>} : memref<64x1024xf32, #tpu.memory_space<vmem>>, vector<64x64xf32>,
    %189 = vector.broadcast %184 : vector<64x1xf32> to vector<64x64xf32>
    %190 = arith.mulf %189, %15 : vector<64x64xf32>
    %c0_155 = arith.constant 0 : index
    %c960_156 = arith.constant 960 : index
    %191 = vector.load %arg11[%c0_155, %c960_156] : memref<64x1024xf32, #tpu.memory_space<vmem>>, vector<64x64xf32>
    tpu.vector_store %arg11[%c0_155, %c960_156], %190 {strides = array<i32>} : memref<64x1024xf32, #tpu.memory_space<vmem>>, vector<64x64xf32>,
    %cst_157 = arith.constant 0.000000e+00 : f32
    %192 = vector.broadcast %cst_157 : f32 to vector<1x1024xf32>
    %c0_i32 = arith.constant 0 : i32
    %c64_i32 = arith.constant 64 : i32
    %193 = arith.addi %c0_i32, %c64_i32 : i32
    %c1_i32 = arith.constant 1 : i32
    %194 = scf.for %arg12 = %c0_i32 to %193 step %c1_i32 iter_args(%arg13 = %192) -> (vector<1x1024xf32>)  : i32 {
      %298 = arith.index_cast %arg12 : i32 to index
      %c0_262 = arith.constant 0 : index
      %299 = vector.load %arg10[%298, %c0_262] : memref<64x1024xf32, #tpu.memory_space<vmem>>, vector<1x1024xf32>
      %300 = arith.mulf %299, %arg13 : vector<1x1024xf32>
      %301 = arith.index_cast %arg12 : i32 to index
      %c0_263 = arith.constant 0 : index
      %302 = vector.load %arg11[%301, %c0_263] : memref<64x1024xf32, #tpu.memory_space<vmem>>, vector<1x1024xf32>
      %303 = arith.addf %300, %302 : vector<1x1024xf32>
      %304 = arith.index_cast %arg12 : i32 to index
      %c0_264 = arith.constant 0 : index
      %305 = vector.load %arg11[%304, %c0_264] : memref<64x1024xf32, #tpu.memory_space<vmem>>, vector<1x1024xf32>
      tpu.vector_store %arg11[%304, %c0_264], %303 {strides = array<i32>} : memref<64x1024xf32, #tpu.memory_space<vmem>>, vector<1x1024xf32>,
      scf.yield %303 : vector<1x1024xf32>
    }
    %c64_i32_158 = arith.constant 64 : i32
    %c0_159 = arith.constant 0 : index
    %c0_160 = arith.constant 0 : index
    %c0_161 = arith.constant 0 : index
    %195 = vector.load %arg7[%c0_159, %c0_160, %c0_161] : memref<1x1x64xf32, #tpu.memory_space<vmem>>, vector<1x1x64xf32>
    %196 = vector.shape_cast %195 : vector<1x1x64xf32> to vector<1x64xf32>
    %197 = vector.broadcast %196 : vector<1x64xf32> to vector<64x64xf32>
    %198 = arith.mulf %197, %1 : vector<64x64xf32>
    %c0_162 = arith.constant 0 : index
    %c0_163 = arith.constant 0 : index
    %c0_164 = arith.constant 0 : index
    %c0_165 = arith.constant 0 : index
    %199 = vector.load %arg6[%c0_162, %c0_163, %c0_164, %c0_165] : memref<1x1x64x16xf32, #tpu.memory_space<vmem>>, vector<1x1x64x1xf32>
    %200 = vector.shape_cast %199 : vector<1x1x64x1xf32> to vector<64x1xf32>
    %c0_166 = arith.constant 0 : index
    %c0_167 = arith.constant 0 : index
    %201 = vector.load %arg11[%c0_166, %c0_167] : memref<64x1024xf32, #tpu.memory_space<vmem>>, vector<64x64xf32>
    %202 = vector.broadcast %200 : vector<64x1xf32> to vector<64x64xf32>
    %203 = arith.mulf %202, %201 : vector<64x64xf32>
    %204 = arith.addf %198, %203 : vector<64x64xf32>
    %c0_168 = arith.constant 0 : index
    %c0_169 = arith.constant 0 : index
    %c0_170 = arith.constant 0 : index
    %c1_171 = arith.constant 1 : index
    %205 = vector.load %arg6[%c0_168, %c0_169, %c0_170, %c1_171] : memref<1x1x64x16xf32, #tpu.memory_space<vmem>>, vector<1x1x64x1xf32>
    %206 = vector.shape_cast %205 : vector<1x1x64x1xf32> to vector<64x1xf32>
    %c0_172 = arith.constant 0 : index
    %c64_173 = arith.constant 64 : index
    %207 = vector.load %arg11[%c0_172, %c64_173] : memref<64x1024xf32, #tpu.memory_space<vmem>>, vector<64x64xf32>
    %208 = vector.broadcast %206 : vector<64x1xf32> to vector<64x64xf32>
    %209 = arith.mulf %208, %207 : vector<64x64xf32>
    %210 = arith.addf %204, %209 : vector<64x64xf32>
    %c0_174 = arith.constant 0 : index
    %c0_175 = arith.constant 0 : index
    %c0_176 = arith.constant 0 : index
    %c2_177 = arith.constant 2 : index
    %211 = vector.load %arg6[%c0_174, %c0_175, %c0_176, %c2_177] : memref<1x1x64x16xf32, #tpu.memory_space<vmem>>, vector<1x1x64x1xf32>
    %212 = vector.shape_cast %211 : vector<1x1x64x1xf32> to vector<64x1xf32>
    %c0_178 = arith.constant 0 : index
    %c128_179 = arith.constant 128 : index
    %213 = vector.load %arg11[%c0_178, %c128_179] : memref<64x1024xf32, #tpu.memory_space<vmem>>, vector<64x64xf32>
    %214 = vector.broadcast %212 : vector<64x1xf32> to vector<64x64xf32>
    %215 = arith.mulf %214, %213 : vector<64x64xf32>
    %216 = arith.addf %210, %215 : vector<64x64xf32>
    %c0_180 = arith.constant 0 : index
    %c0_181 = arith.constant 0 : index
    %c0_182 = arith.constant 0 : index
    %c3_183 = arith.constant 3 : index
    %217 = vector.load %arg6[%c0_180, %c0_181, %c0_182, %c3_183] : memref<1x1x64x16xf32, #tpu.memory_space<vmem>>, vector<1x1x64x1xf32>
    %218 = vector.shape_cast %217 : vector<1x1x64x1xf32> to vector<64x1xf32>
    %c0_184 = arith.constant 0 : index
    %c192_185 = arith.constant 192 : index
    %219 = vector.load %arg11[%c0_184, %c192_185] : memref<64x1024xf32, #tpu.memory_space<vmem>>, vector<64x64xf32>
    %220 = vector.broadcast %218 : vector<64x1xf32> to vector<64x64xf32>
    %221 = arith.mulf %220, %219 : vector<64x64xf32>
    %222 = arith.addf %216, %221 : vector<64x64xf32>
    %c0_186 = arith.constant 0 : index
    %c0_187 = arith.constant 0 : index
    %c0_188 = arith.constant 0 : index
    %c4_189 = arith.constant 4 : index
    %223 = vector.load %arg6[%c0_186, %c0_187, %c0_188, %c4_189] : memref<1x1x64x16xf32, #tpu.memory_space<vmem>>, vector<1x1x64x1xf32>
    %224 = vector.shape_cast %223 : vector<1x1x64x1xf32> to vector<64x1xf32>
    %c0_190 = arith.constant 0 : index
    %c256_191 = arith.constant 256 : index
    %225 = vector.load %arg11[%c0_190, %c256_191] : memref<64x1024xf32, #tpu.memory_space<vmem>>, vector<64x64xf32>
    %226 = vector.broadcast %224 : vector<64x1xf32> to vector<64x64xf32>
    %227 = arith.mulf %226, %225 : vector<64x64xf32>
    %228 = arith.addf %222, %227 : vector<64x64xf32>
    %c0_192 = arith.constant 0 : index
    %c0_193 = arith.constant 0 : index
    %c0_194 = arith.constant 0 : index
    %c5_195 = arith.constant 5 : index
    %229 = vector.load %arg6[%c0_192, %c0_193, %c0_194, %c5_195] : memref<1x1x64x16xf32, #tpu.memory_space<vmem>>, vector<1x1x64x1xf32>
    %230 = vector.shape_cast %229 : vector<1x1x64x1xf32> to vector<64x1xf32>
    %c0_196 = arith.constant 0 : index
    %c320_197 = arith.constant 320 : index
    %231 = vector.load %arg11[%c0_196, %c320_197] : memref<64x1024xf32, #tpu.memory_space<vmem>>, vector<64x64xf32>
    %232 = vector.broadcast %230 : vector<64x1xf32> to vector<64x64xf32>
    %233 = arith.mulf %232, %231 : vector<64x64xf32>
    %234 = arith.addf %228, %233 : vector<64x64xf32>
    %c0_198 = arith.constant 0 : index
    %c0_199 = arith.constant 0 : index
    %c0_200 = arith.constant 0 : index
    %c6_201 = arith.constant 6 : index
    %235 = vector.load %arg6[%c0_198, %c0_199, %c0_200, %c6_201] : memref<1x1x64x16xf32, #tpu.memory_space<vmem>>, vector<1x1x64x1xf32>
    %236 = vector.shape_cast %235 : vector<1x1x64x1xf32> to vector<64x1xf32>
    %c0_202 = arith.constant 0 : index
    %c384_203 = arith.constant 384 : index
    %237 = vector.load %arg11[%c0_202, %c384_203] : memref<64x1024xf32, #tpu.memory_space<vmem>>, vector<64x64xf32>
    %238 = vector.broadcast %236 : vector<64x1xf32> to vector<64x64xf32>
    %239 = arith.mulf %238, %237 : vector<64x64xf32>
    %240 = arith.addf %234, %239 : vector<64x64xf32>
    %c0_204 = arith.constant 0 : index
    %c0_205 = arith.constant 0 : index
    %c0_206 = arith.constant 0 : index
    %c7_207 = arith.constant 7 : index
    %241 = vector.load %arg6[%c0_204, %c0_205, %c0_206, %c7_207] : memref<1x1x64x16xf32, #tpu.memory_space<vmem>>, vector<1x1x64x1xf32>
    %242 = vector.shape_cast %241 : vector<1x1x64x1xf32> to vector<64x1xf32>
    %c0_208 = arith.constant 0 : index
    %c448_209 = arith.constant 448 : index
    %243 = vector.load %arg11[%c0_208, %c448_209] : memref<64x1024xf32, #tpu.memory_space<vmem>>, vector<64x64xf32>
    %244 = vector.broadcast %242 : vector<64x1xf32> to vector<64x64xf32>
    %245 = arith.mulf %244, %243 : vector<64x64xf32>
    %246 = arith.addf %240, %245 : vector<64x64xf32>
    %c0_210 = arith.constant 0 : index
    %c0_211 = arith.constant 0 : index
    %c0_212 = arith.constant 0 : index
    %c8_213 = arith.constant 8 : index
    %247 = vector.load %arg6[%c0_210, %c0_211, %c0_212, %c8_213] : memref<1x1x64x16xf32, #tpu.memory_space<vmem>>, vector<1x1x64x1xf32>
    %248 = vector.shape_cast %247 : vector<1x1x64x1xf32> to vector<64x1xf32>
    %c0_214 = arith.constant 0 : index
    %c512_215 = arith.constant 512 : index
    %249 = vector.load %arg11[%c0_214, %c512_215] : memref<64x1024xf32, #tpu.memory_space<vmem>>, vector<64x64xf32>
    %250 = vector.broadcast %248 : vector<64x1xf32> to vector<64x64xf32>
    %251 = arith.mulf %250, %249 : vector<64x64xf32>
    %252 = arith.addf %246, %251 : vector<64x64xf32>
    %c0_216 = arith.constant 0 : index
    %c0_217 = arith.constant 0 : index
    %c0_218 = arith.constant 0 : index
    %c9_219 = arith.constant 9 : index
    %253 = vector.load %arg6[%c0_216, %c0_217, %c0_218, %c9_219] : memref<1x1x64x16xf32, #tpu.memory_space<vmem>>, vector<1x1x64x1xf32>
    %254 = vector.shape_cast %253 : vector<1x1x64x1xf32> to vector<64x1xf32>
    %c0_220 = arith.constant 0 : index
    %c576_221 = arith.constant 576 : index
    %255 = vector.load %arg11[%c0_220, %c576_221] : memref<64x1024xf32, #tpu.memory_space<vmem>>, vector<64x64xf32>
    %256 = vector.broadcast %254 : vector<64x1xf32> to vector<64x64xf32>
    %257 = arith.mulf %256, %255 : vector<64x64xf32>
    %258 = arith.addf %252, %257 : vector<64x64xf32>
    %c0_222 = arith.constant 0 : index
    %c0_223 = arith.constant 0 : index
    %c0_224 = arith.constant 0 : index
    %c10_225 = arith.constant 10 : index
    %259 = vector.load %arg6[%c0_222, %c0_223, %c0_224, %c10_225] : memref<1x1x64x16xf32, #tpu.memory_space<vmem>>, vector<1x1x64x1xf32>
    %260 = vector.shape_cast %259 : vector<1x1x64x1xf32> to vector<64x1xf32>
    %c0_226 = arith.constant 0 : index
    %c640_227 = arith.constant 640 : index
    %261 = vector.load %arg11[%c0_226, %c640_227] : memref<64x1024xf32, #tpu.memory_space<vmem>>, vector<64x64xf32>
    %262 = vector.broadcast %260 : vector<64x1xf32> to vector<64x64xf32>
    %263 = arith.mulf %262, %261 : vector<64x64xf32>
    %264 = arith.addf %258, %263 : vector<64x64xf32>
    %c0_228 = arith.constant 0 : index
    %c0_229 = arith.constant 0 : index
    %c0_230 = arith.constant 0 : index
    %c11_231 = arith.constant 11 : index
    %265 = vector.load %arg6[%c0_228, %c0_229, %c0_230, %c11_231] : memref<1x1x64x16xf32, #tpu.memory_space<vmem>>, vector<1x1x64x1xf32>
    %266 = vector.shape_cast %265 : vector<1x1x64x1xf32> to vector<64x1xf32>
    %c0_232 = arith.constant 0 : index
    %c704_233 = arith.constant 704 : index
    %267 = vector.load %arg11[%c0_232, %c704_233] : memref<64x1024xf32, #tpu.memory_space<vmem>>, vector<64x64xf32>
    %268 = vector.broadcast %266 : vector<64x1xf32> to vector<64x64xf32>
    %269 = arith.mulf %268, %267 : vector<64x64xf32>
    %270 = arith.addf %264, %269 : vector<64x64xf32>
    %c0_234 = arith.constant 0 : index
    %c0_235 = arith.constant 0 : index
    %c0_236 = arith.constant 0 : index
    %c12_237 = arith.constant 12 : index
    %271 = vector.load %arg6[%c0_234, %c0_235, %c0_236, %c12_237] : memref<1x1x64x16xf32, #tpu.memory_space<vmem>>, vector<1x1x64x1xf32>
    %272 = vector.shape_cast %271 : vector<1x1x64x1xf32> to vector<64x1xf32>
    %c0_238 = arith.constant 0 : index
    %c768_239 = arith.constant 768 : index
    %273 = vector.load %arg11[%c0_238, %c768_239] : memref<64x1024xf32, #tpu.memory_space<vmem>>, vector<64x64xf32>
    %274 = vector.broadcast %272 : vector<64x1xf32> to vector<64x64xf32>
    %275 = arith.mulf %274, %273 : vector<64x64xf32>
    %276 = arith.addf %270, %275 : vector<64x64xf32>
    %c0_240 = arith.constant 0 : index
    %c0_241 = arith.constant 0 : index
    %c0_242 = arith.constant 0 : index
    %c13_243 = arith.constant 13 : index
    %277 = vector.load %arg6[%c0_240, %c0_241, %c0_242, %c13_243] : memref<1x1x64x16xf32, #tpu.memory_space<vmem>>, vector<1x1x64x1xf32>
    %278 = vector.shape_cast %277 : vector<1x1x64x1xf32> to vector<64x1xf32>
    %c0_244 = arith.constant 0 : index
    %c832_245 = arith.constant 832 : index
    %279 = vector.load %arg11[%c0_244, %c832_245] : memref<64x1024xf32, #tpu.memory_space<vmem>>, vector<64x64xf32>
    %280 = vector.broadcast %278 : vector<64x1xf32> to vector<64x64xf32>
    %281 = arith.mulf %280, %279 : vector<64x64xf32>
    %282 = arith.addf %276, %281 : vector<64x64xf32>
    %c0_246 = arith.constant 0 : index
    %c0_247 = arith.constant 0 : index
    %c0_248 = arith.constant 0 : index
    %c14_249 = arith.constant 14 : index
    %283 = vector.load %arg6[%c0_246, %c0_247, %c0_248, %c14_249] : memref<1x1x64x16xf32, #tpu.memory_space<vmem>>, vector<1x1x64x1xf32>
    %284 = vector.shape_cast %283 : vector<1x1x64x1xf32> to vector<64x1xf32>
    %c0_250 = arith.constant 0 : index
    %c896_251 = arith.constant 896 : index
    %285 = vector.load %arg11[%c0_250, %c896_251] : memref<64x1024xf32, #tpu.memory_space<vmem>>, vector<64x64xf32>
    %286 = vector.broadcast %284 : vector<64x1xf32> to vector<64x64xf32>
    %287 = arith.mulf %286, %285 : vector<64x64xf32>
    %288 = arith.addf %282, %287 : vector<64x64xf32>
    %c0_252 = arith.constant 0 : index
    %c0_253 = arith.constant 0 : index
    %c0_254 = arith.constant 0 : index
    %c15_255 = arith.constant 15 : index
    %289 = vector.load %arg6[%c0_252, %c0_253, %c0_254, %c15_255] : memref<1x1x64x16xf32, #tpu.memory_space<vmem>>, vector<1x1x64x1xf32>
    %290 = vector.shape_cast %289 : vector<1x1x64x1xf32> to vector<64x1xf32>
    %c0_256 = arith.constant 0 : index
    %c960_257 = arith.constant 960 : index
    %291 = vector.load %arg11[%c0_256, %c960_257] : memref<64x1024xf32, #tpu.memory_space<vmem>>, vector<64x64xf32>
    %292 = vector.broadcast %290 : vector<64x1xf32> to vector<64x64xf32>
    %293 = arith.mulf %292, %291 : vector<64x64xf32>
    %294 = arith.addf %288, %293 : vector<64x64xf32>
    %c0_258 = arith.constant 0 : index
    %c0_259 = arith.constant 0 : index
    %c0_260 = arith.constant 0 : index
    %c0_261 = arith.constant 0 : index
    %295 = vector.load %arg9[%c0_258, %c0_259, %c0_260, %c0_261] : memref<1x1x64x64xf32, #tpu.memory_space<vmem>>, vector<1x1x64x64xf32>
    %296 = vector.shape_cast %295 : vector<1x1x64x64xf32> to vector<64x64xf32>
    %297 = vector.shape_cast %294 : vector<64x64xf32> to vector<1x1x64x64xf32>
    tpu.vector_store %arg9[%c0_258, %c0_259, %c0_260, %c0_261], %297 {strides = array<i32>} : memref<1x1x64x64xf32, #tpu.memory_space<vmem>>, vector<1x1x64x64xf32>,
    return
  }
  func.func @transform_0(%arg0: i32, %arg1: i32) -> (i32, i32, i32, i32) {
    %c0_i32 = arith.constant 0 : i32
    %c0_i32_0 = arith.constant 0 : i32
    %c0_i32_1 = arith.constant 0 : i32
    return %arg0, %arg1, %c0_i32, %c0_i32_0 : i32, i32, i32, i32
  }
  func.func @transform_1(%arg0: i32, %arg1: i32) -> (i32, i32, i32, i32) {
    %c0_i32 = arith.constant 0 : i32
    %c0_i32_0 = arith.constant 0 : i32
    %c0_i32_1 = arith.constant 0 : i32
    return %arg0, %arg1, %c0_i32, %c0_i32_0 : i32, i32, i32, i32
  }
  func.func @transform_2(%arg0: i32, %arg1: i32) -> (i32, i32, i32) {
    %c0_i32 = arith.constant 0 : i32
    %c0_i32_0 = arith.constant 0 : i32
    %c0_i32_1 = arith.constant 0 : i32
    return %arg0, %c0_i32, %c0_i32_0 : i32, i32, i32
  }
  func.func @transform_3(%arg0: i32, %arg1: i32) -> (i32, i32, i32, i32) {
    %c0_i32 = arith.constant 0 : i32
    %c0_i32_0 = arith.constant 0 : i32
    %c0_i32_1 = arith.constant 0 : i32
    return %arg0, %arg1, %c0_i32, %c0_i32_0 : i32, i32, i32, i32
  }
  func.func @transform_4(%arg0: i32, %arg1: i32) -> (i32, i32, i32, i32) {
    %c0_i32 = arith.constant 0 : i32
    %c0_i32_0 = arith.constant 0 : i32
    %c0_i32_1 = arith.constant 0 : i32
    return %arg0, %arg1, %c0_i32, %c0_i32_0 : i32, i32, i32, i32
  }
  func.func @transform_5(%arg0: i32, %arg1: i32) -> (i32, i32, i32) {
    %c0_i32 = arith.constant 0 : i32
    %c0_i32_0 = arith.constant 0 : i32
    %c0_i32_1 = arith.constant 0 : i32
    return %arg0, %c0_i32, %c0_i32_0 : i32, i32, i32
  }
  func.func @transform_6(%arg0: i32, %arg1: i32) -> (i32, i32, i32) {
    %c0_i32 = arith.constant 0 : i32
    %c0_i32_0 = arith.constant 0 : i32
    %c0_i32_1 = arith.constant 0 : i32
    return %arg0, %c0_i32, %c0_i32_0 : i32, i32, i32
  }
  func.func @transform_7(%arg0: i32, %arg1: i32) -> (i32, i32, i32, i32) {
    %c0_i32 = arith.constant 0 : i32
    %c0_i32_0 = arith.constant 0 : i32
    %c0_i32_1 = arith.constant 0 : i32
    return %arg0, %arg1, %c0_i32, %c0_i32_0 : i32, i32, i32, i32
  }
}

module attributes {stable_mosaic.version = 11 : i64} {
  func.func @_mm_bias_res_kernel(%arg0: i32, %arg1: memref<128x128xf32, #tpu.memory_space<vmem>>, %arg2: memref<128x32xbf16, #tpu.memory_space<vmem>>, %arg3: memref<1x32xf32, #tpu.memory_space<vmem>>, %arg4: memref<128x32xf32, #tpu.memory_space<vmem>>, %arg5: memref<128x32xf32, #tpu.memory_space<vmem>>) attributes {dimension_semantics = [#tpu.dimension_semantics<parallel>], iteration_bounds = array<i64: 1>, scalar_prefetch = 0 : i64, scratch_operands = 0 : i64, tpu.core_type = #tpu.core_type<tc>, window_params = [{transform_indices = @transform_0, window_bounds = array<i64: 128, 128>}, {pipeline_mode = #tpu.pipeline_mode<synchronous>, transform_indices = @transform_1, window_bounds = array<i64: 128, 32>}, {pipeline_mode = #tpu.pipeline_mode<synchronous>, transform_indices = @transform_2, window_bounds = array<i64: 1, 32>}, {transform_indices = @transform_3, window_bounds = array<i64: 128, 32>}, {transform_indices = @transform_4, window_bounds = array<i64: 128, 32>}]} {
    %c0 = arith.constant 0 : index
    %c0_0 = arith.constant 0 : index
    %0 = vector.load %arg1[%c0, %c0_0] : memref<128x128xf32, #tpu.memory_space<vmem>>, vector<128x128xf32>
    %1 = arith.truncf %0 : vector<128x128xf32> to vector<128x128xbf16>
    %c0_1 = arith.constant 0 : index
    %c0_2 = arith.constant 0 : index
    %2 = vector.load %arg2[%c0_1, %c0_2] : memref<128x32xbf16, #tpu.memory_space<vmem>>, vector<128x32xbf16>
    %cst = arith.constant dense<0.000000e+00> : vector<128x32xf32>
    %3 = tpu.matmul %1, %2, %cst {dimension_numbers = #tpu.dot_dimension_numbers<[1], [0], [0], [1], [0, 0, 1, 1], [], []>} : vector<128x128xbf16>, vector<128x32xbf16>, vector<128x32xf32> -> vector<128x32xf32>
    %c0_3 = arith.constant 0 : index
    %c0_4 = arith.constant 0 : index
    %4 = vector.load %arg3[%c0_3, %c0_4] : memref<1x32xf32, #tpu.memory_space<vmem>>, vector<1x32xf32>
    %5 = vector.broadcast %4 : vector<1x32xf32> to vector<128x32xf32>
    %6 = arith.addf %3, %5 : vector<128x32xf32>
    %c0_5 = arith.constant 0 : index
    %c0_6 = arith.constant 0 : index
    %7 = vector.load %arg4[%c0_5, %c0_6] : memref<128x32xf32, #tpu.memory_space<vmem>>, vector<128x32xf32>
    %8 = arith.addf %6, %7 : vector<128x32xf32>
    %c0_7 = arith.constant 0 : index
    %c0_8 = arith.constant 0 : index
    %9 = vector.load %arg5[%c0_7, %c0_8] : memref<128x32xf32, #tpu.memory_space<vmem>>, vector<128x32xf32>
    tpu.vector_store %arg5[%c0_7, %c0_8], %8 {strides = array<i32>} : memref<128x32xf32, #tpu.memory_space<vmem>>, vector<128x32xf32>,
    return
  }
  func.func @transform_0(%arg0: i32) -> (i32, i32) {
    %c0_i32 = arith.constant 0 : i32
    %c0_i32_0 = arith.constant 0 : i32
    return %arg0, %c0_i32 : i32, i32
  }
  func.func @transform_1(%arg0: i32) -> (i32, i32) {
    %c0_i32 = arith.constant 0 : i32
    %c0_i32_0 = arith.constant 0 : i32
    %c0_i32_1 = arith.constant 0 : i32
    return %c0_i32, %c0_i32_0 : i32, i32
  }
  func.func @transform_2(%arg0: i32) -> (i32, i32) {
    %c0_i32 = arith.constant 0 : i32
    %c0_i32_0 = arith.constant 0 : i32
    %c0_i32_1 = arith.constant 0 : i32
    return %c0_i32, %c0_i32_0 : i32, i32
  }
  func.func @transform_3(%arg0: i32) -> (i32, i32) {
    %c0_i32 = arith.constant 0 : i32
    %c0_i32_0 = arith.constant 0 : i32
    return %arg0, %c0_i32 : i32, i32
  }
  func.func @transform_4(%arg0: i32) -> (i32, i32) {
    %c0_i32 = arith.constant 0 : i32
    %c0_i32_0 = arith.constant 0 : i32
    return %arg0, %c0_i32 : i32, i32
  }
}

</mosaic_0001>

<bundles_post_ra>
// kernel: vss_block_forward.7
= control target key start
LH: loop header
LB: loop body
LE: loop exit
PB: predicated region body
PF: predicated region fallthrough
CT: control target
= control target key end

     0   :  { %10 = vsyncpa [#allocation3], 0  ;;  %s666_s21 = smov [#allocation2]   ;;  %s667_s23 = smov 128   ;;  %s1273_s0 = inlined_call_operand.hbm [shape: f32[128,32], index: 0, kind: input, shape index: {}]   ;;  %s1274_s1 = inlined_call_operand.vmem [shape: f32[1,32], index: 1, kind: input, shape index: {}]   ;;  %s1275_s2 = inlined_call_operand.vmem [shape: f32[1,32], index: 2, kind: input, shape index: {}]   ;;  %s1276_s3 = inlined_call_operand.vmem [shape: bf16[32,128], index: 3, kind: input, shape index: {}]   ;;  %s1277_s4 = inlined_call_operand.vmem [shape: f32[1,128], index: 4, kind: input, shape index: {}]   ;;  %s1278_s5 = inlined_call_operand.vmem [shape: f32[128,128], index: 5, kind: output, shape index: {}]  }
   0x1   :  { %s15_s20 = sshll.u32 %s1273_s0, 4  ;;  %s17_s22 = sshll.u32 %s666_s21, 4  ;;  %s16_s20 = int_to_ptr.hbm [resolvable:$true] %s15_s20  ;;  %s18_s22 = int_to_ptr.vmem [resolvable:$true] %s17_s22 }
   0x2   :  { %s668_s24 = smov 8  }
   0x3   :  { %23 = dma.hbm_to_vmem [thread:$0]  %s16_s20, 2048, %s18_s22, [#allocation3], %s667_s23, %s667_s23, %s668_s24  }
   0x4   :  { %664 = dma.done.wait [#allocation3], 2048  }
   0x5   :  { %665 = vsyncadd [#allocation3], 4294965248  ;;  %vm53_vm0 = vcmask 261120   ;;  %v49_v0 = vld [vmem:[#allocation2 + $0x60] sm:$0xff]  ;;  %v709_v6 = vld [vmem:[#allocation2 + $0x68] sm:$0xff]  ;;  %v669_v32 = vmov 32.0  }
   0x6   :  { %v45_v1 = vld [vmem:[#allocation2 + $0x40] sm:$0xff]  ;;  %v90_v3 = vsel %vm53_vm0, %v49_v0, 0.0  ;;  %v711_v7 = vld [vmem:[#allocation2 + $0x48] sm:$0xff]  ;;  %v93_v9 = vsel %vm53_vm0, %v709_v6, 0.0  ;;  %v725_v14 = vld [vmem:[#allocation2 + $0x50] sm:$0xff]  ;;  %606 = vrcp.f32 %v669_v32 }
   0x7   :  { %v703_v2 = vld [vmem:[#allocation2] sm:$0xff]  ;;  %v78_v4 = vsel %vm53_vm0, %v45_v1, 0.0  ;;  %91 = vadd.xlane.f32.xlu1 %v90_v3  ;;  %v713_v8 = vld [vmem:[#allocation2 + $0x8] sm:$0xff]  ;;  %v81_v10 = vsel %vm53_vm0, %v711_v7, 0.0  ;;  %v84_v17 = vsel %vm53_vm0, %v725_v14, 0.0  ;;  %v733_v18 = vld [vmem:[#allocation2 + $0x58] sm:$0xff] }
   0x8   :  { %v54_v5 = vsel %vm53_vm0, %v703_v2, 0.0  ;;  %79 = vadd.xlane.f32.xlu0 %v78_v4  ;;  %v57_v11 = vsel %vm53_vm0, %v713_v8, 0.0  ;;  %v721_v12 = vld [vmem:[#allocation2 + $0x20] sm:$0xff]  ;;  %v723_v13 = vld [vmem:[#allocation2 + $0x28] sm:$0xff]  ;;  %v735_v19 = vld [vmem:[#allocation2 + $0x70] sm:$0xff]  ;;  %v87_v21 = vsel %vm53_vm0, %v733_v18, 0.0 }
   0x9   :  { %55 = vadd.xlane.f32.xlu2 %v54_v5  ;;  %v66_v15 = vsel %vm53_vm0, %v721_v12, 0.0  ;;  %v69_v16 = vsel %vm53_vm0, %v723_v13, 0.0  ;;  %v737_v20 = vld [vmem:[#allocation2 + $0x78] sm:$0xff]  ;;  %v96_v22 = vsel %vm53_vm0, %v735_v19, 0.0  ;;  %v745_v24 = vld [vmem:[#allocation2 + $0x10] sm:$0xff] }
   0xa   :  { %v99_v23 = vsel %vm53_vm0, %v737_v20, 0.0  ;;  %v747_v25 = vld [vmem:[#allocation2 + $0x18] sm:$0xff]  ;;  %v749_v26 = vld [vmem:[#allocation2 + $0x30] sm:$0xff]  ;;  %v60_v27 = vsel %vm53_vm0, %v745_v24, 0.0 }
   0xb   :  { %v63_v28 = vsel %vm53_vm0, %v747_v25, 0.0  ;;  %v72_v29 = vsel %vm53_vm0, %v749_v26, 0.0  ;;  %v757_v30 = vld [vmem:[#allocation2 + $0x38] sm:$0xff] }
   0xc   :  { %v75_v31 = vsel %vm53_vm0, %v757_v30, 0.0  ;;  %v607_v33 = vpop.eup %606 }
   0xd   :  { %v103_v34 = vmul.f32 32.0, %v607_v33  ;;  %vm107_vm1 = vweird.f32 %v607_v33 }
   0xf   :  { %94 = vadd.xlane.f32.xlu1 %v93_v9  ;;  %v104_v35 = vsub.f32 1.0, %v103_v34 }
  0x10   :  { %82 = vadd.xlane.f32.xlu0 %v81_v10 }
  0x11   :  { %58 = vadd.xlane.f32.xlu2 %v57_v11  ;;  %v105_v36 = vmul.f32 %v607_v33, %v104_v35 }
  0x13   :  { %v106_v37 = vadd.f32 %v607_v33, %v105_v36 }
  0x15   :  { %v761_v38 = vsel %vm107_vm1, %v607_v33, %v106_v37 }
  0x17   :  { %70 = vadd.xlane.f32.xlu1 %v69_v16 }
  0x18   :  { %67 = vadd.xlane.f32.xlu0 %v66_v15 }
  0x19   :  { %85 = vadd.xlane.f32.xlu2 %v84_v17 }
  0x1f   :  { %97 = vadd.xlane.f32.xlu1 %v96_v22 }
  0x20   :  { %88 = vadd.xlane.f32.xlu0 %v87_v21 }
  0x21   :  { %100 = vadd.xlane.f32.xlu2 %v99_v23 }
  0x27   :  { %64 = vadd.xlane.f32.xlu1 %v63_v28 }
  0x28   :  { %61 = vadd.xlane.f32.xlu0 %v60_v27 }
  0x29   :  { %73 = vadd.xlane.f32.xlu2 %v72_v29 }
  0x30   :  { %76 = vadd.xlane.f32.xlu0 %v75_v31 }
  0x7a   :  { %v92_v39 = vpop.xlane.xlu1 %91 }
  0x7b   :  { %v80_v40 = vpop.xlane.xlu0 %79  ;;  %v121_v41 = vmul.f32 %v761_v38, %v92_v39 }
  0x7c   :  { %v117_v42 = vmul.f32 %v761_v38, %v80_v40  ;;  %v56_v43 = vpop.xlane.xlu2 %55 }
  0x7d   :  { %v765_v44 = vsub.f32 %v49_v0, %v121_v41  ;;  %v109_v56 = vmul.f32 %v761_v38, %v56_v43 }
  0x7e   :  { %v767_v45 = vsub.f32 %v45_v1, %v117_v42 }
  0x7f   :  { %v153_v47 = vmul.f32 %v765_v44, %v765_v44  ;;  %v795_v63 = vsub.f32 %v703_v2, %v109_v56 }
  0x80   :  { %v149_v46 = vmul.f32 %v767_v45, %v767_v45 }
  0x81   :  { %v193_v49 = vsel %vm53_vm0, %v153_v47, 0.0  ;;  %v141_v10 = vmul.f32 %v795_v63, %v795_v63 }
  0x82   :  { %v181_v48 = vsel %vm53_vm0, %v149_v46, 0.0  ;;  %v95_v50 = vpop.xlane.xlu1 %94  ;;  %194 = vadd.xlane.f32.xlu0 %v193_v49 }
  0x83   :  { %v83_v51 = vpop.xlane.xlu0 %82  ;;  %182 = vadd.xlane.f32.xlu1 %v181_v48  ;;  %v122_v52 = vmul.f32 %v761_v38, %v95_v50 }
  0x84   :  { %v118_v53 = vmul.f32 %v761_v38, %v83_v51  ;;  %v59_v54 = vpop.xlane.xlu2 %58 }
  0x85   :  { %v110_v55 = vmul.f32 %v761_v38, %v59_v54  ;;  %v780_v57 = vsub.f32 %v709_v6, %v122_v52 }
  0x86   :  { %v783_v58 = vsub.f32 %v711_v7, %v118_v53 }
  0x87   :  { %v786_v59 = vsub.f32 %v713_v8, %v110_v55  ;;  %v154_v60 = vmul.f32 %v780_v57, %v780_v57 }
  0x88   :  { %v150_v61 = vmul.f32 %v783_v58, %v783_v58 }
  0x89   :  { %v142_v62 = vmul.f32 %v786_v59, %v786_v59  ;;  %v196_v0 = vsel %vm53_vm0, %v154_v60, 0.0 }
  0x8a   :  { %v184_v1 = vsel %vm53_vm0, %v150_v61, 0.0  ;;  %v71_v5 = vpop.xlane.xlu1 %70 }
  0x8b   :  { %v68_v3 = vpop.xlane.xlu0 %67  ;;  %197 = vadd.xlane.f32.xlu1 %v196_v0  ;;  %185 = vadd.xlane.f32.xlu2 %v184_v1  ;;  %v160_v4 = vsel %vm53_vm0, %v142_v62, 0.0  ;;  %v114_v8 = vmul.f32 %v761_v38, %v71_v5 }
  0x8c   :  { %v113_v6 = vmul.f32 %v761_v38, %v68_v3  ;;  %161 = vadd.xlane.f32.xlu0 %v160_v4  ;;  %v86_v7 = vpop.xlane.xlu2 %85 }
  0x8d   :  { %v119_v9 = vmul.f32 %v761_v38, %v86_v7  ;;  %v812_v15 = vsub.f32 %v723_v13, %v114_v8 }
  0x8e   :  { %v804_v2 = vsub.f32 %v721_v12, %v113_v6  ;;  %v157_v12 = vsel %vm53_vm0, %v141_v10, 0.0 }
  0x8f   :  { %v809_v11 = vsub.f32 %v725_v14, %v119_v9  ;;  %v146_v29 = vmul.f32 %v812_v15, %v812_v15 }
  0x90   :  { %v145_v16 = vmul.f32 %v804_v2, %v804_v2 }
  0x91   :  { %v151_v17 = vmul.f32 %v809_v11, %v809_v11  ;;  %v172_v36 = vsel %vm53_vm0, %v146_v29, 0.0 }
  0x92   :  { %v169_v21 = vsel %vm53_vm0, %v145_v16, 0.0  ;;  %v98_v14 = vpop.xlane.xlu1 %97 }
  0x93   :  { %v89_v22 = vpop.xlane.xlu0 %88  ;;  %170 = vadd.xlane.f32.xlu1 %v169_v21  ;;  %158 = vadd.xlane.f32.xlu2 %v157_v12  ;;  %v187_v23 = vsel %vm53_vm0, %v151_v17, 0.0  ;;  %v123_v28 = vmul.f32 %v761_v38, %v98_v14  ;;  %v591_v17 = vld [vmem:[%s1276_s3] sm:$0xff] }
  0x94   :  { %v120_v27 = vmul.f32 %v761_v38, %v89_v22  ;;  %188 = vadd.xlane.f32.xlu0 %v187_v23  ;;  %v101_v13 = vpop.xlane.xlu2 %100 }
  0x95   :  { %v124_v31 = vmul.f32 %v761_v38, %v101_v13  ;;  %v833_v34 = vsub.f32 %v735_v19, %v123_v28 }
  0x96   :  { %v827_v32 = vsub.f32 %v733_v18, %v120_v27 }
  0x97   :  { %v830_v33 = vsub.f32 %v737_v20, %v124_v31  ;;  %v155_v43 = vmul.f32 %v833_v34, %v833_v34 }
  0x98   :  { %v152_v35 = vmul.f32 %v827_v32, %v827_v32 }
  0x99   :  { %v156_v37 = vmul.f32 %v830_v33, %v830_v33  ;;  %v199_v51 = vsel %vm53_vm0, %v155_v43, 0.0 }
  0x9a   :  { %v190_v39 = vsel %vm53_vm0, %v152_v35, 0.0  ;;  %v65_v20 = vpop.xlane.xlu1 %64 }
  0x9b   :  { %191 = vadd.xlane.f32.xlu1 %v190_v39  ;;  %v62_v40 = vpop.xlane.xlu0 %61  ;;  %173 = vadd.xlane.f32.xlu2 %v172_v36  ;;  %v202_v18 = vsel %vm53_vm0, %v156_v37, 0.0  ;;  %v112_v42 = vmul.f32 %v761_v38, %v65_v20 }
  0x9c   :  { %v111_v41 = vmul.f32 %v761_v38, %v62_v40  ;;  %203 = vadd.xlane.f32.xlu0 %v202_v18  ;;  %v74_v19 = vpop.xlane.xlu2 %73 }
  0x9d   :  { %v115_v46 = vmul.f32 %v761_v38, %v74_v19  ;;  %v854_v49 = vsub.f32 %v747_v25, %v112_v42 }
  0x9e   :  { %v848_v47 = vsub.f32 %v745_v24, %v111_v41 }
  0x9f   :  { %v851_v48 = vsub.f32 %v749_v26, %v115_v46  ;;  %v144_v25 = vmul.f32 %v854_v49, %v854_v49 }
  0xa0   :  { %v143_v50 = vmul.f32 %v848_v47, %v848_v47 }
  0xa1   :  { %v147_v52 = vmul.f32 %v851_v48, %v851_v48  ;;  %v166_v60 = vsel %vm53_vm0, %v144_v25, 0.0 }
  0xa2   :  { %v163_v53 = vsel %vm53_vm0, %v143_v50, 0.0 }
  0xa3   :  { %164 = vadd.xlane.f32.xlu1 %v163_v53  ;;  %v77_v54 = vpop.xlane.xlu0 %76  ;;  %200 = vadd.xlane.f32.xlu2 %v199_v51  ;;  %v175_v24 = vsel %vm53_vm0, %v147_v52, 0.0 }
  0xa4   :  { %v116_v26 = vmul.f32 %v761_v38, %v77_v54  ;;  %176 = vadd.xlane.f32.xlu0 %v175_v24 }
  0xa6   :  { %v867_v55 = vsub.f32 %v757_v30, %v116_v26  ;;  %v592_v30 = vld [vmem:[%s1276_s3 + $0x8] sm:$0xff] }
  0xa7   :  { %594 = vmatpush.bf16.msra.mxu2 %v592_v30  ;;  %595 = vmatpush.bf16.msra.mxu3 %v592_v30 }
  0xa8   :  { %v148_v56 = vmul.f32 %v867_v55, %v867_v55  ;;  %511 = vmatpush.bf16.msra.mxu0 %v592_v30  ;;  %593 = vmatpush.bf16.msra.mxu1 %v592_v30 }
  0xaa   :  { %v178_v61 = vsel %vm53_vm0, %v148_v56, 0.0 }
  0xab   :  { %179 = vadd.xlane.f32.xlu1 %v178_v61  ;;  %167 = vadd.xlane.f32.xlu2 %v166_v60 }
  0xac   :  { %597 = vmatpush.bf16.msra.mxu2 %v591_v17  ;;  %598 = vmatpush.bf16.msra.mxu3 %v591_v17 }
  0xad   :  { %512 = vmatpush.bf16.msra.mxu0 %v591_v17  ;;  %596 = vmatpush.bf16.msra.mxu1 %v591_v17 }
  0xf5   :  { %v195_v0 = vpop.xlane.xlu0 %194 }
  0xf6   :  { %v183_v62 = vpop.xlane.xlu1 %182  ;;  %v217_v3 = vmul.f32 %v195_v0, %v761_v38 }
  0xf7   :  { %v213_v1 = vmul.f32 %v183_v62, %v761_v38 }
  0xf8   :  { %v233_v5 = vadd.f32 1e-06, %v217_v3 }
  0xf9   :  { %v229_v4 = vadd.f32 1e-06, %v213_v1 }
  0xfa   :  { %vm363_vm6 = vweird.f32 %v233_v5 }
  0xfb   :  { %608 = vrsqrt.f32 %v229_v4  ;;  %vm323_vm4 = vweird.f32 %v229_v4 }
  0xfc   :  { %610 = vrsqrt.f32 %v233_v5 }
  0xfe   :  { %v198_v6 = vpop.xlane.xlu1 %197  ;;  %v186_v7 = vpop.xlane.xlu2 %185 }
  0xff   :  { %v218_v8 = vmul.f32 %v198_v6, %v761_v38  ;;  %v162_v9 = vpop.xlane.xlu0 %161  ;;  %v214_v10 = vmul.f32 %v186_v7, %v761_v38 }
 0x100   :  { %v206_v16 = vmul.f32 %v162_v9, %v761_v38 }
 0x101   :  { %v884_v21 = vpop.eup %608  ;;  %v886_v12 = vadd.f32 1e-06, %v218_v8  ;;  %v888_v22 = vadd.f32 1e-06, %v214_v10 }
 0x102   :  { %v890_v23 = vpop.eup %610  ;;  %v318_v14 = vmul.f32 %v884_v21, %v229_v4  ;;  %v893_v27 = vadd.f32 1e-06, %v206_v16  ;;  %vm324_vm2 = vweird.f32 %v884_v21 }
 0x103   :  { %v358_v13 = vmul.f32 %v890_v23, %v233_v5  ;;  %612 = vrsqrt.f32 %v886_v12  ;;  %vm364_vm3 = vweird.f32 %v890_v23  ;;  %vm927_vm5 = vmor %vm323_vm4, %vm324_vm2  ;;  %vm373_vm8 = vweird.f32 %v886_v12 }
 0x104   :  { %v319_v28 = vmul.f32 %v884_v21, %v318_v14  ;;  %614 = vrsqrt.f32 %v893_v27  ;;  %vm934_vm7 = vmor %vm363_vm6, %vm364_vm3  ;;  %vm253_vm9 = vweird.f32 %v893_v27  ;;  %vm333_vm11 = vweird.f32 %v888_v22 }
 0x105   :  { %v359_v29 = vmul.f32 %v890_v23, %v358_v13  ;;  %616 = vrsqrt.f32 %v888_v22 }
 0x106   :  { %v320_v31 = vmul.f32 0.5, %v319_v28  ;;  %v171_v35 = vpop.xlane.xlu1 %170  ;;  %v159_v36 = vpop.xlane.xlu2 %158 }
 0x107   :  { %v360_v37 = vmul.f32 0.5, %v359_v29  ;;  %v209_v39 = vmul.f32 %v171_v35, %v761_v38  ;;  %v189_v40 = vpop.xlane.xlu0 %188  ;;  %v205_v18 = vmul.f32 %v159_v36, %v761_v38 }
 0x108   :  { %v321_v20 = vsub.f32 1.5, %v320_v31  ;;  %v215_v41 = vmul.f32 %v189_v40, %v761_v38  ;;  %v963_v31 = vld [vmem:[%s1274_s1] ss:$0 sm:$0xff] }
 0x109   :  { %v904_v19 = vpop.eup %612  ;;  %v361_v42 = vsub.f32 1.5, %v360_v37  ;;  %v907_v43 = vadd.f32 1e-06, %v209_v39  ;;  %v916_v52 = vadd.f32 1e-06, %v205_v18 }
 0x10a   :  { %v909_v46 = vpop.eup %614  ;;  %v368_v50 = vmul.f32 %v904_v19, %v886_v12  ;;  %v914_v51 = vadd.f32 1e-06, %v215_v41  ;;  %v322_v54 = vmul.f32 %v884_v21, %v321_v20  ;;  %vm374_vm12 = vweird.f32 %v904_v19 }
 0x10b   :  { %v617_v53 = vpop.eup %616  ;;  %v362_v24 = vmul.f32 %v890_v23, %v361_v42  ;;  %v248_v26 = vmul.f32 %v909_v46, %v893_v27  ;;  %618 = vrsqrt.f32 %v907_v43  ;;  %vm254_vm14 = vweird.f32 %v909_v46  ;;  %vm997_vm2 = vmor %vm373_vm8, %vm374_vm12 }
 0x10c   :  { %v369_v25 = vmul.f32 %v904_v19, %v368_v50  ;;  %v328_v56 = vmul.f32 %v617_v53, %v888_v22  ;;  %620 = vrsqrt.f32 %v914_v51  ;;  %v326_v30 = vsel %vm927_vm5, %v884_v21, %v322_v54  ;;  %vm1019_vm5 = vmor %vm253_vm9, %vm254_vm14 }
 0x10d   :  { %v249_v61 = vmul.f32 %v909_v46, %v248_v26  ;;  %v366_v5 = vsel %vm934_vm7, %v890_v23, %v362_v24  ;;  %622 = vrsqrt.f32 %v916_v52  ;;  %vm334_vm10 = vweird.f32 %v617_v53 }
 0x10e   :  { %v370_v0 = vmul.f32 0.5, %v369_v25  ;;  %v329_v1 = vmul.f32 %v617_v53, %v328_v56  ;;  %v192_v3 = vpop.xlane.xlu1 %191  ;;  %v174_v4 = vpop.xlane.xlu2 %173  ;;  %v405_v13 = vmul.f32 %v326_v30, %v767_v45  ;;  %v409_v28 = vmul.f32 %v366_v5, %v765_v44  ;;  %vm335_vm13 = vmor %vm333_vm11, %vm334_vm10 }
 0x10f   :  { %v204_v6 = vpop.xlane.xlu0 %203  ;;  %v250_v7 = vmul.f32 0.5, %v249_v61  ;;  %v216_v9 = vmul.f32 %v192_v3, %v761_v38  ;;  %v210_v21 = vmul.f32 %v174_v4, %v761_v38  ;;  %vm283_vm15 = vweird.f32 %v907_v43 }
 0x110   :  { %v330_v8 = vmul.f32 0.5, %v329_v1  ;;  %v220_v10 = vmul.f32 %v204_v6, %v761_v38  ;;  %v371_v17 = vsub.f32 1.5, %v370_v0  ;;  %vm343_vm1 = vweird.f32 %v914_v51 }
 0x111   :  { %v948_v16 = vpop.eup %618  ;;  %v958_v29 = vadd.f32 1e-06, %v216_v9  ;;  %v251_v36 = vsub.f32 1.5, %v250_v7  ;;  %v977_v18 = vadd.f32 1e-06, %v210_v21  ;;  %v425_v25 = vmul.f32 %v963_v31, %v405_v13 }
 0x112   :  { %v331_v14 = vsub.f32 1.5, %v330_v8  ;;  %v278_v23 = vmul.f32 %v948_v16, %v907_v43  ;;  %v965_v35 = vpop.eup %620  ;;  %v968_v40 = vadd.f32 1e-06, %v220_v10  ;;  %v372_v44 = vmul.f32 %v904_v19, %v371_v17 }
 0x113   :  { %v970_v45 = vpop.eup %622  ;;  %v338_v22 = vmul.f32 %v965_v35, %v914_v51  ;;  %624 = vrsqrt.f32 %v958_v29  ;;  %v1002_v56 = vmul.f32 %v909_v46, %v251_v36  ;;  %vm243_vm3 = vweird.f32 %v916_v52 }
 0x114   :  { %v332_v37 = vmul.f32 %v617_v53, %v331_v14  ;;  %v279_v39 = vmul.f32 %v948_v16, %v278_v23  ;;  %v238_v42 = vmul.f32 %v970_v45, %v916_v52  ;;  %626 = vrsqrt.f32 %v968_v40 }
 0x115   :  { %v339_v54 = vmul.f32 %v965_v35, %v338_v22  ;;  %v429_v62 = vmul.f32 %v963_v31, %v409_v28  ;;  %v376_v12 = vsel %vm997_vm2, %v904_v19, %v372_v44  ;;  %628 = vrsqrt.f32 %v977_v18 }
 0x116   :  { %v336_v20 = vsel %vm335_vm13, %v617_v53, %v332_v37  ;;  %v280_v41 = vmul.f32 0.5, %v279_v39  ;;  %v165_v24 = vpop.xlane.xlu1 %164  ;;  %v991_v53 = vld [vmem:[%s1275_s2] ss:$0 sm:$0xff]  ;;  %v239_v60 = vmul.f32 %v970_v45, %v238_v42  ;;  %v201_v61 = vpop.xlane.xlu2 %200  ;;  %vm284_vm4 = vweird.f32 %v948_v16 }
 0x117   :  { %v406_v50 = vmul.f32 %v336_v20, %v783_v58  ;;  %v177_v26 = vpop.xlane.xlu0 %176  ;;  %v340_v1 = vmul.f32 0.5, %v339_v54  ;;  %v207_v4 = vmul.f32 %v165_v24, %v761_v38  ;;  %v219_v6 = vmul.f32 %v201_v61, %v761_v38  ;;  %vm1061_vm9 = vmor %vm283_vm15, %vm284_vm4 }
 0x118   :  { %v281_v0 = vsub.f32 1.5, %v280_v41  ;;  %v240_v3 = vmul.f32 0.5, %v239_v60  ;;  %v211_v30 = vmul.f32 %v177_v26, %v761_v38  ;;  %v445_v8 = vadd.f32 %v991_v53, %v425_v25 }
 0x119   :  { %v341_v19 = vsub.f32 1.5, %v340_v1  ;;  %v426_v7 = vmul.f32 %v963_v31, %v406_v50  ;;  %v410_v9 = vmul.f32 %v376_v12, %v780_v57  ;;  %v256_v10 = vsel %vm1019_vm5, %v909_v46, %v1002_v56  ;;  %v1033_v21 = vpop.eup %624 }
 0x11a   :  { %v241_v17 = vsub.f32 1.5, %v240_v3  ;;  %v1031_v27 = vadd.f32 1e-06, %v207_v4  ;;  %v1036_v14 = vmul.f32 %v948_v16, %v281_v0  ;;  %vm344_vm6 = vweird.f32 %v965_v35  ;;  %v1042_v57 = vpop.eup %626 }
 0x11b   :  { %vm244_vm7 = vweird.f32 %v970_v45  ;;  %v1040_v23 = vadd.f32 1e-06, %v211_v30  ;;  %v348_v28 = vmul.f32 %v1033_v21, %v958_v29  ;;  %v1048_v36 = vadd.f32 1e-06, %v219_v6  ;;  %v1050_v37 = vpop.eup %628  ;;  %vm1090_vm14 = vmor %vm343_vm1, %vm344_vm6 }
 0x11c   :  { %v242_v13 = vmul.f32 %v970_v45, %v241_v17  ;;  %630 = vrsqrt.f32 %v1031_v27  ;;  %v342_v39 = vmul.f32 %v965_v35, %v341_v19  ;;  %vm353_vm8 = vweird.f32 %v958_v29  ;;  %vm1079_vm12 = vmor %vm243_vm3, %vm244_vm7 }
 0x11d   :  { %v388_v44 = vmul.f32 %v1042_v57, %v968_v40  ;;  %v446_v22 = vadd.f32 %v991_v53, %v426_v7  ;;  %v349_v41 = vmul.f32 %v1033_v21, %v348_v28  ;;  %vm393_vm10 = vweird.f32 %v968_v40 }
 0x11e   :  { %v288_v42 = vmul.f32 %v1050_v37, %v977_v18  ;;  %vm293_vm11 = vweird.f32 %v977_v18  ;;  %v430_v50 = vmul.f32 %v963_v31, %v410_v9  ;;  %v286_v43 = vsel %vm1061_vm9, %v948_v16, %v1036_v14  ;;  %v180_v26 = vpop.xlane.xlu1 %179  ;;  %v168_v60 = vpop.xlane.xlu2 %167 }
 0x11f   :  { %vm354_vm13 = vweird.f32 %v1033_v21  ;;  %v389_v24 = vmul.f32 %v1042_v57, %v388_v44  ;;  %632 = vrsqrt.f32 %v1040_v23  ;;  %v246_v52 = vsel %vm1079_vm12, %v970_v45, %v242_v13 }
 0x120   :  { %v350_v25 = vmul.f32 0.5, %v349_v41  ;;  %v289_v58 = vmul.f32 %v1050_v37, %v288_v42  ;;  %634 = vrsqrt.f32 %v1048_v36  ;;  %v346_v61 = vsel %vm1090_vm14, %v965_v35, %v342_v39  ;;  %vm1120_vm1 = vmor %vm353_vm8, %vm354_vm13 }
 0x121   :  { %v390_v12 = vmul.f32 0.5, %v389_v24  ;;  %v457_v51 = vpack.c.bf16 %v446_v22, %v445_v8  ;;  %v449_v0 = vadd.f32 %v991_v53, %v429_v62  ;;  %v450_v45 = vadd.f32 %v991_v53, %v430_v50 }
 0x122   :  { %v1103_v1 = vpop.eup %630  ;;  %v351_v3 = vsub.f32 1.5, %v350_v25  ;;  %v290_v4 = vmul.f32 0.5, %v289_v58  ;;  %v212_v30 = vmul.f32 %v180_v26, %v761_v38  ;;  %v397_v19 = vmul.f32 %v246_v52, %v795_v63 }
 0x123   :  { %v391_v6 = vsub.f32 1.5, %v390_v12  ;;  %v258_v7 = vmul.f32 %v1103_v1, %v1031_v27  ;;  %587 = vmatmul.msk.bf16.vlgmr.msra.gmra.mxu2 %vm53_vm0, %v457_v51  ;;  %v208_v35 = vmul.f32 %v168_v60, %v761_v38  ;;  %vm294_vm15 = vweird.f32 %v1050_v37 }
 0x124   :  { %v352_v62 = vmul.f32 %v1033_v21, %v351_v3  ;;  %v291_v8 = vsub.f32 1.5, %v290_v4  ;;  %v459_v9 = vpack.c.bf16 %v450_v45, %v449_v0  ;;  %vm394_vm2 = vweird.f32 %v1042_v57  ;;  %vm295_vm3 = vmor %vm293_vm11, %vm294_vm15 }
 0x125   :  { %v1114_v17 = vpop.eup %632  ;;  %v392_v14 = vmul.f32 %v1042_v57, %v391_v6  ;;  %v259_v38 = vmul.f32 %v1103_v1, %v258_v7  ;;  %v1127_v13 = vadd.f32 1e-06, %v212_v30  ;;  %v1136_v22 = vadd.f32 1e-06, %v208_v35  ;;  %vm1159_vm4 = vmor %vm393_vm10, %vm394_vm2 }
 0x126   :  { %v635_v28 = vpop.eup %634  ;;  %v356_v39 = vsel %vm1120_vm1, %v1033_v21, %v352_v62  ;;  %v292_v44 = vmul.f32 %v1050_v37, %v291_v8  ;;  %v298_v29 = vmul.f32 %v1114_v17, %v1040_v23  ;;  %589 = vmatmul.msk.bf16.vlgmr.msra.gmra.mxu3 %vm53_vm0, %v459_v9  ;;  %v398_v20 = vmul.f32 %v256_v10, %v786_v59 }
 0x127   :  { %v401_v41 = vmul.f32 %v286_v43, %v804_v2  ;;  %v378_v21 = vmul.f32 %v635_v28, %v1048_v36  ;;  %v417_v42 = vmul.f32 %v963_v31, %v397_v19  ;;  %v407_v50 = vmul.f32 %v346_v61, %v809_v11 }
 0x128   :  { %v408_v54 = vmul.f32 %v356_v39, %v827_v32  ;;  %v296_v5 = vsel %vm295_vm3, %v1050_v37, %v292_v44  ;;  %v299_v46 = vmul.f32 %v1114_v17, %v298_v29  ;;  %v260_v18 = vmul.f32 0.5, %v259_v38 }
 0x129   :  { %v402_v2 = vmul.f32 %v296_v5, %v812_v15  ;;  %v379_v56 = vmul.f32 %v635_v28, %v378_v21  ;;  %636 = vrsqrt.f32 %v1127_v13  ;;  %v396_v11 = vsel %vm1159_vm4, %v1042_v57, %v392_v14 }
 0x12a   :  { %v300_v32 = vmul.f32 0.5, %v299_v46  ;;  %vm303_vm5 = vweird.f32 %v1040_v23  ;;  %638 = vrsqrt.f32 %v1136_v22  ;;  %vm384_vm6 = vweird.f32 %v635_v28 }
 0x12b   :  { %v380_v40 = vmul.f32 0.5, %v379_v56  ;;  %v418_v10 = vmul.f32 %v963_v31, %v398_v20  ;;  %v437_v37 = vadd.f32 %v991_v53, %v417_v42  ;;  %v421_v43 = vmul.f32 %v963_v31, %v401_v41 }
 0x12c   :  { %v301_v15 = vsub.f32 1.5, %v300_v32  ;;  %v422_v24 = vmul.f32 %v963_v31, %v402_v2  ;;  %v427_v26 = vmul.f32 %v963_v31, %v407_v50  ;;  %v261_v16 = vsub.f32 1.5, %v260_v18 }
 0x12d   :  { %v381_v57 = vsub.f32 1.5, %v380_v40  ;;  %v438_v52 = vadd.f32 %v991_v53, %v418_v10  ;;  %v428_v25 = vmul.f32 %v963_v31, %v408_v54  ;;  %v412_v58 = vmul.f32 %v396_v11, %v830_v33 }
 0x12e   :  { %vm383_vm7 = vweird.f32 %v1048_v36  ;;  %v441_v60 = vadd.f32 %v991_v53, %v421_v43  ;;  %v442_v61 = vadd.f32 %v991_v53, %v422_v24  ;;  %vm304_vm8 = vweird.f32 %v1114_v17 }
 0x12f   :  { %v637_v12 = vpop.eup %636  ;;  %v382_v51 = vmul.f32 %v635_v28, %v381_v57  ;;  %v453_v0 = vpack.c.bf16 %v438_v52, %v437_v37  ;;  %v448_v3 = vadd.f32 %v991_v53, %v428_v25  ;;  %v302_v45 = vmul.f32 %v1114_v17, %v301_v15  ;;  %vm385_vm9 = vmor %vm383_vm7, %vm384_vm6 }
 0x130   :  { %v639_v4 = vpop.eup %638  ;;  %v308_v33 = vmul.f32 %v637_v12, %v1127_v13  ;;  %v455_v30 = vpack.c.bf16 %v442_v61, %v441_v60  ;;  %v447_v36 = vadd.f32 %v991_v53, %v427_v26  ;;  %v262_v19 = vmul.f32 %v1103_v1, %v261_v16  ;;  %vm305_vm12 = vmor %vm303_vm5, %vm304_vm8 }
 0x131   :  { %vm264_vm10 = vweird.f32 %v1103_v1  ;;  %v386_v6 = vsel %vm385_vm9, %v635_v28, %v382_v51  ;;  %v268_v7 = vmul.f32 %v639_v4, %v1136_v22  ;;  %583 = vmatmul.msk.bf16.vlgmr.msra.gmra.mxu0 %vm53_vm0, %v453_v0  ;;  %v432_v9 = vmul.f32 %v963_v31, %v412_v58 }
 0x132   :  { %v411_v35 = vmul.f32 %v386_v6, %v833_v34  ;;  %v309_v62 = vmul.f32 %v637_v12, %v308_v33  ;;  %585 = vmatmul.msk.bf16.vlgmr.msra.gmra.mxu1 %vm53_vm0, %v455_v30  ;;  %v458_v8 = vpack.c.bf16 %v448_v3, %v447_v36  ;;  %vm263_vm11 = vweird.f32 %v1031_v27 }
 0x133   :  { %v269_v63 = vmul.f32 %v639_v4, %v268_v7  ;;  %vm265_vm13 = vmor %vm263_vm11, %vm264_vm10  ;;  %v306_v14 = vsel %vm305_vm12, %v1114_v17, %v302_v45  ;;  %vm314_vm14 = vweird.f32 %v637_v12  ;;  %v452_v29 = vadd.f32 %v991_v53, %v432_v9 }
 0x134   :  { %v310_v38 = vmul.f32 0.5, %v309_v62  ;;  %588 = vmatmul.msk.bf16.gmra.mxu2 %vm53_vm0, %v458_v8  ;;  %v431_v34 = vmul.f32 %v963_v31, %v411_v35  ;;  %v266_v28 = vsel %vm265_vm13, %v1103_v1, %v262_v19  ;;  %v403_v23 = vmul.f32 %v306_v14, %v851_v48 }
 0x135   :  { %v270_v39 = vmul.f32 0.5, %v269_v63  ;;  %vm274_vm15 = vweird.f32 %v639_v4  ;;  %v399_v17 = vmul.f32 %v266_v28, %v848_v47  ;;  %vm313_vm1 = vweird.f32 %v1127_v13 }
 0x136   :  { %v311_v44 = vsub.f32 1.5, %v310_v38  ;;  %v451_v27 = vadd.f32 %v991_v53, %v431_v34  ;;  %vm315_vm2 = vmor %vm313_vm1, %vm314_vm14  ;;  %vm273_vm3 = vweird.f32 %v1136_v22  ;;  %v423_v48 = vmul.f32 %v963_v31, %v403_v23 }
 0x137   :  { %v271_v20 = vsub.f32 1.5, %v270_v39  ;;  %vm275_vm4 = vmor %vm273_vm3, %vm274_vm15  ;;  %v419_v47 = vmul.f32 %v963_v31, %v399_v17 }
 0x138   :  { %v312_v41 = vmul.f32 %v637_v12, %v311_v44  ;;  %v460_v21 = vpack.c.bf16 %v452_v29, %v451_v27  ;;  %v443_v59 = vadd.f32 %v991_v53, %v423_v48 }
 0x139   :  { %v272_v42 = vmul.f32 %v639_v4, %v271_v20  ;;  %v439_v2 = vadd.f32 %v991_v53, %v419_v47 }
 0x13a   :  { %v316_v1 = vsel %vm315_vm2, %v637_v12, %v312_v41  ;;  %590 = vmatmul.msk.bf16.gmra.mxu3 %vm53_vm0, %v460_v21 }
 0x13b   :  { %v404_v50 = vmul.f32 %v316_v1, %v867_v55  ;;  %v276_v54 = vsel %vm275_vm4, %v639_v4, %v272_v42 }
 0x13c   :  { %v400_v5 = vmul.f32 %v276_v54, %v854_v49  ;;  %v605_v49 = vld [vmem:[%s1277_s4] ss:$0 sm:$0xff] }
 0x13d   :  { %v424_v13 = vmul.f32 %v963_v31, %v404_v50 }
 0x13e   :  { %v420_v46 = vmul.f32 %v963_v31, %v400_v5 }
 0x13f   :  { %v444_v22 = vadd.f32 %v991_v53, %v424_v13 }
 0x140   :  { %v440_v18 = vadd.f32 %v991_v53, %v420_v46 }
 0x141   :  { %v456_v55 = vpack.c.bf16 %v444_v22, %v443_v59 }
 0x142   :  { %v454_v56 = vpack.c.bf16 %v440_v18, %v439_v2 }
 0x143   :  { %586 = vmatmul.msk.bf16.gmra.mxu1 %vm53_vm0, %v456_v55 }
 0x144   :  { %584 = vmatmul.msk.bf16.gmra.mxu0 %vm53_vm0, %v454_v56 }
 0x1a6   :  { %v534_v11 = vpop.f32.mrf.mxu2 }
 0x1a7   :  { %v535_v31 = vadd.f32 %v605_v49, %v534_v11 }
 0x1a9   :  { %562 = vst [vmem:[%s1278_s5 + $0x40] sm:$0xff] %v535_v31  ;;  %v544_v32 = vpop.f32.mrf.mxu3 }
 0x1aa   :  { %v545_v40 = vadd.f32 %v605_v49, %v544_v32 }
 0x1ac   :  { %566 = vst [vmem:[%s1278_s5 + $0x60] sm:$0xff] %v545_v40 }
 0x1ae   :  { %v514_v53 = vpop.f32.mrf.mxu0  ;;  %v536_v10 = vpop.f32.mrf.mxu2 }
 0x1af   :  { %v515_v37 = vadd.f32 %v605_v49, %v514_v53  ;;  %v537_v15 = vadd.f32 %v605_v49, %v536_v10  ;;  %v524_v43 = vpop.f32.mrf.mxu1 }
 0x1b0   :  { %v525_v24 = vadd.f32 %v605_v49, %v524_v43 }
 0x1b1   :  { %554 = vst [vmem:[%s1278_s5] sm:$0xff] %v515_v37  ;;  %v546_v26 = vpop.f32.mrf.mxu3 }
 0x1b2   :  { %563 = vst [vmem:[%s1278_s5 + $0x48] sm:$0xff] %v537_v15  ;;  %v547_v16 = vadd.f32 %v605_v49, %v546_v26 }
 0x1b3   :  { %558 = vst [vmem:[%s1278_s5 + $0x20] sm:$0xff] %v525_v24 }
 0x1b4   :  { %567 = vst [vmem:[%s1278_s5 + $0x68] sm:$0xff] %v547_v16 }
 0x1b6   :  { %v516_v57 = vpop.f32.mrf.mxu0 }
 0x1b7   :  { %v517_v52 = vadd.f32 %v605_v49, %v516_v57  ;;  %v539_v25 = vpop.f32.mrf.mxu2  ;;  %v526_v58 = vpop.f32.mrf.mxu1 }
 0x1b8   :  { %v540_v60 = vadd.f32 %v605_v49, %v539_v25  ;;  %v527_v61 = vadd.f32 %v605_v49, %v526_v58 }
 0x1b9   :  { %555 = vst [vmem:[%s1278_s5 + $0x8] sm:$0xff] %v517_v52 }
 0x1ba   :  { %564 = vst [vmem:[%s1278_s5 + $0x50] sm:$0xff] %v540_v60 }
 0x1bb   :  { %559 = vst [vmem:[%s1278_s5 + $0x28] sm:$0xff] %v527_v61 }
 0x1bd   :  { %v549_v12 = vpop.f32.mrf.mxu3 }
 0x1be   :  { %v550_v51 = vadd.f32 %v605_v49, %v549_v12 }
 0x1bf   :  { %v541_v0 = vpop.f32.mrf.mxu2 }
 0x1c0   :  { %v542_v3 = vadd.f32 %v605_v49, %v541_v0  ;;  %568 = vst [vmem:[%s1278_s5 + $0x70] sm:$0xff] %v550_v51  ;;  %v529_v4 = vpop.f32.mrf.mxu1 }
 0x1c1   :  { %v519_v45 = vpop.f32.mrf.mxu0  ;;  %v530_v33 = vadd.f32 %v605_v49, %v529_v4 }
 0x1c2   :  { %565 = vst [vmem:[%s1278_s5 + $0x58] sm:$0xff] %v542_v3  ;;  %v520_v30 = vadd.f32 %v605_v49, %v519_v45 }
 0x1c3   :  { %560 = vst [vmem:[%s1278_s5 + $0x30] sm:$0xff] %v530_v33 }
 0x1c4   :  { %556 = vst [vmem:[%s1278_s5 + $0x10] sm:$0xff] %v520_v30 }
 0x1c5   :  { %v551_v36 = vpop.f32.mrf.mxu3 }
 0x1c6   :  { %v552_v19 = vadd.f32 %v605_v49, %v551_v36 }
 0x1c8   :  { %569 = vst [vmem:[%s1278_s5 + $0x78] sm:$0xff] %v552_v19  ;;  %v531_v6 = vpop.f32.mrf.mxu1 }
 0x1c9   :  { %v521_v7 = vpop.f32.mrf.mxu0  ;;  %v532_v35 = vadd.f32 %v605_v49, %v531_v6 }
 0x1ca   :  { %v522_v62 = vadd.f32 %v605_v49, %v521_v7 }
 0x1cb   :  { %561 = vst [vmem:[%s1278_s5 + $0x38] sm:$0xff] %v532_v35 }
 0x1cc   :  { %557 = vst [vmem:[%s1278_s5 + $0x18] sm:$0xff] %v522_v62 }
 0x1cd   :  { %574 = vsyncpa [#allocation3], 1 }

// kernel: vss_block_forward.8
= control target key start
LH: loop header
LB: loop body
LE: loop exit
PB: predicated region body
PF: predicated region fallthrough
CT: control target
= control target key end

     0   :  { %s1002_s12 = smov 0   ;;  %s1565_s0 = inlined_call_operand.vmem [shape: f32[2,10,10,64], index: 0, kind: input, shape index: {}]   ;;  %s1566_s1 = inlined_call_operand.vmem [shape: f32[9,64], index: 1, kind: input, shape index: {}]   ;;  %s1567_s2 = inlined_call_operand.vmem [shape: f32[1,64], index: 2, kind: input, shape index: {}]   ;;  %s1568_s3 = inlined_call_operand.vmem [shape: f32[2,8,8,64], index: 3, kind: output, shape index: {}]  }
   0x1 LB: > { %s920_s13 = sadd.s32 4294967295, %s980_s12   ;;  %p924_p0 = scmp.ge.s32.totalorder %s980_s12, 1  ;;  %s980_s12 = sphi %s1002_s12, %s13_s12  }
   0x2   : > { %p137_p1 = scmp.lt.s32.totalorder %s980_s12, 3 }
   0x4   : > { %p138_p2 = pnand %p924_p0, %p137_p1 }
   0x5   : > { %p161_p3 = scmp.lt.s32.totalorder (!%p138_p2), %s920_s13, 1 }
   0x6   : > { %141 = sbr.rel (%p138_p2) target bundleno = 152 (0x98), region = 32 }
   0xb   : > { %v1013_v0 = vld [vmem:[%s1566_s1] sm:$0xff]  ;;  %s1596_s13 = smov (!%p161_p3, %s920_s13), 1  ;;  %vm243_vm0 = vcmask 1046528   ;;  %vm317_vm1 = vcmask 1045504  }
   0xc   : > { %s931_s16 = smul.u32 160, %s1596_s13  ;;  %v193_v1 = vperm.slane %v1013_v0, 0  ;;  %v210_v2 = vperm.slane %v1013_v0, 1  ;;  %v1026_v3 = vperm.slane %v1013_v0, 2  ;;  %v1038_v7 = vperm.slane %v1013_v0, 3  ;;  %s930_s24 = sshll.u32 %s1596_s13, 6 }
   0xd   : > { %v1041_v8 = vperm.slane %v1013_v0, 4  ;;  %s1517_s27 = scalar_lea.vmem %s1568_s3, %s930_s24 }
   0xe   : > { %s1023_s19 = scalar_lea.vmem %s1565_s0, %s931_s16 }
   0xf   : > { %v1029_v4 = vld [vmem:[%s1023_s19] sm:$0xff]  ;;  %v1032_v5 = vld [vmem:[%s1023_s19 + $0x8] sm:$0x3]  ;;  %v1035_v6 = vld [vmem:[%s1023_s19 + $0x10] sm:$0xff] }
  0x10   : > { %v1044_v9 = vld [vmem:[%s1023_s19 + $0x18] sm:$0x3]  ;;  %v1047_v10 = vld [vmem:[%s1023_s19 + $0x20] sm:$0xff]  ;;  %v1050_v11 = vld [vmem:[%s1023_s19 + $0x28] sm:$0x3]  ;;  %v194_v12 = vmul.f32 %v193_v1, %v1029_v4  ;;  %v195_v13 = vmul.f32 %v193_v1, %v1035_v6  ;;  %v211_v14 = vmul.f32 %v210_v2, %v1029_v4  ;;  %v212_v15 = vmul.f32 %v210_v2, %v1032_v5 }
  0x11   : > { %v1057_v16 = vld [vmem:[%s1023_s19 + $0x30] sm:$0xff]  ;;  %v1060_v17 = vld [vmem:[%s1023_s19 + $0x38] sm:$0x3]  ;;  %v1063_v18 = vld [vmem:[%s1023_s19 + $0x40] sm:$0xff]  ;;  %v196_v19 = vmul.f32 %v193_v1, %v1047_v10  ;;  %v213_v20 = vmul.f32 %v210_v2, %v1035_v6  ;;  %v214_v21 = vmul.f32 %v210_v2, %v1044_v9  ;;  %v215_v22 = vmul.f32 %v210_v2, %v1047_v10 }
  0x12   : > { %v1070_v23 = vld [vmem:[%s1023_s19 + $0x48] sm:$0x3]  ;;  %v1073_v24 = vld [vmem:[%s1023_s19 + $0x50] sm:$0xff]  ;;  %v1076_v25 = vld [vmem:[%s1023_s19 + $0x58] sm:$0x3]  ;;  %v197_v26 = vmul.f32 %v193_v1, %v1057_v16  ;;  %v198_v27 = vmul.f32 %v193_v1, %v1063_v18  ;;  %v216_v28 = vmul.f32 %v210_v2, %v1050_v11  ;;  %v217_v29 = vmul.f32 %v210_v2, %v1057_v16 }
  0x13   : > { %v1083_v30 = vld [vmem:[%s1023_s19 + $0x60] sm:$0xff]  ;;  %v1086_v31 = vld [vmem:[%s1023_s19 + $0x68] sm:$0x3]  ;;  %v1089_v32 = vld [vmem:[%s1023_s19 + $0x70] sm:$0xff]  ;;  %v199_v33 = vmul.f32 %v193_v1, %v1073_v24  ;;  %v218_v34 = vmul.f32 %v210_v2, %v1060_v17  ;;  %v219_v35 = vmul.f32 %v210_v2, %v1063_v18  ;;  %v220_v36 = vmul.f32 %v210_v2, %v1070_v23 }
  0x14   : > { %v1096_v37 = vld [vmem:[%s1023_s19 + $0x78] sm:$0x3]  ;;  %v200_v38 = vmul.f32 %v193_v1, %v1083_v30  ;;  %v201_v39 = vmul.f32 %v193_v1, %v1089_v32  ;;  %v221_v40 = vmul.f32 %v210_v2, %v1073_v24  ;;  %v222_v41 = vmul.f32 %v210_v2, %v1076_v25 }
  0x15   : > { %v223_v42 = vmul.f32 %v210_v2, %v1083_v30  ;;  %v224_v43 = vmul.f32 %v210_v2, %v1086_v31  ;;  %v225_v44 = vmul.f32 %v210_v2, %v1089_v32  ;;  %v226_v45 = vmul.f32 %v210_v2, %v1096_v37 }
  0x16   : > { %v244_v46 = vrot.slane %v211_v14, 1  ;;  %v245_v47 = vrot.slane %v212_v15, 1  ;;  %v247_v48 = vrot.slane %v213_v20, 1  ;;  %v248_v49 = vrot.slane %v214_v21, 1 }
  0x17   : > { %v250_v50 = vrot.slane %v215_v22, 1  ;;  %v251_v51 = vrot.slane %v216_v28, 1  ;;  %v253_v52 = vrot.slane %v217_v29, 1  ;;  %v254_v53 = vrot.slane %v218_v34, 1 }
  0x18   : > { %v246_v54 = vsel %vm243_vm0, %v244_v46, %v245_v47  ;;  %v249_v55 = vsel %vm243_vm0, %v247_v48, %v248_v49  ;;  %v256_v56 = vrot.slane %v219_v35, 1  ;;  %v257_v57 = vrot.slane %v220_v36, 1 }
  0x19   : > { %v252_v58 = vsel %vm243_vm0, %v250_v50, %v251_v51  ;;  %v255_v59 = vsel %vm243_vm0, %v253_v52, %v254_v53  ;;  %v259_v60 = vrot.slane %v221_v40, 1  ;;  %v260_v61 = vrot.slane %v222_v41, 1 }
  0x1a   : > { %v258_v62 = vsel %vm243_vm0, %v256_v56, %v257_v57  ;;  %v262_v63 = vrot.slane %v223_v42, 1  ;;  %v263_v1 = vrot.slane %v224_v43, 1  ;;  %v265_v2 = vrot.slane %v225_v44, 1 }
  0x1b   : > { %v261_v14 = vsel %vm243_vm0, %v259_v60, %v260_v61  ;;  %v266_v15 = vrot.slane %v226_v45, 1  ;;  %v276_v20 = vadd.f32 %v246_v54, %v194_v12  ;;  %v277_v21 = vadd.f32 %v249_v55, %v195_v13 }
  0x1c   : > { %v264_v22 = vsel %vm243_vm0, %v262_v63, %v263_v1  ;;  %v278_v28 = vadd.f32 %v252_v58, %v196_v19  ;;  %v279_v29 = vadd.f32 %v255_v59, %v197_v26  ;;  %v280_v34 = vadd.f32 %v258_v62, %v198_v27 }
  0x1d   : > { %v267_v35 = vsel %vm243_vm0, %v265_v2, %v266_v15  ;;  %v281_v36 = vadd.f32 %v261_v14, %v199_v33  ;;  %v282_v40 = vadd.f32 %v264_v22, %v200_v38  ;;  %v285_v41 = vmul.f32 %v1026_v3, %v1029_v4 }
  0x1e   : > { %v283_v42 = vadd.f32 %v267_v35, %v201_v39  ;;  %v286_v43 = vmul.f32 %v1026_v3, %v1032_v5  ;;  %v287_v12 = vmul.f32 %v1026_v3, %v1035_v6  ;;  %v288_v13 = vmul.f32 %v1026_v3, %v1044_v9 }
  0x1f   : > { %v289_v19 = vmul.f32 %v1026_v3, %v1047_v10  ;;  %v290_v26 = vmul.f32 %v1026_v3, %v1050_v11  ;;  %v291_v27 = vmul.f32 %v1026_v3, %v1057_v16  ;;  %v292_v4 = vmul.f32 %v1026_v3, %v1060_v17 }
  0x20   : > { %v293_v5 = vmul.f32 %v1026_v3, %v1063_v18  ;;  %v294_v33 = vmul.f32 %v1026_v3, %v1070_v23  ;;  %v295_v38 = vmul.f32 %v1026_v3, %v1073_v24  ;;  %v296_v39 = vmul.f32 %v1026_v3, %v1076_v25 }
  0x21   : > { %v297_v44 = vmul.f32 %v1026_v3, %v1083_v30  ;;  %v298_v45 = vmul.f32 %v1026_v3, %v1086_v31  ;;  %v299_v46 = vmul.f32 %v1026_v3, %v1089_v32  ;;  %v300_v47 = vmul.f32 %v1026_v3, %v1096_v37 }
  0x22   : > { %v318_v48 = vrot.slane %v285_v41, 2  ;;  %v319_v49 = vrot.slane %v286_v43, 2  ;;  %v321_v50 = vrot.slane %v287_v12, 2  ;;  %v322_v51 = vrot.slane %v288_v13, 2  ;;  %v1153_v43 = vld [vmem:[%s1023_s19 + $0x80] sm:$0xff] }
  0x23   : > { %v324_v52 = vrot.slane %v289_v19, 2  ;;  %v325_v53 = vrot.slane %v290_v26, 2  ;;  %v327_v54 = vrot.slane %v291_v27, 2  ;;  %v328_v55 = vrot.slane %v292_v4, 2 }
  0x24   : > { %v320_v56 = vsel %vm317_vm1, %v318_v48, %v319_v49  ;;  %v323_v57 = vsel %vm317_vm1, %v321_v50, %v322_v51  ;;  %v330_v58 = vrot.slane %v293_v5, 2  ;;  %v331_v59 = vrot.slane %v294_v33, 2  ;;  %v1174_v50 = vld [vmem:[%s1023_s19 + $0x88] sm:$0x3] }
  0x25   : > { %v326_v60 = vsel %vm317_vm1, %v324_v52, %v325_v53  ;;  %v329_v61 = vsel %vm317_vm1, %v327_v54, %v328_v55  ;;  %v333_v3 = vrot.slane %v295_v38, 2  ;;  %v334_v62 = vrot.slane %v296_v39, 2 }
  0x26   : > { %v332_v63 = vsel %vm317_vm1, %v330_v58, %v331_v59  ;;  %v336_v1 = vrot.slane %v297_v44, 2  ;;  %v337_v2 = vrot.slane %v298_v45, 2  ;;  %v339_v14 = vrot.slane %v299_v46, 2 }
  0x27   : > { %v335_v15 = vsel %vm317_vm1, %v333_v3, %v334_v62  ;;  %v340_v22 = vrot.slane %v300_v47, 2  ;;  %v350_v35 = vadd.f32 %v320_v56, %v276_v20  ;;  %v351_v41 = vadd.f32 %v323_v57, %v277_v21 }
  0x28   : > { %v338_v12 = vsel %vm317_vm1, %v336_v1, %v337_v2  ;;  %v352_v13 = vadd.f32 %v326_v60, %v278_v28  ;;  %v353_v19 = vadd.f32 %v329_v61, %v279_v29  ;;  %v354_v26 = vadd.f32 %v332_v63, %v280_v34 }
  0x29   : > { %v341_v27 = vsel %vm317_vm1, %v339_v14, %v340_v22  ;;  %v355_v4 = vadd.f32 %v335_v15, %v281_v36  ;;  %v356_v5 = vadd.f32 %v338_v12, %v282_v40  ;;  %v359_v33 = vmul.f32 %v1038_v7, %v1035_v6 }
  0x2a   : > { %v357_v38 = vadd.f32 %v341_v27, %v283_v42  ;;  %v360_v20 = vmul.f32 %v1038_v7, %v1047_v10  ;;  %v361_v21 = vmul.f32 %v1038_v7, %v1057_v16  ;;  %v362_v28 = vmul.f32 %v1038_v7, %v1063_v18 }
  0x2b   : > { %v363_v29 = vmul.f32 %v1038_v7, %v1073_v24  ;;  %v364_v34 = vmul.f32 %v1038_v7, %v1083_v30  ;;  %v365_v36 = vmul.f32 %v1038_v7, %v1089_v32  ;;  %v366_v40 = vmul.f32 %v1038_v7, %v1153_v43 }
  0x2c   : > { %v367_v42 = vadd.f32 %v359_v33, %v350_v35  ;;  %v368_v39 = vadd.f32 %v360_v20, %v351_v41  ;;  %v369_v44 = vadd.f32 %v361_v21, %v352_v13  ;;  %v370_v45 = vadd.f32 %v362_v28, %v353_v19 }
  0x2d   : > { %v371_v46 = vadd.f32 %v363_v29, %v354_v26  ;;  %v372_v47 = vadd.f32 %v364_v34, %v355_v4  ;;  %v373_v48 = vadd.f32 %v365_v36, %v356_v5  ;;  %v374_v49 = vadd.f32 %v366_v40, %v357_v38  ;;  %v1216_v34 = vld [vmem:[%s1566_s1 + $0x8] ss:$0 sm:$0xff] }
  0x2e   : > { %v376_v51 = vmul.f32 %v1041_v8, %v1035_v6  ;;  %v377_v52 = vmul.f32 %v1041_v8, %v1044_v9  ;;  %v378_v53 = vmul.f32 %v1041_v8, %v1047_v10  ;;  %v379_v7 = vmul.f32 %v1041_v8, %v1050_v11 }
  0x2f   : > { %v380_v54 = vmul.f32 %v1041_v8, %v1057_v16  ;;  %v381_v55 = vmul.f32 %v1041_v8, %v1060_v17  ;;  %v382_v56 = vmul.f32 %v1041_v8, %v1063_v18  ;;  %v383_v57 = vmul.f32 %v1041_v8, %v1070_v23 }
  0x30   : > { %v384_v58 = vmul.f32 %v1041_v8, %v1073_v24  ;;  %v385_v59 = vmul.f32 %v1041_v8, %v1076_v25  ;;  %v386_v60 = vmul.f32 %v1041_v8, %v1083_v30  ;;  %v387_v61 = vmul.f32 %v1041_v8, %v1086_v31 }
  0x31   : > { %v388_v3 = vmul.f32 %v1041_v8, %v1089_v32  ;;  %v389_v62 = vmul.f32 %v1041_v8, %v1096_v37  ;;  %v390_v63 = vmul.f32 %v1041_v8, %v1153_v43  ;;  %v391_v1 = vmul.f32 %v1041_v8, %v1174_v50 }
  0x32   : > { %v408_v2 = vrot.slane %v376_v51, 1  ;;  %v409_v14 = vrot.slane %v377_v52, 1  ;;  %v411_v15 = vrot.slane %v378_v53, 1  ;;  %v412_v22 = vrot.slane %v379_v7, 1 }
  0x33   : > { %v414_v35 = vrot.slane %v380_v54, 1  ;;  %v415_v41 = vrot.slane %v381_v55, 1  ;;  %v417_v12 = vrot.slane %v382_v56, 1  ;;  %v418_v13 = vrot.slane %v383_v57, 1 }
  0x34   : > { %v410_v19 = vsel %vm243_vm0, %v408_v2, %v409_v14  ;;  %v413_v26 = vsel %vm243_vm0, %v411_v15, %v412_v22  ;;  %v420_v27 = vrot.slane %v384_v58, 1  ;;  %v421_v4 = vrot.slane %v385_v59, 1 }
  0x35   : > { %v416_v5 = vsel %vm243_vm0, %v414_v35, %v415_v41  ;;  %v419_v33 = vsel %vm243_vm0, %v417_v12, %v418_v13  ;;  %v423_v38 = vrot.slane %v386_v60, 1  ;;  %v424_v8 = vrot.slane %v387_v61, 1 }
  0x36   : > { %v422_v20 = vsel %vm243_vm0, %v420_v27, %v421_v4  ;;  %v426_v21 = vrot.slane %v388_v3, 1  ;;  %v427_v28 = vrot.slane %v389_v62, 1  ;;  %v429_v29 = vrot.slane %v390_v63, 1 }
  0x37   : > { %v425_v36 = vsel %vm243_vm0, %v423_v38, %v424_v8  ;;  %v430_v40 = vrot.slane %v391_v1, 1  ;;  %v440_v51 = vadd.f32 %v410_v19, %v367_v42  ;;  %v441_v52 = vadd.f32 %v413_v26, %v368_v39 }
  0x38   : > { %v428_v53 = vsel %vm243_vm0, %v426_v21, %v427_v28  ;;  %v442_v7 = vadd.f32 %v416_v5, %v369_v44  ;;  %v443_v54 = vadd.f32 %v419_v33, %v370_v45  ;;  %v444_v55 = vadd.f32 %v422_v20, %v371_v46 }
  0x39   : > { %v431_v56 = vsel %vm243_vm0, %v429_v29, %v430_v40  ;;  %v445_v57 = vadd.f32 %v425_v36, %v372_v47  ;;  %v446_v58 = vadd.f32 %v428_v53, %v373_v48  ;;  %v448_v59 = vperm.slane %v1013_v0, 5 }
  0x3a   : > { %v447_v60 = vadd.f32 %v431_v56, %v374_v49  ;;  %v521_v61 = vperm.slane %v1013_v0, 6  ;;  %v1224_v3 = vperm.slane %v1013_v0, 7  ;;  %v1228_v42 = vmul.f32 %v1216_v34, %v1047_v10 }
  0x3b   : > { %v449_v39 = vmul.f32 %v448_v59, %v1035_v6  ;;  %v450_v44 = vmul.f32 %v448_v59, %v1044_v9  ;;  %v451_v45 = vmul.f32 %v448_v59, %v1047_v10  ;;  %v452_v46 = vmul.f32 %v448_v59, %v1050_v11 }
  0x3c   : > { %v453_v47 = vmul.f32 %v448_v59, %v1057_v16  ;;  %v454_v48 = vmul.f32 %v448_v59, %v1060_v17  ;;  %v455_v49 = vmul.f32 %v448_v59, %v1063_v18  ;;  %v456_v0 = vmul.f32 %v448_v59, %v1070_v23 }
  0x3d   : > { %v457_v62 = vmul.f32 %v448_v59, %v1073_v24  ;;  %v458_v63 = vmul.f32 %v448_v59, %v1076_v25  ;;  %v459_v6 = vmul.f32 %v448_v59, %v1083_v30  ;;  %v460_v9 = vmul.f32 %v448_v59, %v1086_v31 }
  0x3e   : > { %v461_v1 = vmul.f32 %v448_v59, %v1089_v32  ;;  %v462_v2 = vmul.f32 %v448_v59, %v1096_v37  ;;  %v463_v14 = vmul.f32 %v448_v59, %v1153_v43  ;;  %v464_v15 = vmul.f32 %v448_v59, %v1174_v50 }
  0x3f   : > { %v481_v22 = vrot.slane %v449_v39, 2  ;;  %v482_v35 = vrot.slane %v450_v44, 2  ;;  %v484_v41 = vrot.slane %v451_v45, 2  ;;  %v485_v12 = vrot.slane %v452_v46, 2  ;;  %v1253_v45 = vld [vmem:[%s1023_s19 + $0x90] sm:$0xff] }
  0x40   : > { %v487_v13 = vrot.slane %v453_v47, 2  ;;  %v488_v19 = vrot.slane %v454_v48, 2  ;;  %v490_v26 = vrot.slane %v455_v49, 2  ;;  %v491_v27 = vrot.slane %v456_v0, 2 }
  0x41   : > { %v483_v4 = vsel %vm317_vm1, %v481_v22, %v482_v35  ;;  %v486_v5 = vsel %vm317_vm1, %v484_v41, %v485_v12  ;;  %v493_v33 = vrot.slane %v457_v62, 2  ;;  %v494_v38 = vrot.slane %v458_v63, 2  ;;  %v1266_v12 = vld [vmem:[%s1023_s19 + $0x98] sm:$0x3] }
  0x42   : > { %v489_v8 = vsel %vm317_vm1, %v487_v13, %v488_v19  ;;  %v492_v20 = vsel %vm317_vm1, %v490_v26, %v491_v27  ;;  %v496_v21 = vrot.slane %v459_v6, 2  ;;  %v497_v28 = vrot.slane %v460_v9, 2 }
  0x43   : > { %v495_v29 = vsel %vm317_vm1, %v493_v33, %v494_v38  ;;  %v499_v36 = vrot.slane %v461_v1, 2  ;;  %v500_v40 = vrot.slane %v462_v2, 2  ;;  %v502_v53 = vrot.slane %v463_v14, 2 }
  0x44   : > { %v498_v56 = vsel %vm317_vm1, %v496_v21, %v497_v28  ;;  %v503_v59 = vrot.slane %v464_v15, 2  ;;  %v513_v39 = vadd.f32 %v483_v4, %v440_v51  ;;  %v514_v44 = vadd.f32 %v486_v5, %v441_v52 }
  0x45   : > { %v501_v46 = vsel %vm317_vm1, %v499_v36, %v500_v40  ;;  %v515_v47 = vadd.f32 %v489_v8, %v442_v7  ;;  %v516_v48 = vadd.f32 %v492_v20, %v443_v54  ;;  %v517_v49 = vadd.f32 %v495_v29, %v444_v55 }
  0x46   : > { %v504_v0 = vsel %vm317_vm1, %v502_v53, %v503_v59  ;;  %v518_v62 = vadd.f32 %v498_v56, %v445_v57  ;;  %v519_v63 = vadd.f32 %v501_v46, %v446_v58  ;;  %v522_v6 = vmul.f32 %v521_v61, %v1047_v10 }
  0x47   : > { %v520_v9 = vadd.f32 %v504_v0, %v447_v60  ;;  %v523_v1 = vmul.f32 %v521_v61, %v1057_v16  ;;  %v524_v51 = vmul.f32 %v521_v61, %v1063_v18  ;;  %v525_v52 = vmul.f32 %v521_v61, %v1073_v24 }
  0x48   : > { %v526_v2 = vmul.f32 %v521_v61, %v1083_v30  ;;  %v527_v7 = vmul.f32 %v521_v61, %v1089_v32  ;;  %v528_v54 = vmul.f32 %v521_v61, %v1153_v43  ;;  %v529_v55 = vmul.f32 %v521_v61, %v1253_v45 }
  0x49   : > { %v530_v57 = vadd.f32 %v522_v6, %v513_v39  ;;  %v531_v58 = vadd.f32 %v523_v1, %v514_v44  ;;  %v532_v14 = vadd.f32 %v524_v51, %v515_v47  ;;  %v533_v15 = vadd.f32 %v525_v52, %v516_v48 }
  0x4a   : > { %v534_v60 = vadd.f32 %v526_v2, %v517_v49  ;;  %v535_v22 = vadd.f32 %v527_v7, %v518_v62  ;;  %v536_v35 = vadd.f32 %v528_v54, %v519_v63  ;;  %v537_v41 = vadd.f32 %v529_v55, %v520_v9 }
  0x4b   : > { %v539_v13 = vmul.f32 %v1224_v3, %v1047_v10  ;;  %v540_v19 = vmul.f32 %v1224_v3, %v1050_v11  ;;  %v541_v26 = vmul.f32 %v1224_v3, %v1057_v16  ;;  %v542_v61 = vmul.f32 %v1224_v3, %v1060_v17 }
  0x4c   : > { %v543_v27 = vmul.f32 %v1224_v3, %v1063_v18  ;;  %v544_v4 = vmul.f32 %v1224_v3, %v1070_v23  ;;  %v545_v5 = vmul.f32 %v1224_v3, %v1073_v24  ;;  %v546_v10 = vmul.f32 %v1224_v3, %v1076_v25 }
  0x4d   : > { %v547_v33 = vmul.f32 %v1224_v3, %v1083_v30  ;;  %v548_v38 = vmul.f32 %v1224_v3, %v1086_v31  ;;  %v549_v8 = vmul.f32 %v1224_v3, %v1089_v32  ;;  %v550_v20 = vmul.f32 %v1224_v3, %v1096_v37 }
  0x4e   : > { %v551_v21 = vmul.f32 %v1224_v3, %v1153_v43  ;;  %v552_v28 = vmul.f32 %v1224_v3, %v1174_v50  ;;  %v553_v29 = vmul.f32 %v1224_v3, %v1253_v45  ;;  %v554_v36 = vmul.f32 %v1224_v3, %v1266_v12 }
  0x4f   : > { %v571_v40 = vrot.slane %v539_v13, 1  ;;  %v572_v53 = vrot.slane %v540_v19, 1  ;;  %v574_v56 = vrot.slane %v541_v26, 1  ;;  %v575_v59 = vrot.slane %v542_v61, 1 }
  0x50   : > { %v577_v39 = vrot.slane %v543_v27, 1  ;;  %v578_v44 = vrot.slane %v544_v4, 1  ;;  %v580_v46 = vrot.slane %v545_v5, 1  ;;  %v581_v47 = vrot.slane %v546_v10, 1 }
  0x51   : > { %v573_v48 = vsel %vm243_vm0, %v571_v40, %v572_v53  ;;  %v576_v49 = vsel %vm243_vm0, %v574_v56, %v575_v59  ;;  %v583_v0 = vrot.slane %v547_v33, 1  ;;  %v584_v62 = vrot.slane %v548_v38, 1  ;;  %v941_v40 = vld [vmem:[%s1567_s2] ss:$0 sm:$0xff] }
  0x52   : > { %v579_v63 = vsel %vm243_vm0, %v577_v39, %v578_v44  ;;  %v582_v6 = vsel %vm243_vm0, %v580_v46, %v581_v47  ;;  %v586_v9 = vrot.slane %v549_v8, 1  ;;  %v587_v3 = vrot.slane %v550_v20, 1 }
  0x53   : > { %v585_v1 = vsel %vm243_vm0, %v583_v0, %v584_v62  ;;  %v589_v51 = vrot.slane %v551_v21, 1  ;;  %v590_v52 = vrot.slane %v552_v28, 1  ;;  %v592_v2 = vrot.slane %v553_v29, 1 }
  0x54   : > { %v588_v7 = vsel %vm243_vm0, %v586_v9, %v587_v3  ;;  %v593_v54 = vrot.slane %v554_v36, 1  ;;  %v603_v55 = vadd.f32 %v573_v48, %v530_v57  ;;  %v604_v13 = vadd.f32 %v576_v49, %v531_v58 }
  0x55   : > { %v591_v19 = vsel %vm243_vm0, %v589_v51, %v590_v52  ;;  %v605_v26 = vadd.f32 %v579_v63, %v532_v14  ;;  %v606_v61 = vadd.f32 %v582_v6, %v533_v15  ;;  %v607_v27 = vadd.f32 %v585_v1, %v534_v60 }
  0x56   : > { %v594_v4 = vsel %vm243_vm0, %v592_v2, %v593_v54  ;;  %v608_v5 = vadd.f32 %v588_v7, %v535_v22  ;;  %v609_v10 = vadd.f32 %v591_v19, %v536_v35  ;;  %v613_v33 = vmul.f32 %v1216_v34, %v1050_v11 }
  0x57   : > { %v610_v38 = vadd.f32 %v594_v4, %v537_v41  ;;  %v614_v8 = vmul.f32 %v1216_v34, %v1057_v16  ;;  %v615_v57 = vmul.f32 %v1216_v34, %v1060_v17  ;;  %v616_v58 = vmul.f32 %v1216_v34, %v1063_v18 }
  0x58   : > { %v617_v14 = vmul.f32 %v1216_v34, %v1070_v23  ;;  %v618_v15 = vmul.f32 %v1216_v34, %v1073_v24  ;;  %v619_v60 = vmul.f32 %v1216_v34, %v1076_v25  ;;  %v620_v11 = vmul.f32 %v1216_v34, %v1083_v30 }
  0x59   : > { %v621_v16 = vmul.f32 %v1216_v34, %v1086_v31  ;;  %v622_v17 = vmul.f32 %v1216_v34, %v1089_v32  ;;  %v623_v18 = vmul.f32 %v1216_v34, %v1096_v37  ;;  %v624_v23 = vmul.f32 %v1216_v34, %v1153_v43 }
  0x5a   : > { %v625_v24 = vmul.f32 %v1216_v34, %v1174_v50  ;;  %v626_v25 = vmul.f32 %v1216_v34, %v1253_v45  ;;  %v627_v30 = vmul.f32 %v1216_v34, %v1266_v12  ;;  %v644_v31 = vrot.slane %v1228_v42, 2 }
  0x5b   : > { %v645_v22 = vrot.slane %v613_v33, 2  ;;  %v647_v35 = vrot.slane %v614_v8, 2  ;;  %v648_v32 = vrot.slane %v615_v57, 2  ;;  %v650_v41 = vrot.slane %v616_v58, 2 }
  0x5c   : > { %v651_v20 = vrot.slane %v617_v14, 2  ;;  %v653_v37 = vrot.slane %v618_v15, 2  ;;  %v654_v21 = vrot.slane %v619_v60, 2  ;;  %v656_v28 = vrot.slane %v620_v11, 2 }
  0x5d   : > { %v646_v43 = vsel %vm317_vm1, %v644_v31, %v645_v22  ;;  %v649_v50 = vsel %vm317_vm1, %v647_v35, %v648_v32  ;;  %v657_v29 = vrot.slane %v621_v16, 2  ;;  %v659_v36 = vrot.slane %v622_v17, 2 }
  0x5e   : > { %v652_v45 = vsel %vm317_vm1, %v650_v41, %v651_v20  ;;  %v655_v34 = vsel %vm317_vm1, %v653_v37, %v654_v21  ;;  %v660_v12 = vrot.slane %v623_v18, 2  ;;  %v662_v42 = vrot.slane %v624_v23, 2 }
  0x5f   : > { %v658_v53 = vsel %vm317_vm1, %v656_v28, %v657_v29  ;;  %v663_v56 = vrot.slane %v625_v24, 2  ;;  %v665_v59 = vrot.slane %v626_v25, 2  ;;  %v666_v39 = vrot.slane %v627_v30, 2 }
  0x60   : > { %v661_v44 = vsel %vm317_vm1, %v659_v36, %v660_v12  ;;  %v676_v46 = vadd.f32 %v646_v43, %v603_v55  ;;  %v677_v47 = vadd.f32 %v649_v50, %v604_v13  ;;  %v678_v48 = vadd.f32 %v652_v45, %v605_v26 }
  0x61   : > { %v664_v49 = vsel %vm317_vm1, %v662_v42, %v663_v56  ;;  %v667_v0 = vsel %vm317_vm1, %v665_v59, %v666_v39  ;;  %v679_v62 = vadd.f32 %v655_v34, %v606_v61  ;;  %v680_v63 = vadd.f32 %v658_v53, %v607_v27 }
  0x62   : > { %v681_v6 = vadd.f32 %v661_v44, %v608_v5  ;;  %v682_v9 = vadd.f32 %v664_v49, %v609_v10  ;;  %v683_v3 = vadd.f32 %v667_v0, %v610_v38  ;;  %v1350_v1 = vadd.f32 %v941_v40, %v676_v46 }
  0x63   : > { %v1352_v51 = vadd.f32 %v941_v40, %v677_v47  ;;  %v1354_v52 = vadd.f32 %v941_v40, %v678_v48  ;;  %v1356_v2 = vadd.f32 %v941_v40, %v679_v62  ;;  %v1358_v7 = vadd.f32 %v941_v40, %v680_v63 }
  0x64   : > { %v1360_v54 = vadd.f32 %v941_v40, %v681_v6  ;;  %v1362_v55 = vadd.f32 %v941_v40, %v682_v9  ;;  %v1364_v13 = vadd.f32 %v941_v40, %v683_v3  ;;  %v696_v19 = vsub.f32 0.0, %v1350_v1 }
  0x65   : > { %v697_v26 = vsub.f32 0.0, %v1352_v51  ;;  %v698_v61 = vsub.f32 0.0, %v1354_v52  ;;  %v699_v27 = vsub.f32 0.0, %v1356_v2  ;;  %v700_v4 = vsub.f32 0.0, %v1358_v7 }
  0x66   : > { %v701_v5 = vsub.f32 0.0, %v1360_v54  ;;  %v702_v10 = vsub.f32 0.0, %v1362_v55  ;;  %v704_v33 = vmul.f32 1.442695, %v696_v19  ;;  %v703_v58 = vsub.f32 0.0, %v1364_v13 }
  0x67   : > { %v706_v38 = vmul.f32 1.442695, %v697_v26  ;;  %v708_v8 = vmul.f32 1.442695, %v698_v61  ;;  %v710_v57 = vmul.f32 1.442695, %v699_v27 }
  0x68   : > { %942 = vpow2.f32 %v704_v33  ;;  %v712_v14 = vmul.f32 1.442695, %v700_v4  ;;  %v714_v15 = vmul.f32 1.442695, %v701_v5  ;;  %v716_v60 = vmul.f32 1.442695, %v702_v10 }
  0x69   : > { %944 = vpow2.f32 %v706_v38  ;;  %v718_v11 = vmul.f32 1.442695, %v703_v58 }
  0x6a   : > { %946 = vpow2.f32 %v708_v8 }
  0x6b   : > { %948 = vpow2.f32 %v710_v57 }
  0x6c   : > { %950 = vpow2.f32 %v712_v14 }
  0x6d   : > { %952 = vpow2.f32 %v714_v15 }
  0x6e   : > { %v943_v16 = vpop.eup %942  ;;  %954 = vpow2.f32 %v716_v60 }
  0x6f   : > { %v945_v17 = vpop.eup %944  ;;  %v720_v18 = vadd.f32 1.0, %v943_v16  ;;  %956 = vpow2.f32 %v718_v11 }
  0x70   : > { %v947_v23 = vpop.eup %946  ;;  %v721_v24 = vadd.f32 1.0, %v945_v17 }
  0x71   : > { %v949_v25 = vpop.eup %948  ;;  %v1374_v30 = vadd.f32 1.0, %v947_v23  ;;  %958 = vrcp.f32 %v720_v18  ;;  %v739_v41 = vand.u32 2147483648, %v720_v18  ;;  %vm733_vm2 = vweird.f32 %v720_v18 }
  0x72   : > { %v951_v31 = vpop.eup %950  ;;  %v1376_v22 = vadd.f32 1.0, %v949_v25  ;;  %960 = vrcp.f32 %v721_v24  ;;  %v737_v37 = vand.u32 2147483647, %v720_v18  ;;  %v754_v21 = vand.u32 2147483648, %v721_v24 }
  0x73   : > { %v953_v35 = vpop.eup %952  ;;  %v1378_v32 = vadd.f32 1.0, %v951_v31  ;;  %962 = vrcp.f32 %v1374_v30  ;;  %vm748_vm3 = vweird.f32 %v721_v24  ;;  %v752_v50 = vand.u32 2147483647, %v721_v24 }
  0x74   : > { %v955_v20 = vpop.eup %954  ;;  %v1381_v43 = vadd.f32 1.0, %v953_v35  ;;  %964 = vrcp.f32 %v1376_v22  ;;  %v1386_v36 = vor.u32 1.1754944e-38, %v739_v41  ;;  %v767_v45 = vand.u32 2147483647, %v1374_v30 }
  0x75   : > { %v957_v28 = vpop.eup %956  ;;  %v769_v34 = vand.u32 2147483648, %v1374_v30  ;;  %966 = vrcp.f32 %v1378_v32  ;;  %v1393_v42 = vadd.f32 1.0, %v955_v20  ;;  %vm763_vm4 = vweird.f32 %v1374_v30 }
  0x76   : > { %v782_v53 = vand.u32 2147483647, %v1376_v22  ;;  %v1398_v56 = vadd.f32 1.0, %v957_v28  ;;  %v755_v39 = vor.u32 1.1754944e-38, %v754_v21  ;;  %vm778_vm5 = vweird.f32 %v1376_v22 }
  0x77   : > { %v1384_v29 = vpop.eup %958  ;;  %vm1405_vm7 = vcmp.eq.f32.partialorder %v737_v37, 8.507059e+37  ;;  %vm1409_vm8 = vcmp.eq.f32.partialorder %v752_v50, 8.507059e+37  ;;  %v784_v49 = vand.u32 2147483648, %v1376_v22  ;;  %968 = vrcp.f32 %v1381_v43 }
  0x78   : > { %v1391_v12 = vpop.eup %960  ;;  %v729_v40 = vmul.f32 %v1384_v29, %v720_v18  ;;  %vm734_vm6 = vweird.f32 %v1384_v29  ;;  %vm1417_vm9 = vcmp.eq.f32.partialorder %v767_v45, 8.507059e+37  ;;  %v770_v6 = vor.u32 1.1754944e-38, %v769_v34 }
  0x79   : > { %v744_v59 = vmul.f32 %v1391_v12, %v721_v24  ;;  %v1402_v44 = vpop.eup %962  ;;  %vm793_vm10 = vweird.f32 %v1378_v32  ;;  %vm749_vm11 = vweird.f32 %v1391_v12  ;;  %vm1424_vm12 = vcmp.eq.f32.partialorder %v782_v53, 8.507059e+37  ;;  %vm1436_vm14 = vmor %vm733_vm2, %vm734_vm6 }
  0x7a   : > { %v730_v46 = vsub.f32 1.0, %v729_v40  ;;  %v759_v62 = vmul.f32 %v1402_v44, %v1374_v30  ;;  %v965_v9 = vpop.eup %964  ;;  %v797_v26 = vand.u32 2147483647, %v1378_v32  ;;  %vm764_vm13 = vweird.f32 %v1402_v44  ;;  %vm1444_vm15 = vmor %vm748_vm3, %vm749_vm11 }
  0x7b   : > { %v745_v0 = vsub.f32 1.0, %v744_v59  ;;  %v967_v61 = vpop.eup %966  ;;  %v774_v5 = vmul.f32 %v965_v9, %v1376_v22  ;;  %v785_v38 = vor.u32 1.1754944e-38, %v784_v49  ;;  %v799_v57 = vand.u32 2147483648, %v1378_v32  ;;  %vm1451_vm1 = vmor %vm763_vm4, %vm764_vm13 }
  0x7c   : > { %v731_v3 = vmul.f32 %v1384_v29, %v730_v46  ;;  %v760_v4 = vsub.f32 1.0, %v759_v62  ;;  %v789_v8 = vmul.f32 %v967_v61, %v1378_v32  ;;  %vm779_vm0 = vweird.f32 %v965_v9 }
  0x7d   : > { %v746_v27 = vmul.f32 %v1391_v12, %v745_v0  ;;  %v775_v60 = vsub.f32 1.0, %v774_v5  ;;  %v969_v11 = vpop.eup %968  ;;  %vm794_vm2 = vweird.f32 %v967_v61  ;;  %v812_v18 = vand.u32 2147483647, %v1381_v43  ;;  %vm1471_vm4 = vmor %vm778_vm5, %vm779_vm0 }
  0x7e   : > { %v732_v10 = vadd.f32 %v1384_v29, %v731_v3  ;;  %v761_v15 = vmul.f32 %v1402_v44, %v760_v4  ;;  %v790_v17 = vsub.f32 1.0, %v789_v8  ;;  %970 = vrcp.f32 %v1393_v42  ;;  %vm1481_vm11 = vmor %vm793_vm10, %vm794_vm2 }
  0x7f   : > { %v747_v58 = vadd.f32 %v1391_v12, %v746_v27  ;;  %v776_v24 = vmul.f32 %v965_v9, %v775_v60  ;;  %vm1458_vm3 = vcmp.eq.f32.partialorder %v797_v26, 8.507059e+37  ;;  %vm808_vm6 = vweird.f32 %v1381_v43 }
  0x80   : > { %v762_v23 = vadd.f32 %v1402_v44, %v761_v15  ;;  %v736_v30 = vsel %vm1436_vm14, %v1384_v29, %v732_v10  ;;  %v791_v41 = vmul.f32 %v967_v61, %v790_v17  ;;  %v804_v20 = vmul.f32 %v969_v11, %v1381_v43 }
  0x81   : > { %v751_v31 = vsel %vm1444_vm15, %v1391_v12, %v747_v58  ;;  %v777_v21 = vadd.f32 %v965_v9, %v776_v24  ;;  %v800_v50 = vor.u32 1.1754944e-38, %v799_v57  ;;  %v814_v22 = vand.u32 2147483648, %v1381_v43 }
  0x82   : > { %v766_v37 = vsel %vm1451_vm1, %v1402_v44, %v762_v23  ;;  %v792_v29 = vadd.f32 %v967_v61, %v791_v41  ;;  %v805_v45 = vsub.f32 1.0, %v804_v20  ;;  %vm809_vm5 = vweird.f32 %v969_v11 }
  0x83   : > { %vm1486_vm13 = vcmp.eq.f32.partialorder %v812_v18, 8.507059e+37  ;;  %v741_v12 = vsel %vm1405_vm7, %v1386_v36, %v736_v30  ;;  %v756_v32 = vsel %vm1409_vm8, %v755_v39, %v751_v31  ;;  %v781_v40 = vsel %vm1471_vm4, %v965_v9, %v777_v21  ;;  %vm1508_vm7 = vmor %vm808_vm6, %vm809_vm5 }
  0x84   : > { %972 = vrcp.f32 %v1398_v56  ;;  %v971_v53 = vpop.eup %970  ;;  %v771_v59 = vsel %vm1417_vm9, %v770_v6, %v766_v37  ;;  %v796_v44 = vsel %vm1481_vm11, %v967_v61, %v792_v29  ;;  %v806_v46 = vmul.f32 %v969_v11, %v805_v45 }
  0x85   : > { %vm823_vm10 = vweird.f32 %v1393_v42  ;;  %v786_v36 = vsel %vm1424_vm12, %v785_v38, %v781_v40  ;;  %v815_v47 = vor.u32 1.1754944e-38, %v814_v22  ;;  %v819_v48 = vmul.f32 %v971_v53, %v1393_v42 }
  0x86   : > { %v829_v49 = vand.u32 2147483648, %v1393_v42  ;;  %v801_v0 = vsel %vm1458_vm3, %v800_v50, %v796_v44  ;;  %v807_v62 = vadd.f32 %v969_v11, %v806_v46  ;;  %v848_v43 = vmul.f32 %v741_v12, %v1350_v1 }
  0x87   : > { %v849_v63 = vmul.f32 %v756_v32, %v1352_v51  ;;  %v820_v6 = vsub.f32 1.0, %v819_v48  ;;  %vm824_vm8 = vweird.f32 %v971_v53  ;;  %v827_v9 = vand.u32 2147483647, %v1393_v42 }
  0x88   : > { %v850_v3 = vmul.f32 %v771_v59, %v1354_v52  ;;  %v811_v19 = vsel %vm1508_vm7, %v969_v11, %v807_v62  ;;  %v851_v26 = vmul.f32 %v786_v36, %v1356_v2  ;;  %vm856_vm9 = vcmask 523264   ;;  %vm1535_vm12 = vmor %vm823_vm10, %vm824_vm8 }
  0x89   : > { %v816_v1 = vsel %vm1486_vm13, %v815_v47, %v811_v19  ;;  %v821_v27 = vmul.f32 %v971_v53, %v820_v6  ;;  %v852_v51 = vmul.f32 %v801_v0, %v1358_v7  ;;  %857 = vst.msk [vmem:[%s1517_s27] sm:$0xff] %vm856_vm9, %v848_v43  ;;  %v830_v4 = vor.u32 1.1754944e-38, %v829_v49 }
  0x8a   : > { %v973_v61 = vpop.eup %972  ;;  %v853_v5 = vmul.f32 %v816_v1, %v1360_v54  ;;  %858 = vst.msk [vmem:[%s1517_s27 + $0x8] sm:$0xff] %vm856_vm9, %v849_v63  ;;  %vm828_vm14 = vcmp.eq.f32.partialorder %v827_v9, 8.507059e+37  ;;  %v844_v7 = vand.u32 2147483648, %v1398_v56  ;;  %vm838_vm15 = vweird.f32 %v1398_v56 }
  0x8b   : > { %v834_v2 = vmul.f32 %v973_v61, %v1398_v56  ;;  %v822_v10 = vadd.f32 %v971_v53, %v821_v27  ;;  %859 = vst.msk [vmem:[%s1517_s27 + $0x10] sm:$0xff] %vm856_vm9, %v850_v3  ;;  %vm839_vm0 = vweird.f32 %v973_v61  ;;  %v842_v33 = vand.u32 2147483647, %v1398_v56 }
  0x8c   : > { %860 = vst.msk [vmem:[%s1517_s27 + $0x18] sm:$0xff] %vm856_vm9, %v851_v26  ;;  %vm840_vm1 = vmor %vm838_vm15, %vm839_vm0  ;;  %v845_v57 = vor.u32 1.1754944e-38, %v844_v7 }
  0x8d   : > { %v835_v42 = vsub.f32 1.0, %v834_v2  ;;  %v826_v54 = vsel %vm1535_vm12, %v971_v53, %v822_v10  ;;  %861 = vst.msk [vmem:[%s1517_s27 + $0x20] sm:$0xff] %vm856_vm9, %v852_v51  ;;  %vm843_vm2 = vcmp.eq.f32.partialorder %v842_v33, 8.507059e+37 }
  0x8e   : > { %v831_v38 = vsel %vm828_vm14, %v830_v4, %v826_v54  ;;  %862 = vst.msk [vmem:[%s1517_s27 + $0x28] sm:$0xff] %vm856_vm9, %v853_v5 }
  0x8f   : > { %v836_v8 = vmul.f32 %v973_v61, %v835_v42  ;;  %v854_v58 = vmul.f32 %v831_v38, %v1362_v55 }
  0x91   : > { %v837_v14 = vadd.f32 %v973_v61, %v836_v8  ;;  %863 = vst.msk [vmem:[%s1517_s27 + $0x30] sm:$0xff] %vm856_vm9, %v854_v58 }
  0x93   : > { %v841_v56 = vsel %vm840_vm1, %v973_v61, %v837_v14 }
  0x94   : > { %v846_v15 = vsel %vm843_vm2, %v845_v57, %v841_v56 }
  0x95   : > { %v855_v60 = vmul.f32 %v846_v15, %v1364_v13 }
  0x97   : > { %864 = vst.msk [vmem:[%s1517_s27 + $0x38] sm:$0xff] %vm856_vm9, %v855_v60 }
  0x98 PF: > { %s13_s12 = sadd.s32 1, %s980_s12  }
  0x99   : > { %p10_p4 = scmp.ge.s32.totalorder %s13_s12, 4  }
  0x9b   :  { %12 = sbr.rel (!%p10_p4) target bundleno = 1 (0x1), region = 62 }

// kernel: vss_block_forward.9
= control target key start
LH: loop header
LB: loop body
LE: loop exit
PB: predicated region body
PF: predicated region fallthrough
CT: control target
= control target key end

     0   :  { %s568_s9 = smov 0   ;;  %s570_s10 = smov 0   ;;  %s656_s0 = inlined_call_operand.vmem [shape: f32[4,128,64], index: 0, kind: input, shape index: {}]   ;;  %s657_s1 = inlined_call_operand.vmem [shape: bf16[4,64,128], index: 1, kind: input, shape index: {}]   ;;  %s658_s2 = inlined_call_operand.vmem [shape: f32[4,128,128], index: 2, kind: output, shape index: {}]  }
   0x1   :  { %s572_s11 = smov 0  }
   0x2 LB: > { %s24_s12 = sadd.s32 1, %s547_s10  ;;  %p453_p0 = scmp.ge.s32.totalorder %s551_s11, 1  ;;  %s551_s11 = sphi %s572_s11, %s12_s11   ;;  %s547_s10 = sphi %s570_s10, %s660_s10   ;;  %s543_s9 = sphi %s568_s9, %s659_s9  }
   0x3   : > { %p26_p1 = scmp.ge.s32.totalorder %s24_s12, 4  ;;  %p143_p2 = scmp.lt.s32.totalorder %s551_s11, 5 }
   0x5   : > { %s662_s12 = smov (%p26_p1, %s24_s12), 0  ;;  %p144_p3 = pnand %p453_p0, %p143_p2 }
   0x6   : > { %p179_p4 = scmp.lt.s32.totalorder (!%p144_p3), %s543_s9, 3 }
   0x7   : > { %147 = sbr.rel (%p144_p3) target bundleno = 190 (0xbe), region = 28 }
   0xc   : > { %s664_s9 = smov (!%p179_p4, %s543_s9), 3  ;;  %vm260_vm0 = vcmask 523264  }
   0xd   : > { %s487_s13 = sshll.u32 %s664_s9, 5  ;;  %s486_s17 = sshll.u32 %s664_s9, 7 }
   0xe   : > { %s192_s16 = scalar_lea.vmem %s657_s1, %s487_s13  ;;  %s598_s20 = scalar_lea.vmem %s656_s0, %s486_s17 }
   0xf   : > { %v492_v0 = vld [vmem:[%s192_s16 + $0x18] sm:$0xff]  ;;  %v491_v1 = vld [vmem:[%s192_s16 + $0x10] sm:$0xff]  ;;  %v490_v2 = vld [vmem:[%s192_s16 + $0x8] sm:$0xff]  ;;  %s629_s23 = scalar_lea.vmem %s658_s2, %s486_s17 }
  0x10   : > { %289 = vmatpush.bf16.msra.mxu0 %v492_v0  ;;  %493 = vmatpush.bf16.msra.mxu1 %v492_v0  ;;  %v489_v3 = vld [vmem:[%s192_s16] sm:$0xff]  ;;  %v205_v5 = vld [vmem:[%s598_s20 + $0x8] sm:$0xff]  ;;  %v206_v16 = vld [vmem:[%s598_s20 + $0x10] sm:$0xff] }
  0x11   : > { %494 = vmatpush.bf16.msra.mxu2 %v492_v0  ;;  %495 = vmatpush.bf16.msra.mxu3 %v492_v0  ;;  %v204_v4 = vld [vmem:[%s598_s20] sm:$0xff]  ;;  %v209_v7 = vld [vmem:[%s598_s20 + $0x28] sm:$0xff]  ;;  %v207_v17 = vld [vmem:[%s598_s20 + $0x18] sm:$0xff] }
  0x12   : > { %v208_v6 = vld [vmem:[%s598_s20 + $0x20] sm:$0xff]  ;;  %v213_v9 = vld [vmem:[%s598_s20 + $0x48] sm:$0xff]  ;;  %v220_v12 = vpack.c.bf16 %v205_v5, %v204_v4  ;;  %v210_v18 = vld [vmem:[%s598_s20 + $0x30] sm:$0xff]  ;;  %v221_v24 = vpack.c.bf16 %v207_v17, %v206_v16 }
  0x13   : > { %v212_v8 = vld [vmem:[%s598_s20 + $0x40] sm:$0xff]  ;;  %v217_v11 = vld [vmem:[%s598_s20 + $0x68] sm:$0xff]  ;;  %v222_v13 = vpack.c.bf16 %v209_v7, %v208_v6  ;;  %v211_v19 = vld [vmem:[%s598_s20 + $0x38] sm:$0xff] }
  0x14   : > { %290 = vmatpush.bf16.msra.mxu0 %v491_v1  ;;  %496 = vmatpush.bf16.msra.mxu1 %v491_v1  ;;  %v216_v10 = vld [vmem:[%s598_s20 + $0x60] sm:$0xff]  ;;  %v224_v14 = vpack.c.bf16 %v213_v9, %v212_v8  ;;  %v214_v20 = vld [vmem:[%s598_s20 + $0x50] sm:$0xff]  ;;  %v215_v21 = vld [vmem:[%s598_s20 + $0x58] sm:$0xff]  ;;  %v223_v25 = vpack.c.bf16 %v211_v19, %v210_v18 }
  0x15   : > { %497 = vmatpush.bf16.msra.mxu2 %v491_v1  ;;  %498 = vmatpush.bf16.msra.mxu3 %v491_v1  ;;  %v226_v15 = vpack.c.bf16 %v217_v11, %v216_v10  ;;  %v218_v22 = vld [vmem:[%s598_s20 + $0x70] sm:$0xff]  ;;  %v219_v23 = vld [vmem:[%s598_s20 + $0x78] sm:$0xff]  ;;  %v225_v26 = vpack.c.bf16 %v215_v21, %v214_v20 }
  0x16   : > { %v227_v27 = vpack.c.bf16 %v219_v23, %v218_v22 }
  0x18   : > { %291 = vmatpush.bf16.msra.mxu0 %v490_v2  ;;  %499 = vmatpush.bf16.msra.mxu1 %v490_v2 }
  0x19   : > { %500 = vmatpush.bf16.msra.mxu2 %v490_v2  ;;  %501 = vmatpush.bf16.msra.mxu3 %v490_v2 }
  0x1c   : > { %292 = vmatpush.bf16.msra.mxu0 %v489_v3  ;;  %502 = vmatpush.bf16.msra.mxu1 %v489_v3 }
  0x1d   : > { %503 = vmatpush.bf16.msra.mxu2 %v489_v3  ;;  %504 = vmatpush.bf16.msra.mxu3 %v489_v3 }
  0x1f   : > { %476 = vmatmul.msk.bf16.vlgmr.msra.gmra.mxu0 %vm260_vm0, %v220_v12  ;;  %478 = vmatmul.msk.bf16.vlgmr.msra.gmra.mxu1 %vm260_vm0, %v222_v13 }
  0x20   : > { %480 = vmatmul.msk.bf16.vlgmr.msra.gmra.mxu2 %vm260_vm0, %v224_v14  ;;  %482 = vmatmul.msk.bf16.vlgmr.msra.gmra.mxu3 %vm260_vm0, %v226_v15 }
  0x2f   : > { %477 = vmatmul.msk.bf16.gmra.mxu0 %vm260_vm0, %v221_v24  ;;  %479 = vmatmul.msk.bf16.gmra.mxu1 %vm260_vm0, %v223_v25 }
  0x30   : > { %481 = vmatmul.msk.bf16.gmra.mxu2 %vm260_vm0, %v225_v26  ;;  %483 = vmatmul.msk.bf16.gmra.mxu3 %vm260_vm0, %v227_v27 }
  0x9c   : > { %v294_v28 = vpop.f32.mrf.mxu0  ;;  %v304_v29 = vpop.f32.mrf.mxu1 }
  0x9d   : > { %334 = vst [vmem:[%s629_s23] sm:$0xff] %v294_v28 }
  0x9e   : > { %338 = vst [vmem:[%s629_s23 + $0x20] sm:$0xff] %v304_v29 }
  0xa3   : > { %v314_v30 = vpop.f32.mrf.mxu2  ;;  %v324_v31 = vpop.f32.mrf.mxu3 }
  0xa4   : > { %342 = vst [vmem:[%s629_s23 + $0x40] sm:$0xff] %v314_v30  ;;  %v296_v32 = vpop.f32.mrf.mxu0  ;;  %v306_v33 = vpop.f32.mrf.mxu1 }
  0xa5   : > { %346 = vst [vmem:[%s629_s23 + $0x60] sm:$0xff] %v324_v31 }
  0xa6   : > { %335 = vst [vmem:[%s629_s23 + $0x8] sm:$0xff] %v296_v32 }
  0xa7   : > { %339 = vst [vmem:[%s629_s23 + $0x28] sm:$0xff] %v306_v33 }
  0xab   : > { %v316_v34 = vpop.f32.mrf.mxu2  ;;  %v326_v35 = vpop.f32.mrf.mxu3 }
  0xac   : > { %343 = vst [vmem:[%s629_s23 + $0x48] sm:$0xff] %v316_v34  ;;  %v299_v36 = vpop.f32.mrf.mxu0  ;;  %v309_v37 = vpop.f32.mrf.mxu1 }
  0xad   : > { %347 = vst [vmem:[%s629_s23 + $0x68] sm:$0xff] %v326_v35 }
  0xae   : > { %336 = vst [vmem:[%s629_s23 + $0x10] sm:$0xff] %v299_v36 }
  0xaf   : > { %340 = vst [vmem:[%s629_s23 + $0x30] sm:$0xff] %v309_v37 }
  0xb3   : > { %v319_v38 = vpop.f32.mrf.mxu2  ;;  %v329_v39 = vpop.f32.mrf.mxu3 }
  0xb4   : > { %344 = vst [vmem:[%s629_s23 + $0x50] sm:$0xff] %v319_v38  ;;  %v301_v40 = vpop.f32.mrf.mxu0  ;;  %v311_v41 = vpop.f32.mrf.mxu1 }
  0xb5   : > { %348 = vst [vmem:[%s629_s23 + $0x70] sm:$0xff] %v329_v39 }
  0xb6   : > { %337 = vst [vmem:[%s629_s23 + $0x18] sm:$0xff] %v301_v40 }
  0xb7   : > { %341 = vst [vmem:[%s629_s23 + $0x38] sm:$0xff] %v311_v41 }
  0xbb   : > { %v321_v42 = vpop.f32.mrf.mxu2  ;;  %v331_v43 = vpop.f32.mrf.mxu3 }
  0xbc   : > { %345 = vst [vmem:[%s629_s23 + $0x58] sm:$0xff] %v321_v42 }
  0xbd   : > { %349 = vst [vmem:[%s629_s23 + $0x78] sm:$0xff] %v331_v43 }
  0xbe PF: > { %s12_s11 = sadd.s32 1, %s551_s11   ;;  %s659_s9 = smov %s547_s10 }
  0xbf   : > { %p9_p5 = scmp.ge.s32.totalorder %s12_s11, 6   ;;  %s660_s10 = smov %s662_s12 }
  0xc1   :  { %11 = sbr.rel (!%p9_p5) target bundleno = 2 (0x2), region = 61 }

// kernel: vss_block_forward.12
= control target key start
LH: loop header
LB: loop body
LE: loop exit
PB: predicated region body
PF: predicated region fallthrough
CT: control target
= control target key end

     0   :  { %vm37_vm0 = vcmask 261120   ;;  %v620_v32 = vmov 32.0   ;;  %s1269_s0 = inlined_call_operand.vmem [shape: f32[128,32], index: 0, kind: input, shape index: {}]   ;;  %s1270_s1 = inlined_call_operand.vmem [shape: f32[1,32], index: 1, kind: input, shape index: {}]   ;;  %s1271_s2 = inlined_call_operand.vmem [shape: f32[1,32], index: 2, kind: input, shape index: {}]   ;;  %s1272_s4 = inlined_call_operand.vmem [shape: f32[1,128], index: 4, kind: input, shape index: {}]   ;;  %s1273_s3 = inlined_call_operand.vmem [shape: bf16[32,128], index: 3, kind: input, shape index: {}]   ;;  %s1274_s5 = inlined_call_operand.vmem [shape: f32[128,128], index: 5, kind: output, shape index: {}]  }
   0x1   :  { %v33_v0 = vld [vmem:[%s1269_s0 + $0x60] sm:$0xff]  ;;  %v669_v6 = vld [vmem:[%s1269_s0 + $0x68] sm:$0xff]  ;;  %v700_v14 = vld [vmem:[%s1269_s0 + $0x50] sm:$0xff]  ;;  %586 = vrcp.f32 %v620_v32 }
   0x2   :  { %v29_v1 = vld [vmem:[%s1269_s0 + $0x40] sm:$0xff]  ;;  %v74_v3 = vsel %vm37_vm0, %v33_v0, 0.0  ;;  %v674_v7 = vld [vmem:[%s1269_s0 + $0x48] sm:$0xff]  ;;  %v77_v9 = vsel %vm37_vm0, %v669_v6, 0.0  ;;  %v68_v17 = vsel %vm37_vm0, %v700_v14, 0.0  ;;  %v711_v18 = vld [vmem:[%s1269_s0 + $0x58] sm:$0xff] }
   0x3   :  { %v660_v2 = vld [vmem:[%s1269_s0] sm:$0xff]  ;;  %v62_v4 = vsel %vm37_vm0, %v29_v1, 0.0  ;;  %75 = vadd.xlane.f32.xlu1 %v74_v3  ;;  %v679_v8 = vld [vmem:[%s1269_s0 + $0x8] sm:$0xff]  ;;  %v65_v10 = vsel %vm37_vm0, %v674_v7, 0.0  ;;  %v716_v19 = vld [vmem:[%s1269_s0 + $0x70] sm:$0xff]  ;;  %v71_v21 = vsel %vm37_vm0, %v711_v18, 0.0 }
   0x4   :  { %v38_v5 = vsel %vm37_vm0, %v660_v2, 0.0  ;;  %63 = vadd.xlane.f32.xlu0 %v62_v4  ;;  %v41_v11 = vsel %vm37_vm0, %v679_v8, 0.0  ;;  %v690_v12 = vld [vmem:[%s1269_s0 + $0x20] sm:$0xff]  ;;  %v695_v13 = vld [vmem:[%s1269_s0 + $0x28] sm:$0xff]  ;;  %v721_v20 = vld [vmem:[%s1269_s0 + $0x78] sm:$0xff]  ;;  %v80_v22 = vsel %vm37_vm0, %v716_v19, 0.0 }
   0x5   :  { %39 = vadd.xlane.f32.xlu2 %v38_v5  ;;  %v50_v15 = vsel %vm37_vm0, %v690_v12, 0.0  ;;  %v53_v16 = vsel %vm37_vm0, %v695_v13, 0.0  ;;  %v83_v23 = vsel %vm37_vm0, %v721_v20, 0.0  ;;  %v732_v24 = vld [vmem:[%s1269_s0 + $0x10] sm:$0xff]  ;;  %v737_v25 = vld [vmem:[%s1269_s0 + $0x18] sm:$0xff] }
   0x6   :  { %v742_v26 = vld [vmem:[%s1269_s0 + $0x30] sm:$0xff]  ;;  %v44_v27 = vsel %vm37_vm0, %v732_v24, 0.0  ;;  %v47_v28 = vsel %vm37_vm0, %v737_v25, 0.0  ;;  %v753_v30 = vld [vmem:[%s1269_s0 + $0x38] sm:$0xff] }
   0x7   :  { %v56_v29 = vsel %vm37_vm0, %v742_v26, 0.0  ;;  %v59_v31 = vsel %vm37_vm0, %v753_v30, 0.0  ;;  %v587_v33 = vpop.eup %586 }
   0x8   :  { %v87_v34 = vmul.f32 32.0, %v587_v33  ;;  %vm91_vm1 = vweird.f32 %v587_v33 }
   0xa   :  { %v88_v35 = vsub.f32 1.0, %v87_v34 }
   0xb   :  { %78 = vadd.xlane.f32.xlu1 %v77_v9 }
   0xc   :  { %66 = vadd.xlane.f32.xlu0 %v65_v10  ;;  %v89_v36 = vmul.f32 %v587_v33, %v88_v35 }
   0xd   :  { %42 = vadd.xlane.f32.xlu2 %v41_v11 }
   0xe   :  { %v90_v37 = vadd.f32 %v587_v33, %v89_v36 }
  0x10   :  { %v757_v38 = vsel %vm91_vm1, %v587_v33, %v90_v37 }
  0x13   :  { %54 = vadd.xlane.f32.xlu1 %v53_v16 }
  0x14   :  { %51 = vadd.xlane.f32.xlu0 %v50_v15 }
  0x15   :  { %69 = vadd.xlane.f32.xlu2 %v68_v17 }
  0x1b   :  { %81 = vadd.xlane.f32.xlu1 %v80_v22 }
  0x1c   :  { %72 = vadd.xlane.f32.xlu0 %v71_v21 }
  0x1d   :  { %84 = vadd.xlane.f32.xlu2 %v83_v23 }
  0x23   :  { %48 = vadd.xlane.f32.xlu1 %v47_v28 }
  0x24   :  { %45 = vadd.xlane.f32.xlu0 %v44_v27 }
  0x25   :  { %57 = vadd.xlane.f32.xlu2 %v56_v29 }
  0x2c   :  { %60 = vadd.xlane.f32.xlu0 %v59_v31 }
  0x76   :  { %v76_v39 = vpop.xlane.xlu1 %75 }
  0x77   :  { %v64_v40 = vpop.xlane.xlu0 %63  ;;  %v105_v41 = vmul.f32 %v757_v38, %v76_v39 }
  0x78   :  { %v101_v42 = vmul.f32 %v757_v38, %v64_v40  ;;  %v40_v43 = vpop.xlane.xlu2 %39 }
  0x79   :  { %v761_v44 = vsub.f32 %v33_v0, %v105_v41  ;;  %v93_v56 = vmul.f32 %v757_v38, %v40_v43 }
  0x7a   :  { %v763_v45 = vsub.f32 %v29_v1, %v101_v42 }
  0x7b   :  { %v137_v47 = vmul.f32 %v761_v44, %v761_v44  ;;  %v791_v63 = vsub.f32 %v660_v2, %v93_v56 }
  0x7c   :  { %v133_v46 = vmul.f32 %v763_v45, %v763_v45 }
  0x7d   :  { %v177_v49 = vsel %vm37_vm0, %v137_v47, 0.0  ;;  %v125_v10 = vmul.f32 %v791_v63, %v791_v63 }
  0x7e   :  { %v165_v48 = vsel %vm37_vm0, %v133_v46, 0.0  ;;  %v79_v50 = vpop.xlane.xlu1 %78  ;;  %178 = vadd.xlane.f32.xlu0 %v177_v49 }
  0x7f   :  { %v67_v51 = vpop.xlane.xlu0 %66  ;;  %166 = vadd.xlane.f32.xlu1 %v165_v48  ;;  %v106_v52 = vmul.f32 %v757_v38, %v79_v50 }
  0x80   :  { %v102_v53 = vmul.f32 %v757_v38, %v67_v51  ;;  %v43_v54 = vpop.xlane.xlu2 %42 }
  0x81   :  { %v94_v55 = vmul.f32 %v757_v38, %v43_v54  ;;  %v776_v57 = vsub.f32 %v669_v6, %v106_v52 }
  0x82   :  { %v779_v58 = vsub.f32 %v674_v7, %v102_v53 }
  0x83   :  { %v782_v59 = vsub.f32 %v679_v8, %v94_v55  ;;  %v138_v60 = vmul.f32 %v776_v57, %v776_v57 }
  0x84   :  { %v134_v61 = vmul.f32 %v779_v58, %v779_v58 }
  0x85   :  { %v126_v62 = vmul.f32 %v782_v59, %v782_v59  ;;  %v180_v0 = vsel %vm37_vm0, %v138_v60, 0.0 }
  0x86   :  { %v168_v1 = vsel %vm37_vm0, %v134_v61, 0.0  ;;  %v55_v5 = vpop.xlane.xlu1 %54 }
  0x87   :  { %v52_v3 = vpop.xlane.xlu0 %51  ;;  %181 = vadd.xlane.f32.xlu1 %v180_v0  ;;  %169 = vadd.xlane.f32.xlu2 %v168_v1  ;;  %v144_v4 = vsel %vm37_vm0, %v126_v62, 0.0  ;;  %v98_v8 = vmul.f32 %v757_v38, %v55_v5 }
  0x88   :  { %v97_v6 = vmul.f32 %v757_v38, %v52_v3  ;;  %145 = vadd.xlane.f32.xlu0 %v144_v4  ;;  %v70_v7 = vpop.xlane.xlu2 %69 }
  0x89   :  { %v103_v9 = vmul.f32 %v757_v38, %v70_v7  ;;  %v808_v15 = vsub.f32 %v695_v13, %v98_v8 }
  0x8a   :  { %v800_v2 = vsub.f32 %v690_v12, %v97_v6  ;;  %v141_v12 = vsel %vm37_vm0, %v125_v10, 0.0 }
  0x8b   :  { %v805_v11 = vsub.f32 %v700_v14, %v103_v9  ;;  %v130_v29 = vmul.f32 %v808_v15, %v808_v15 }
  0x8c   :  { %v129_v16 = vmul.f32 %v800_v2, %v800_v2 }
  0x8d   :  { %v135_v17 = vmul.f32 %v805_v11, %v805_v11  ;;  %v156_v36 = vsel %vm37_vm0, %v130_v29, 0.0 }
  0x8e   :  { %v153_v21 = vsel %vm37_vm0, %v129_v16, 0.0  ;;  %v82_v14 = vpop.xlane.xlu1 %81 }
  0x8f   :  { %v73_v22 = vpop.xlane.xlu0 %72  ;;  %154 = vadd.xlane.f32.xlu1 %v153_v21  ;;  %142 = vadd.xlane.f32.xlu2 %v141_v12  ;;  %v171_v23 = vsel %vm37_vm0, %v135_v17, 0.0  ;;  %v107_v28 = vmul.f32 %v757_v38, %v82_v14  ;;  %v574_v17 = vld [vmem:[%s1273_s3] sm:$0xff] }
  0x90   :  { %v104_v27 = vmul.f32 %v757_v38, %v73_v22  ;;  %172 = vadd.xlane.f32.xlu0 %v171_v23  ;;  %v85_v13 = vpop.xlane.xlu2 %84 }
  0x91   :  { %v108_v31 = vmul.f32 %v757_v38, %v85_v13  ;;  %v829_v34 = vsub.f32 %v716_v19, %v107_v28 }
  0x92   :  { %v823_v32 = vsub.f32 %v711_v18, %v104_v27 }
  0x93   :  { %v826_v33 = vsub.f32 %v721_v20, %v108_v31  ;;  %v139_v43 = vmul.f32 %v829_v34, %v829_v34 }
  0x94   :  { %v136_v35 = vmul.f32 %v823_v32, %v823_v32 }
  0x95   :  { %v140_v37 = vmul.f32 %v826_v33, %v826_v33  ;;  %v183_v51 = vsel %vm37_vm0, %v139_v43, 0.0 }
  0x96   :  { %v174_v39 = vsel %vm37_vm0, %v136_v35, 0.0  ;;  %v49_v20 = vpop.xlane.xlu1 %48 }
  0x97   :  { %175 = vadd.xlane.f32.xlu1 %v174_v39  ;;  %v46_v40 = vpop.xlane.xlu0 %45  ;;  %157 = vadd.xlane.f32.xlu2 %v156_v36  ;;  %v186_v18 = vsel %vm37_vm0, %v140_v37, 0.0  ;;  %v96_v42 = vmul.f32 %v757_v38, %v49_v20 }
  0x98   :  { %v95_v41 = vmul.f32 %v757_v38, %v46_v40  ;;  %187 = vadd.xlane.f32.xlu0 %v186_v18  ;;  %v58_v19 = vpop.xlane.xlu2 %57 }
  0x99   :  { %v99_v46 = vmul.f32 %v757_v38, %v58_v19  ;;  %v850_v49 = vsub.f32 %v737_v25, %v96_v42 }
  0x9a   :  { %v844_v47 = vsub.f32 %v732_v24, %v95_v41 }
  0x9b   :  { %v847_v48 = vsub.f32 %v742_v26, %v99_v46  ;;  %v128_v25 = vmul.f32 %v850_v49, %v850_v49 }
  0x9c   :  { %v127_v50 = vmul.f32 %v844_v47, %v844_v47 }
  0x9d   :  { %v131_v52 = vmul.f32 %v847_v48, %v847_v48  ;;  %v150_v60 = vsel %vm37_vm0, %v128_v25, 0.0 }
  0x9e   :  { %v147_v53 = vsel %vm37_vm0, %v127_v50, 0.0 }
  0x9f   :  { %148 = vadd.xlane.f32.xlu1 %v147_v53  ;;  %v61_v54 = vpop.xlane.xlu0 %60  ;;  %184 = vadd.xlane.f32.xlu2 %v183_v51  ;;  %v159_v24 = vsel %vm37_vm0, %v131_v52, 0.0 }
  0xa0   :  { %v100_v26 = vmul.f32 %v757_v38, %v61_v54  ;;  %160 = vadd.xlane.f32.xlu0 %v159_v24 }
  0xa2   :  { %v863_v55 = vsub.f32 %v753_v30, %v100_v26  ;;  %v575_v30 = vld [vmem:[%s1273_s3 + $0x8] sm:$0xff] }
  0xa3   :  { %577 = vmatpush.bf16.msra.mxu2 %v575_v30  ;;  %578 = vmatpush.bf16.msra.mxu3 %v575_v30 }
  0xa4   :  { %v132_v56 = vmul.f32 %v863_v55, %v863_v55  ;;  %495 = vmatpush.bf16.msra.mxu0 %v575_v30  ;;  %576 = vmatpush.bf16.msra.mxu1 %v575_v30 }
  0xa6   :  { %v162_v61 = vsel %vm37_vm0, %v132_v56, 0.0 }
  0xa7   :  { %163 = vadd.xlane.f32.xlu1 %v162_v61  ;;  %151 = vadd.xlane.f32.xlu2 %v150_v60 }
  0xa8   :  { %580 = vmatpush.bf16.msra.mxu2 %v574_v17  ;;  %581 = vmatpush.bf16.msra.mxu3 %v574_v17 }
  0xa9   :  { %496 = vmatpush.bf16.msra.mxu0 %v574_v17  ;;  %579 = vmatpush.bf16.msra.mxu1 %v574_v17 }
  0xf1   :  { %v179_v0 = vpop.xlane.xlu0 %178 }
  0xf2   :  { %v167_v62 = vpop.xlane.xlu1 %166  ;;  %v201_v3 = vmul.f32 %v179_v0, %v757_v38 }
  0xf3   :  { %v197_v1 = vmul.f32 %v167_v62, %v757_v38 }
  0xf4   :  { %v217_v5 = vadd.f32 1e-06, %v201_v3 }
  0xf5   :  { %v213_v4 = vadd.f32 1e-06, %v197_v1 }
  0xf6   :  { %vm347_vm6 = vweird.f32 %v217_v5 }
  0xf7   :  { %588 = vrsqrt.f32 %v213_v4  ;;  %vm307_vm4 = vweird.f32 %v213_v4 }
  0xf8   :  { %590 = vrsqrt.f32 %v217_v5 }
  0xfa   :  { %v182_v6 = vpop.xlane.xlu1 %181  ;;  %v170_v7 = vpop.xlane.xlu2 %169 }
  0xfb   :  { %v202_v8 = vmul.f32 %v182_v6, %v757_v38  ;;  %v146_v9 = vpop.xlane.xlu0 %145  ;;  %v198_v10 = vmul.f32 %v170_v7, %v757_v38 }
  0xfc   :  { %v190_v16 = vmul.f32 %v146_v9, %v757_v38 }
  0xfd   :  { %v880_v21 = vpop.eup %588  ;;  %v882_v12 = vadd.f32 1e-06, %v202_v8  ;;  %v884_v22 = vadd.f32 1e-06, %v198_v10 }
  0xfe   :  { %v886_v23 = vpop.eup %590  ;;  %v302_v14 = vmul.f32 %v880_v21, %v213_v4  ;;  %v889_v27 = vadd.f32 1e-06, %v190_v16  ;;  %vm308_vm2 = vweird.f32 %v880_v21 }
  0xff   :  { %v342_v13 = vmul.f32 %v886_v23, %v217_v5  ;;  %592 = vrsqrt.f32 %v882_v12  ;;  %vm348_vm3 = vweird.f32 %v886_v23  ;;  %vm923_vm5 = vmor %vm307_vm4, %vm308_vm2  ;;  %vm357_vm8 = vweird.f32 %v882_v12 }
 0x100   :  { %v303_v28 = vmul.f32 %v880_v21, %v302_v14  ;;  %594 = vrsqrt.f32 %v889_v27  ;;  %vm930_vm7 = vmor %vm347_vm6, %vm348_vm3  ;;  %vm237_vm9 = vweird.f32 %v889_v27  ;;  %vm317_vm11 = vweird.f32 %v884_v22 }
 0x101   :  { %v343_v29 = vmul.f32 %v886_v23, %v342_v13  ;;  %596 = vrsqrt.f32 %v884_v22 }
 0x102   :  { %v304_v31 = vmul.f32 0.5, %v303_v28  ;;  %v155_v35 = vpop.xlane.xlu1 %154  ;;  %v143_v36 = vpop.xlane.xlu2 %142 }
 0x103   :  { %v344_v37 = vmul.f32 0.5, %v343_v29  ;;  %v193_v39 = vmul.f32 %v155_v35, %v757_v38  ;;  %v173_v40 = vpop.xlane.xlu0 %172  ;;  %v189_v18 = vmul.f32 %v143_v36, %v757_v38 }
 0x104   :  { %v305_v20 = vsub.f32 1.5, %v304_v31  ;;  %v199_v41 = vmul.f32 %v173_v40, %v757_v38  ;;  %v959_v31 = vld [vmem:[%s1270_s1] ss:$0 sm:$0xff] }
 0x105   :  { %v900_v19 = vpop.eup %592  ;;  %v345_v42 = vsub.f32 1.5, %v344_v37  ;;  %v903_v43 = vadd.f32 1e-06, %v193_v39  ;;  %v912_v52 = vadd.f32 1e-06, %v189_v18 }
 0x106   :  { %v905_v46 = vpop.eup %594  ;;  %v352_v50 = vmul.f32 %v900_v19, %v882_v12  ;;  %v910_v51 = vadd.f32 1e-06, %v199_v41  ;;  %v306_v54 = vmul.f32 %v880_v21, %v305_v20  ;;  %vm358_vm12 = vweird.f32 %v900_v19 }
 0x107   :  { %v597_v53 = vpop.eup %596  ;;  %v346_v24 = vmul.f32 %v886_v23, %v345_v42  ;;  %v232_v26 = vmul.f32 %v905_v46, %v889_v27  ;;  %598 = vrsqrt.f32 %v903_v43  ;;  %vm238_vm14 = vweird.f32 %v905_v46  ;;  %vm993_vm2 = vmor %vm357_vm8, %vm358_vm12 }
 0x108   :  { %v353_v25 = vmul.f32 %v900_v19, %v352_v50  ;;  %v312_v56 = vmul.f32 %v597_v53, %v884_v22  ;;  %600 = vrsqrt.f32 %v910_v51  ;;  %v310_v30 = vsel %vm923_vm5, %v880_v21, %v306_v54  ;;  %vm1015_vm5 = vmor %vm237_vm9, %vm238_vm14 }
 0x109   :  { %v233_v61 = vmul.f32 %v905_v46, %v232_v26  ;;  %v350_v5 = vsel %vm930_vm7, %v886_v23, %v346_v24  ;;  %602 = vrsqrt.f32 %v912_v52  ;;  %vm318_vm10 = vweird.f32 %v597_v53 }
 0x10a   :  { %v354_v0 = vmul.f32 0.5, %v353_v25  ;;  %v313_v1 = vmul.f32 %v597_v53, %v312_v56  ;;  %v176_v3 = vpop.xlane.xlu1 %175  ;;  %v158_v4 = vpop.xlane.xlu2 %157  ;;  %v389_v13 = vmul.f32 %v310_v30, %v763_v45  ;;  %v393_v28 = vmul.f32 %v350_v5, %v761_v44  ;;  %vm319_vm13 = vmor %vm317_vm11, %vm318_vm10 }
 0x10b   :  { %v188_v6 = vpop.xlane.xlu0 %187  ;;  %v234_v7 = vmul.f32 0.5, %v233_v61  ;;  %v200_v9 = vmul.f32 %v176_v3, %v757_v38  ;;  %v194_v21 = vmul.f32 %v158_v4, %v757_v38  ;;  %vm267_vm15 = vweird.f32 %v903_v43 }
 0x10c   :  { %v314_v8 = vmul.f32 0.5, %v313_v1  ;;  %v204_v10 = vmul.f32 %v188_v6, %v757_v38  ;;  %v355_v17 = vsub.f32 1.5, %v354_v0  ;;  %vm327_vm1 = vweird.f32 %v910_v51 }
 0x10d   :  { %v944_v16 = vpop.eup %598  ;;  %v954_v29 = vadd.f32 1e-06, %v200_v9  ;;  %v235_v36 = vsub.f32 1.5, %v234_v7  ;;  %v973_v18 = vadd.f32 1e-06, %v194_v21  ;;  %v409_v25 = vmul.f32 %v959_v31, %v389_v13 }
 0x10e   :  { %v315_v14 = vsub.f32 1.5, %v314_v8  ;;  %v262_v23 = vmul.f32 %v944_v16, %v903_v43  ;;  %v961_v35 = vpop.eup %600  ;;  %v964_v40 = vadd.f32 1e-06, %v204_v10  ;;  %v356_v44 = vmul.f32 %v900_v19, %v355_v17 }
 0x10f   :  { %v966_v45 = vpop.eup %602  ;;  %v322_v22 = vmul.f32 %v961_v35, %v910_v51  ;;  %604 = vrsqrt.f32 %v954_v29  ;;  %v998_v56 = vmul.f32 %v905_v46, %v235_v36  ;;  %vm227_vm3 = vweird.f32 %v912_v52 }
 0x110   :  { %v316_v37 = vmul.f32 %v597_v53, %v315_v14  ;;  %v263_v39 = vmul.f32 %v944_v16, %v262_v23  ;;  %v222_v42 = vmul.f32 %v966_v45, %v912_v52  ;;  %606 = vrsqrt.f32 %v964_v40 }
 0x111   :  { %v323_v54 = vmul.f32 %v961_v35, %v322_v22  ;;  %v413_v62 = vmul.f32 %v959_v31, %v393_v28  ;;  %v360_v12 = vsel %vm993_vm2, %v900_v19, %v356_v44  ;;  %608 = vrsqrt.f32 %v973_v18 }
 0x112   :  { %v320_v20 = vsel %vm319_vm13, %v597_v53, %v316_v37  ;;  %v264_v41 = vmul.f32 0.5, %v263_v39  ;;  %v149_v24 = vpop.xlane.xlu1 %148  ;;  %v987_v53 = vld [vmem:[%s1271_s2] ss:$0 sm:$0xff]  ;;  %v223_v60 = vmul.f32 %v966_v45, %v222_v42  ;;  %v185_v61 = vpop.xlane.xlu2 %184  ;;  %vm268_vm4 = vweird.f32 %v944_v16 }
 0x113   :  { %v390_v50 = vmul.f32 %v320_v20, %v779_v58  ;;  %v161_v26 = vpop.xlane.xlu0 %160  ;;  %v324_v1 = vmul.f32 0.5, %v323_v54  ;;  %v191_v4 = vmul.f32 %v149_v24, %v757_v38  ;;  %v203_v6 = vmul.f32 %v185_v61, %v757_v38  ;;  %vm1057_vm9 = vmor %vm267_vm15, %vm268_vm4 }
 0x114   :  { %v265_v0 = vsub.f32 1.5, %v264_v41  ;;  %v224_v3 = vmul.f32 0.5, %v223_v60  ;;  %v195_v30 = vmul.f32 %v161_v26, %v757_v38  ;;  %v429_v8 = vadd.f32 %v987_v53, %v409_v25 }
 0x115   :  { %v325_v19 = vsub.f32 1.5, %v324_v1  ;;  %v410_v7 = vmul.f32 %v959_v31, %v390_v50  ;;  %v394_v9 = vmul.f32 %v360_v12, %v776_v57  ;;  %v240_v10 = vsel %vm1015_vm5, %v905_v46, %v998_v56  ;;  %v1029_v21 = vpop.eup %604 }
 0x116   :  { %v225_v17 = vsub.f32 1.5, %v224_v3  ;;  %v1027_v27 = vadd.f32 1e-06, %v191_v4  ;;  %v1032_v14 = vmul.f32 %v944_v16, %v265_v0  ;;  %vm328_vm6 = vweird.f32 %v961_v35  ;;  %v1038_v57 = vpop.eup %606 }
 0x117   :  { %vm228_vm7 = vweird.f32 %v966_v45  ;;  %v1036_v23 = vadd.f32 1e-06, %v195_v30  ;;  %v332_v28 = vmul.f32 %v1029_v21, %v954_v29  ;;  %v1044_v36 = vadd.f32 1e-06, %v203_v6  ;;  %v1046_v37 = vpop.eup %608  ;;  %vm1086_vm14 = vmor %vm327_vm1, %vm328_vm6 }
 0x118   :  { %v226_v13 = vmul.f32 %v966_v45, %v225_v17  ;;  %610 = vrsqrt.f32 %v1027_v27  ;;  %v326_v39 = vmul.f32 %v961_v35, %v325_v19  ;;  %vm337_vm8 = vweird.f32 %v954_v29  ;;  %vm1075_vm12 = vmor %vm227_vm3, %vm228_vm7 }
 0x119   :  { %v372_v44 = vmul.f32 %v1038_v57, %v964_v40  ;;  %v430_v22 = vadd.f32 %v987_v53, %v410_v7  ;;  %v333_v41 = vmul.f32 %v1029_v21, %v332_v28  ;;  %vm377_vm10 = vweird.f32 %v964_v40 }
 0x11a   :  { %v272_v42 = vmul.f32 %v1046_v37, %v973_v18  ;;  %vm277_vm11 = vweird.f32 %v973_v18  ;;  %v414_v50 = vmul.f32 %v959_v31, %v394_v9  ;;  %v270_v43 = vsel %vm1057_vm9, %v944_v16, %v1032_v14  ;;  %v164_v26 = vpop.xlane.xlu1 %163  ;;  %v152_v60 = vpop.xlane.xlu2 %151 }
 0x11b   :  { %vm338_vm13 = vweird.f32 %v1029_v21  ;;  %v373_v24 = vmul.f32 %v1038_v57, %v372_v44  ;;  %612 = vrsqrt.f32 %v1036_v23  ;;  %v230_v52 = vsel %vm1075_vm12, %v966_v45, %v226_v13 }
 0x11c   :  { %v334_v25 = vmul.f32 0.5, %v333_v41  ;;  %v273_v58 = vmul.f32 %v1046_v37, %v272_v42  ;;  %614 = vrsqrt.f32 %v1044_v36  ;;  %v330_v61 = vsel %vm1086_vm14, %v961_v35, %v326_v39  ;;  %vm1116_vm1 = vmor %vm337_vm8, %vm338_vm13 }
 0x11d   :  { %v374_v12 = vmul.f32 0.5, %v373_v24  ;;  %v441_v51 = vpack.c.bf16 %v430_v22, %v429_v8  ;;  %v433_v0 = vadd.f32 %v987_v53, %v413_v62  ;;  %v434_v45 = vadd.f32 %v987_v53, %v414_v50 }
 0x11e   :  { %v1099_v1 = vpop.eup %610  ;;  %v335_v3 = vsub.f32 1.5, %v334_v25  ;;  %v274_v4 = vmul.f32 0.5, %v273_v58  ;;  %v196_v30 = vmul.f32 %v164_v26, %v757_v38  ;;  %v381_v19 = vmul.f32 %v230_v52, %v791_v63 }
 0x11f   :  { %v375_v6 = vsub.f32 1.5, %v374_v12  ;;  %v242_v7 = vmul.f32 %v1099_v1, %v1027_v27  ;;  %570 = vmatmul.msk.bf16.vlgmr.msra.gmra.mxu2 %vm37_vm0, %v441_v51  ;;  %v192_v35 = vmul.f32 %v152_v60, %v757_v38  ;;  %vm278_vm15 = vweird.f32 %v1046_v37 }
 0x120   :  { %v336_v62 = vmul.f32 %v1029_v21, %v335_v3  ;;  %v275_v8 = vsub.f32 1.5, %v274_v4  ;;  %v443_v9 = vpack.c.bf16 %v434_v45, %v433_v0  ;;  %vm378_vm2 = vweird.f32 %v1038_v57  ;;  %vm279_vm3 = vmor %vm277_vm11, %vm278_vm15 }
 0x121   :  { %v1110_v17 = vpop.eup %612  ;;  %v376_v14 = vmul.f32 %v1038_v57, %v375_v6  ;;  %v243_v38 = vmul.f32 %v1099_v1, %v242_v7  ;;  %v1123_v13 = vadd.f32 1e-06, %v196_v30  ;;  %v1132_v22 = vadd.f32 1e-06, %v192_v35  ;;  %vm1155_vm4 = vmor %vm377_vm10, %vm378_vm2 }
 0x122   :  { %v615_v28 = vpop.eup %614  ;;  %v340_v39 = vsel %vm1116_vm1, %v1029_v21, %v336_v62  ;;  %v276_v44 = vmul.f32 %v1046_v37, %v275_v8  ;;  %v282_v29 = vmul.f32 %v1110_v17, %v1036_v23  ;;  %572 = vmatmul.msk.bf16.vlgmr.msra.gmra.mxu3 %vm37_vm0, %v443_v9  ;;  %v382_v20 = vmul.f32 %v240_v10, %v782_v59 }
 0x123   :  { %v385_v41 = vmul.f32 %v270_v43, %v800_v2  ;;  %v362_v21 = vmul.f32 %v615_v28, %v1044_v36  ;;  %v401_v42 = vmul.f32 %v959_v31, %v381_v19  ;;  %v391_v50 = vmul.f32 %v330_v61, %v805_v11 }
 0x124   :  { %v392_v54 = vmul.f32 %v340_v39, %v823_v32  ;;  %v280_v5 = vsel %vm279_vm3, %v1046_v37, %v276_v44  ;;  %v283_v46 = vmul.f32 %v1110_v17, %v282_v29  ;;  %v244_v18 = vmul.f32 0.5, %v243_v38 }
 0x125   :  { %v386_v2 = vmul.f32 %v280_v5, %v808_v15  ;;  %v363_v56 = vmul.f32 %v615_v28, %v362_v21  ;;  %616 = vrsqrt.f32 %v1123_v13  ;;  %v380_v11 = vsel %vm1155_vm4, %v1038_v57, %v376_v14 }
 0x126   :  { %v284_v32 = vmul.f32 0.5, %v283_v46  ;;  %vm287_vm5 = vweird.f32 %v1036_v23  ;;  %618 = vrsqrt.f32 %v1132_v22  ;;  %vm368_vm6 = vweird.f32 %v615_v28 }
 0x127   :  { %v364_v40 = vmul.f32 0.5, %v363_v56  ;;  %v402_v10 = vmul.f32 %v959_v31, %v382_v20  ;;  %v421_v37 = vadd.f32 %v987_v53, %v401_v42  ;;  %v405_v43 = vmul.f32 %v959_v31, %v385_v41 }
 0x128   :  { %v285_v15 = vsub.f32 1.5, %v284_v32  ;;  %v406_v24 = vmul.f32 %v959_v31, %v386_v2  ;;  %v411_v26 = vmul.f32 %v959_v31, %v391_v50  ;;  %v245_v16 = vsub.f32 1.5, %v244_v18 }
 0x129   :  { %v365_v57 = vsub.f32 1.5, %v364_v40  ;;  %v422_v52 = vadd.f32 %v987_v53, %v402_v10  ;;  %v412_v25 = vmul.f32 %v959_v31, %v392_v54  ;;  %v396_v58 = vmul.f32 %v380_v11, %v826_v33 }
 0x12a   :  { %vm367_vm7 = vweird.f32 %v1044_v36  ;;  %v425_v60 = vadd.f32 %v987_v53, %v405_v43  ;;  %v426_v61 = vadd.f32 %v987_v53, %v406_v24  ;;  %vm288_vm8 = vweird.f32 %v1110_v17 }
 0x12b   :  { %v617_v12 = vpop.eup %616  ;;  %v366_v51 = vmul.f32 %v615_v28, %v365_v57  ;;  %v437_v0 = vpack.c.bf16 %v422_v52, %v421_v37  ;;  %v432_v3 = vadd.f32 %v987_v53, %v412_v25  ;;  %v286_v45 = vmul.f32 %v1110_v17, %v285_v15  ;;  %vm369_vm9 = vmor %vm367_vm7, %vm368_vm6 }
 0x12c   :  { %v619_v4 = vpop.eup %618  ;;  %v292_v33 = vmul.f32 %v617_v12, %v1123_v13  ;;  %v439_v30 = vpack.c.bf16 %v426_v61, %v425_v60  ;;  %v431_v36 = vadd.f32 %v987_v53, %v411_v26  ;;  %v246_v19 = vmul.f32 %v1099_v1, %v245_v16  ;;  %vm289_vm12 = vmor %vm287_vm5, %vm288_vm8 }
 0x12d   :  { %vm248_vm10 = vweird.f32 %v1099_v1  ;;  %v370_v6 = vsel %vm369_vm9, %v615_v28, %v366_v51  ;;  %v252_v7 = vmul.f32 %v619_v4, %v1132_v22  ;;  %566 = vmatmul.msk.bf16.vlgmr.msra.gmra.mxu0 %vm37_vm0, %v437_v0  ;;  %v416_v9 = vmul.f32 %v959_v31, %v396_v58 }
 0x12e   :  { %v395_v35 = vmul.f32 %v370_v6, %v829_v34  ;;  %v293_v62 = vmul.f32 %v617_v12, %v292_v33  ;;  %568 = vmatmul.msk.bf16.vlgmr.msra.gmra.mxu1 %vm37_vm0, %v439_v30  ;;  %v442_v8 = vpack.c.bf16 %v432_v3, %v431_v36  ;;  %vm247_vm11 = vweird.f32 %v1027_v27 }
 0x12f   :  { %v253_v63 = vmul.f32 %v619_v4, %v252_v7  ;;  %vm249_vm13 = vmor %vm247_vm11, %vm248_vm10  ;;  %v290_v14 = vsel %vm289_vm12, %v1110_v17, %v286_v45  ;;  %vm298_vm14 = vweird.f32 %v617_v12  ;;  %v436_v29 = vadd.f32 %v987_v53, %v416_v9 }
 0x130   :  { %v294_v38 = vmul.f32 0.5, %v293_v62  ;;  %571 = vmatmul.msk.bf16.gmra.mxu2 %vm37_vm0, %v442_v8  ;;  %v415_v34 = vmul.f32 %v959_v31, %v395_v35  ;;  %v250_v28 = vsel %vm249_vm13, %v1099_v1, %v246_v19  ;;  %v387_v23 = vmul.f32 %v290_v14, %v847_v48 }
 0x131   :  { %v254_v39 = vmul.f32 0.5, %v253_v63  ;;  %vm258_vm15 = vweird.f32 %v619_v4  ;;  %v383_v17 = vmul.f32 %v250_v28, %v844_v47  ;;  %vm297_vm1 = vweird.f32 %v1123_v13 }
 0x132   :  { %v295_v44 = vsub.f32 1.5, %v294_v38  ;;  %v435_v27 = vadd.f32 %v987_v53, %v415_v34  ;;  %vm299_vm2 = vmor %vm297_vm1, %vm298_vm14  ;;  %vm257_vm3 = vweird.f32 %v1132_v22  ;;  %v407_v48 = vmul.f32 %v959_v31, %v387_v23 }
 0x133   :  { %v255_v20 = vsub.f32 1.5, %v254_v39  ;;  %vm259_vm4 = vmor %vm257_vm3, %vm258_vm15  ;;  %v403_v47 = vmul.f32 %v959_v31, %v383_v17 }
 0x134   :  { %v296_v41 = vmul.f32 %v617_v12, %v295_v44  ;;  %v444_v21 = vpack.c.bf16 %v436_v29, %v435_v27  ;;  %v427_v59 = vadd.f32 %v987_v53, %v407_v48 }
 0x135   :  { %v256_v42 = vmul.f32 %v619_v4, %v255_v20  ;;  %v423_v2 = vadd.f32 %v987_v53, %v403_v47 }
 0x136   :  { %v300_v1 = vsel %vm299_vm2, %v617_v12, %v296_v41  ;;  %573 = vmatmul.msk.bf16.gmra.mxu3 %vm37_vm0, %v444_v21 }
 0x137   :  { %v388_v50 = vmul.f32 %v300_v1, %v863_v55  ;;  %v260_v54 = vsel %vm259_vm4, %v619_v4, %v256_v42 }
 0x138   :  { %v384_v5 = vmul.f32 %v260_v54, %v850_v49  ;;  %v585_v49 = vld [vmem:[%s1272_s4] ss:$0 sm:$0xff] }
 0x139   :  { %v408_v13 = vmul.f32 %v959_v31, %v388_v50 }
 0x13a   :  { %v404_v46 = vmul.f32 %v959_v31, %v384_v5 }
 0x13b   :  { %v428_v22 = vadd.f32 %v987_v53, %v408_v13 }
 0x13c   :  { %v424_v18 = vadd.f32 %v987_v53, %v404_v46 }
 0x13d   :  { %v440_v55 = vpack.c.bf16 %v428_v22, %v427_v59 }
 0x13e   :  { %v438_v56 = vpack.c.bf16 %v424_v18, %v423_v2 }
 0x13f   :  { %569 = vmatmul.msk.bf16.gmra.mxu1 %vm37_vm0, %v440_v55 }
 0x140   :  { %567 = vmatmul.msk.bf16.gmra.mxu0 %vm37_vm0, %v438_v56 }
 0x1a2   :  { %v518_v11 = vpop.f32.mrf.mxu2 }
 0x1a3   :  { %v519_v31 = vadd.f32 %v585_v49, %v518_v11 }
 0x1a5   :  { %546 = vst [vmem:[%s1274_s5 + $0x40] sm:$0xff] %v519_v31  ;;  %v528_v32 = vpop.f32.mrf.mxu3 }
 0x1a6   :  { %v529_v40 = vadd.f32 %v585_v49, %v528_v32 }
 0x1a8   :  { %550 = vst [vmem:[%s1274_s5 + $0x60] sm:$0xff] %v529_v40 }
 0x1aa   :  { %v498_v53 = vpop.f32.mrf.mxu0  ;;  %v520_v10 = vpop.f32.mrf.mxu2 }
 0x1ab   :  { %v499_v37 = vadd.f32 %v585_v49, %v498_v53  ;;  %v521_v15 = vadd.f32 %v585_v49, %v520_v10  ;;  %v508_v43 = vpop.f32.mrf.mxu1 }
 0x1ac   :  { %v509_v24 = vadd.f32 %v585_v49, %v508_v43 }
 0x1ad   :  { %538 = vst [vmem:[%s1274_s5] sm:$0xff] %v499_v37  ;;  %v530_v26 = vpop.f32.mrf.mxu3 }
 0x1ae   :  { %547 = vst [vmem:[%s1274_s5 + $0x48] sm:$0xff] %v521_v15  ;;  %v531_v16 = vadd.f32 %v585_v49, %v530_v26 }
 0x1af   :  { %542 = vst [vmem:[%s1274_s5 + $0x20] sm:$0xff] %v509_v24 }
 0x1b0   :  { %551 = vst [vmem:[%s1274_s5 + $0x68] sm:$0xff] %v531_v16 }
 0x1b2   :  { %v500_v57 = vpop.f32.mrf.mxu0 }
 0x1b3   :  { %v501_v52 = vadd.f32 %v585_v49, %v500_v57  ;;  %v523_v25 = vpop.f32.mrf.mxu2  ;;  %v510_v58 = vpop.f32.mrf.mxu1 }
 0x1b4   :  { %v524_v60 = vadd.f32 %v585_v49, %v523_v25  ;;  %v511_v61 = vadd.f32 %v585_v49, %v510_v58 }
 0x1b5   :  { %539 = vst [vmem:[%s1274_s5 + $0x8] sm:$0xff] %v501_v52 }
 0x1b6   :  { %548 = vst [vmem:[%s1274_s5 + $0x50] sm:$0xff] %v524_v60 }
 0x1b7   :  { %543 = vst [vmem:[%s1274_s5 + $0x28] sm:$0xff] %v511_v61 }
 0x1b9   :  { %v533_v12 = vpop.f32.mrf.mxu3 }
 0x1ba   :  { %v534_v51 = vadd.f32 %v585_v49, %v533_v12 }
 0x1bb   :  { %v525_v0 = vpop.f32.mrf.mxu2 }
 0x1bc   :  { %v526_v3 = vadd.f32 %v585_v49, %v525_v0  ;;  %552 = vst [vmem:[%s1274_s5 + $0x70] sm:$0xff] %v534_v51  ;;  %v513_v4 = vpop.f32.mrf.mxu1 }
 0x1bd   :  { %v503_v45 = vpop.f32.mrf.mxu0  ;;  %v514_v33 = vadd.f32 %v585_v49, %v513_v4 }
 0x1be   :  { %549 = vst [vmem:[%s1274_s5 + $0x58] sm:$0xff] %v526_v3  ;;  %v504_v30 = vadd.f32 %v585_v49, %v503_v45 }
 0x1bf   :  { %544 = vst [vmem:[%s1274_s5 + $0x30] sm:$0xff] %v514_v33 }
 0x1c0   :  { %540 = vst [vmem:[%s1274_s5 + $0x10] sm:$0xff] %v504_v30 }
 0x1c1   :  { %v535_v36 = vpop.f32.mrf.mxu3 }
 0x1c2   :  { %v536_v19 = vadd.f32 %v585_v49, %v535_v36 }
 0x1c4   :  { %553 = vst [vmem:[%s1274_s5 + $0x78] sm:$0xff] %v536_v19  ;;  %v515_v6 = vpop.f32.mrf.mxu1 }
 0x1c5   :  { %v505_v7 = vpop.f32.mrf.mxu0  ;;  %v516_v35 = vadd.f32 %v585_v49, %v515_v6 }
 0x1c6   :  { %v506_v62 = vadd.f32 %v585_v49, %v505_v7 }
 0x1c7   :  { %545 = vst [vmem:[%s1274_s5 + $0x38] sm:$0xff] %v516_v35 }
 0x1c8   :  { %541 = vst [vmem:[%s1274_s5 + $0x18] sm:$0xff] %v506_v62 }

// kernel: vss_block_forward.11
= control target key start
LH: loop header
LB: loop body
LE: loop exit
PB: predicated region body
PF: predicated region fallthrough
CT: control target
= control target key end

     0   :  { %vm2427_vm0 = vcmask 523264   ;;  %v1083_v32 = vmov 64.0   ;;  %s2410_s0 = inlined_call_operand.vmem [shape: f32[128,64], index: 0, kind: input, shape index: {}]   ;;  %s2411_s2 = inlined_call_operand.vmem [shape: f32[1,64], index: 2, kind: input, shape index: {}]   ;;  %s2412_s3 = inlined_call_operand.vmem [shape: f32[1,64], index: 3, kind: input, shape index: {}]   ;;  %s2413_s1 = inlined_call_operand.vmem [shape: f32[128,64], index: 1, kind: input, shape index: {}]   ;;  %s2414_s4 = inlined_call_operand.vmem [shape: bf16[64,32], index: 4, kind: input, shape index: {}]   ;;  %s2415_s5 = inlined_call_operand.vmem [shape: f32[128,32], index: 5, kind: input, shape index: {}]   ;;  %s2416_s6 = inlined_call_operand.vmem [shape: f32[128,32], index: 6, kind: output, shape index: {}]  }
   0x1   :  { %v36_v0 = vld [vmem:[%s2410_s0 + $0x60] sm:$0xff]  ;;  %v1137_v6 = vld [vmem:[%s2410_s0 + $0x68] sm:$0xff]  ;;  %v1168_v14 = vld [vmem:[%s2410_s0 + $0x50] sm:$0xff]  ;;  %985 = vrcp.f32 %v1083_v32 }
   0x2   :  { %v32_v1 = vld [vmem:[%s2410_s0 + $0x40] sm:$0xff]  ;;  %v77_v3 = vsel %vm2427_vm0, %v36_v0, 0.0  ;;  %v1142_v7 = vld [vmem:[%s2410_s0 + $0x48] sm:$0xff]  ;;  %v80_v9 = vsel %vm2427_vm0, %v1137_v6, 0.0  ;;  %v71_v17 = vsel %vm2427_vm0, %v1168_v14, 0.0  ;;  %v1179_v18 = vld [vmem:[%s2410_s0 + $0x58] sm:$0xff] }
   0x3   :  { %v1128_v2 = vld [vmem:[%s2410_s0] sm:$0xff]  ;;  %v65_v4 = vsel %vm2427_vm0, %v32_v1, 0.0  ;;  %78 = vadd.xlane.f32.xlu1 %v77_v3  ;;  %v1147_v8 = vld [vmem:[%s2410_s0 + $0x8] sm:$0xff]  ;;  %v68_v10 = vsel %vm2427_vm0, %v1142_v7, 0.0  ;;  %v1184_v19 = vld [vmem:[%s2410_s0 + $0x70] sm:$0xff]  ;;  %v74_v21 = vsel %vm2427_vm0, %v1179_v18, 0.0 }
   0x4   :  { %v41_v5 = vsel %vm2427_vm0, %v1128_v2, 0.0  ;;  %66 = vadd.xlane.f32.xlu0 %v65_v4  ;;  %v44_v11 = vsel %vm2427_vm0, %v1147_v8, 0.0  ;;  %v1158_v12 = vld [vmem:[%s2410_s0 + $0x20] sm:$0xff]  ;;  %v1163_v13 = vld [vmem:[%s2410_s0 + $0x28] sm:$0xff]  ;;  %v1189_v20 = vld [vmem:[%s2410_s0 + $0x78] sm:$0xff]  ;;  %v83_v22 = vsel %vm2427_vm0, %v1184_v19, 0.0 }
   0x5   :  { %42 = vadd.xlane.f32.xlu2 %v41_v5  ;;  %v53_v15 = vsel %vm2427_vm0, %v1158_v12, 0.0  ;;  %v56_v16 = vsel %vm2427_vm0, %v1163_v13, 0.0  ;;  %v86_v23 = vsel %vm2427_vm0, %v1189_v20, 0.0  ;;  %v1200_v24 = vld [vmem:[%s2410_s0 + $0x10] sm:$0xff]  ;;  %v1205_v25 = vld [vmem:[%s2410_s0 + $0x18] sm:$0xff] }
   0x6   :  { %v1210_v26 = vld [vmem:[%s2410_s0 + $0x30] sm:$0xff]  ;;  %v47_v27 = vsel %vm2427_vm0, %v1200_v24, 0.0  ;;  %v50_v28 = vsel %vm2427_vm0, %v1205_v25, 0.0  ;;  %v1221_v30 = vld [vmem:[%s2410_s0 + $0x38] sm:$0xff] }
   0x7   :  { %v59_v29 = vsel %vm2427_vm0, %v1210_v26, 0.0  ;;  %v62_v31 = vsel %vm2427_vm0, %v1221_v30, 0.0  ;;  %v986_v33 = vpop.eup %985 }
   0x8   :  { %v90_v34 = vmul.f32 64.0, %v986_v33  ;;  %vm94_vm1 = vweird.f32 %v986_v33 }
   0xa   :  { %v91_v35 = vsub.f32 1.0, %v90_v34 }
   0xb   :  { %81 = vadd.xlane.f32.xlu1 %v80_v9 }
   0xc   :  { %69 = vadd.xlane.f32.xlu0 %v68_v10  ;;  %v92_v36 = vmul.f32 %v986_v33, %v91_v35 }
   0xd   :  { %45 = vadd.xlane.f32.xlu2 %v44_v11 }
   0xe   :  { %v93_v37 = vadd.f32 %v986_v33, %v92_v36 }
  0x10   :  { %v1225_v38 = vsel %vm94_vm1, %v986_v33, %v93_v37 }
  0x13   :  { %57 = vadd.xlane.f32.xlu1 %v56_v16 }
  0x14   :  { %54 = vadd.xlane.f32.xlu0 %v53_v15 }
  0x15   :  { %72 = vadd.xlane.f32.xlu2 %v71_v17 }
  0x1b   :  { %84 = vadd.xlane.f32.xlu1 %v83_v22 }
  0x1c   :  { %75 = vadd.xlane.f32.xlu0 %v74_v21 }
  0x1d   :  { %87 = vadd.xlane.f32.xlu2 %v86_v23 }
  0x23   :  { %51 = vadd.xlane.f32.xlu1 %v50_v28 }
  0x24   :  { %48 = vadd.xlane.f32.xlu0 %v47_v27 }
  0x25   :  { %60 = vadd.xlane.f32.xlu2 %v59_v29 }
  0x2c   :  { %63 = vadd.xlane.f32.xlu0 %v62_v31 }
  0x76   :  { %v79_v39 = vpop.xlane.xlu1 %78 }
  0x77   :  { %v67_v40 = vpop.xlane.xlu0 %66  ;;  %v108_v41 = vmul.f32 %v1225_v38, %v79_v39 }
  0x78   :  { %v104_v42 = vmul.f32 %v1225_v38, %v67_v40  ;;  %v43_v43 = vpop.xlane.xlu2 %42 }
  0x79   :  { %v1229_v44 = vsub.f32 %v36_v0, %v108_v41  ;;  %v96_v56 = vmul.f32 %v1225_v38, %v43_v43 }
  0x7a   :  { %v1231_v45 = vsub.f32 %v32_v1, %v104_v42 }
  0x7b   :  { %v140_v47 = vmul.f32 %v1229_v44, %v1229_v44  ;;  %v1259_v63 = vsub.f32 %v1128_v2, %v96_v56 }
  0x7c   :  { %v136_v46 = vmul.f32 %v1231_v45, %v1231_v45 }
  0x7d   :  { %v180_v49 = vsel %vm2427_vm0, %v140_v47, 0.0  ;;  %v128_v10 = vmul.f32 %v1259_v63, %v1259_v63 }
  0x7e   :  { %v168_v48 = vsel %vm2427_vm0, %v136_v46, 0.0  ;;  %v82_v50 = vpop.xlane.xlu1 %81  ;;  %181 = vadd.xlane.f32.xlu0 %v180_v49 }
  0x7f   :  { %v70_v51 = vpop.xlane.xlu0 %69  ;;  %169 = vadd.xlane.f32.xlu1 %v168_v48  ;;  %v109_v52 = vmul.f32 %v1225_v38, %v82_v50 }
  0x80   :  { %v105_v53 = vmul.f32 %v1225_v38, %v70_v51  ;;  %v46_v54 = vpop.xlane.xlu2 %45 }
  0x81   :  { %v97_v55 = vmul.f32 %v1225_v38, %v46_v54  ;;  %v1244_v57 = vsub.f32 %v1137_v6, %v109_v52 }
  0x82   :  { %v1247_v58 = vsub.f32 %v1142_v7, %v105_v53 }
  0x83   :  { %v1250_v59 = vsub.f32 %v1147_v8, %v97_v55  ;;  %v141_v60 = vmul.f32 %v1244_v57, %v1244_v57 }
  0x84   :  { %v137_v61 = vmul.f32 %v1247_v58, %v1247_v58 }
  0x85   :  { %v129_v62 = vmul.f32 %v1250_v59, %v1250_v59  ;;  %v183_v0 = vsel %vm2427_vm0, %v141_v60, 0.0 }
  0x86   :  { %v171_v1 = vsel %vm2427_vm0, %v137_v61, 0.0  ;;  %v58_v5 = vpop.xlane.xlu1 %57 }
  0x87   :  { %v55_v3 = vpop.xlane.xlu0 %54  ;;  %184 = vadd.xlane.f32.xlu1 %v183_v0  ;;  %172 = vadd.xlane.f32.xlu2 %v171_v1  ;;  %v147_v4 = vsel %vm2427_vm0, %v129_v62, 0.0  ;;  %v101_v8 = vmul.f32 %v1225_v38, %v58_v5  ;;  %v1340_v62 = vld [vmem:[%s2413_s1 + $0x40] sm:$0xff] }
  0x88   :  { %v100_v6 = vmul.f32 %v1225_v38, %v55_v3  ;;  %148 = vadd.xlane.f32.xlu0 %v147_v4  ;;  %v73_v7 = vpop.xlane.xlu2 %72  ;;  %v464_v0 = vsub.f32 0.0, %v1340_v62 }
  0x89   :  { %v106_v9 = vmul.f32 %v1225_v38, %v73_v7  ;;  %v1276_v15 = vsub.f32 %v1163_v13, %v101_v8 }
  0x8a   :  { %v1268_v2 = vsub.f32 %v1158_v12, %v100_v6  ;;  %v144_v12 = vsel %vm2427_vm0, %v128_v10, 0.0  ;;  %v488_v1 = vmul.f32 1.442695, %v464_v0  ;;  %v1361_v10 = vld [vmem:[%s2413_s1 + $0x60] sm:$0xff] }
  0x8b   :  { %v1273_v11 = vsub.f32 %v1168_v14, %v106_v9  ;;  %v133_v29 = vmul.f32 %v1276_v15, %v1276_v15  ;;  %v969_v9 = vld [vmem:[%s2414_s4 + $0x18] sm:$0xff] }
  0x8c   :  { %v132_v16 = vmul.f32 %v1268_v2, %v1268_v2  ;;  %987 = vpow2.f32 %v488_v1  ;;  %971 = vmatpush.bf16.msra.mxu2 %v969_v9  ;;  %972 = vmatpush.bf16.msra.mxu3 %v969_v9 }
  0x8d   :  { %v138_v17 = vmul.f32 %v1273_v11, %v1273_v11  ;;  %v159_v36 = vsel %vm2427_vm0, %v133_v29, 0.0  ;;  %876 = vmatpush.bf16.msra.mxu0 %v969_v9  ;;  %970 = vmatpush.bf16.msra.mxu1 %v969_v9 }
  0x8e   :  { %v156_v21 = vsel %vm2427_vm0, %v132_v16, 0.0  ;;  %v85_v14 = vpop.xlane.xlu1 %84 }
  0x8f   :  { %v76_v22 = vpop.xlane.xlu0 %75  ;;  %157 = vadd.xlane.f32.xlu1 %v156_v21  ;;  %145 = vadd.xlane.f32.xlu2 %v144_v12  ;;  %v174_v23 = vsel %vm2427_vm0, %v138_v17, 0.0  ;;  %v110_v28 = vmul.f32 %v1225_v38, %v85_v14 }
  0x90   :  { %v107_v27 = vmul.f32 %v1225_v38, %v76_v22  ;;  %175 = vadd.xlane.f32.xlu0 %v174_v23  ;;  %v88_v13 = vpop.xlane.xlu2 %87  ;;  %v468_v22 = vsub.f32 0.0, %v1361_v10 }
  0x91   :  { %v111_v31 = vmul.f32 %v1225_v38, %v88_v13  ;;  %v1297_v34 = vsub.f32 %v1184_v19, %v110_v28 }
  0x92   :  { %v1291_v32 = vsub.f32 %v1179_v18, %v107_v27  ;;  %v988_v5 = vpop.eup %987  ;;  %v968_v27 = vld [vmem:[%s2414_s4 + $0x10] sm:$0xff]  ;;  %v496_v29 = vmul.f32 1.442695, %v468_v22 }
  0x93   :  { %v1294_v33 = vsub.f32 %v1189_v20, %v111_v31  ;;  %v142_v43 = vmul.f32 %v1297_v34, %v1297_v34  ;;  %v1349_v6 = vadd.f32 1.0, %v988_v5  ;;  %974 = vmatpush.bf16.msra.mxu2 %v968_v27  ;;  %975 = vmatpush.bf16.msra.mxu3 %v968_v27 }
  0x94   :  { %v139_v35 = vmul.f32 %v1291_v32, %v1291_v32  ;;  %877 = vmatpush.bf16.msra.mxu0 %v968_v27  ;;  %973 = vmatpush.bf16.msra.mxu1 %v968_v27 }
  0x95   :  { %v143_v37 = vmul.f32 %v1294_v33, %v1294_v33  ;;  %v186_v51 = vsel %vm2427_vm0, %v142_v43, 0.0  ;;  %vm645_vm2 = vweird.f32 %v1349_v6  ;;  %v651_v1 = vand.u32 2147483648, %v1349_v6 }
  0x96   :  { %v177_v39 = vsel %vm2427_vm0, %v139_v35, 0.0  ;;  %v52_v20 = vpop.xlane.xlu1 %51 }
  0x97   :  { %178 = vadd.xlane.f32.xlu1 %v177_v39  ;;  %v49_v40 = vpop.xlane.xlu0 %48  ;;  %160 = vadd.xlane.f32.xlu2 %v159_v36  ;;  %v189_v18 = vsel %vm2427_vm0, %v143_v37, 0.0  ;;  %v99_v42 = vmul.f32 %v1225_v38, %v52_v20  ;;  %v967_v39 = vld [vmem:[%s2414_s4 + $0x8] sm:$0xff] }
  0x98   :  { %v98_v41 = vmul.f32 %v1225_v38, %v49_v40  ;;  %190 = vadd.xlane.f32.xlu0 %v189_v18  ;;  %v61_v19 = vpop.xlane.xlu2 %60  ;;  %977 = vmatpush.bf16.msra.mxu2 %v967_v39 }
  0x99   :  { %v102_v46 = vmul.f32 %v1225_v38, %v61_v19  ;;  %v1318_v49 = vsub.f32 %v1205_v25, %v99_v42  ;;  %978 = vmatpush.bf16.msra.mxu3 %v967_v39  ;;  %878 = vmatpush.bf16.msra.mxu0 %v967_v39 }
  0x9a   :  { %v1312_v47 = vsub.f32 %v1200_v24, %v98_v41  ;;  %976 = vmatpush.bf16.msra.mxu1 %v967_v39 }
  0x9b   :  { %v1315_v48 = vsub.f32 %v1210_v26, %v102_v46  ;;  %2437 = vst [vmem:[#allocation3_spill] sm:$0xff] %v1318_v49  ;;  %v131_v25 = vmul.f32 %v1318_v49, %v1318_v49 }
  0x9c   :  { %v130_v50 = vmul.f32 %v1312_v47, %v1312_v47 }
  0x9d   :  { %2436 = vst [vmem:[#allocation2_spill] sm:$0xff] %v1315_v48  ;;  %v134_v52 = vmul.f32 %v1315_v48, %v1315_v48  ;;  %v153_v60 = vsel %vm2427_vm0, %v131_v25, 0.0  ;;  %v1412_v25 = vld [vmem:[%s2413_s1 + $0x68] sm:$0xff] }
  0x9e   :  { %v150_v53 = vsel %vm2427_vm0, %v130_v50, 0.0 }
  0x9f   :  { %151 = vadd.xlane.f32.xlu1 %v150_v53  ;;  %v64_v54 = vpop.xlane.xlu0 %63  ;;  %187 = vadd.xlane.f32.xlu2 %v186_v51  ;;  %v162_v24 = vsel %vm2427_vm0, %v134_v52, 0.0  ;;  %v966_v53 = vld [vmem:[%s2414_s4] sm:$0xff] }
  0xa0   :  { %v103_v26 = vmul.f32 %v1225_v38, %v64_v54  ;;  %163 = vadd.xlane.f32.xlu0 %v162_v24  ;;  %980 = vmatpush.bf16.msra.mxu2 %v966_v53 }
  0xa1   :  { %981 = vmatpush.bf16.msra.mxu3 %v966_v53  ;;  %879 = vmatpush.bf16.msra.mxu0 %v966_v53 }
  0xa2   :  { %v1331_v55 = vsub.f32 %v1221_v30, %v103_v26  ;;  %v1346_v30 = vld [vmem:[%s2413_s1 + $0x48] sm:$0xff]  ;;  %979 = vmatpush.bf16.msra.mxu1 %v966_v53 }
  0xa3   :  { %v465_v3 = vsub.f32 0.0, %v1346_v30 }
  0xa4   :  { %2438 = vst [vmem:[#allocation4_spill] sm:$0xff] %v1331_v55  ;;  %v135_v56 = vmul.f32 %v1331_v55, %v1331_v55 }
  0xa5   :  { %v490_v4 = vmul.f32 1.442695, %v465_v3 }
  0xa6   :  { %v165_v61 = vsel %vm2427_vm0, %v135_v56, 0.0 }
  0xa7   :  { %166 = vadd.xlane.f32.xlu1 %v165_v61  ;;  %154 = vadd.xlane.f32.xlu2 %v153_v60  ;;  %989 = vpow2.f32 %v490_v4 }
  0xa8   :  { %991 = vrcp.f32 %v1349_v6 }
  0xad   :  { %v990_v7 = vpop.eup %989 }
  0xae   :  { %v1351_v8 = vadd.f32 1.0, %v990_v7  ;;  %v1363_v21 = vpop.eup %991 }
  0xaf   :  { %v641_v28 = vmul.f32 %v1363_v21, %v1349_v6  ;;  %vm646_vm3 = vweird.f32 %v1363_v21 }
  0xb0   :  { %993 = vrcp.f32 %v1351_v8  ;;  %vm660_vm4 = vweird.f32 %v1351_v8  ;;  %vm1427_vm6 = vmor %vm645_vm2, %vm646_vm3  ;;  %v666_v27 = vand.u32 2147483648, %v1351_v8 }
  0xb1   :  { %v642_v40 = vsub.f32 1.0, %v641_v28 }
  0xb2   :  { %v667_v53 = vor.u32 1.1754944e-38, %v666_v27 }
  0xb3   :  { %v643_v54 = vmul.f32 %v1363_v21, %v642_v40 }
  0xb5   :  { %v644_v0 = vadd.f32 %v1363_v21, %v643_v54 }
  0xb6   :  { %v1373_v13 = vpop.eup %993 }
  0xb7   :  { %v656_v35 = vmul.f32 %v1373_v13, %v1351_v8  ;;  %vm661_vm5 = vweird.f32 %v1373_v13 }
  0xb8   :  { %vm1443_vm7 = vmor %vm660_vm4, %vm661_vm5 }
  0xb9   :  { %v657_v50 = vsub.f32 1.0, %v656_v35 }
  0xbb   :  { %v658_v26 = vmul.f32 %v1373_v13, %v657_v50 }
  0xf1   :  { %v182_v17 = vpop.xlane.xlu0 %181 }
  0xf2   :  { %v170_v16 = vpop.xlane.xlu1 %169  ;;  %v204_v14 = vmul.f32 %v182_v17, %v1225_v38  ;;  %v649_v17 = vand.u32 2147483647, %v1349_v6  ;;  %v664_v6 = vand.u32 2147483647, %v1351_v8 }
  0xf3   :  { %v200_v12 = vmul.f32 %v170_v16, %v1225_v38 }
  0xf4   :  { %v1378_v31 = vadd.f32 1e-05, %v204_v14  ;;  %v659_v14 = vadd.f32 %v1373_v13, %v658_v26  ;;  %vm1461_vm8 = vcmp.eq.f32.partialorder %v649_v17, 8.507059e+37  ;;  %vm1472_vm10 = vcmp.eq.f32.partialorder %v664_v6, 8.507059e+37 }
  0xf5   :  { %v1367_v23 = vadd.f32 1e-05, %v200_v12  ;;  %v469_v12 = vsub.f32 0.0, %v1412_v25 }
  0xf6   :  { %vm350_vm15 = vweird.f32 %v1378_v31 }
  0xf7   :  { %995 = vrsqrt.f32 %v1367_v23  ;;  %vm310_vm11 = vweird.f32 %v1367_v23 }
  0xf8   :  { %997 = vpow2.f32 %v496_v29 }
  0xf9   :  { %999 = vrsqrt.f32 %v1378_v31 }
  0xfa   :  { %v185_v36 = vpop.xlane.xlu1 %184  ;;  %v173_v37 = vpop.xlane.xlu2 %172 }
  0xfb   :  { %v205_v18 = vmul.f32 %v185_v36, %v1225_v38  ;;  %v149_v20 = vpop.xlane.xlu0 %148  ;;  %v201_v41 = vmul.f32 %v173_v37, %v1225_v38 }
  0xfc   :  { %v193_v19 = vmul.f32 %v149_v20, %v1225_v38  ;;  %v652_v20 = vor.u32 1.1754944e-38, %v651_v1 }
  0xfd   :  { %v1388_v42 = vpop.eup %995  ;;  %v1391_v43 = vadd.f32 1e-05, %v205_v18  ;;  %v1393_v46 = vadd.f32 1e-05, %v201_v41  ;;  %v648_v18 = vsel %vm1427_vm6, %v1363_v21, %v644_v0  ;;  %v498_v21 = vmul.f32 1.442695, %v469_v12 }
  0xfe   :  { %v305_v51 = vmul.f32 %v1388_v42, %v1367_v23  ;;  %v1397_v52 = vadd.f32 1e-05, %v193_v19  ;;  %v998_v56 = vpop.eup %997  ;;  %vm311_vm9 = vweird.f32 %v1388_v42  ;;  %v653_v17 = vsel %vm1461_vm8, %v652_v20, %v648_v18 }
  0xff   :  { %1001 = vrsqrt.f32 %v1391_v43  ;;  %v1417_v3 = vpop.eup %999  ;;  %v1437_v28 = vadd.f32 1.0, %v998_v56  ;;  %vm1499_vm13 = vmor %vm310_vm11, %vm311_vm9  ;;  %vm320_vm14 = vweird.f32 %v1393_v46  ;;  %vm360_vm3 = vweird.f32 %v1391_v43 }
 0x100   :  { %v306_v24 = vmul.f32 %v1388_v42, %v305_v51  ;;  %1003 = vrsqrt.f32 %v1393_v46  ;;  %v345_v35 = vmul.f32 %v1417_v3, %v1378_v31  ;;  %v663_v51 = vsel %vm1443_vm7, %v1373_v13, %v659_v14 }
 0x101   :  { %1005 = vrsqrt.f32 %v1397_v52  ;;  %vm351_vm2 = vweird.f32 %v1417_v3  ;;  %vm240_vm4 = vweird.f32 %v1397_v52 }
 0x102   :  { %v158_v60 = vpop.xlane.xlu1 %157  ;;  %v146_v61 = vpop.xlane.xlu2 %145  ;;  %v307_v4 = vmul.f32 0.5, %v306_v24  ;;  %v346_v54 = vmul.f32 %v1417_v3, %v345_v35  ;;  %v668_v35 = vsel %vm1472_vm10, %v667_v53, %v663_v51  ;;  %vm1581_vm6 = vmor %vm350_vm15, %vm351_vm2 }
 0x103   :  { %v196_v5 = vmul.f32 %v158_v60, %v1225_v38  ;;  %v176_v7 = vpop.xlane.xlu0 %175  ;;  %v192_v40 = vmul.f32 %v146_v61, %v1225_v38 }
 0x104   :  { %v202_v9 = vmul.f32 %v176_v7, %v1225_v38  ;;  %v308_v39 = vsub.f32 1.5, %v307_v4  ;;  %v347_v14 = vmul.f32 0.5, %v346_v54 }
 0x105   :  { %v1433_v22 = vadd.f32 1e-05, %v196_v5  ;;  %v1439_v29 = vpop.eup %1001  ;;  %v1481_v1 = vadd.f32 1e-05, %v192_v40 }
 0x106   :  { %v1448_v37 = vpop.eup %1003  ;;  %v1459_v50 = vadd.f32 1e-05, %v202_v9  ;;  %v309_v61 = vmul.f32 %v1388_v42, %v308_v39  ;;  %v355_v13 = vmul.f32 %v1439_v29, %v1391_v43  ;;  %v348_v54 = vsub.f32 1.5, %v347_v14 }
 0x107   :  { %v1454_v41 = vpop.eup %1005  ;;  %v315_v19 = vmul.f32 %v1448_v37, %v1393_v46  ;;  %1007 = vrsqrt.f32 %v1433_v22  ;;  %vm321_vm12 = vweird.f32 %v1448_v37  ;;  %vm361_vm5 = vweird.f32 %v1439_v29 }
 0x108   :  { %1009 = vrcp.f32 %v1437_v28  ;;  %v235_v0 = vmul.f32 %v1454_v41, %v1397_v52  ;;  %v356_v6 = vmul.f32 %v1439_v29, %v355_v13  ;;  %v313_v18 = vsel %vm1499_vm13, %v1388_v42, %v309_v61  ;;  %vm1516_vm1 = vmor %vm320_vm14, %vm321_vm12 }
 0x109   :  { %v316_v24 = vmul.f32 %v1448_v37, %v315_v19  ;;  %1011 = vrsqrt.f32 %v1459_v50  ;;  %v392_v61 = vmul.f32 %v313_v18, %v1231_v45  ;;  %vm241_vm7 = vweird.f32 %v1454_v41  ;;  %vm1614_vm9 = vmor %vm360_vm3, %vm361_vm5 }
 0x10a   :  { %v179_v26 = vpop.xlane.xlu1 %178  ;;  %v161_v56 = vpop.xlane.xlu2 %160  ;;  %1013 = vpow2.f32 %v498_v21  ;;  %v236_v39 = vmul.f32 %v1454_v41, %v235_v0  ;;  %v1525_v21 = vmul.f32 %v653_v17, %v1340_v62  ;;  %v357_v62 = vmul.f32 0.5, %v356_v6  ;;  %v1567_v6 = vld [vmem:[%s2412_s3] ss:$0 sm:$0xff]  ;;  %vm1626_vm10 = vmor %vm240_vm4, %vm241_vm7 }
 0x10b   :  { %v191_v4 = vpop.xlane.xlu0 %190  ;;  %v317_v5 = vmul.f32 0.5, %v316_v24  ;;  %v203_v7 = vmul.f32 %v179_v26, %v1225_v38  ;;  %v197_v16 = vmul.f32 %v161_v56, %v1225_v38  ;;  %1015 = vrsqrt.f32 %v1481_v1 }
 0x10c   :  { %v207_v9 = vmul.f32 %v191_v4, %v1225_v38  ;;  %v1533_v26 = vmul.f32 %v668_v35, %v1346_v30  ;;  %v237_v13 = vmul.f32 0.5, %v236_v39  ;;  %v358_v14 = vsub.f32 1.5, %v357_v62 }
 0x10d   :  { %v1490_v12 = vpop.eup %1007  ;;  %v318_v27 = vsub.f32 1.5, %v317_v5  ;;  %v1506_v40 = vadd.f32 1e-05, %v203_v7  ;;  %v1522_v53 = vadd.f32 1e-05, %v197_v16  ;;  %v349_v7 = vmul.f32 %v1417_v3, %v348_v54 }
 0x10e   :  { %v1495_v36 = vpop.eup %1009  ;;  %v1513_v19 = vadd.f32 1e-05, %v207_v9  ;;  %v265_v51 = vmul.f32 %v1490_v12, %v1433_v22  ;;  %vm270_vm8 = vweird.f32 %v1433_v22  ;;  %vm330_vm11 = vweird.f32 %v1459_v50 }
 0x10f   :  { %v319_v20 = vmul.f32 %v1448_v37, %v318_v27  ;;  %v1527_v42 = vpop.eup %1011  ;;  %v1537_v56 = vmul.f32 %v1495_v36, %v1437_v28  ;;  %1017 = vrsqrt.f32 %v1506_v40  ;;  %v238_v27 = vsub.f32 1.5, %v237_v13 }
 0x110   :  { %v1014_v60 = vpop.eup %1013  ;;  %1019 = vrsqrt.f32 %v1513_v19  ;;  %v266_v45 = vmul.f32 %v1490_v12, %v265_v51  ;;  %v325_v5 = vmul.f32 %v1527_v42, %v1459_v50  ;;  %vm271_vm12 = vweird.f32 %v1490_v12 }
 0x111   :  { %v323_v46 = vsel %vm1516_vm1, %v1448_v37, %v319_v20  ;;  %v1544_v37 = vld [vmem:[%s2411_s2] ss:$0 sm:$0xff]  ;;  %v1550_v4 = vpop.eup %1015  ;;  %1021 = vrsqrt.f32 %v1522_v53  ;;  %v1559_v17 = vadd.f32 1.0, %v1014_v60  ;;  %vm230_vm13 = vweird.f32 %v1481_v1  ;;  %vm1667_vm14 = vmor %vm270_vm8, %vm271_vm12 }
 0x112   :  { %v188_v24 = vpop.xlane.xlu2 %187  ;;  %v152_v0 = vpop.xlane.xlu1 %151  ;;  %2451 = vst [vmem:[#allocation5_spill] sm:$0xff] %v1544_v37  ;;  %v393_v30 = vmul.f32 %v323_v46, %v1247_v58  ;;  %v412_v23 = vmul.f32 %v1544_v37, %v392_v61  ;;  %v225_v39 = vmul.f32 %v1550_v4, %v1481_v1  ;;  %v267_v54 = vmul.f32 0.5, %v266_v45 }
 0x113   :  { %v194_v9 = vmul.f32 %v152_v0, %v1225_v38  ;;  %v164_v16 = vpop.xlane.xlu0 %163  ;;  %v206_v35 = vmul.f32 %v188_v24, %v1225_v38  ;;  %v326_v46 = vmul.f32 %v1527_v42, %v325_v5  ;;  %v353_v61 = vsel %vm1581_vm6, %v1417_v3, %v349_v7 }
 0x114   :  { %v413_v20 = vmul.f32 %v1544_v37, %v393_v30  ;;  %v198_v24 = vmul.f32 %v164_v16, %v1225_v38  ;;  %v359_v0 = vmul.f32 %v1439_v29, %v358_v14  ;;  %v239_v30 = vmul.f32 %v1454_v41, %v238_v27 }
 0x115   :  { %v1572_v18 = vadd.f32 1e-05, %v194_v9  ;;  %v1575_v8 = vpop.eup %1017  ;;  %v1596_v62 = vadd.f32 1e-05, %v206_v35  ;;  %v432_v45 = vadd.f32 %v1567_v6, %v412_v23  ;;  %v226_v5 = vmul.f32 %v1550_v4, %v225_v39 }
 0x116   :  { %v1588_v60 = vpop.eup %1019  ;;  %v335_v31 = vmul.f32 %v1575_v8, %v1506_v40  ;;  %v433_v16 = vadd.f32 %v1567_v6, %v413_v20  ;;  %v268_v27 = vsub.f32 1.5, %v267_v54  ;;  %v327_v35 = vmul.f32 0.5, %v326_v46 }
 0x117   :  { %1023 = vrsqrt.f32 %v1572_v18  ;;  %v1598_v13 = vpop.eup %1021  ;;  %v375_v3 = vmul.f32 %v1588_v60, %v1513_v19  ;;  %v1619_v39 = vadd.f32 1e-05, %v198_v24  ;;  %v396_v51 = vmul.f32 %v353_v61, %v1229_v44 }
 0x118   :  { %v275_v7 = vmul.f32 %v1598_v13, %v1522_v53  ;;  %v336_v23 = vmul.f32 %v1575_v8, %v335_v31  ;;  %1025 = vrsqrt.f32 %v1596_v62  ;;  %v363_v54 = vsel %vm1614_vm9, %v1439_v29, %v359_v0 }
 0x119   :  { %2456 = vst [vmem:[#allocation6_spill] sm:$0xff] %v1619_v39  ;;  %v243_v44 = vsel %vm1626_vm10, %v1454_v41, %v239_v30  ;;  %v227_v61 = vmul.f32 0.5, %v226_v5  ;;  %v376_v31 = vmul.f32 %v1588_v60, %v375_v3  ;;  %v785_v58 = vmul.f32 %v1533_v26, %v433_v16 }
 0x11a   :  { %v155_v9 = vpop.xlane.xlu2 %154  ;;  %v276_v43 = vmul.f32 %v1598_v13, %v275_v7  ;;  %v167_v52 = vpop.xlane.xlu1 %166  ;;  %v784_v7 = vmul.f32 %v1525_v21, %v432_v45  ;;  %v269_v29 = vmul.f32 %v1490_v12, %v268_v27  ;;  %v328_v0 = vsub.f32 1.5, %v327_v35 }
 0x11b   :  { %v195_v46 = vmul.f32 %v155_v9, %v1225_v38  ;;  %v337_v14 = vmul.f32 0.5, %v336_v23  ;;  %1027 = vrsqrt.f32 %v1619_v39  ;;  %v199_v30 = vmul.f32 %v167_v52, %v1225_v38 }
 0x11c   :  { %v277_v41 = vmul.f32 0.5, %v276_v43  ;;  %v796_v9 = vpack.c.bf16 %v785_v58, %v784_v7  ;;  %v397_v5 = vmul.f32 %v363_v54, %v1244_v57  ;;  %v1656_v26 = vmul.f32 %v1544_v37, %v396_v51 }
 0x11d   :  { %v1641_v24 = vpop.eup %1023  ;;  %v1653_v21 = vadd.f32 1e-05, %v195_v46  ;;  %v1661_v16 = vmul.f32 %v243_v44, %v1250_v59  ;;  %vm331_vm15 = vweird.f32 %v1527_v42  ;;  %v228_v57 = vsub.f32 1.5, %v227_v61 }
 0x11e   :  { %v245_v3 = vmul.f32 %v1641_v24, %v1572_v18  ;;  %v1658_v45 = vpop.eup %1025  ;;  %v377_v58 = vmul.f32 0.5, %v376_v31  ;;  %962 = vmatmul.msk.bf16.vlgmr.msra.gmra.mxu2 %vm2427_vm0, %v796_v9  ;;  %v273_v27 = vsel %vm1667_vm14, %v1490_v12, %v269_v29  ;;  %v329_v59 = vmul.f32 %v1527_v42, %v328_v0  ;;  %vm1696_vm4 = vmor %vm330_vm11, %vm331_vm15 }
 0x11f   :  { %2459 = vst [vmem:[#allocation7_spill] sm:$0xff] %v1658_v45  ;;  %v338_v35 = vsub.f32 1.5, %v337_v14  ;;  %v365_v22 = vmul.f32 %v1658_v45, %v1596_v62  ;;  %vm231_vm1 = vweird.f32 %v1550_v4  ;;  %vm340_vm2 = vweird.f32 %v1506_v40 }
 0x120   :  { %v278_v23 = vsub.f32 1.5, %v277_v41  ;;  %v1681_v51 = vadd.f32 1e-05, %v199_v30  ;;  %vm380_vm3 = vweird.f32 %v1513_v19  ;;  %v246_v43 = vmul.f32 %v1641_v24, %v245_v3  ;;  %vm1719_vm8 = vmor %vm230_vm13, %vm231_vm1 }
 0x121   :  { %v1683_v20 = vpop.eup %1027  ;;  %v366_v12 = vmul.f32 %v1658_v45, %v365_v22  ;;  %1029 = vrsqrt.f32 %v1653_v21  ;;  %v1690_v54 = vmul.f32 %v273_v27, %v1268_v2  ;;  %v229_v52 = vmul.f32 %v1550_v4, %v228_v57 }
 0x122   :  { %2462 = vst [vmem:[#allocation8_spill] sm:$0xff] %v1681_v51  ;;  %v378_v46 = vsub.f32 1.5, %v377_v58  ;;  %vm280_vm5 = vweird.f32 %v1522_v53  ;;  %v333_v61 = vsel %vm1696_vm4, %v1527_v42, %v329_v59  ;;  %v339_v2 = vmul.f32 %v1575_v8, %v338_v35 }
 0x123   :  { %2463 = vst [vmem:[#allocation9_spill] sm:$0xff] %v1683_v20  ;;  %vm341_vm6 = vweird.f32 %v1575_v8  ;;  %v2466_v31 = vsub.f32 1.0, %v1537_v56  ;;  %v279_v7 = vmul.f32 %v1598_v13, %v278_v23  ;;  %vm281_vm7 = vweird.f32 %v1598_v13 }
 0x124   :  { %v285_v29 = vmul.f32 %v1683_v20, %v1619_v39  ;;  %1031 = vrsqrt.f32 %v1681_v51  ;;  %v247_v56 = vmul.f32 0.5, %v246_v43  ;;  %v367_v0 = vmul.f32 0.5, %v366_v12  ;;  %vm1730_vm11 = vmor %vm340_vm2, %vm341_vm6 }
 0x125   :  { %v703_v50 = vmul.f32 %v1495_v36, %v2466_v31  ;;  %vm705_vm9 = vweird.f32 %v1437_v28  ;;  %vm706_vm10 = vweird.f32 %v1495_v36  ;;  %v233_v14 = vsel %vm1719_vm8, %v1550_v4, %v229_v52  ;;  %vm1748_vm13 = vmor %vm280_vm5, %vm281_vm7 }
 0x126   :  { %v1735_v1 = vmul.f32 %v1588_v60, %v378_v46  ;;  %vm381_vm12 = vweird.f32 %v1588_v60  ;;  %v711_v30 = vand.u32 2147483648, %v1437_v28  ;;  %v343_v3 = vsel %vm1730_vm11, %v1575_v8, %v339_v2  ;;  %vm1766_vm14 = vmor %vm705_vm9, %vm706_vm10 }
 0x127   :  { %v1739_v9 = vpop.eup %1029  ;;  %v704_v4 = vadd.f32 %v1495_v36, %v703_v50  ;;  %v709_v38 = vand.u32 2147483647, %v1437_v28  ;;  %1033 = vrcp.f32 %v1559_v17  ;;  %v1756_v57 = vmul.f32 %v333_v61, %v1273_v11  ;;  %vm1773_vm15 = vmor %vm380_vm3, %vm381_vm12  ;;  %v1815_v61 = vld [vmem:[%s2413_s1 + $0x8] sm:$0xff]  ;;  %v1829_v50 = vld [vmem:[%s2413_s1 + $0x20] sm:$0xff] }
 0x128   :  { %v286_v58 = vmul.f32 %v1683_v20, %v285_v29  ;;  %v255_v8 = vmul.f32 %v1739_v9, %v1653_v21  ;;  %v417_v53 = vmul.f32 %v1544_v37, %v397_v5  ;;  %v384_v59 = vmul.f32 %v233_v14, %v1259_v63  ;;  %v1847_v14 = vld [vmem:[%s2413_s1 + $0x58] sm:$0xff]  ;;  %v2526_v11 = vld [vmem:[#allocation7_spill] sm:$0xff] }
 0x129   :  { %v283_v5 = vsel %vm1748_vm13, %v1598_v13, %v279_v7  ;;  %v248_v35 = vsub.f32 1.5, %v247_v56  ;;  %vm250_vm1 = vweird.f32 %v1572_v18  ;;  %v368_v28 = vsub.f32 1.5, %v367_v0  ;;  %v1794_v13 = vld [vmem:[%s2413_s1] sm:$0xff]  ;;  %v1834_v7 = vld [vmem:[%s2413_s1 + $0x28] sm:$0xff]  ;;  %v1842_v0 = vld [vmem:[%s2413_s1 + $0x50] sm:$0xff] }
 0x12a   :  { %v1781_v22 = vpop.eup %1031  ;;  %v1784_v23 = vmul.f32 %v343_v3, %v1291_v32  ;;  %vm251_vm2 = vweird.f32 %v1641_v24  ;;  %v712_v19 = vor.u32 1.1754944e-38, %v711_v30  ;;  %vm371_vm3 = vweird.f32 %v1658_v45 }
 0x12b   :  { %2477 = vst [vmem:[#allocation10_spill] sm:$0xff] %v1781_v22  ;;  %v256_v43 = vmul.f32 %v1739_v9, %v255_v8  ;;  %v708_v32 = vsel %vm1766_vm14, %v1495_v36, %v704_v4  ;;  %vm710_vm4 = vcmp.eq.f32.partialorder %v709_v38, 8.507059e+37  ;;  %v389_v12 = vmul.f32 %v283_v5, %v1276_v15  ;;  %vm1859_vm8 = vmor %vm250_vm1, %vm251_vm2 }
 0x12c   :  { %v1802_v44 = vmul.f32 0.5, %v286_v58  ;;  %vm370_vm5 = vweird.f32 %v1596_v62  ;;  %v1807_v52 = vadd.f32 %v1567_v6, %v1656_v26  ;;  %v1810_v46 = vadd.f32 %v1567_v6, %v417_v53 }
 0x12d   :  { %v1034_v36 = vpop.eup %1033  ;;  %v1818_v2 = vmul.f32 %v1641_v24, %v248_v35  ;;  %v1821_v15 = vmul.f32 %v1658_v45, %v368_v28  ;;  %v295_v31 = vmul.f32 %v1781_v22, %v1681_v51  ;;  %v456_v26 = vsub.f32 0.0, %v1794_v13  ;;  %vm1880_vm11 = vmor %vm370_vm5, %vm371_vm3 }
 0x12e   :  { %2478 = vst [vmem:[#allocation11_spill] sm:$0xff] %v1802_v44  ;;  %v713_v29 = vsel %vm710_vm4, %v712_v19, %v708_v32  ;;  %v716_v42 = vmul.f32 %v1034_v36, %v1559_v17  ;;  %vm720_vm6 = vweird.f32 %v1559_v17  ;;  %v724_v56 = vand.u32 2147483647, %v1559_v17 }
 0x12f   :  { %2479 = vst [vmem:[#allocation12_spill] sm:$0xff] %v1821_v15  ;;  %v257_v41 = vmul.f32 0.5, %v256_v43  ;;  %v726_v30 = vand.u32 2147483648, %v1559_v17  ;;  %v457_v3 = vsub.f32 0.0, %v1815_v61  ;;  %v472_v40 = vmul.f32 1.442695, %v456_v26 }
 0x130   :  { %v717_v4 = vsub.f32 1.0, %v716_v42  ;;  %vm721_vm7 = vweird.f32 %v1034_v36  ;;  %v460_v38 = vsub.f32 0.0, %v1829_v50  ;;  %v461_v58 = vsub.f32 0.0, %v1834_v7 }
 0x131   :  { %1035 = vpow2.f32 %v472_v40  ;;  %v474_v8 = vmul.f32 1.442695, %v457_v3  ;;  %v466_v53 = vsub.f32 0.0, %v1842_v0  ;;  %v467_v27 = vsub.f32 0.0, %v1847_v14  ;;  %vm1870_vm9 = vmor %vm720_vm6, %vm721_vm7 }
 0x132   :  { %v718_v35 = vmul.f32 %v1034_v36, %v717_v4  ;;  %v404_v28 = vmul.f32 %v1544_v37, %v384_v59  ;;  %v480_v19 = vmul.f32 1.442695, %v460_v38  ;;  %v482_v43 = vmul.f32 1.442695, %v461_v58 }
 0x133   :  { %v727_v18 = vor.u32 1.1754944e-38, %v726_v30  ;;  %v405_v42 = vmul.f32 %v1544_v37, %v1661_v16  ;;  %1037 = vpow2.f32 %v474_v8  ;;  %vm725_vm10 = vcmp.eq.f32.partialorder %v724_v56, 8.507059e+37 }
 0x134   :  { %v719_v3 = vadd.f32 %v1034_v36, %v718_v35  ;;  %1039 = vpow2.f32 %v480_v19  ;;  %v492_v59 = vmul.f32 1.442695, %v466_v53  ;;  %v2484_v40 = vmov 0 }
 0x135   :  { %v2485_v40 = vsel %vm1880_vm11, 4294967295, %v2484_v40  ;;  %v258_v17 = vsub.f32 1.5, %v257_v41  ;;  %v772_v4 = vmul.f32 %v713_v29, %v1361_v10  ;;  %1041 = vpow2.f32 %v482_v43  ;;  %v1900_v10 = vld [vmem:[%s2413_s1 + $0x70] sm:$0xff] }
 0x136   :  { %2486 = vst [vmem:[#allocation13_spill] sm:$0xff] %v2485_v40  ;;  %v494_v30 = vmul.f32 1.442695, %v467_v27  ;;  %v1890_v56 = vmul.f32 %v1781_v22, %v295_v31  ;;  %v723_v62 = vsel %vm1870_vm9, %v1034_v36, %v719_v3  ;;  %v1895_v38 = vadd.f32 %v1567_v6, %v404_v28  ;;  %v1908_v36 = vld [vmem:[%s2413_s1 + $0x78] sm:$0xff] }
 0x137   :  { %2487 = vst [vmem:[#allocation14_spill] sm:$0xff] %v1900_v10  ;;  %v1036_v29 = vpop.eup %1035  ;;  %v728_v41 = vsel %vm725_vm10, %v727_v18, %v723_v62  ;;  %v408_v58 = vmul.f32 %v1544_v37, %v1690_v54  ;;  %v409_v8 = vmul.f32 %v1544_v37, %v389_v12  ;;  %1043 = vpow2.f32 %v492_v59 }
 0x138   :  { %2488 = vst [vmem:[#allocation15_spill] sm:$0xff] %v1908_v36  ;;  %v773_v31 = vmul.f32 %v728_v41, %v1412_v25  ;;  %v1912_v53 = vadd.f32 %v1567_v6, %v405_v42  ;;  %v1914_v27 = vadd.f32 1.0, %v1036_v29  ;;  %1045 = vpow2.f32 %v494_v30  ;;  %v1928_v25 = vld [vmem:[%s2413_s1 + $0x10] sm:$0xff] }
 0x139   :  { %v1038_v35 = vpop.eup %1037  ;;  %v1917_v28 = vmul.f32 %v1739_v9, %v258_v17  ;;  %v788_v54 = vmul.f32 %v772_v4, %v1807_v52  ;;  %v1922_v12 = vmul.f32 %v1544_v37, %v1756_v57  ;;  %v470_v19 = vsub.f32 0.0, %v1900_v10 }
 0x13a   :  { %v1040_v43 = vpop.eup %1039  ;;  %v789_v26 = vmul.f32 %v773_v31, %v1810_v46  ;;  %v1931_v18 = vadd.f32 1.0, %v1038_v35  ;;  %1047 = vrcp.f32 %v1914_v27  ;;  %v471_v52 = vsub.f32 0.0, %v1908_v36 }
 0x13b   :  { %v1042_v42 = vpop.eup %1041  ;;  %v1936_v57 = vadd.f32 %v1567_v6, %v408_v58  ;;  %v1939_v3 = vadd.f32 %v1567_v6, %v409_v8  ;;  %v1941_v59 = vadd.f32 1.0, %v1040_v43  ;;  %v1945_v17 = vmul.f32 %v1544_v37, %v1784_v23 }
 0x13c   :  { %v798_v46 = vpack.c.bf16 %v789_v26, %v788_v54  ;;  %v529_v4 = vand.u32 2147483647, %v1914_v27  ;;  %1049 = vrcp.f32 %v1931_v18  ;;  %v531_v29 = vand.u32 2147483648, %v1914_v27 }
 0x13d   :  { %v1044_v62 = vpop.eup %1043  ;;  %v544_v41 = vand.u32 2147483647, %v1931_v18  ;;  %v1952_v58 = vadd.f32 1.0, %v1042_v42  ;;  %v1954_v8 = vmul.f32 1.442695, %v470_v19  ;;  %vm525_vm12 = vweird.f32 %v1914_v27 }
 0x13e   :  { %v1046_v31 = vpop.eup %1045  ;;  %964 = vmatmul.msk.bf16.vlgmr.msra.gmra.mxu3 %vm2427_vm0, %v798_v46  ;;  %v546_v23 = vand.u32 2147483648, %v1931_v18  ;;  %1051 = vrcp.f32 %v1941_v59  ;;  %v1960_v35 = vmul.f32 1.442695, %v471_v52  ;;  %vm540_vm13 = vweird.f32 %v1931_v18 }
 0x13f   :  { %v589_v54 = vand.u32 2147483647, %v1941_v59  ;;  %v591_v43 = vand.u32 2147483648, %v1941_v59  ;;  %1053 = vrcp.f32 %v1952_v58  ;;  %vm1966_vm14 = vcmp.eq.f32.partialorder %v529_v4, 8.507059e+37 }
 0x140   :  { %v1048_v19 = vpop.eup %1047  ;;  %v604_v42 = vand.u32 2147483647, %v1952_v58  ;;  %v606_v46 = vand.u32 2147483648, %v1952_v58  ;;  %v1972_v16 = vadd.f32 1.0, %v1044_v62  ;;  %v532_v32 = vor.u32 1.1754944e-38, %v531_v29 }
 0x141   :  { %v521_v52 = vmul.f32 %v1048_v19, %v1914_v27  ;;  %vm1975_vm1 = vcmp.eq.f32.partialorder %v544_v41, 8.507059e+37  ;;  %v1979_v30 = vadd.f32 1.0, %v1046_v31  ;;  %v547_v4 = vor.u32 1.1754944e-38, %v546_v23 }
 0x142   :  { %v1050_v55 = vpop.eup %1049  ;;  %1055 = vrcp.f32 %v1972_v16  ;;  %vm526_vm4 = vweird.f32 %v1048_v19  ;;  %vm1985_vm5 = vcmp.eq.f32.partialorder %v589_v54, 8.507059e+37  ;;  %v592_v41 = vor.u32 1.1754944e-38, %v591_v43 }
 0x143   :  { %v522_v48 = vsub.f32 1.0, %v521_v52  ;;  %v536_v62 = vmul.f32 %v1050_v55, %v1931_v18  ;;  %vm1989_vm6 = vcmp.eq.f32.partialorder %v604_v42, 8.507059e+37  ;;  %v607_v23 = vor.u32 1.1754944e-38, %v606_v46  ;;  %vm2000_vm9 = vmor %vm525_vm12, %vm526_vm4 }
 0x144   :  { %v1052_v36 = vpop.eup %1051  ;;  %v679_v10 = vand.u32 2147483647, %v1972_v16  ;;  %v681_v51 = vand.u32 2147483648, %v1972_v16  ;;  %1057 = vrcp.f32 %v1979_v30  ;;  %vm541_vm7 = vweird.f32 %v1050_v55 }
 0x145   :  { %v1054_v52 = vpop.eup %1053  ;;  %v523_v39 = vmul.f32 %v1048_v19, %v522_v48  ;;  %v537_v22 = vsub.f32 1.0, %v536_v62  ;;  %v581_v54 = vmul.f32 %v1052_v36, %v1941_v59  ;;  %v694_v46 = vand.u32 2147483647, %v1979_v30  ;;  %vm2010_vm2 = vmor %vm540_vm13, %vm541_vm7 }
 0x146   :  { %v596_v42 = vmul.f32 %v1054_v52, %v1952_v58  ;;  %vm586_vm3 = vweird.f32 %v1052_v36  ;;  %vm601_vm12 = vweird.f32 %v1054_v52  ;;  %vm2014_vm4 = vcmp.eq.f32.partialorder %v679_v10, 8.507059e+37 }
 0x147   :  { %v524_v48 = vadd.f32 %v1048_v19, %v523_v39  ;;  %v538_v62 = vmul.f32 %v1050_v55, %v537_v22  ;;  %v582_v20 = vsub.f32 1.0, %v581_v54  ;;  %v682_v15 = vor.u32 1.1754944e-38, %v681_v51 }
 0x148   :  { %v1056_v37 = vpop.eup %1055  ;;  %v597_v44 = vsub.f32 1.0, %v596_v42  ;;  %vm2503_vm13 = vweird.f32 %v1941_v59  ;;  %vm2030_vm0 = vcmp.eq.f32.partialorder %v694_v46, 8.507059e+37  ;;  %1059 = vpow2.f32 %v1954_v8  ;;  %v2527_v59 = vld [vmem:[#allocation12_spill] sm:$0xff] }
 0x149   :  { %v528_v39 = vsel %vm2000_vm9, %v1048_v19, %v524_v48  ;;  %v539_v22 = vadd.f32 %v1050_v55, %v538_v62  ;;  %v583_v54 = vmul.f32 %v1052_v36, %v582_v20  ;;  %v671_v18 = vmul.f32 %v1056_v37, %v1972_v16  ;;  %vm2026_vm7 = vmor %vm2503_vm13, %vm586_vm3  ;;  %v2056_v62 = vld [vmem:[%s2413_s1 + $0x18] sm:$0xff] }
 0x14a   :  { %v1058_v45 = vpop.eup %1057  ;;  %v533_v40 = vsel %vm1966_vm14, %v532_v32, %v528_v39  ;;  %v598_v51 = vmul.f32 %v1054_v52, %v597_v44  ;;  %vm676_vm10 = vweird.f32 %v1056_v37  ;;  %vm260_vm9 = vweird.f32 %v1653_v21 }
 0x14b   :  { %v543_v20 = vsel %vm2010_vm2, %v1050_v55, %v539_v22  ;;  %v760_v19 = vmul.f32 %v533_v40, %v1794_v13  ;;  %v584_v32 = vadd.f32 %v1052_v36, %v583_v54  ;;  %vm2508_vm14 = vweird.f32 %v1952_v58  ;;  %v2079_v22 = vld [vmem:[%s2413_s1 + $0x30] sm:$0xff] }
 0x14c   :  { %vm2041_vm3 = vmor %vm2508_vm14, %vm601_vm12  ;;  %v672_v44 = vsub.f32 1.0, %v671_v18  ;;  %v548_v26 = vsel %vm1975_vm1, %v547_v4, %v543_v20  ;;  %v599_v43 = vadd.f32 %v1054_v52, %v598_v51  ;;  %v686_v46 = vmul.f32 %v1058_v45, %v1979_v30 }
 0x14d   :  { %v696_v48 = vand.u32 2147483648, %v1979_v30  ;;  %v761_v55 = vmul.f32 %v548_v26, %v1815_v61  ;;  %v776_v13 = vmul.f32 %v760_v19, %v1895_v38  ;;  %v588_v40 = vsel %vm2026_vm7, %v1052_v36, %v584_v32  ;;  %v2529_v26 = vld [vmem:[#allocation3_spill] sm:$0xff] }
 0x14e   :  { %v673_v58 = vmul.f32 %v1056_v37, %v672_v44  ;;  %v593_v63 = vsel %vm1985_vm5, %v592_v41, %v588_v40  ;;  %v603_v4 = vsel %vm2041_vm3, %v1054_v52, %v599_v43  ;;  %vm2511_vm1 = vweird.f32 %v1972_v16  ;;  %v1060_v32 = vpop.eup %1059 }
 0x14f   :  { %vm2065_vm2 = vmor %vm2511_vm1, %vm676_vm10  ;;  %v687_v38 = vsub.f32 1.0, %v686_v46  ;;  %vm691_vm12 = vweird.f32 %v1058_v45  ;;  %v777_v36 = vmul.f32 %v761_v55, %v1912_v53  ;;  %v608_v27 = vsel %vm1989_vm6, %v607_v23, %v603_v4 }
 0x150   :  { %v764_v29 = vmul.f32 %v593_v63, %v1829_v50  ;;  %v674_v41 = vadd.f32 %v1056_v37, %v673_v58  ;;  %v765_v39 = vmul.f32 %v608_v27, %v1834_v7  ;;  %v459_v16 = vsub.f32 0.0, %v2056_v62  ;;  %v2533_v27 = vld [vmem:[#allocation9_spill] sm:$0xff] }
 0x151   :  { %v688_v52 = vmul.f32 %v1058_v45, %v687_v38  ;;  %v792_v54 = vpack.c.bf16 %v777_v36, %v776_v13  ;;  %vm2514_vm5 = vweird.f32 %v1979_v30  ;;  %v697_v7 = vor.u32 1.1754944e-38, %v696_v48  ;;  %v2531_v13 = vld [vmem:[#allocation5_spill] sm:$0xff] }
 0x152   :  { %v678_v53 = vsel %vm2065_vm2, %v1056_v37, %v674_v41  ;;  %vm2085_vm6 = vmor %vm2514_vm5, %vm691_vm12  ;;  %1061 = vpow2.f32 %v1960_v35  ;;  %v780_v8 = vmul.f32 %v764_v29, %v1936_v57  ;;  %v781_v31 = vmul.f32 %v765_v39, %v1939_v3 }
 0x153   :  { %v683_v23 = vsel %vm2014_vm4, %v682_v15, %v678_v53  ;;  %v689_v18 = vadd.f32 %v1058_v45, %v688_v52  ;;  %vm2517_vm10 = vcmask 523264   ;;  %v434_v37 = vadd.f32 %v1567_v6, %v1922_v12  ;;  %v2534_v52 = vld [vmem:[#allocation10_spill] sm:$0xff] }
 0x154   :  { %958 = vmatmul.msk.bf16.vlgmr.msra.gmra.mxu0 %vm2517_vm10, %v792_v54  ;;  %v2518_v30 = vsub.f32 0.0, %v1928_v25  ;;  %v478_v51 = vmul.f32 1.442695, %v459_v16  ;;  %v462_v20 = vsub.f32 0.0, %v2079_v22  ;;  %vm2519_vm13 = vweird.f32 %v1739_v9  ;;  %vm2523_vm4 = vmmov %vm2517_vm10 }
 0x155   :  { %vm2104_vm7 = vmor %vm260_vm9, %vm2519_vm13  ;;  %v794_v49 = vpack.c.bf16 %v781_v31, %v780_v8  ;;  %v435_v15 = vadd.f32 %v1567_v6, %v1945_v17  ;;  %v693_v12 = vsel %vm2085_vm6, %v1058_v45, %v689_v18  ;;  %v770_v3 = vmul.f32 %v683_v23, %v1842_v0 }
 0x156   :  { %v476_v10 = vmul.f32 1.442695, %v2518_v30  ;;  %v297_v35 = vmul.f32 0.5, %v1890_v56  ;;  %v263_v21 = vsel %vm2104_vm7, %v1739_v9, %v1917_v28  ;;  %v698_v19 = vsel %vm2030_vm0, %v697_v7, %v693_v12  ;;  %vm2532_vm0 = vmmov %vm2523_vm4  ;;  %v2537_v12 = vld [vmem:[#allocation6_spill] sm:$0xff] }
 0x157   :  { %v2522_v45 = vsel %vm1773_vm15, %v1588_v60, %v1735_v1  ;;  %960 = vmatmul.msk.bf16.vlgmr.msra.gmra.mxu1 %vm2523_vm4, %v794_v49  ;;  %v771_v0 = vmul.f32 %v698_v19, %v1847_v14  ;;  %v2524_v9 = vsel %vm1859_vm8, %v1641_v24, %v1818_v2  ;;  %v2528_v60 = vsel %vm1880_vm11, %v2526_v11, %v2527_v59  ;;  %v2143_v14 = vld [vmem:[%s2413_s1 + $0x38] sm:$0xff]  ;;  %v2542_v11 = vld [vmem:[#allocation8_spill] sm:$0xff] }
 0x158   :  { %1063 = vpow2.f32 %v476_v10  ;;  %v399_v17 = vmul.f32 %v2522_v45, %v1294_v33  ;;  %v1062_v56 = vpop.eup %1061  ;;  %v386_v28 = vmul.f32 %v2524_v9, %v1312_v47  ;;  %v398_v33 = vmul.f32 %v2528_v60, %v1297_v34  ;;  %v2530_v47 = vld [vmem:[#allocation11_spill] sm:$0xff] }
 0x159   :  { %1065 = vpow2.f32 %v478_v51  ;;  %v518_v1 = vadd.f32 1.0, %v1060_v32  ;;  %v484_v44 = vmul.f32 1.442695, %v462_v20  ;;  %v387_v5 = vmul.f32 %v263_v21, %v2529_v26 }
 0x15a   :  { %v786_v43 = vmul.f32 %v770_v3, %v434_v37  ;;  %v787_v46 = vmul.f32 %v771_v0, %v435_v15  ;;  %v519_v24 = vadd.f32 1.0, %v1062_v56  ;;  %v288_v2 = vsub.f32 1.5, %v2530_v47 }
 0x15b   :  { %v298_v48 = vsub.f32 1.5, %v297_v35  ;;  %1067 = vrcp.f32 %v518_v1  ;;  %v419_v40 = vmul.f32 %v2531_v13, %v399_v17  ;;  %v463_v34 = vsub.f32 0.0, %v2143_v14 }
 0x15c   :  { %v797_v55 = vpack.c.bf16 %v787_v46, %v786_v43  ;;  %1069 = vrcp.f32 %v519_v24  ;;  %v418_v63 = vmul.f32 %v2531_v13, %v398_v33  ;;  %v406_v61 = vmul.f32 %v2531_v13, %v386_v28 }
 0x15d   :  { %1071 = vpow2.f32 %v484_v44  ;;  %v407_v38 = vmul.f32 %v2531_v13, %v387_v5  ;;  %v2156_v29 = vmul.f32 %v2533_v27, %v288_v2  ;;  %v739_v41 = vand.u32 2147483647, %v518_v1 }
 0x15e   :  { %v1064_v58 = vpop.eup %1063  ;;  %963 = vmatmul.msk.bf16.gmra.mxu2 %vm2532_vm0, %v797_v55  ;;  %v2161_v16 = vmul.f32 %v2534_v52, %v298_v48  ;;  %v2164_v54 = vadd.f32 %v1567_v6, %v419_v40  ;;  %v486_v53 = vmul.f32 1.442695, %v463_v34  ;;  %v2168_v7 = vadd.f32 %v1567_v6, %v418_v63  ;;  %v2547_v63 = vld [vmem:[#allocation14_spill] sm:$0xff] }
 0x15f   :  { %v1066_v4 = vpop.eup %1065  ;;  %v2153_v36 = vadd.f32 1.0, %v1064_v58  ;;  %v741_v8 = vand.u32 2147483648, %v518_v1  ;;  %v754_v31 = vand.u32 2147483647, %v519_v24  ;;  %v756_v37 = vand.u32 2147483648, %v519_v24 }
 0x160   :  { %v2158_v39 = vadd.f32 1.0, %v1066_v4  ;;  %v2172_v30 = vadd.f32 %v1567_v6, %v406_v61  ;;  %v2175_v10 = vadd.f32 %v1567_v6, %v407_v38  ;;  %vm735_vm15 = vweird.f32 %v518_v1  ;;  %v820_v61 = vld [vmem:[%s2415_s5 + $0x60] sm:$0xff] }
 0x161   :  { %1073 = vrcp.f32 %v2153_v36  ;;  %v1068_v50 = vpop.eup %1067  ;;  %vm2177_vm8 = vcmp.eq.f32.partialorder %v739_v41, 8.507059e+37  ;;  %vm750_vm11 = vweird.f32 %v519_v24  ;;  %vm290_vm14 = vweird.f32 %v2537_v12 }
 0x162   :  { %1075 = vrcp.f32 %v2158_v39  ;;  %v1070_v23 = vpop.eup %1069  ;;  %v731_v18 = vmul.f32 %v1068_v50, %v518_v1  ;;  %vm736_vm9 = vweird.f32 %v1068_v50  ;;  %vm291_vm3 = vweird.f32 %v2533_v27 }
 0x163   :  { %v1072_v51 = vpop.eup %1071  ;;  %v746_v57 = vmul.f32 %v1070_v23, %v519_v24  ;;  %1077 = vpow2.f32 %v486_v53  ;;  %v742_v3 = vor.u32 1.1754944e-38, %v741_v8  ;;  %vm751_vm1 = vweird.f32 %v1070_v23  ;;  %vm2194_vm5 = vmor %vm735_vm15, %vm736_vm9  ;;  %v2550_v53 = vld [vmem:[#allocation15_spill] sm:$0xff] }
 0x164   :  { %v732_v49 = vsub.f32 1.0, %v731_v18  ;;  %v2181_v15 = vadd.f32 1.0, %v1072_v51  ;;  %vm2185_vm2 = vcmp.eq.f32.partialorder %v754_v31, 8.507059e+37  ;;  %vm301_vm12 = vweird.f32 %v2534_v52  ;;  %vm2204_vm13 = vmor %vm750_vm11, %vm751_vm1  ;;  %v808_v31 = vld [vmem:[%s2415_s5] sm:$0xff] }
 0x165   :  { %v747_v35 = vsub.f32 1.0, %v746_v57  ;;  %v757_v45 = vor.u32 1.1754944e-38, %v756_v37  ;;  %v559_v17 = vand.u32 2147483647, %v2153_v36  ;;  %vm555_vm6 = vweird.f32 %v2153_v36 }
 0x166   :  { %v733_v32 = vmul.f32 %v1068_v50, %v732_v49  ;;  %1079 = vrcp.f32 %v2181_v15  ;;  %v561_v42 = vand.u32 2147483648, %v2153_v36  ;;  %vm300_vm10 = vweird.f32 %v2542_v11 }
 0x167   :  { %v1074_v19 = vpop.eup %1073  ;;  %v748_v9 = vmul.f32 %v1070_v23, %v747_v35  ;;  %vm570_vm7 = vweird.f32 %v2158_v39  ;;  %v574_v1 = vand.u32 2147483647, %v2158_v39  ;;  %v576_v5 = vand.u32 2147483648, %v2158_v39 }
 0x168   :  { %v1076_v0 = vpop.eup %1075  ;;  %v551_v28 = vmul.f32 %v1074_v19, %v2153_v36  ;;  %v734_v59 = vadd.f32 %v1068_v50, %v733_v32  ;;  %vm556_vm4 = vweird.f32 %v1074_v19  ;;  %vm2214_vm0 = vcmp.eq.f32.partialorder %v559_v17, 8.507059e+37 }
 0x169   :  { %v566_v33 = vmul.f32 %v1076_v0, %v2158_v39  ;;  %v749_v44 = vadd.f32 %v1070_v23, %v748_v9  ;;  %v1078_v43 = vpop.eup %1077  ;;  %vm571_vm15 = vweird.f32 %v1076_v0  ;;  %vm2227_vm11 = vmor %vm555_vm6, %vm556_vm4  ;;  %v562_v38 = vor.u32 1.1754944e-38, %v561_v42 }
 0x16a   :  { %v552_v26 = vsub.f32 1.0, %v551_v28  ;;  %v738_v46 = vsel %vm2194_vm5, %v1068_v50, %v734_v59  ;;  %v511_v40 = vadd.f32 1.0, %v1078_v43  ;;  %vm575_vm9 = vcmp.eq.f32.partialorder %v574_v1, 8.507059e+37  ;;  %vm2261_vm6 = vmor %vm300_vm10, %vm301_vm12 }
 0x16b   :  { %v567_v47 = vsub.f32 1.0, %v566_v33  ;;  %v743_v2 = vsel %vm2177_vm8, %v742_v3, %v738_v46  ;;  %v753_v48 = vsel %vm2204_vm13, %v1070_v23, %v749_v44  ;;  %vm2234_vm8 = vmor %vm570_vm7, %vm571_vm15  ;;  %v577_v23 = vor.u32 1.1754944e-38, %v576_v5  ;;  %v818_v3 = vld [vmem:[%s2415_s5 + $0x50] sm:$0xff] }
 0x16c   :  { %v553_v55 = vmul.f32 %v1074_v19, %v552_v26  ;;  %v1080_v34 = vpop.eup %1079  ;;  %v758_v58 = vsel %vm2185_vm2, %v757_v45, %v753_v48  ;;  %v774_v4 = vmul.f32 %v743_v2, %v2547_v63  ;;  %1081 = vrcp.f32 %v511_v40  ;;  %vm2248_vm2 = vmor %vm290_vm14, %vm291_vm3 }
 0x16d   :  { %v568_v41 = vmul.f32 %v1076_v0, %v567_v47  ;;  %v775_v50 = vmul.f32 %v758_v58, %v2550_v53  ;;  %v611_v18 = vmul.f32 %v1080_v34, %v2181_v15  ;;  %vm615_vm1 = vweird.f32 %v2181_v15  ;;  %v821_v53 = vld [vmem:[%s2415_s5 + $0x68] sm:$0xff] }
 0x16e   :  { %v554_v8 = vadd.f32 %v1074_v19, %v553_v55  ;;  %v790_v36 = vmul.f32 %v774_v4, %v2168_v7  ;;  %vm616_vm5 = vweird.f32 %v1080_v34  ;;  %v619_v49 = vand.u32 2147483647, %v2181_v15 }
 0x16f   :  { %v569_v37 = vadd.f32 %v1076_v0, %v568_v41  ;;  %v791_v51 = vmul.f32 %v775_v50, %v2164_v54  ;;  %v612_v57 = vsub.f32 1.0, %v611_v18  ;;  %v293_v32 = vsel %vm2248_vm2, %v2533_v27, %v2156_v29  ;;  %vm2282_vm3 = vmor %vm615_vm1, %vm616_vm5  ;;  %v2560_v29 = vld [vmem:[#allocation2_spill] sm:$0xff]  ;;  %v823_v27 = vld [vmem:[%s2415_s5 + $0x78] sm:$0xff] }
 0x170   :  { %v558_v20 = vsel %vm2227_vm11, %v1074_v19, %v554_v8  ;;  %v303_v45 = vsel %vm2261_vm6, %v2534_v52, %v2161_v16  ;;  %vm2557_vm14 = vcmask 523264   ;;  %v390_v52 = vmul.f32 %v293_v32, %v2560_v29 }
 0x171   :  { %v563_v7 = vsel %vm2214_vm0, %v562_v38, %v558_v20  ;;  %v573_v54 = vsel %vm2234_vm8, %v1076_v0, %v569_v37  ;;  %v799_v12 = vpack.c.bf16 %v791_v51, %v790_v36  ;;  %v613_v19 = vmul.f32 %v1080_v34, %v612_v57  ;;  %vm2562_vm7 = vmmov %vm2557_vm14  ;;  %v812_v36 = vld [vmem:[%s2415_s5 + $0x20] sm:$0xff]  ;;  %v809_v20 = vld [vmem:[%s2415_s5 + $0x8] sm:$0xff] }
 0x172   :  { %v578_v35 = vsel %vm575_vm9, %v577_v23, %v573_v54  ;;  %v762_v21 = vmul.f32 %v563_v7, %v1928_v25  ;;  %v621_v0 = vand.u32 2147483648, %v2181_v15  ;;  %v1082_v9 = vpop.eup %1081  ;;  %vm620_vm12 = vcmp.eq.f32.partialorder %v619_v49, 8.507059e+37  ;;  %vm2563_vm15 = vmmov %vm2562_vm7  ;;  %v813_v7 = vld [vmem:[%s2415_s5 + $0x28] sm:$0xff] }
 0x173   :  { %v763_v17 = vmul.f32 %v578_v35, %v2056_v62  ;;  %965 = vmatmul.msk.bf16.gmra.mxu3 %vm2557_vm14, %v799_v12  ;;  %v614_v56 = vadd.f32 %v1080_v34, %v613_v19  ;;  %v2561_v62 = vld [vmem:[#allocation4_spill] sm:$0xff]  ;;  %v626_v42 = vmul.f32 %v1082_v9, %v511_v40  ;;  %vm630_vm10 = vweird.f32 %v511_v40 }
 0x174   :  { %v778_v25 = vmul.f32 %v762_v21, %v2172_v30  ;;  %v391_v16 = vmul.f32 %v303_v45, %v2561_v62  ;;  %v622_v59 = vor.u32 1.1754944e-38, %v621_v0  ;;  %v636_v60 = vand.u32 2147483648, %v511_v40  ;;  %v819_v21 = vld [vmem:[%s2415_s5 + $0x58] sm:$0xff]  ;;  %v810_v45 = vld [vmem:[%s2415_s5 + $0x10] sm:$0xff] }
 0x175   :  { %v779_v28 = vmul.f32 %v763_v17, %v2175_v10  ;;  %v618_v30 = vsel %vm2282_vm3, %v1080_v34, %v614_v56  ;;  %v627_v10 = vsub.f32 1.0, %v626_v42  ;;  %vm631_vm13 = vweird.f32 %v1082_v9  ;;  %v822_v17 = vld [vmem:[%s2415_s5 + $0x70] sm:$0xff] }
 0x176   :  { %v634_v15 = vand.u32 2147483647, %v511_v40  ;;  %v410_v33 = vmul.f32 %v2531_v13, %v390_v52  ;;  %v411_v1 = vmul.f32 %v2531_v13, %v391_v16  ;;  %v623_v26 = vsel %vm620_vm12, %v622_v59, %v618_v30  ;;  %vm632_vm4 = vmor %vm630_vm10, %vm631_vm13  ;;  %v816_v13 = vld [vmem:[%s2415_s5 + $0x40] sm:$0xff]  ;;  %v814_v42 = vld [vmem:[%s2415_s5 + $0x30] sm:$0xff] }
 0x177   :  { %v793_v11 = vpack.c.bf16 %v779_v28, %v778_v25  ;;  %v628_v44 = vmul.f32 %v1082_v9, %v627_v10  ;;  %v637_v5 = vor.u32 1.1754944e-38, %v636_v60  ;;  %v766_v2 = vmul.f32 %v623_v26, %v2079_v22  ;;  %v811_v28 = vld [vmem:[%s2415_s5 + $0x18] sm:$0xff] }
 0x178   :  { %vm635_vm0 = vcmp.eq.f32.partialorder %v634_v15, 8.507059e+37  ;;  %v430_v46 = vadd.f32 %v1567_v6, %v410_v33  ;;  %v431_v24 = vadd.f32 %v1567_v6, %v411_v1  ;;  %vm921_vm11 = vcmask 261120   ;;  %v817_v6 = vld [vmem:[%s2415_s5 + $0x48] sm:$0xff]  ;;  %v815_v60 = vld [vmem:[%s2415_s5 + $0x38] sm:$0xff] }
 0x179   :  { %959 = vmatmul.msk.bf16.gmra.mxu0 %vm2562_vm7, %v793_v11  ;;  %v629_v43 = vadd.f32 %v1082_v9, %v628_v44 }
 0x17a   :  { %v782_v40 = vmul.f32 %v766_v2, %v430_v46 }
 0x17b   :  { %v633_v47 = vsel %vm632_vm4, %v1082_v9, %v629_v43 }
 0x17c   :  { %v638_v48 = vsel %vm635_vm0, %v637_v5, %v633_v47 }
 0x17d   :  { %v767_v55 = vmul.f32 %v638_v48, %v2143_v14 }
 0x17f   :  { %v783_v34 = vmul.f32 %v767_v55, %v431_v24 }
 0x181   :  { %v795_v58 = vpack.c.bf16 %v783_v34, %v782_v40 }
 0x183   :  { %961 = vmatmul.msk.bf16.gmra.mxu1 %vm2563_vm15, %v795_v58 }
 0x1a1   :  { %v901_v63 = vpop.f32.mrf.mxu2 }
 0x1a2   :  { %v902_v4 = vadd.f32 %v901_v63, %v816_v13 }
 0x1a4   :  { %930 = vst.msk [vmem:[%s2416_s6 + $0x40] sm:$0xff] %vm921_vm11, %v902_v4 }
 0x1a9   :  { %v903_v22 = vpop.f32.mrf.mxu2 }
 0x1aa   :  { %v904_v14 = vadd.f32 %v903_v22, %v817_v6 }
 0x1ac   :  { %931 = vst.msk [vmem:[%s2416_s6 + $0x48] sm:$0xff] %vm921_vm11, %v904_v14 }
 0x1c1   :  { %v911_v38 = vpop.f32.mrf.mxu3 }
 0x1c2   :  { %v912_v41 = vadd.f32 %v911_v38, %v820_v61 }
 0x1c4   :  { %934 = vst.msk [vmem:[%s2416_s6 + $0x60] sm:$0xff] %vm921_vm11, %v912_v41 }
 0x1c9   :  { %v913_v50 = vpop.f32.mrf.mxu3 }
 0x1ca   :  { %v914_v8 = vadd.f32 %v913_v50, %v821_v53 }
 0x1cc   :  { %935 = vst.msk [vmem:[%s2416_s6 + $0x68] sm:$0xff] %vm921_vm11, %v914_v8 }
 0x1d1   :  { %v881_v23 = vpop.f32.mrf.mxu0 }
 0x1d2   :  { %v882_v18 = vadd.f32 %v881_v23, %v808_v31 }
 0x1d4   :  { %922 = vst.msk [vmem:[%s2416_s6] sm:$0xff] %vm921_vm11, %v882_v18  ;;  %v891_v37 = vpop.f32.mrf.mxu1 }
 0x1d5   :  { %v892_v51 = vadd.f32 %v891_v37, %v812_v36 }
 0x1d7   :  { %926 = vst.msk [vmem:[%s2416_s6 + $0x20] sm:$0xff] %vm921_vm11, %v892_v51 }
 0x1d9   :  { %v883_v57 = vpop.f32.mrf.mxu0 }
 0x1da   :  { %v884_v39 = vadd.f32 %v883_v57, %v809_v20 }
 0x1dc   :  { %923 = vst.msk [vmem:[%s2416_s6 + $0x8] sm:$0xff] %vm921_vm11, %v884_v39  ;;  %v893_v54 = vpop.f32.mrf.mxu1 }
 0x1dd   :  { %v894_v49 = vadd.f32 %v893_v54, %v813_v7 }
 0x1df   :  { %927 = vst.msk [vmem:[%s2416_s6 + $0x28] sm:$0xff] %vm921_vm11, %v894_v49 }
 0x1e1   :  { %v906_v12 = vpop.f32.mrf.mxu2 }
 0x1e2   :  { %v907_v35 = vadd.f32 %v906_v12, %v818_v3 }
 0x1e4   :  { %932 = vst.msk [vmem:[%s2416_s6 + $0x50] sm:$0xff] %vm921_vm11, %v907_v35 }
 0x1e9   :  { %v908_v19 = vpop.f32.mrf.mxu2 }
 0x1ea   :  { %v909_v32 = vadd.f32 %v908_v19, %v819_v21 }
 0x1ec   :  { %933 = vst.msk [vmem:[%s2416_s6 + $0x58] sm:$0xff] %vm921_vm11, %v909_v32 }
 0x1f6   :  { %v886_v0 = vpop.f32.mrf.mxu0  ;;  %v916_v56 = vpop.f32.mrf.mxu3 }
 0x1f7   :  { %v887_v9 = vadd.f32 %v886_v0, %v810_v45  ;;  %v917_v25 = vadd.f32 %v916_v56, %v822_v17 }
 0x1f9   :  { %924 = vst.msk [vmem:[%s2416_s6 + $0x10] sm:$0xff] %vm921_vm11, %v887_v9 }
 0x1fa   :  { %936 = vst.msk [vmem:[%s2416_s6 + $0x70] sm:$0xff] %vm921_vm11, %v917_v25 }
 0x1fe   :  { %v888_v29 = vpop.f32.mrf.mxu0  ;;  %v918_v52 = vpop.f32.mrf.mxu3 }
 0x1ff   :  { %v889_v62 = vadd.f32 %v888_v29, %v811_v28  ;;  %v919_v16 = vadd.f32 %v918_v52, %v823_v27 }
 0x200   :  { %v896_v11 = vpop.f32.mrf.mxu1 }
 0x201   :  { %925 = vst.msk [vmem:[%s2416_s6 + $0x18] sm:$0xff] %vm921_vm11, %v889_v62  ;;  %v897_v59 = vadd.f32 %v896_v11, %v814_v42 }
 0x202   :  { %937 = vst.msk [vmem:[%s2416_s6 + $0x78] sm:$0xff] %vm921_vm11, %v919_v16 }
 0x203   :  { %928 = vst.msk [vmem:[%s2416_s6 + $0x30] sm:$0xff] %vm921_vm11, %v897_v59 }
 0x208   :  { %v898_v30 = vpop.f32.mrf.mxu1 }
 0x209   :  { %v899_v10 = vadd.f32 %v898_v30, %v815_v60 }
 0x20b   :  { %929 = vst.msk [vmem:[%s2416_s6 + $0x38] sm:$0xff] %vm921_vm11, %v899_v10 }

// kernel: vss_block_forward.13
= control target key start
LH: loop header
LB: loop body
LE: loop exit
PB: predicated region body
PF: predicated region fallthrough
CT: control target
= control target key end

     0   :  { %s508_s0 = inlined_call_operand.vmem [shape: f32[128,128], index: 0, kind: input, shape index: {}]   ;;  %s509_s1 = inlined_call_operand.vmem [shape: bf16[128,32], index: 1, kind: input, shape index: {}]   ;;  %s510_s2 = inlined_call_operand.vmem [shape: f32[1,32], index: 2, kind: input, shape index: {}]   ;;  %s511_s3 = inlined_call_operand.vmem [shape: f32[128,32], index: 3, kind: input, shape index: {}]   ;;  %s512_s4 = inlined_call_operand.hbm [shape: f32[128,32], index: 4, kind: output, shape index: {}]  }
   0x1   :  { %v265_v0 = vld [vmem:[%s509_s1 + $0x38] sm:$0xff]  ;;  %v264_v1 = vld [vmem:[%s509_s1 + $0x30] sm:$0xff]  ;;  %v263_v2 = vld [vmem:[%s509_s1 + $0x28] sm:$0xff] }
   0x2   :  { %110 = vmatpush.bf16.msra.mxu0 %v265_v0  ;;  %266 = vmatpush.bf16.msra.mxu1 %v265_v0 }
   0x3   :  { %267 = vmatpush.bf16.msra.mxu2 %v265_v0  ;;  %268 = vmatpush.bf16.msra.mxu3 %v265_v0 }
   0x6   :  { %111 = vmatpush.bf16.msra.mxu0 %v264_v1  ;;  %269 = vmatpush.bf16.msra.mxu1 %v264_v1 }
   0x7   :  { %9 = vsyncpa [#allocation3], 0  ;;  %270 = vmatpush.bf16.msra.mxu2 %v264_v1  ;;  %271 = vmatpush.bf16.msra.mxu3 %v264_v1  ;;  %v262_v3 = vld [vmem:[%s509_s1 + $0x20] sm:$0xff]  ;;  %v261_v4 = vld [vmem:[%s509_s1 + $0x18] sm:$0xff]  ;;  %vm191_vm0 = vcmask 261120   ;;  %s214_s16 = sshll.u32 %s512_s4, 4  ;;  %s215_s16 = int_to_ptr.hbm [resolvable:$true] %s214_s16 }
   0x8   :  { %v260_v5 = vld [vmem:[%s509_s1 + $0x10] sm:$0xff]  ;;  %v259_v6 = vld [vmem:[%s509_s1 + $0x8] sm:$0xff]  ;;  %v258_v7 = vld [vmem:[%s509_s1] sm:$0xff]  ;;  %s320_s1 = smov [#allocation2]   ;;  %s321_s17 = smov 128  }
   0x9   :  { %v18_v8 = vld [vmem:[%s508_s0] sm:$0xff]  ;;  %v19_v9 = vld [vmem:[%s508_s0 + $0x8] sm:$0xff]  ;;  %v20_v20 = vld [vmem:[%s508_s0 + $0x10] sm:$0xff] }
   0xa   :  { %112 = vmatpush.bf16.msra.mxu0 %v263_v2  ;;  %272 = vmatpush.bf16.msra.mxu1 %v263_v2  ;;  %v22_v10 = vld [vmem:[%s508_s0 + $0x20] sm:$0xff]  ;;  %v23_v11 = vld [vmem:[%s508_s0 + $0x28] sm:$0xff]  ;;  %v34_v16 = vpack.c.bf16 %v19_v9, %v18_v8  ;;  %v21_v21 = vld [vmem:[%s508_s0 + $0x18] sm:$0xff] }
   0xb   :  { %273 = vmatpush.bf16.msra.mxu2 %v263_v2  ;;  %274 = vmatpush.bf16.msra.mxu3 %v263_v2  ;;  %v26_v12 = vld [vmem:[%s508_s0 + $0x40] sm:$0xff]  ;;  %v27_v13 = vld [vmem:[%s508_s0 + $0x48] sm:$0xff]  ;;  %v36_v17 = vpack.c.bf16 %v23_v11, %v22_v10  ;;  %v24_v22 = vld [vmem:[%s508_s0 + $0x30] sm:$0xff]  ;;  %v35_v28 = vpack.c.bf16 %v21_v21, %v20_v20 }
   0xc   :  { %v30_v14 = vld [vmem:[%s508_s0 + $0x60] sm:$0xff]  ;;  %v31_v15 = vld [vmem:[%s508_s0 + $0x68] sm:$0xff]  ;;  %v38_v18 = vpack.c.bf16 %v27_v13, %v26_v12  ;;  %v25_v23 = vld [vmem:[%s508_s0 + $0x38] sm:$0xff] }
   0xd   :  { %v40_v19 = vpack.c.bf16 %v31_v15, %v30_v14  ;;  %v28_v24 = vld [vmem:[%s508_s0 + $0x50] sm:$0xff]  ;;  %v29_v25 = vld [vmem:[%s508_s0 + $0x58] sm:$0xff]  ;;  %v37_v29 = vpack.c.bf16 %v25_v23, %v24_v22  ;;  %v423_v32 = vld [vmem:[%s510_s2] ss:$0 sm:$0xff]  ;;  %s212_s2 = sshll.u32 %s320_s1, 4  ;;  %s213_s2 = int_to_ptr.vmem [resolvable:$true] %s212_s2 }
   0xe   :  { %113 = vmatpush.bf16.msra.mxu0 %v262_v3  ;;  %275 = vmatpush.bf16.msra.mxu1 %v262_v3  ;;  %v32_v26 = vld [vmem:[%s508_s0 + $0x70] sm:$0xff]  ;;  %v33_v27 = vld [vmem:[%s508_s0 + $0x78] sm:$0xff]  ;;  %v39_v30 = vpack.c.bf16 %v29_v25, %v28_v24  ;;  %v159_v34 = vld [vmem:[%s511_s3] sm:$0xff] }
   0xf   :  { %276 = vmatpush.bf16.msra.mxu2 %v262_v3  ;;  %277 = vmatpush.bf16.msra.mxu3 %v262_v3  ;;  %v41_v31 = vpack.c.bf16 %v33_v27, %v32_v26  ;;  %v163_v36 = vld [vmem:[%s511_s3 + $0x20] sm:$0xff]  ;;  %v160_v48 = vld [vmem:[%s511_s3 + $0x8] sm:$0xff]  ;;  %v161_v0 = vld [vmem:[%s511_s3 + $0x10] sm:$0xff] }
  0x10   :  { %v167_v42 = vld [vmem:[%s511_s3 + $0x40] sm:$0xff]  ;;  %v164_v50 = vld [vmem:[%s511_s3 + $0x28] sm:$0xff]  ;;  %v165_v2 = vld [vmem:[%s511_s3 + $0x30] sm:$0xff] }
  0x11   :  { %v171_v44 = vld [vmem:[%s511_s3 + $0x60] sm:$0xff]  ;;  %v168_v58 = vld [vmem:[%s511_s3 + $0x48] sm:$0xff]  ;;  %v169_v10 = vld [vmem:[%s511_s3 + $0x50] sm:$0xff] }
  0x12   :  { %114 = vmatpush.bf16.msra.mxu0 %v261_v4  ;;  %278 = vmatpush.bf16.msra.mxu1 %v261_v4  ;;  %v172_v60 = vld [vmem:[%s511_s3 + $0x68] sm:$0xff]  ;;  %v173_v12 = vld [vmem:[%s511_s3 + $0x70] sm:$0xff]  ;;  %v170_v26 = vld [vmem:[%s511_s3 + $0x58] sm:$0xff] }
  0x13   :  { %279 = vmatpush.bf16.msra.mxu2 %v261_v4  ;;  %280 = vmatpush.bf16.msra.mxu3 %v261_v4 }
  0x16   :  { %115 = vmatpush.bf16.msra.mxu0 %v260_v5  ;;  %281 = vmatpush.bf16.msra.mxu1 %v260_v5 }
  0x17   :  { %282 = vmatpush.bf16.msra.mxu2 %v260_v5  ;;  %283 = vmatpush.bf16.msra.mxu3 %v260_v5 }
  0x1a   :  { %116 = vmatpush.bf16.msra.mxu0 %v259_v6  ;;  %284 = vmatpush.bf16.msra.mxu1 %v259_v6 }
  0x1b   :  { %285 = vmatpush.bf16.msra.mxu2 %v259_v6  ;;  %286 = vmatpush.bf16.msra.mxu3 %v259_v6 }
  0x1e   :  { %117 = vmatpush.bf16.msra.mxu0 %v258_v7  ;;  %287 = vmatpush.bf16.msra.mxu1 %v258_v7 }
  0x1f   :  { %288 = vmatpush.bf16.msra.mxu2 %v258_v7  ;;  %289 = vmatpush.bf16.msra.mxu3 %v258_v7 }
  0x21   :  { %118 = vmatmul.bf16.vlgmr.msra.gmra.mxu0 %v34_v16  ;;  %128 = vmatmul.bf16.vlgmr.msra.gmra.mxu1 %v36_v17  ;;  %v162_v16 = vld [vmem:[%s511_s3 + $0x18] sm:$0xff] }
  0x22   :  { %138 = vmatmul.bf16.vlgmr.msra.gmra.mxu2 %v38_v18  ;;  %148 = vmatmul.bf16.vlgmr.msra.gmra.mxu3 %v40_v19  ;;  %v166_v18 = vld [vmem:[%s511_s3 + $0x38] sm:$0xff] }
  0x31   :  { %123 = vmatmul.bf16.gmra.mxu0 %v35_v28  ;;  %133 = vmatmul.bf16.gmra.mxu1 %v37_v29  ;;  %v174_v28 = vld [vmem:[%s511_s3 + $0x78] sm:$0xff]  ;;  %s322_s3 = smov 8  }
  0x32   :  { %143 = vmatmul.bf16.gmra.mxu2 %v39_v30  ;;  %153 = vmatmul.bf16.gmra.mxu3 %v41_v31 }
  0x9e   :  { %v119_v33 = vpop.f32.mrf.mxu0  ;;  %v129_v35 = vpop.f32.mrf.mxu1 }
  0x9f   :  { %v120_v37 = vadd.f32 %v423_v32, %v119_v33  ;;  %v130_v38 = vadd.f32 %v423_v32, %v129_v35 }
  0xa1   :  { %v175_v39 = vadd.f32 %v159_v34, %v120_v37  ;;  %v179_v40 = vadd.f32 %v163_v36, %v130_v38 }
  0xa3   :  { %192 = vst.msk [vmem:[#allocation2] sm:$0xff] %vm191_vm0, %v175_v39 }
  0xa4   :  { %196 = vst.msk [vmem:[#allocation2 + $0x20] sm:$0xff] %vm191_vm0, %v179_v40 }
  0xa5   :  { %v139_v41 = vpop.f32.mrf.mxu2  ;;  %v149_v43 = vpop.f32.mrf.mxu3 }
  0xa6   :  { %v140_v45 = vadd.f32 %v423_v32, %v139_v41  ;;  %v150_v46 = vadd.f32 %v423_v32, %v149_v43  ;;  %v121_v47 = vpop.f32.mrf.mxu0  ;;  %v131_v49 = vpop.f32.mrf.mxu1 }
  0xa7   :  { %v122_v51 = vadd.f32 %v423_v32, %v121_v47  ;;  %v132_v52 = vadd.f32 %v423_v32, %v131_v49 }
  0xa8   :  { %v183_v53 = vadd.f32 %v167_v42, %v140_v45  ;;  %v187_v54 = vadd.f32 %v171_v44, %v150_v46 }
  0xa9   :  { %v176_v55 = vadd.f32 %v160_v48, %v122_v51  ;;  %v180_v56 = vadd.f32 %v164_v50, %v132_v52 }
  0xaa   :  { %200 = vst.msk [vmem:[#allocation2 + $0x40] sm:$0xff] %vm191_vm0, %v183_v53 }
  0xab   :  { %204 = vst.msk [vmem:[#allocation2 + $0x60] sm:$0xff] %vm191_vm0, %v187_v54 }
  0xac   :  { %193 = vst.msk [vmem:[#allocation2 + $0x8] sm:$0xff] %vm191_vm0, %v176_v55 }
  0xad   :  { %197 = vst.msk [vmem:[#allocation2 + $0x28] sm:$0xff] %vm191_vm0, %v180_v56  ;;  %v141_v57 = vpop.f32.mrf.mxu2  ;;  %v151_v59 = vpop.f32.mrf.mxu3 }
  0xae   :  { %v142_v61 = vadd.f32 %v423_v32, %v141_v57  ;;  %v152_v62 = vadd.f32 %v423_v32, %v151_v59  ;;  %v124_v63 = vpop.f32.mrf.mxu0  ;;  %v134_v1 = vpop.f32.mrf.mxu1 }
  0xaf   :  { %v125_v3 = vadd.f32 %v423_v32, %v124_v63  ;;  %v135_v4 = vadd.f32 %v423_v32, %v134_v1 }
  0xb0   :  { %v184_v5 = vadd.f32 %v168_v58, %v142_v61  ;;  %v188_v6 = vadd.f32 %v172_v60, %v152_v62 }
  0xb1   :  { %v177_v7 = vadd.f32 %v161_v0, %v125_v3  ;;  %v181_v8 = vadd.f32 %v165_v2, %v135_v4 }
  0xb2   :  { %201 = vst.msk [vmem:[#allocation2 + $0x48] sm:$0xff] %vm191_vm0, %v184_v5 }
  0xb3   :  { %205 = vst.msk [vmem:[#allocation2 + $0x68] sm:$0xff] %vm191_vm0, %v188_v6 }
  0xb4   :  { %194 = vst.msk [vmem:[#allocation2 + $0x10] sm:$0xff] %vm191_vm0, %v177_v7 }
  0xb5   :  { %198 = vst.msk [vmem:[#allocation2 + $0x30] sm:$0xff] %vm191_vm0, %v181_v8  ;;  %v144_v9 = vpop.f32.mrf.mxu2  ;;  %v154_v11 = vpop.f32.mrf.mxu3 }
  0xb6   :  { %v145_v13 = vadd.f32 %v423_v32, %v144_v9  ;;  %v155_v14 = vadd.f32 %v423_v32, %v154_v11  ;;  %v126_v15 = vpop.f32.mrf.mxu0  ;;  %v136_v17 = vpop.f32.mrf.mxu1 }
  0xb7   :  { %v127_v19 = vadd.f32 %v423_v32, %v126_v15  ;;  %v137_v20 = vadd.f32 %v423_v32, %v136_v17 }
  0xb8   :  { %v185_v21 = vadd.f32 %v169_v10, %v145_v13  ;;  %v189_v22 = vadd.f32 %v173_v12, %v155_v14 }
  0xb9   :  { %v178_v23 = vadd.f32 %v162_v16, %v127_v19  ;;  %v182_v24 = vadd.f32 %v166_v18, %v137_v20 }
  0xba   :  { %202 = vst.msk [vmem:[#allocation2 + $0x50] sm:$0xff] %vm191_vm0, %v185_v21 }
  0xbb   :  { %206 = vst.msk [vmem:[#allocation2 + $0x70] sm:$0xff] %vm191_vm0, %v189_v22 }
  0xbc   :  { %195 = vst.msk [vmem:[#allocation2 + $0x18] sm:$0xff] %vm191_vm0, %v178_v23 }
  0xbd   :  { %199 = vst.msk [vmem:[#allocation2 + $0x38] sm:$0xff] %vm191_vm0, %v182_v24  ;;  %v146_v25 = vpop.f32.mrf.mxu2  ;;  %v156_v27 = vpop.f32.mrf.mxu3 }
  0xbe   :  { %v147_v29 = vadd.f32 %v423_v32, %v146_v25  ;;  %v157_v30 = vadd.f32 %v423_v32, %v156_v27 }
  0xc0   :  { %v186_v31 = vadd.f32 %v170_v26, %v147_v29  ;;  %v190_v33 = vadd.f32 %v174_v28, %v157_v30 }
  0xc2   :  { %203 = vst.msk [vmem:[#allocation2 + $0x58] sm:$0xff] %vm191_vm0, %v186_v31 }
  0xc3   :  { %207 = vst.msk [vmem:[#allocation2 + $0x78] sm:$0xff] %vm191_vm0, %v190_v33 }
  0xc4   :  { %220 = dma.vmem_to_hbm [thread:$0]  %s213_s2, 2048, %s215_s16, [#allocation3], %s321_s17, %s321_s17, %s322_s3  }
  0xc5   :  { %318 = dma.done.wait [#allocation3], 2048  }
  0xc6   :  { %319 = vsyncadd [#allocation3], 4294965248 }
  0xc7   :  { %225 = vsyncpa [#allocation3], 1 }

// kernel: vss_block_forward.10
= control target key start
LH: loop header
LB: loop body
LE: loop exit
PB: predicated region body
PF: predicated region fallthrough
CT: control target
= control target key end

     0   :  { %s4677_s24 = smov 0   ;;  %s4679_s25 = smov 0   ;;  %s6443_s0 = inlined_call_operand.vmem [shape: f32[4,2,64,64], index: 0, kind: input, shape index: {}]   ;;  %s6444_s1 = inlined_call_operand.vmem [shape: f32[4,2,64,64], index: 1, kind: input, shape index: {}]   ;;  %s6445_s2 = inlined_call_operand.vmem [shape: f32[4,16,64], index: 2, kind: input, shape index: {}]   ;;  %s6446_s3 = inlined_call_operand.vmem [shape: f32[4,2,64,16], index: 3, kind: input, shape index: {}]   ;;  %s6447_s4 = inlined_call_operand.vmem [shape: f32[4,2,64,16], index: 4, kind: input, shape index: {}]   ;;  %s6448_s5 = inlined_call_operand.vmem [shape: f32[4,1,64], index: 5, kind: input, shape index: {}]   ;;  %s6449_s6 = inlined_call_operand.vmem [shape: f32[4,1,64], index: 6, kind: input, shape index: {}]   ;;  %s6450_s7 = inlined_call_operand.vmem [shape: f32[4,2,64,64], index: 7, kind: output, shape index: {}]  }
   0x1   :  { %s4681_s26 = smov 0   ;;  %s4683_s27 = smov 0  }
   0x2   :  { %s4685_s28 = smov 0  }
   0x3 LB: > { %s26_s29 = sadd.s32 1, %s4602_s26  ;;  %s29_s30 = sadd.s32 1, %s4606_s27  ;;  %s4610_s28 = sphi %s4685_s28, %s17_s28   ;;  %s4606_s27 = sphi %s4683_s27, %s6480_s27   ;;  %s4602_s26 = sphi %s4681_s26, %s6479_s26   ;;  %s4598_s25 = sphi %s4679_s25, %s6478_s25   ;;  %s4594_s24 = sphi %s4677_s24, %s6477_s24  }
   0x4   : > { %p27_p0 = scmp.ge.s32.totalorder %s26_s29, 2  ;;  %p4051_p1 = scmp.ge.s32.totalorder %s4610_s28, 1 }
   0x5   : > { %p331_p2 = scmp.lt.s32.totalorder %s4610_s28, 9 }
   0x6   : > { %s6482_s29 = smov (%p27_p0, %s26_s29), 0  ;;  %s6484_s30 = smov (!%p27_p0, %s29_s30), %s4606_s27 }
   0x7   : > { %p332_p3 = pnand %p4051_p1, %p331_p2  ;;  %p31_p4 = scmp.ge.s32.totalorder %s6484_s30, 4 }
   0x8   : > { %p409_p5 = scmp.lt.s32.totalorder (!%p332_p3), %s4598_s25, 3  ;;  %p411_p6 = scmp.lt.s32.totalorder (!%p332_p3), %s4594_s24, 1 }
   0x9   : > { %s6486_s30 = smov (%p31_p4, %s6484_s30), 0  ;;  %335 = sbr.rel (%p332_p3) target bundleno = 2853 (0xb25), region = 48 }
   0xa   : > { %s4622_s18 = smov (!%p332_p3), 64  }
   0xe   : > { %v4620_v0 = vmov 0   ;;  %s6488_s25 = smov (!%p409_p5, %s4598_s25), 3  ;;  %s6490_s24 = smov (!%p411_p6, %s4594_s24), 1  ;;  %v4621_v48 = vmov 1  }
   0xf   : > { %4149 = vset.pattern.permute.xlu1 %v4620_v0  ;;  %4150 = vset.pattern.permute.xlu2 %v4620_v0  ;;  %s4053_s8 = sshll.u32 %s6488_s25, 4  ;;  %s452_s11 = scalar_lea.vmem %s6448_s5, %s6488_s25 }
  0x10   : > { %4148 = vset.pattern.permute.xlu0 %v4620_v0  ;;  %s4052_s12 = sshll.u32 %s6490_s24, 3  ;;  %s4720_s15 = scalar_lea.vmem %s6445_s2, %s4053_s8 }
  0x11   : > { %s415_s16 = sadd.s32 %s4053_s8, %s4052_s12  ;;  %s455_s19 = scalar_lea.vmem %s6449_s6, %s6488_s25 }
  0x12   : > { %s4726_s20 = sshll.u32 %s415_s16, 3  ;;  %v4196_v1 = vld [vmem:[%s455_s19] ss:$0 sm:$0xff] }
  0x13   : > { %s4732_s23 = scalar_lea.vmem %s6446_s3, %s4726_s20  ;;  %s4738_s8 = scalar_lea.vmem %s6447_s4, %s4726_s20 }
  0x14   : > { %s4744_s13 = scalar_lea.vmem %s6450_s7, %s4726_s20  ;;  %v4747_v2 = vld [vmem:[%s4732_s23 + $0x10] sm:$0xff]  ;;  %v4750_v3 = vld [vmem:[%s4732_s23 + $0x20] sm:$0xff]  ;;  %s426_s17 = scalar_lea.vmem %s6444_s1, %s4726_s20  ;;  %v4771_v15 = vld [vmem:[%s4732_s23 + $0x18] sm:$0xff] }
  0x15   : > { %668 = vperm.xlu1 %4149, %v4747_v2   ;;  %678 = vperm.xlu2 %4150, %v4750_v3   ;;  %v4759_v4 = vld [vmem:[%s4732_s23] sm:$0xff]  ;;  %v475_v5 = vld [vmem:[%s426_s17 + $0x10] sm:$0xff]  ;;  %v474_v7 = vld [vmem:[%s426_s17 + $0x8] sm:$0xff]  ;;  %s4956_s22 = scalar_lea.vmem %s6443_s0, %s4726_s20 }
  0x16   : > { %658 = vperm.xlu0 %4148, %v4759_v4   ;;  %v4762_v6 = vadd.f32 %v4196_v1, %v475_v5  ;;  %v473_v8 = vld [vmem:[%s426_s17] sm:$0xff]  ;;  %v478_v9 = vld [vmem:[%s426_s17 + $0x28] sm:$0xff]  ;;  %v4764_v10 = vadd.f32 %v4196_v1, %v474_v7  ;;  %v476_v14 = vld [vmem:[%s426_s17 + $0x18] sm:$0xff] }
  0x17   : > { %v4766_v11 = vadd.f32 %v4196_v1, %v473_v8  ;;  %v4768_v12 = vadd.f32 %v4196_v1, %v478_v9  ;;  %v477_v13 = vld [vmem:[%s426_s17 + $0x20] sm:$0xff]  ;;  %v4776_v18 = vadd.f32 %v4196_v1, %v476_v14  ;;  %v4779_v19 = vld [vmem:[%s4732_s23 + $0x28] sm:$0xff]  ;;  %v480_v22 = vld [vmem:[%s426_s17 + $0x38] sm:$0xff] }
  0x18   : > { %v503_v16 = vmin.f32 %v4762_v6, 20.0  ;;  %v4774_v17 = vadd.f32 %v4196_v1, %v477_v13  ;;  %v502_v20 = vmin.f32 %v4764_v10, 20.0  ;;  %v4784_v23 = vld [vmem:[%s4732_s23 + $0x8] sm:$0xff]  ;;  %v479_v26 = vld [vmem:[%s426_s17 + $0x30] sm:$0xff]  ;;  %v4791_v32 = vadd.f32 %v4196_v1, %v480_v22  ;;  %v4799_v38 = vld [vmem:[%s4732_s23 + $0x38] sm:$0xff] }
  0x19   : > { %v501_v21 = vmin.f32 %v4766_v11, 20.0  ;;  %v506_v25 = vmin.f32 %v4768_v12, 20.0  ;;  %v504_v31 = vmin.f32 %v4776_v18, 20.0  ;;  %v4794_v34 = vadd.f32 %v4196_v1, %v479_v26  ;;  %v4802_v42 = vld [vmem:[%s4732_s23 + $0x30] sm:$0xff]  ;;  %v4832_v26 = vld [vmem:[%s4720_s15 + $0x1] ss:$0 sm:$0xff] }
  0x1a   : > { %v513_v24 = vmul.f32 1.442695, %v503_v16  ;;  %v511_v27 = vmul.f32 1.442695, %v502_v20  ;;  %v505_v29 = vmin.f32 %v4774_v17, 20.0  ;;  %v508_v36 = vmin.f32 %v4791_v32, 20.0 }
  0x1b   : > { %v509_v28 = vmul.f32 1.442695, %v501_v21  ;;  %v519_v30 = vmul.f32 1.442695, %v506_v25  ;;  %v515_v35 = vmul.f32 1.442695, %v504_v31 }
  0x1c   : > { %4213 = vpow2.f32 %v513_v24  ;;  %v517_v33 = vmul.f32 1.442695, %v505_v29  ;;  %v507_v37 = vmin.f32 %v4794_v34, 20.0  ;;  %v523_v39 = vmul.f32 1.442695, %v508_v36 }
  0x1d   : > { %673 = vperm.xlu1 %4149, %v4771_v15   ;;  %683 = vperm.xlu2 %4150, %v4779_v19   ;;  %4215 = vpow2.f32 %v511_v27  ;;  %vm495_vm0 = vcmp.gt.f32.partialorder %v4762_v6, 20.0  ;;  %vm494_vm1 = vcmp.gt.f32.partialorder %v4764_v10, 20.0  ;;  %vm493_vm3 = vcmp.gt.f32.partialorder %v4766_v11, 20.0 }
  0x1e   : > { %663 = vperm.xlu0 %4148, %v4784_v23   ;;  %4217 = vpow2.f32 %v509_v28  ;;  %v521_v40 = vmul.f32 1.442695, %v507_v37  ;;  %vm498_vm5 = vcmp.gt.f32.partialorder %v4768_v12, 20.0  ;;  %vm497_vm7 = vcmp.gt.f32.partialorder %v4774_v17, 20.0 }
  0x1f   : > { %4219 = vpow2.f32 %v519_v30  ;;  %vm496_vm10 = vcmp.gt.f32.partialorder %v4776_v18, 20.0  ;;  %vm500_vm13 = vcmp.gt.f32.partialorder %v4791_v32, 20.0  ;;  %vm499_vm15 = vcmp.gt.f32.partialorder %v4794_v34, 20.0 }
  0x20   : > { %4221 = vpow2.f32 %v517_v33 }
  0x21   : > { %4223 = vpow2.f32 %v515_v35 }
  0x22   : > { %v4214_v41 = vpop.eup %4213  ;;  %4225 = vpow2.f32 %v523_v39 }
  0x23   : > { %v4216_v43 = vpop.eup %4215  ;;  %v543_v44 = vadd.f32 1.0, %v4214_v41  ;;  %v546_v45 = vmul.f32 -0.5, %v4214_v41  ;;  %v549_v46 = vand.u32 2147483647, %v4214_v41  ;;  %4227 = vpow2.f32 %v521_v40 }
  0x24   : > { %v4218_v47 = vpop.eup %4217  ;;  %v534_v49 = vadd.f32 1.0, %v4216_v43  ;;  %v537_v50 = vmul.f32 -0.5, %v4216_v43  ;;  %v540_v51 = vand.u32 2147483647, %v4216_v43 }
  0x25   : > { %693 = vperm.xlu1 %4149, %v4799_v38   ;;  %4152 = vset.pattern.permute.xlu2 %v4621_v48  ;;  %v4220_v52 = vpop.eup %4219  ;;  %4229 = vlog2.f32 %v543_v44  ;;  %v547_v53 = vadd.f32 1.0, %v546_v45  ;;  %v525_v54 = vadd.f32 1.0, %v4218_v47  ;;  %vm4810_vm2 = vcmp.lt.f32.partialorder %v549_v46, 0.0004427343 }
  0x26   : > { %794 = vperm.xlu2 %4152, %v4784_v23   ;;  %688 = vperm.xlu0 %4148, %v4802_v42   ;;  %v4222_v55 = vpop.eup %4221  ;;  %4231 = vlog2.f32 %v534_v49  ;;  %v538_v57 = vadd.f32 1.0, %v537_v50  ;;  %v528_v58 = vmul.f32 -0.5, %v4218_v47  ;;  %vm4815_vm4 = vcmp.lt.f32.partialorder %v540_v51, 0.0004427343 }
  0x27   : > { %4233 = vlog2.f32 %v525_v54  ;;  %v531_v60 = vand.u32 2147483647, %v4218_v47  ;;  %v570_v61 = vadd.f32 1.0, %v4220_v52  ;;  %v4819_v62 = vpop.eup %4223  ;;  %v548_v63 = vmul.f32 %v4214_v41, %v547_v53 }
  0x28   : > { %v529_v1 = vadd.f32 1.0, %v528_v58  ;;  %v573_v5 = vmul.f32 -0.5, %v4220_v52  ;;  %v576_v7 = vand.u32 2147483647, %v4220_v52  ;;  %v4822_v8 = vpop.eup %4225  ;;  %v539_v9 = vmul.f32 %v4216_v43, %v538_v57 }
  0x29   : > { %4235 = vlog2.f32 %v570_v61  ;;  %v561_v13 = vadd.f32 1.0, %v4222_v55  ;;  %v564_v14 = vmul.f32 -0.5, %v4222_v55  ;;  %v4824_v16 = vpop.eup %4227  ;;  %vm4826_vm6 = vcmp.lt.f32.partialorder %v531_v60, 0.0004427343 }
  0x2a   : > { %v530_v20 = vmul.f32 %v4218_v47, %v529_v1  ;;  %v574_v22 = vadd.f32 1.0, %v573_v5  ;;  %v567_v24 = vand.u32 2147483647, %v4222_v55  ;;  %v552_v28 = vadd.f32 1.0, %v4819_v62 }
  0x2b   : > { %v4230_v25 = vpop.eup %4229  ;;  %4237 = vlog2.f32 %v561_v13  ;;  %v565_v27 = vadd.f32 1.0, %v564_v14  ;;  %v555_v29 = vmul.f32 -0.5, %v4819_v62  ;;  %vm4837_vm8 = vcmp.lt.f32.partialorder %v576_v7, 0.0004427343 }
  0x2c   : > { %v4232_v30 = vpop.eup %4231  ;;  %v545_v31 = vmul.f32 0.6931472, %v4230_v25  ;;  %v575_v33 = vmul.f32 %v4220_v52, %v574_v22  ;;  %v558_v36 = vand.u32 2147483647, %v4819_v62  ;;  %vm4843_vm9 = vcmp.lt.f32.partialorder %v567_v24, 0.0004427343 }
  0x2d   : > { %4151 = vset.pattern.permute.xlu1 %v4621_v48  ;;  %v4234_v37 = vpop.eup %4233  ;;  %v536_v39 = vmul.f32 0.6931472, %v4232_v30  ;;  %v566_v40 = vmul.f32 %v4222_v55, %v565_v27  ;;  %4239 = vlog2.f32 %v552_v28  ;;  %v556_v45 = vadd.f32 1.0, %v555_v29 }
  0x2e   : > { %789 = vperm.xlu1 %4151, %v4759_v4   ;;  %4153 = vset.pattern.permute.xlu0 %v4621_v48  ;;  %v551_v43 = vsel %vm4810_vm2, %v548_v63, %v545_v31  ;;  %v527_v44 = vmul.f32 0.6931472, %v4234_v37  ;;  %v588_v46 = vadd.f32 1.0, %v4822_v8  ;;  %vm4859_vm11 = vcmp.lt.f32.partialorder %v558_v36, 0.0004427343 }
  0x2f   : > { %v4236_v47 = vpop.eup %4235  ;;  %v4855_v49 = vsel %vm495_vm0, %v4762_v6, %v551_v43  ;;  %v542_v50 = vsel %vm4815_vm4, %v539_v9, %v536_v39  ;;  %v591_v52 = vmul.f32 -0.5, %v4822_v8  ;;  %v594_v9 = vand.u32 2147483647, %v4822_v8 }
  0x30   : > { %v724_v53 = vmul.f32 %v4832_v26, %v4855_v49  ;;  %v4869_v54 = vsel %vm494_vm1, %v4764_v10, %v542_v50  ;;  %v533_v6 = vsel %vm4826_vm6, %v530_v20, %v527_v44  ;;  %v572_v55 = vmul.f32 0.6931472, %v4236_v47 }
  0x31   : > { %v4238_v56 = vpop.eup %4237  ;;  %v723_v57 = vmul.f32 %v4832_v26, %v4869_v54  ;;  %v4878_v58 = vsel %vm493_vm3, %v4766_v11, %v533_v6  ;;  %4241 = vlog2.f32 %v588_v46  ;;  %v592_v59 = vadd.f32 1.0, %v591_v52 }
  0x32   : > { %v734_v60 = vmul.f32 1.442695, %v724_v53  ;;  %v722_v10 = vmul.f32 %v4832_v26, %v4878_v58  ;;  %v578_v61 = vsel %vm4837_vm8, %v575_v33, %v572_v55  ;;  %v563_v63 = vmul.f32 0.6931472, %v4238_v56 }
  0x33   : > { %v4240_v1 = vpop.eup %4239  ;;  %v732_v5 = vmul.f32 1.442695, %v723_v57  ;;  %v4887_v7 = vsel %vm498_vm5, %v4768_v12, %v578_v61  ;;  %v557_v11 = vmul.f32 %v4819_v62, %v556_v45  ;;  %v593_v22 = vmul.f32 %v4822_v8, %v592_v59 }
  0x34   : > { %4243 = vpow2.f32 %v734_v60  ;;  %v730_v13 = vmul.f32 1.442695, %v722_v10  ;;  %v727_v14 = vmul.f32 %v4832_v26, %v4887_v7  ;;  %v569_v20 = vsel %vm4843_vm9, %v566_v40, %v563_v63  ;;  %v4969_v60 = vld [vmem:[%s4720_s15 + $0x3] ss:$0 sm:$0xff] }
  0x35   : > { %4245 = vpow2.f32 %v732_v5  ;;  %v4898_v21 = vsel %vm497_vm7, %v4774_v17, %v569_v20  ;;  %v554_v12 = vmul.f32 0.6931472, %v4240_v1  ;;  %v579_v25 = vadd.f32 1.0, %v4824_v16  ;;  %v4978_v1 = vld [vmem:[%s4956_s22 + $0x28] sm:$0xff] }
  0x36   : > { %4247 = vpow2.f32 %v730_v13  ;;  %v740_v62 = vmul.f32 1.442695, %v727_v14  ;;  %v726_v24 = vmul.f32 %v4832_v26, %v4898_v21  ;;  %vm4906_vm12 = vcmp.lt.f32.partialorder %v594_v9, 0.0004427343  ;;  %v4988_v13 = vld [vmem:[%s4720_s15] ss:$0 sm:$0xff] }
  0x37   : > { %v4242_v27 = vpop.eup %4241  ;;  %v560_v28 = vsel %vm4859_vm11, %v557_v11, %v554_v12  ;;  %v582_v17 = vmul.f32 -0.5, %v4824_v16  ;;  %4249 = vlog2.f32 %v579_v25  ;;  %v585_v41 = vand.u32 2147483647, %v4824_v16 }
  0x38   : > { %v738_v30 = vmul.f32 1.442695, %v726_v24  ;;  %v4914_v8 = vsel %vm496_vm10, %v4776_v18, %v560_v28  ;;  %v590_v31 = vmul.f32 0.6931472, %v4242_v27  ;;  %4251 = vpow2.f32 %v740_v62 }
  0x39   : > { %v725_v33 = vmul.f32 %v4832_v26, %v4914_v8  ;;  %v583_v37 = vadd.f32 1.0, %v582_v17  ;;  %vm586_vm14 = vcmp.lt.f32.partialorder %v585_v41, 0.0004427343  ;;  %vm647_vm0 = vcmask 523264  }
  0x3a   : > { %v4244_v35 = vpop.eup %4243  ;;  %v596_v36 = vsel %vm4906_vm12, %v593_v22, %v590_v31  ;;  %4253 = vpow2.f32 %v738_v30  ;;  %v985_v63 = vmul.f32 %v4969_v60, %v4855_v49  ;;  %v984_v5 = vmul.f32 %v4969_v60, %v4869_v54 }
  0x3b   : > { %v4246_v39 = vpop.eup %4245  ;;  %758 = vrot.lane.b32.xlu1 %v4244_v35, %s4622_s18  ;;  %v736_v18 = vmul.f32 1.442695, %v725_v33  ;;  %v4923_v40 = vsel %vm500_vm13, %v4791_v32, %v596_v36  ;;  %v584_v45 = vmul.f32 %v4824_v16, %v583_v37  ;;  %v4985_v11 = vmul.f32 %v4887_v7, %v4978_v1  ;;  %v5003_v33 = vld [vmem:[%s4956_s22 + $0x10] sm:$0xff]  ;;  %v5009_v37 = vld [vmem:[%s4956_s22] sm:$0xff] }
  0x3c   : > { %v4248_v43 = vpop.eup %4247  ;;  %756 = vrot.lane.b32.xlu0 %v4246_v39, %s4622_s18  ;;  %v729_v44 = vmul.f32 %v4832_v26, %v4923_v40  ;;  %v995_v9 = vmul.f32 1.442695, %v985_v63  ;;  %v993_v14 = vmul.f32 1.442695, %v984_v5  ;;  %v623_v22 = vmul.f32 %v4988_v13, %v4878_v58 }
  0x3d   : > { %754 = vrot.lane.b32.xlu2 %v4248_v43, %s4622_s18  ;;  %4255 = vpow2.f32 %v736_v18  ;;  %v4250_v46 = vpop.eup %4249  ;;  %v988_v62 = vmul.f32 %v4969_v60, %v4887_v7  ;;  %v626_v25 = vmul.f32 %v4988_v13, %v4914_v8  ;;  %v987_v27 = vmul.f32 %v4969_v60, %v4898_v21 }
  0x3e   : > { %v744_v47 = vmul.f32 1.442695, %v729_v44  ;;  %v4252_v50 = vpop.eup %4251  ;;  %v581_v32 = vmul.f32 0.6931472, %v4250_v46  ;;  %v631_v24 = vmul.f32 1.442695, %v623_v22  ;;  %v5014_v41 = vmul.f32 %v4855_v49, %v5003_v33 }
  0x3f   : > { %v1001_v29 = vmul.f32 1.442695, %v988_v62  ;;  %v637_v17 = vmul.f32 1.442695, %v626_v25  ;;  %v999_v30 = vmul.f32 1.442695, %v987_v27  ;;  %v5018_v44 = vmul.f32 %v4878_v58, %v5009_v37 }
  0x40   : > { %v4254_v51 = vpop.eup %4253  ;;  %v587_v52 = vsel %vm586_vm14, %v584_v45, %v581_v32  ;;  %4257 = vpow2.f32 %v744_v47  ;;  %v5022_v46 = vld [vmem:[%s4956_s22 + $0x8] sm:$0xff]  ;;  %v624_v5 = vmul.f32 %v4988_v13, %v4869_v54  ;;  %v5051_v22 = vld [vmem:[%s4956_s22 + $0x38] sm:$0xff]  ;;  %v5057_v27 = vld [vmem:[%s4956_s22 + $0x30] sm:$0xff]  ;;  %vm778_vm1 = vcmask 1048064  }
  0x41   : > { %v4934_v6 = vsel %vm499_vm15, %v4794_v34, %v587_v52  ;;  %v4623_v34 = vmov 2   ;;  %v5030_v52 = vmul.f32 %v4869_v54, %v5022_v46 }
  0x42   : > { %v728_v16 = vmul.f32 %v4832_v26, %v4934_v6  ;;  %v4962_v26 = vld [vmem:[%s4956_s22 + $0x20] sm:$0xff]  ;;  %v629_v35 = vmul.f32 %v4988_v13, %v4934_v6 }
  0x43   : > { %v4256_v53 = vpop.eup %4255  ;;  %764 = vrot.lane.b32.xlu1 %v4252_v50, %s4622_s18  ;;  %v4966_v59 = vmul.f32 %v4898_v21, %v4962_v26  ;;  %v625_v50 = vmul.f32 %v4988_v13, %v4855_v49 }
  0x44   : > { %762 = vrot.lane.b32.xlu0 %v4254_v51, %s4622_s18  ;;  %v742_v55 = vmul.f32 1.442695, %v728_v16  ;;  %v643_v39 = vmul.f32 1.442695, %v629_v35  ;;  %v627_v35 = vmul.f32 %v4988_v13, %v4898_v21 }
  0x45   : > { %760 = vrot.lane.b32.xlu2 %v4256_v53, %s4622_s18  ;;  %v5033_v53 = vld [vmem:[%s4956_s22 + $0x18] sm:$0xff] }
  0x46   : > { %4259 = vpow2.f32 %v742_v55  ;;  %v4258_v56 = vpop.eup %4257  ;;  %v635_v55 = vmul.f32 1.442695, %v625_v50 }
  0x47   : > { %4261 = vpow2.f32 %v993_v14 }
  0x48   : > { %4263 = vpow2.f32 %v995_v9  ;;  %v628_v9 = vmul.f32 %v4988_v13, %v4887_v7 }
  0x49   : > { %4265 = vpow2.f32 %v631_v24  ;;  %v633_v24 = vmul.f32 1.442695, %v624_v5 }
  0x4a   : > { %4267 = vpow2.f32 %v637_v17  ;;  %v641_v25 = vmul.f32 1.442695, %v628_v9 }
  0x4b   : > { %804 = vperm.xlu1 %4151, %v4771_v15   ;;  %4269 = vpow2.f32 %v999_v30  ;;  %v5069_v30 = vmul.f32 %v4934_v6, %v5057_v27 }
  0x4c   : > { %768 = vrot.lane.b32.xlu0 %v4258_v56, %s4622_s18  ;;  %v4260_v57 = vpop.eup %4259  ;;  %4271 = vpow2.f32 %v1001_v29  ;;  %v5064_v29 = vmul.f32 %v4923_v40, %v5051_v22 }
  0x4d   : > { %766 = vrot.lane.b32.xlu2 %v4260_v57, %s4622_s18  ;;  %v4262_v28 = vpop.eup %4261  ;;  %4273 = vpow2.f32 %v643_v39 }
  0x4e   : > { %v4264_v31 = vpop.eup %4263  ;;  %4275 = vpow2.f32 %v635_v55  ;;  %v630_v55 = vmul.f32 %v4988_v13, %v4923_v40 }
  0x4f   : > { %v4266_v36 = vpop.eup %4265  ;;  %4277 = vpow2.f32 %v633_v24 }
  0x50   : > { %648 = vst.msk [vmem:[#allocation2] sm:$0xff] %vm647_vm0, %v4266_v36  ;;  %v4268_v18 = vpop.eup %4267  ;;  %4279 = vpow2.f32 %v641_v25  ;;  %v645_v5 = vmul.f32 1.442695, %v630_v55  ;;  %v4624_v25 = vmov 3  }
  0x51   : > { %v4270_v43 = vpop.eup %4269  ;;  %651 = vst.msk [vmem:[#allocation2 + $0xc0] sm:$0xff] %vm647_vm0, %v4268_v18 }
  0x52   : > { %v4272_v45 = vpop.eup %4271 }
  0x53   : > { %814 = vperm.xlu1 %4151, %v4779_v19   ;;  %v4274_v56 = vpop.eup %4273 }
  0x54   : > { %799 = vperm.xlu0 %4153, %v4747_v2   ;;  %654 = vst.msk [vmem:[#allocation2 + $0x180] sm:$0xff] %vm647_vm0, %v4274_v56 }
  0x55   : > { %809 = vperm.xlu2 %4152, %v4750_v3  }
  0x5b   : > { %4155 = vset.pattern.permute.xlu1 %v4623_v34 }
  0x5c   : > { %824 = vperm.xlu0 %4153, %v4799_v38   ;;  %924 = vperm.xlu1 %4155, %v4784_v23  }
  0x5d   : > { %819 = vperm.xlu2 %4152, %v4802_v42  }
  0x64   : > { %934 = vperm.xlu1 %4155, %v4771_v15   ;;  %4154 = vset.pattern.permute.xlu0 %v4623_v34 }
  0x65   : > { %919 = vperm.xlu0 %4154, %v4759_v4   ;;  %4156 = vset.pattern.permute.xlu2 %v4623_v34 }
  0x66   : > { %929 = vperm.xlu2 %4156, %v4747_v2  }
  0x6c   : > { %949 = vperm.xlu1 %4155, %v4802_v42  }
  0x6d   : > { %944 = vperm.xlu0 %4154, %v4779_v19  }
  0x6e   : > { %939 = vperm.xlu2 %4156, %v4750_v3  }
  0x6f   : > { %v679_v10 = vpop.permute.xlu2 %678 }
  0x70   : > { %v700_v61 = vmul.f32 %v679_v10, %v4966_v59  ;;  %v5041_v10 = vmul.f32 %v4914_v8, %v5033_v53 }
  0x72   : > { %708 = vst.msk [vmem:[#allocation3 + $0x100] sm:$0xff] %vm647_vm0, %v700_v61 }
  0x74   : > { %1017 = vrot.lane.b32.xlu1 %v4262_v28, %s4622_s18  ;;  %v983_v28 = vmul.f32 %v4969_v60, %v4878_v58 }
  0x75   : > { %4159 = vset.pattern.permute.xlu1 %v4624_v25  ;;  %4158 = vset.pattern.permute.xlu0 %v4624_v25 }
  0x76   : > { %954 = vperm.xlu2 %4156, %v4799_v38   ;;  %v991_v17 = vmul.f32 1.442695, %v983_v28 }
  0x77   : > { %v684_v20 = vpop.permute.xlu2 %683 }
  0x78   : > { %v701_v12 = vmul.f32 %v684_v20, %v4985_v11  ;;  %4281 = vpow2.f32 %v991_v17 }
  0x7a   : > { %709 = vst.msk [vmem:[#allocation3 + $0x140] sm:$0xff] %vm647_vm0, %v701_v12  ;;  %v4276_v12 = vpop.eup %4275 }
  0x7b   : > { %650 = vst.msk [vmem:[#allocation2 + $0x80] sm:$0xff] %vm647_vm0, %v4276_v12 }
  0x7c   : > { %1023 = vrot.lane.b32.xlu1 %v4270_v43, %s4622_s18  ;;  %v4278_v43 = vpop.eup %4277 }
  0x7d   : > { %v4280_v50 = vpop.eup %4279  ;;  %649 = vst.msk [vmem:[#allocation2 + $0x40] sm:$0xff] %vm647_vm0, %v4278_v43 }
  0x7e   : > { %1019 = vrot.lane.b32.xlu2 %v4264_v31, %s4622_s18  ;;  %653 = vst.msk [vmem:[#allocation2 + $0x140] sm:$0xff] %vm647_vm0, %v4280_v50 }
  0x7f   : > { %4157 = vset.pattern.permute.xlu2 %v4624_v25 }
  0x80   : > { %v795_v57 = vpop.permute.xlu2 %794 }
  0x81   : > { %v828_v61 = vmul.f32 %v795_v57, %v5030_v52 }
  0x86   : > { %1025 = vrot.lane.b32.xlu2 %v4272_v45, %s4622_s18 }
  0x87   : > { %v669_v47 = vpop.permute.xlu1 %668 }
  0x88   : > { %v698_v32 = vmul.f32 %v669_v47, %v5014_v41  ;;  %v659_v51 = vpop.permute.xlu0 %658  ;;  %v639_v47 = vmul.f32 1.442695, %v627_v35 }
  0x89   : > { %v696_v16 = vmul.f32 %v659_v51, %v5018_v44  ;;  %v4282_v51 = vpop.eup %4281 }
  0x8a   : > { %706 = vst.msk [vmem:[#allocation3 + $0x80] sm:$0xff] %vm647_vm0, %v698_v32  ;;  %v986_v32 = vmul.f32 %v4969_v60, %v4914_v8  ;;  %4283 = vpow2.f32 %v639_v47  ;;  %1015 = vrot.lane.b32.xlu0 %v4282_v51, %s4622_s18 }
  0x8b   : > { %704 = vst.msk [vmem:[#allocation3] sm:$0xff] %vm647_vm0, %v696_v16 }
  0x8c   : > { %v997_v16 = vmul.f32 1.442695, %v986_v32 }
  0x8e   : > { %845 = vrot.lane.b32.xlu2 %v828_v61, %s4622_s18  ;;  %4285 = vpow2.f32 %v997_v16  ;;  %v989_v16 = vmul.f32 %v4969_v60, %v4934_v6 }
  0x8f   : > { %v674_v63 = vpop.permute.xlu1 %673  ;;  %4287 = vpow2.f32 %v645_v5 }
  0x90   : > { %v699_v14 = vmul.f32 %v674_v63, %v5041_v10  ;;  %v664_v20 = vpop.permute.xlu0 %663  ;;  %v4284_v61 = vpop.eup %4283 }
  0x91   : > { %v697_v62 = vmul.f32 %v664_v20, %v5030_v52  ;;  %652 = vst.msk [vmem:[#allocation2 + $0x100] sm:$0xff] %vm647_vm0, %v4284_v61 }
  0x92   : > { %707 = vst.msk [vmem:[#allocation3 + $0xc0] sm:$0xff] %vm647_vm0, %v699_v14 }
  0x93   : > { %705 = vst.msk [vmem:[#allocation3 + $0x40] sm:$0xff] %vm647_vm0, %v697_v62 }
  0x94   : > { %v4286_v9 = vpop.eup %4285 }
  0x95   : > { %1021 = vrot.lane.b32.xlu0 %v4286_v9, %s4622_s18  ;;  %v4288_v14 = vpop.eup %4287 }
  0x96   : > { %655 = vst.msk [vmem:[#allocation2 + $0x1c0] sm:$0xff] %vm647_vm0, %v4288_v14 }
  0x97   : > { %v694_v31 = vpop.permute.xlu1 %693  ;;  %v755_v36 = vpop.permute.xlu2 %754 }
  0x98   : > { %v703_v39 = vmul.f32 %v694_v31, %v5064_v29  ;;  %v689_v18 = vpop.permute.xlu0 %688  ;;  %779 = vst.msk [vmem:[#allocation2] sm:$0xff] %vm778_vm1, %v755_v36 }
  0x99   : > { %v702_v45 = vmul.f32 %v689_v18, %v5069_v30  ;;  %v990_v18 = vmul.f32 %v4969_v60, %v4923_v40 }
  0x9a   : > { %711 = vst.msk [vmem:[#allocation3 + $0x1c0] sm:$0xff] %vm647_vm0, %v703_v39 }
  0x9b   : > { %710 = vst.msk [vmem:[#allocation3 + $0x180] sm:$0xff] %vm647_vm0, %v702_v45  ;;  %v1005_v45 = vmul.f32 1.442695, %v990_v18 }
  0x9d   : > { %4289 = vpow2.f32 %v1005_v45 }
  0x9f   : > { %v761_v56 = vpop.permute.xlu2 %760 }
  0xa0   : > { %v790_v57 = vpop.permute.xlu1 %789  ;;  %782 = vst.msk [vmem:[#allocation2 + $0xc0] sm:$0xff] %vm778_vm1, %v761_v56  ;;  %v5115_v56 = vld [vmem:[%s4720_s15 + $0x2] ss:$0 sm:$0xff] }
  0xa1   : > { %v827_v63 = vmul.f32 %v790_v57, %v5018_v44  ;;  %v1003_v57 = vmul.f32 1.442695, %v989_v16  ;;  %v887_v5 = vmul.f32 %v5115_v56, %v4855_v49  ;;  %v890_v9 = vmul.f32 %v5115_v56, %v4887_v7 }
  0xa3   : > { %843 = vrot.lane.b32.xlu1 %v827_v63, %s4622_s18  ;;  %v4290_v60 = vpop.eup %4289  ;;  %v897_v14 = vmul.f32 1.442695, %v887_v5  ;;  %4291 = vpow2.f32 %v1003_v57 }
  0xa5   : > { %4293 = vpow2.f32 %v897_v14  ;;  %v888_v14 = vmul.f32 %v5115_v56, %v4914_v8 }
  0xa7   : > { %v767_v20 = vpop.permute.xlu2 %766 }
  0xa8   : > { %785 = vst.msk [vmem:[#allocation2 + $0x180] sm:$0xff] %vm778_vm1, %v767_v20  ;;  %v903_v20 = vmul.f32 1.442695, %v890_v9 }
  0xaa   : > { %4295 = vpow2.f32 %v903_v20 }
  0xad   : > { %v759_v13 = vpop.permute.xlu1 %758 }
  0xae   : > { %781 = vst.msk [vmem:[#allocation2 + $0x80] sm:$0xff] %vm778_vm1, %v759_v13  ;;  %v757_v12 = vpop.permute.xlu0 %756 }
  0xaf   : > { %780 = vst.msk [vmem:[#allocation2 + $0x40] sm:$0xff] %vm778_vm1, %v757_v12  ;;  %v810_v62 = vpop.permute.xlu2 %809 }
  0xb0   : > { %v831_v24 = vmul.f32 %v810_v62, %v4966_v59  ;;  %v886_v62 = vmul.f32 %v5115_v56, %v4869_v54 }
  0xb2   : > { %851 = vrot.lane.b32.xlu2 %v831_v24, %s4622_s18 }
  0xb5   : > { %v765_v28 = vpop.permute.xlu1 %764 }
  0xb6   : > { %784 = vst.msk [vmem:[#allocation2 + $0x140] sm:$0xff] %vm778_vm1, %v765_v28  ;;  %v763_v17 = vpop.permute.xlu0 %762 }
  0xb7   : > { %783 = vst.msk [vmem:[#allocation2 + $0x100] sm:$0xff] %vm778_vm1, %v763_v17  ;;  %v820_v31 = vpop.permute.xlu2 %819 }
  0xb8   : > { %v833_v50 = vmul.f32 %v820_v31, %v5069_v30  ;;  %v895_v31 = vmul.f32 1.442695, %v886_v62 }
  0xba   : > { %4297 = vpow2.f32 %v895_v31 }
  0xbd   : > { %v805_v35 = vpop.permute.xlu1 %804 }
  0xbe   : > { %v830_v36 = vmul.f32 %v805_v35, %v5041_v10  ;;  %v769_v39 = vpop.permute.xlu0 %768 }
  0xbf   : > { %786 = vst.msk [vmem:[#allocation2 + $0x1c0] sm:$0xff] %vm778_vm1, %v769_v39  ;;  %v4292_v39 = vpop.eup %4291 }
  0xc0   : > { %849 = vrot.lane.b32.xlu1 %v830_v36, %s4622_s18  ;;  %v930_v43 = vpop.permute.xlu2 %929  ;;  %v4294_v18 = vpop.eup %4293 }
  0xc1   : > { %v959_v47 = vmul.f32 %v930_v43, %v5014_v41  ;;  %v4296_v43 = vpop.eup %4295  ;;  %911 = vst.msk [vmem:[#allocation2 + $0x88] sm:$0xff] %vm647_vm0, %v4294_v18 }
  0xc2   : > { %914 = vst.msk [vmem:[#allocation2 + $0x148] sm:$0xff] %vm647_vm0, %v4296_v43 }
  0xc3   : > { %967 = vst.msk [vmem:[#allocation3 + $0x88] sm:$0xff] %vm647_vm0, %v959_v47 }
  0xc5   : > { %v815_v32 = vpop.permute.xlu1 %814 }
  0xc6   : > { %v800_v51 = vpop.permute.xlu0 %799  ;;  %v832_v24 = vmul.f32 %v815_v32, %v4985_v11 }
  0xc7   : > { %v829_v55 = vmul.f32 %v800_v51, %v5014_v41 }
  0xc8   : > { %855 = vrot.lane.b32.xlu1 %v833_v50, %s4622_s18  ;;  %v940_v61 = vpop.permute.xlu2 %939  ;;  %v4298_v50 = vpop.eup %4297 }
  0xc9   : > { %847 = vrot.lane.b32.xlu0 %v829_v55, %s4622_s18  ;;  %v961_v63 = vmul.f32 %v940_v61, %v4966_v59  ;;  %910 = vst.msk [vmem:[#allocation2 + $0x48] sm:$0xff] %vm647_vm0, %v4298_v50 }
  0xcb   : > { %969 = vst.msk [vmem:[#allocation3 + $0x108] sm:$0xff] %vm647_vm0, %v961_v63 }
  0xce   : > { %v825_v13 = vpop.permute.xlu0 %824  ;;  %v925_v12 = vpop.permute.xlu1 %924 }
  0xcf   : > { %v834_v28 = vmul.f32 %v825_v13, %v5064_v29  ;;  %v958_v17 = vmul.f32 %v925_v12, %v5030_v52  ;;  %v899_v12 = vmul.f32 1.442695, %v888_v14  ;;  %v4501_v14 = vld [vmem:[%s4732_s23] sm:$0xff] }
  0xd0   : > { %1029 = vrot.lane.b32.xlu1 %v4290_v60, %s4622_s18  ;;  %v955_v35 = vpop.permute.xlu2 %954 }
  0xd1   : > { %853 = vrot.lane.b32.xlu0 %v832_v24, %s4622_s18  ;;  %857 = vrot.lane.b32.xlu2 %v834_v28, %s4622_s18  ;;  %966 = vst.msk [vmem:[#allocation3 + $0x48] sm:$0xff] %vm647_vm0, %v958_v17  ;;  %v964_v36 = vmul.f32 %v955_v35, %v5064_v29  ;;  %v892_v17 = vmul.f32 %v5115_v56, %v4923_v40 }
  0xd2   : > { %v891_v35 = vmul.f32 %v5115_v56, %v4934_v6 }
  0xd3   : > { %972 = vst.msk [vmem:[#allocation3 + $0x1c8] sm:$0xff] %vm647_vm0, %v964_v36  ;;  %v907_v31 = vmul.f32 1.442695, %v892_v17 }
  0xd6   : > { %v935_v45 = vpop.permute.xlu1 %934 }
  0xd7   : > { %v960_v47 = vmul.f32 %v935_v45, %v5041_v10 }
  0xd8   : > { %1059 = vperm.xlu1 %4159, %v4747_v2   ;;  %v1020_v32 = vpop.permute.xlu2 %1019 }
  0xd9   : > { %1027 = vrot.lane.b32.xlu0 %v4292_v39, %s4622_s18  ;;  %1049 = vperm.xlu2 %4157, %v4759_v4   ;;  %968 = vst.msk [vmem:[#allocation3 + $0xc8] sm:$0xff] %vm647_vm0, %v960_v47  ;;  %v905_v39 = vmul.f32 1.442695, %v891_v35  ;;  %v5216_v35 = vld [vmem:[%s4732_s23 + $0x10] sm:$0xff] }
  0xda   : > { %1041 = vst.msk [vmem:[#allocation2 + $0x88] sm:$0xff] %vm778_vm1, %v1020_v32 }
  0xde   : > { %v950_v51 = vpop.permute.xlu1 %949 }
  0xdf   : > { %v963_v16 = vmul.f32 %v950_v51, %v5069_v30 }
  0xe0   : > { %1069 = vperm.xlu1 %4159, %v4750_v3   ;;  %v1026_v2 = vpop.permute.xlu2 %1025  ;;  %v889_v3 = vmul.f32 %v5115_v56, %v4898_v21 }
  0xe1   : > { %1054 = vperm.xlu0 %4158, %v4784_v23   ;;  %1064 = vperm.xlu2 %4157, %v4771_v15   ;;  %971 = vst.msk [vmem:[#allocation3 + $0x188] sm:$0xff] %vm647_vm0, %v963_v16  ;;  %v920_v15 = vpop.permute.xlu0 %919 }
  0xe2   : > { %1044 = vst.msk [vmem:[#allocation2 + $0x148] sm:$0xff] %vm778_vm1, %v1026_v2  ;;  %v957_v23 = vmul.f32 %v920_v15, %v5018_v44  ;;  %v901_v57 = vmul.f32 1.442695, %v889_v3  ;;  %v4625_v2 = vmov 4  }
  0xe4   : > { %965 = vst.msk [vmem:[#allocation3 + $0x8] sm:$0xff] %vm647_vm0, %v957_v23  ;;  %4299 = vpow2.f32 %v901_v57 }
  0xe6   : > { %v1018_v55 = vpop.permute.xlu1 %1017 }
  0xe7   : > { %1040 = vst.msk [vmem:[#allocation2 + $0x48] sm:$0xff] %vm778_vm1, %v1018_v55 }
  0xe8   : > { %1084 = vperm.xlu1 %4159, %v4799_v38   ;;  %v846_v4 = vpop.permute.xlu2 %845  ;;  %v885_v38 = vmul.f32 %v5115_v56, %v4878_v58 }
  0xe9   : > { %1079 = vperm.xlu0 %4158, %v4802_v42   ;;  %1074 = vperm.xlu2 %4157, %v4779_v19   ;;  %868 = vst.msk [vmem:[#allocation3 + $0x40] sm:$0xff] %vm778_vm1, %v846_v4  ;;  %v945_v19 = vpop.permute.xlu0 %944 }
  0xea   : > { %v893_v61 = vmul.f32 1.442695, %v885_v38  ;;  %v962_v63 = vmul.f32 %v945_v19, %v4985_v11  ;;  %v4300_v5 = vpop.eup %4299 }
  0xeb   : > { %913 = vst.msk [vmem:[#allocation2 + $0x108] sm:$0xff] %vm647_vm0, %v4300_v5 }
  0xec   : > { %4301 = vpow2.f32 %v893_v61  ;;  %970 = vst.msk [vmem:[#allocation3 + $0x148] sm:$0xff] %vm647_vm0, %v962_v63 }
  0xed   : > { %4303 = vpow2.f32 %v899_v12  ;;  %v5205_v12 = vld [vmem:[%s4732_s23 + $0x18] sm:$0xff] }
  0xee   : > { %v1024_v9 = vpop.permute.xlu1 %1023  ;;  %4305 = vpow2.f32 %v907_v31  ;;  %v5213_v31 = vld [vmem:[%s4732_s23 + $0x20] sm:$0xff] }
  0xef   : > { %1043 = vst.msk [vmem:[#allocation2 + $0x108] sm:$0xff] %vm778_vm1, %v1024_v9  ;;  %4307 = vpow2.f32 %v905_v39 }
  0xf0   : > { %4160 = vset.pattern.permute.xlu1 %v4625_v2 }
  0xf1   : > { %4161 = vset.pattern.permute.xlu2 %v4625_v2  ;;  %4162 = vset.pattern.permute.xlu0 %v4625_v2 }
  0xf2   : > { %v4302_v60 = vpop.eup %4301 }
  0xf3   : > { %909 = vst.msk [vmem:[#allocation2 + $0x8] sm:$0xff] %vm647_vm0, %v4302_v60  ;;  %v4304_v24 = vpop.eup %4303 }
  0xf4   : > { %912 = vst.msk [vmem:[#allocation2 + $0xc8] sm:$0xff] %vm647_vm0, %v4304_v24  ;;  %v4306_v36 = vpop.eup %4305 }
  0xf5   : > { %916 = vst.msk [vmem:[#allocation2 + $0x1c8] sm:$0xff] %vm647_vm0, %v4306_v36  ;;  %v4308_v43 = vpop.eup %4307 }
  0xf6   : > { %915 = vst.msk [vmem:[#allocation2 + $0x188] sm:$0xff] %vm647_vm0, %v4308_v43 }
  0xfc   : > { %v1016_v13 = vpop.permute.xlu0 %1015 }
  0xfd   : > { %1039 = vst.msk [vmem:[#allocation2 + $0x8] sm:$0xff] %vm778_vm1, %v1016_v13 }
 0x107   : > { %v1022_v28 = vpop.permute.xlu0 %1021 }
 0x108   : > { %1042 = vst.msk [vmem:[#allocation2 + $0xc8] sm:$0xff] %vm778_vm1, %v1022_v28  ;;  %v4502_v28 = vld [vmem:[%s4732_s23 + $0x8] sm:$0xff] }
 0x10c   : > { %v852_v20 = vpop.permute.xlu2 %851 }
 0x10d   : > { %871 = vst.msk [vmem:[#allocation3 + $0x100] sm:$0xff] %vm778_vm1, %v852_v20  ;;  %v4201_v20 = vld [vmem:[%s4720_s15 + $0x5] ss:$0 sm:$0xff] }
 0x10e   : > { %v1243_v24 = vmul.f32 %v4201_v20, %v4878_v58  ;;  %v1244_v36 = vmul.f32 %v4201_v20, %v4869_v54  ;;  %v1246_v39 = vmul.f32 %v4201_v20, %v4914_v8  ;;  %v1245_v43 = vmul.f32 %v4201_v20, %v4855_v49 }
 0x110   : > { %v1251_v17 = vmul.f32 1.442695, %v1243_v24 }
 0x112   : > { %4309 = vpow2.f32 %v1251_v17  ;;  %v4202_v17 = vld [vmem:[%s4720_s15 + $0x4] ss:$0 sm:$0xff] }
 0x115   : > { %v844_v62 = vpop.permute.xlu1 %843 }
 0x116   : > { %867 = vst.msk [vmem:[#allocation3] sm:$0xff] %vm778_vm1, %v844_v62 }
 0x12b   : > { %v858_v18 = vpop.permute.xlu2 %857 }
 0x12c   : > { %874 = vst.msk [vmem:[#allocation3 + $0x1c0] sm:$0xff] %vm778_vm1, %v858_v18  ;;  %v4503_v18 = vld [vmem:[%s4732_s23 + $0x28] sm:$0xff] }
 0x132   : > { %v850_v45 = vpop.permute.xlu1 %849 }
 0x133   : > { %v1050_v47 = vpop.permute.xlu2 %1049  ;;  %870 = vst.msk [vmem:[#allocation3 + $0xc0] sm:$0xff] %vm778_vm1, %v850_v45  ;;  %v1253_v45 = vmul.f32 1.442695, %v1244_v36  ;;  %v1146_v36 = vmul.f32 %v4202_v17, %v4869_v54 }
 0x134   : > { %v1087_v50 = vmul.f32 %v1050_v47, %v5018_v44  ;;  %v1257_v47 = vmul.f32 1.442695, %v1246_v39 }
 0x135   : > { %4311 = vpow2.f32 %v1253_v45  ;;  %v1155_v39 = vmul.f32 1.442695, %v1146_v36 }
 0x136   : > { %1103 = vrot.lane.b32.xlu2 %v1087_v50, %s4622_s18  ;;  %v1255_v50 = vmul.f32 1.442695, %v1245_v43  ;;  %4313 = vpow2.f32 %v1257_v47  ;;  %v1149_v43 = vmul.f32 %v4202_v17, %v4898_v21 }
 0x138   : > { %4315 = vpow2.f32 %v1255_v50  ;;  %v1161_v45 = vmul.f32 1.442695, %v1149_v43  ;;  %v1147_v43 = vmul.f32 %v4202_v17, %v4855_v49 }
 0x13a   : > { %v856_v56 = vpop.permute.xlu1 %855 }
 0x13b   : > { %v848_v32 = vpop.permute.xlu0 %847  ;;  %v1065_v51 = vpop.permute.xlu2 %1064  ;;  %873 = vst.msk [vmem:[#allocation3 + $0x180] sm:$0xff] %vm778_vm1, %v856_v56 }
 0x13c   : > { %869 = vst.msk [vmem:[#allocation3 + $0x80] sm:$0xff] %vm778_vm1, %v848_v32  ;;  %v1090_v16 = vmul.f32 %v1065_v51, %v5041_v10  ;;  %v4310_v56 = vpop.eup %4309  ;;  %v5225_v32 = vld [vmem:[%s4732_s23 + $0x38] sm:$0xff]  ;;  %v1247_v51 = vmul.f32 %v4201_v20, %v4898_v21 }
 0x13e   : > { %1109 = vrot.lane.b32.xlu2 %v1090_v16, %s4622_s18  ;;  %v1249_v16 = vmul.f32 %v4201_v20, %v4934_v6 }
 0x142   : > { %v1030_v4 = vpop.permute.xlu1 %1029 }
 0x143   : > { %v854_v55 = vpop.permute.xlu0 %853  ;;  %1046 = vst.msk [vmem:[#allocation2 + $0x1c8] sm:$0xff] %vm778_vm1, %v1030_v4  ;;  %v1075_v57 = vpop.permute.xlu2 %1074  ;;  %v1248_v4 = vmul.f32 %v4201_v20, %v4887_v7 }
 0x144   : > { %872 = vst.msk [vmem:[#allocation3 + $0x140] sm:$0xff] %vm778_vm1, %v854_v55  ;;  %v1092_v38 = vmul.f32 %v1075_v57, %v4985_v11  ;;  %v1259_v55 = vmul.f32 1.442695, %v1247_v51  ;;  %v1145_v51 = vmul.f32 %v4202_v17, %v4878_v58 }
 0x145   : > { %v1261_v57 = vmul.f32 1.442695, %v1248_v4 }
 0x146   : > { %4317 = vpow2.f32 %v1259_v55  ;;  %v1153_v4 = vmul.f32 1.442695, %v1145_v51  ;;  %v1152_v55 = vmul.f32 %v4202_v17, %v4923_v40 }
 0x14a   : > { %v1060_v3 = vpop.permute.xlu1 %1059 }
 0x14b   : > { %v1028_v15 = vpop.permute.xlu0 %1027  ;;  %v1089_v23 = vmul.f32 %v1060_v3, %v5014_v41  ;;  %v4626_v3 = vmov 5  }
 0x14c   : > { %1045 = vst.msk [vmem:[#allocation2 + $0x188] sm:$0xff] %vm778_vm1, %v1028_v15  ;;  %v1263_v15 = vmul.f32 1.442695, %v1249_v16 }
 0x14d   : > { %1107 = vrot.lane.b32.xlu1 %v1089_v23, %s4622_s18  ;;  %v4312_v23 = vpop.eup %4311 }
 0x14e   : > { %4319 = vpow2.f32 %v1263_v15 }
 0x14f   : > { %4321 = vpow2.f32 %v1261_v57 }
 0x152   : > { %v1070_v63 = vpop.permute.xlu1 %1069 }
 0x153   : > { %v1055_v19 = vpop.permute.xlu0 %1054  ;;  %v1091_v9 = vmul.f32 %v1070_v63, %v4966_v59 }
 0x154   : > { %v1088_v61 = vmul.f32 %v1055_v19, %v5030_v52 }
 0x155   : > { %1113 = vrot.lane.b32.xlu1 %v1092_v38, %s4622_s18  ;;  %v4314_v38 = vpop.eup %4313 }
 0x156   : > { %1105 = vrot.lane.b32.xlu0 %v1088_v61, %s4622_s18  ;;  %v4316_v19 = vpop.eup %4315 }
 0x157   : > { %v4318_v61 = vpop.eup %4317 }
 0x15a   : > { %v1085_v13 = vpop.permute.xlu1 %1084 }
 0x15b   : > { %v1080_v5 = vpop.permute.xlu0 %1079  ;;  %v1094_v62 = vmul.f32 %v1085_v13, %v5064_v29 }
 0x15c   : > { %v1093_v60 = vmul.f32 %v1080_v5, %v5069_v30  ;;  %v4320_v5 = vpop.eup %4319 }
 0x15d   : > { %1179 = vperm.xlu1 %4160, %v4501_v14  }
 0x15e   : > { %1115 = vrot.lane.b32.xlu2 %v1093_v60, %s4622_s18  ;;  %1111 = vrot.lane.b32.xlu0 %v1091_v9, %s4622_s18  ;;  %v4322_v9 = vpop.eup %4321  ;;  %v5244_v60 = vld [vmem:[%s4732_s23 + $0x8] sm:$0xff] }
 0x165   : > { %1194 = vperm.xlu1 %4160, %v5205_v12  }
 0x166   : > { %1184 = vperm.xlu2 %4161, %v4502_v28   ;;  %1117 = vrot.lane.b32.xlu0 %v1094_v62, %s4622_s18  ;;  %v5254_v62 = vld [vmem:[%s4732_s23 + $0x28] sm:$0xff]  ;;  %v5261_v28 = vld [vmem:[%s4732_s23 + $0x30] sm:$0xff] }
 0x16d   : > { %1204 = vperm.xlu1 %4160, %v4503_v18  }
 0x16e   : > { %1199 = vperm.xlu2 %4161, %v5213_v31   ;;  %1189 = vperm.xlu0 %4162, %v5216_v35  }
 0x175   : > { %1275 = vrot.lane.b32.xlu1 %v4310_v56, %s4622_s18 }
 0x176   : > { %1209 = vperm.xlu2 %4161, %v4802_v42   ;;  %1214 = vperm.xlu0 %4162, %v5225_v32   ;;  %v1250_v42 = vmul.f32 %v4201_v20, %v4923_v40  ;;  %v5247_v20 = vld [vmem:[%s4732_s23] sm:$0xff] }
 0x177   : > { %4164 = vset.pattern.permute.xlu1 %v4626_v3 }
 0x178   : > { %v1265_v63 = vmul.f32 1.442695, %v1250_v42  ;;  %v1148_v42 = vmul.f32 %v4202_v17, %v4914_v8 }
 0x17a   : > { %4323 = vpow2.f32 %v1265_v63 }
 0x17b   : > { %4325 = vpow2.f32 %v1155_v39  ;;  %v1151_v39 = vmul.f32 %v4202_v17, %v4934_v6 }
 0x17c   : > { %4327 = vpow2.f32 %v1161_v45 }
 0x17d   : > { %1281 = vrot.lane.b32.xlu1 %v4314_v38, %s4622_s18  ;;  %4329 = vpow2.f32 %v1153_v4 }
 0x17e   : > { %1277 = vrot.lane.b32.xlu2 %v4312_v23, %s4622_s18  ;;  %1279 = vrot.lane.b32.xlu0 %v4316_v19, %s4622_s18  ;;  %v1167_v23 = vmul.f32 1.442695, %v1152_v55  ;;  %v1150_v55 = vmul.f32 %v4202_v17, %v4887_v7 }
 0x17f   : > { %4163 = vset.pattern.permute.xlu0 %v4626_v3  ;;  %4165 = vset.pattern.permute.xlu2 %v4626_v3 }
 0x180   : > { %v4324_v14 = vpop.eup %4323  ;;  %4331 = vpow2.f32 %v1167_v23 }
 0x181   : > { %v4326_v47 = vpop.eup %4325 }
 0x182   : > { %1170 = vst.msk [vmem:[#allocation2 + $0x50] sm:$0xff] %vm647_vm0, %v4326_v47  ;;  %v4328_v15 = vpop.eup %4327  ;;  %v1165_v47 = vmul.f32 1.442695, %v1151_v39 }
 0x183   : > { %1173 = vst.msk [vmem:[#allocation2 + $0x110] sm:$0xff] %vm647_vm0, %v4328_v15  ;;  %v4330_v63 = vpop.eup %4329 }
 0x184   : > { %1169 = vst.msk [vmem:[#allocation2 + $0x10] sm:$0xff] %vm647_vm0, %v4330_v63 }
 0x185   : > { %1287 = vrot.lane.b32.xlu1 %v4320_v5, %s4622_s18  ;;  %v1159_v5 = vmul.f32 1.442695, %v1148_v42 }
 0x186   : > { %1283 = vrot.lane.b32.xlu2 %v4318_v61, %s4622_s18  ;;  %1285 = vrot.lane.b32.xlu0 %v4322_v9, %s4622_s18  ;;  %v4332_v9 = vpop.eup %4331 }
 0x187   : > { %4333 = vpow2.f32 %v1159_v5  ;;  %1176 = vst.msk [vmem:[#allocation2 + $0x1d0] sm:$0xff] %vm647_vm0, %v4332_v9 }
 0x188   : > { %4335 = vpow2.f32 %v1165_v47 }
 0x18d   : > { %1314 = vperm.xlu1 %4164, %v5244_v60   ;;  %v4334_v45 = vpop.eup %4333 }
 0x18e   : > { %1289 = vrot.lane.b32.xlu2 %v4324_v14, %s4622_s18  ;;  %1309 = vperm.xlu0 %4163, %v5247_v20   ;;  %1172 = vst.msk [vmem:[#allocation2 + $0xd0] sm:$0xff] %vm647_vm0, %v4334_v45  ;;  %v4336_v15 = vpop.eup %4335 }
 0x18f   : > { %1175 = vst.msk [vmem:[#allocation2 + $0x190] sm:$0xff] %vm647_vm0, %v4336_v15 }
 0x190   : > { %v1104_v13 = vpop.permute.xlu2 %1103 }
 0x191   : > { %1127 = vst.msk [vmem:[#allocation3 + $0x8] sm:$0xff] %vm778_vm1, %v1104_v13 }
 0x195   : > { %1324 = vperm.xlu1 %4164, %v5205_v12  }
 0x196   : > { %1319 = vperm.xlu2 %4165, %v5216_v35   ;;  %1334 = vperm.xlu0 %4163, %v5254_v62  }
 0x198   : > { %v1110_v24 = vpop.permute.xlu2 %1109 }
 0x199   : > { %1130 = vst.msk [vmem:[#allocation3 + $0xc8] sm:$0xff] %vm778_vm1, %v1110_v24 }
 0x19d   : > { %1339 = vperm.xlu1 %4164, %v5261_v28  }
 0x19e   : > { %1329 = vperm.xlu2 %4165, %v5213_v31  }
 0x1a6   : > { %1344 = vperm.xlu2 %4165, %v5225_v32  }
 0x1b8   : > { %v1116_v18 = vpop.permute.xlu2 %1115 }
 0x1b9   : > { %1133 = vst.msk [vmem:[#allocation3 + $0x188] sm:$0xff] %vm778_vm1, %v1116_v18 }
 0x1bf   : > { %v1108_v50 = vpop.permute.xlu1 %1107 }
 0x1c0   : > { %v1185_v56 = vpop.permute.xlu2 %1184  ;;  %1129 = vst.msk [vmem:[#allocation3 + $0x88] sm:$0xff] %vm778_vm1, %v1108_v50  ;;  %v1157_v50 = vmul.f32 1.442695, %v1147_v43  ;;  %v4627_v43 = vmov 6  }
 0x1c1   : > { %v1218_v16 = vmul.f32 %v1185_v56, %v5030_v52  ;;  %4166 = vset.pattern.permute.xlu2 %v4627_v43  ;;  %4168 = vset.pattern.permute.xlu1 %v4627_v43 }
 0x1c2   : > { %4337 = vpow2.f32 %v1157_v50  ;;  %4167 = vset.pattern.permute.xlu0 %v4627_v43 }
 0x1c3   : > { %1226 = vst.msk [vmem:[#allocation3 + $0x50] sm:$0xff] %vm647_vm0, %v1218_v16 }
 0x1c7   : > { %v1114_v57 = vpop.permute.xlu1 %1113 }
 0x1c8   : > { %v1106_v38 = vpop.permute.xlu0 %1105  ;;  %v1200_v19 = vpop.permute.xlu2 %1199  ;;  %1132 = vst.msk [vmem:[#allocation3 + $0x148] sm:$0xff] %vm778_vm1, %v1114_v57  ;;  %v1163_v57 = vmul.f32 1.442695, %v1150_v55 }
 0x1c9   : > { %1128 = vst.msk [vmem:[#allocation3 + $0x48] sm:$0xff] %vm778_vm1, %v1106_v38  ;;  %v1221_v61 = vmul.f32 %v1200_v19, %v4966_v59  ;;  %v4338_v23 = vpop.eup %4337 }
 0x1ca   : > { %1171 = vst.msk [vmem:[#allocation2 + $0x90] sm:$0xff] %vm647_vm0, %v4338_v23  ;;  %4339 = vpow2.f32 %v1163_v57 }
 0x1cb   : > { %1229 = vst.msk [vmem:[#allocation3 + $0x110] sm:$0xff] %vm647_vm0, %v1221_v61 }
 0x1cf   : > { %v1180_v14 = vpop.permute.xlu1 %1179 }
 0x1d0   : > { %v1210_v13 = vpop.permute.xlu2 %1209  ;;  %v1112_v24 = vpop.permute.xlu0 %1111  ;;  %v1217_v36 = vmul.f32 %v1180_v14, %v5018_v44 }
 0x1d1   : > { %v1223_v18 = vmul.f32 %v1210_v13, %v5069_v30  ;;  %1131 = vst.msk [vmem:[#allocation3 + $0x108] sm:$0xff] %vm778_vm1, %v1112_v24  ;;  %v4340_v63 = vpop.eup %4339 }
 0x1d2   : > { %1225 = vst.msk [vmem:[#allocation3 + $0x10] sm:$0xff] %vm647_vm0, %v1217_v36 }
 0x1d3   : > { %1231 = vst.msk [vmem:[#allocation3 + $0x190] sm:$0xff] %vm647_vm0, %v1223_v18 }
 0x1d4   : > { %1174 = vst.msk [vmem:[#allocation2 + $0x150] sm:$0xff] %vm647_vm0, %v4340_v63  ;;  %v4203_v63 = vld [vmem:[%s4720_s15 + $0x7] ss:$0 sm:$0xff] }
 0x1d7   : > { %v1195_v56 = vpop.permute.xlu1 %1194 }
 0x1d8   : > { %v1278_v51 = vpop.permute.xlu2 %1277  ;;  %v1118_v16 = vpop.permute.xlu0 %1117  ;;  %v1220_v4 = vmul.f32 %v1195_v56, %v5041_v10 }
 0x1d9   : > { %1300 = vst.msk [vmem:[#allocation2 + $0x50] sm:$0xff] %vm778_vm1, %v1278_v51 }
 0x1da   : > { %1134 = vst.msk [vmem:[#allocation3 + $0x1c8] sm:$0xff] %vm778_vm1, %v1118_v16 }
 0x1db   : > { %1228 = vst.msk [vmem:[#allocation3 + $0xd0] sm:$0xff] %vm647_vm0, %v1220_v4 }
 0x1df   : > { %v1205_v38 = vpop.permute.xlu1 %1204 }
 0x1e0   : > { %v1284_v19 = vpop.permute.xlu2 %1283  ;;  %v1190_v42 = vpop.permute.xlu0 %1189  ;;  %v1222_v61 = vmul.f32 %v1205_v38, %v4985_v11 }
 0x1e1   : > { %1303 = vst.msk [vmem:[#allocation2 + $0x110] sm:$0xff] %vm778_vm1, %v1284_v19  ;;  %v1219_v17 = vmul.f32 %v1190_v42, %v5014_v41 }
 0x1e2   : > { %1230 = vst.msk [vmem:[#allocation3 + $0x150] sm:$0xff] %vm647_vm0, %v1222_v61 }
 0x1e3   : > { %1227 = vst.msk [vmem:[#allocation3 + $0x90] sm:$0xff] %vm647_vm0, %v1219_v17 }
 0x1e7   : > { %v1276_v5 = vpop.permute.xlu1 %1275 }
 0x1e8   : > { %v1290_v9 = vpop.permute.xlu2 %1289  ;;  %v1215_v14 = vpop.permute.xlu0 %1214  ;;  %1299 = vst.msk [vmem:[#allocation2 + $0x10] sm:$0xff] %vm778_vm1, %v1276_v5  ;;  %v1503_v5 = vmul.f32 %v4203_v63, %v4878_v58 }
 0x1e9   : > { %1306 = vst.msk [vmem:[#allocation2 + $0x1d0] sm:$0xff] %vm778_vm1, %v1290_v9  ;;  %v1224_v13 = vmul.f32 %v1215_v14, %v5064_v29  ;;  %v1504_v9 = vmul.f32 %v4203_v63, %v4869_v54 }
 0x1ea   : > { %v1511_v14 = vmul.f32 1.442695, %v1503_v5 }
 0x1eb   : > { %1232 = vst.msk [vmem:[#allocation3 + $0x1d0] sm:$0xff] %vm647_vm0, %v1224_v13  ;;  %v1513_v13 = vmul.f32 1.442695, %v1504_v9 }
 0x1ec   : > { %4341 = vpow2.f32 %v1511_v14  ;;  %v4204_v14 = vld [vmem:[%s4720_s15 + $0x6] ss:$0 sm:$0xff] }
 0x1ed   : > { %4343 = vpow2.f32 %v1513_v13  ;;  %v1405_v13 = vmul.f32 %v4204_v14, %v4878_v58 }
 0x1ef   : > { %v1282_v24 = vpop.permute.xlu1 %1281 }
 0x1f0   : > { %v1320_v36 = vpop.permute.xlu2 %1319  ;;  %v1280_v39 = vpop.permute.xlu0 %1279  ;;  %1302 = vst.msk [vmem:[#allocation2 + $0xd0] sm:$0xff] %vm778_vm1, %v1282_v24  ;;  %v1505_v24 = vmul.f32 %v4203_v63, %v4855_v49 }
 0x1f1   : > { %v1349_v18 = vmul.f32 %v1320_v36, %v5014_v41  ;;  %1301 = vst.msk [vmem:[#allocation2 + $0x90] sm:$0xff] %vm778_vm1, %v1280_v39  ;;  %v1506_v36 = vmul.f32 %v4203_v63, %v4914_v8  ;;  %v1507_v39 = vmul.f32 %v4203_v63, %v4898_v21 }
 0x1f3   : > { %1367 = vrot.lane.b32.xlu2 %v1349_v18, %s4622_s18  ;;  %v1515_v18 = vmul.f32 1.442695, %v1505_v24  ;;  %v1413_v24 = vmul.f32 1.442695, %v1405_v13 }
 0x1f5   : > { %4345 = vpow2.f32 %v1515_v18  ;;  %v1408_v18 = vmul.f32 %v4204_v14, %v4914_v8 }
 0x1f7   : > { %v1288_v45 = vpop.permute.xlu1 %1287 }
 0x1f8   : > { %v1286_v47 = vpop.permute.xlu0 %1285  ;;  %1305 = vst.msk [vmem:[#allocation2 + $0x190] sm:$0xff] %vm778_vm1, %v1288_v45  ;;  %v1330_v4 = vpop.permute.xlu2 %1329  ;;  %v1517_v45 = vmul.f32 1.442695, %v1506_v36 }
 0x1f9   : > { %1304 = vst.msk [vmem:[#allocation2 + $0x150] sm:$0xff] %vm778_vm1, %v1286_v47  ;;  %v1351_v15 = vmul.f32 %v1330_v4, %v4966_v59  ;;  %v1519_v47 = vmul.f32 1.442695, %v1507_v39  ;;  %v1510_v4 = vmul.f32 %v4203_v63, %v4923_v40 }
 0x1fa   : > { %4347 = vpow2.f32 %v1517_v45  ;;  %v1419_v45 = vmul.f32 1.442695, %v1408_v18  ;;  %v1409_v18 = vmul.f32 %v4204_v14, %v4898_v21 }
 0x1fb   : > { %4349 = vpow2.f32 %v1519_v47 }
 0x1ff   : > { %v1315_v50 = vpop.permute.xlu1 %1314 }
 0x200   : > { %v1310_v56 = vpop.permute.xlu0 %1309  ;;  %v1348_v51 = vmul.f32 %v1315_v50, %v5030_v52  ;;  %v1345_v19 = vpop.permute.xlu2 %1344 }
 0x201   : > { %v1347_v16 = vmul.f32 %v1310_v56, %v5018_v44  ;;  %v1354_v61 = vmul.f32 %v1345_v19, %v5064_v29  ;;  %v4342_v50 = vpop.eup %4341 }
 0x202   : > { %1365 = vrot.lane.b32.xlu1 %v1348_v51, %s4622_s18  ;;  %v4344_v56 = vpop.eup %4343  ;;  %v1508_v51 = vmul.f32 %v4203_v63, %v4887_v7 }
 0x203   : > { %1363 = vrot.lane.b32.xlu0 %v1347_v16, %s4622_s18  ;;  %v1509_v16 = vmul.f32 %v4203_v63, %v4934_v6 }
 0x207   : > { %v1325_v55 = vpop.permute.xlu1 %1324 }
 0x208   : > { %v1350_v23 = vmul.f32 %v1325_v55, %v5041_v10  ;;  %v1335_v57 = vpop.permute.xlu0 %1334  ;;  %v1521_v55 = vmul.f32 1.442695, %v1508_v51 }
 0x209   : > { %v1352_v38 = vmul.f32 %v1335_v57, %v4985_v11  ;;  %v4346_v57 = vpop.eup %4345 }
 0x20a   : > { %1371 = vrot.lane.b32.xlu1 %v1351_v15, %s4622_s18  ;;  %v4628_v15 = vmov 7   ;;  %v4348_v19 = vpop.eup %4347  ;;  %4351 = vpow2.f32 %v1521_v55 }
 0x20b   : > { %1369 = vrot.lane.b32.xlu0 %v1350_v23, %s4622_s18  ;;  %1373 = vrot.lane.b32.xlu2 %v1352_v38, %s4622_s18  ;;  %v1523_v23 = vmul.f32 1.442695, %v1509_v16  ;;  %v1525_v38 = vmul.f32 1.442695, %v1510_v4  ;;  %v1411_v4 = vmul.f32 %v4204_v14, %v4934_v6 }
 0x20d   : > { %4353 = vpow2.f32 %v1523_v23  ;;  %v1425_v23 = vmul.f32 1.442695, %v1411_v4 }
 0x20e   : > { %4355 = vpow2.f32 %v1525_v38 }
 0x20f   : > { %v1340_v42 = vpop.permute.xlu1 %1339  ;;  %4357 = vpow2.f32 %v1413_v24 }
 0x210   : > { %v1353_v17 = vmul.f32 %v1340_v42, %v5069_v30  ;;  %v4350_v42 = vpop.eup %4349  ;;  %4359 = vpow2.f32 %v1419_v45 }
 0x211   : > { %4361 = vpow2.f32 %v1425_v23 }
 0x212   : > { %1377 = vrot.lane.b32.xlu1 %v1354_v61, %s4622_s18  ;;  %v4352_v61 = vpop.eup %4351 }
 0x213   : > { %1375 = vrot.lane.b32.xlu0 %v1353_v17, %s4622_s18  ;;  %1439 = vperm.xlu2 %4166, %v5247_v20   ;;  %v4354_v17 = vpop.eup %4353 }
 0x214   : > { %v4356_v63 = vpop.eup %4355 }
 0x215   : > { %v4358_v47 = vpop.eup %4357 }
 0x216   : > { %1429 = vst.msk [vmem:[#allocation2 + $0x18] sm:$0xff] %vm647_vm0, %v4358_v47  ;;  %v4360_v55 = vpop.eup %4359 }
 0x217   : > { %1432 = vst.msk [vmem:[#allocation2 + $0xd8] sm:$0xff] %vm647_vm0, %v4360_v55 }
 0x21a   : > { %1449 = vperm.xlu1 %4168, %v5216_v35  }
 0x21b   : > { %1454 = vperm.xlu2 %4166, %v5205_v12   ;;  %1444 = vperm.xlu0 %4167, %v5244_v60  }
 0x222   : > { %1459 = vperm.xlu1 %4168, %v5213_v31  }
 0x223   : > { %1464 = vperm.xlu2 %4166, %v5254_v62   ;;  %1469 = vperm.xlu0 %4167, %v5261_v28  }
 0x22a   : > { %1474 = vperm.xlu1 %4168, %v5225_v32  }
 0x22b   : > { %1535 = vrot.lane.b32.xlu2 %v4342_v50, %s4622_s18  ;;  %1537 = vrot.lane.b32.xlu0 %v4344_v56, %s4622_s18 }
 0x22c   : > { %4170 = vset.pattern.permute.xlu2 %v4628_v15  ;;  %4171 = vset.pattern.permute.xlu0 %v4628_v15 }
 0x232   : > { %1539 = vrot.lane.b32.xlu1 %v4346_v57, %s4622_s18 }
 0x233   : > { %1541 = vrot.lane.b32.xlu2 %v4348_v19, %s4622_s18  ;;  %1543 = vrot.lane.b32.xlu0 %v4350_v42, %s4622_s18  ;;  %v1407_v42 = vmul.f32 %v4204_v14, %v4855_v49 }
 0x234   : > { %4169 = vset.pattern.permute.xlu1 %v4628_v15 }
 0x23a   : > { %1545 = vrot.lane.b32.xlu1 %v4352_v61, %s4622_s18 }
 0x23b   : > { %1547 = vrot.lane.b32.xlu2 %v4354_v17, %s4622_s18  ;;  %1549 = vrot.lane.b32.xlu0 %v4356_v63, %s4622_s18  ;;  %v1406_v17 = vmul.f32 %v4204_v14, %v4869_v54  ;;  %v1417_v63 = vmul.f32 1.442695, %v1407_v42 }
 0x23d   : > { %4363 = vpow2.f32 %v1417_v63 }
 0x242   : > { %1569 = vperm.xlu1 %4169, %v5247_v20  }
 0x243   : > { %1574 = vperm.xlu2 %4170, %v5244_v60   ;;  %1579 = vperm.xlu0 %4171, %v5216_v35  }
 0x24a   : > { %1584 = vperm.xlu1 %4169, %v5205_v12  }
 0x24b   : > { %1589 = vperm.xlu2 %4170, %v5213_v31   ;;  %1604 = vperm.xlu0 %4171, %v5225_v32  }
 0x24d   : > { %v1368_v5 = vpop.permute.xlu2 %1367 }
 0x24e   : > { %1389 = vst.msk [vmem:[#allocation3 + $0x90] sm:$0xff] %vm778_vm1, %v1368_v5  ;;  %v4362_v5 = vpop.eup %4361 }
 0x24f   : > { %1435 = vst.msk [vmem:[#allocation2 + $0x198] sm:$0xff] %vm647_vm0, %v4362_v5  ;;  %v4364_v45 = vpop.eup %4363 }
 0x250   : > { %1431 = vst.msk [vmem:[#allocation2 + $0x98] sm:$0xff] %vm647_vm0, %v4364_v45 }
 0x252   : > { %1594 = vperm.xlu1 %4169, %v5254_v62  }
 0x253   : > { %1599 = vperm.xlu2 %4170, %v5261_v28  }
 0x265   : > { %v1374_v9 = vpop.permute.xlu2 %1373 }
 0x266   : > { %1392 = vst.msk [vmem:[#allocation3 + $0x150] sm:$0xff] %vm778_vm1, %v1374_v9  ;;  %v1415_v9 = vmul.f32 1.442695, %v1406_v17 }
 0x268   : > { %4365 = vpow2.f32 %v1415_v9 }
 0x26d   : > { %v1440_v36 = vpop.permute.xlu2 %1439 }
 0x26e   : > { %v1477_v39 = vmul.f32 %v1440_v36, %v5018_v44 }
 0x270   : > { %1485 = vst.msk [vmem:[#allocation3 + $0x18] sm:$0xff] %vm647_vm0, %v1477_v39  ;;  %v1410_v39 = vmul.f32 %v4204_v14, %v4887_v7 }
 0x272   : > { %v1423_v47 = vmul.f32 1.442695, %v1410_v39 }
 0x274   : > { %v1366_v50 = vpop.permute.xlu1 %1365  ;;  %4367 = vpow2.f32 %v1423_v47 }
 0x275   : > { %v1364_v56 = vpop.permute.xlu0 %1363  ;;  %1388 = vst.msk [vmem:[#allocation3 + $0x50] sm:$0xff] %vm778_vm1, %v1366_v50  ;;  %v1455_v51 = vpop.permute.xlu2 %1454  ;;  %v1421_v50 = vmul.f32 1.442695, %v1409_v18 }
 0x276   : > { %1387 = vst.msk [vmem:[#allocation3 + $0x10] sm:$0xff] %vm778_vm1, %v1364_v56  ;;  %v1480_v16 = vmul.f32 %v1455_v51, %v5041_v10  ;;  %v4366_v56 = vpop.eup %4365 }
 0x277   : > { %1430 = vst.msk [vmem:[#allocation2 + $0x58] sm:$0xff] %vm647_vm0, %v4366_v56  ;;  %4369 = vpow2.f32 %v1421_v50 }
 0x278   : > { %1488 = vst.msk [vmem:[#allocation3 + $0xd8] sm:$0xff] %vm647_vm0, %v1480_v16 }
 0x27c   : > { %v1372_v57 = vpop.permute.xlu1 %1371 }
 0x27d   : > { %v1370_v38 = vpop.permute.xlu0 %1369  ;;  %1391 = vst.msk [vmem:[#allocation3 + $0x110] sm:$0xff] %vm778_vm1, %v1372_v57  ;;  %v1465_v19 = vpop.permute.xlu2 %1464  ;;  %v1412_v57 = vmul.f32 %v4204_v14, %v4923_v40 }
 0x27e   : > { %1390 = vst.msk [vmem:[#allocation3 + $0xd0] sm:$0xff] %vm778_vm1, %v1370_v38  ;;  %v1482_v61 = vmul.f32 %v1465_v19, %v4985_v11  ;;  %v4368_v38 = vpop.eup %4367 }
 0x27f   : > { %v4370_v19 = vpop.eup %4369  ;;  %v1427_v42 = vmul.f32 1.442695, %v1412_v57  ;;  %1434 = vst.msk [vmem:[#allocation2 + $0x158] sm:$0xff] %vm647_vm0, %v4368_v38 }
 0x280   : > { %1490 = vst.msk [vmem:[#allocation3 + $0x158] sm:$0xff] %vm647_vm0, %v1482_v61 }
 0x281   : > { %1433 = vst.msk [vmem:[#allocation2 + $0x118] sm:$0xff] %vm647_vm0, %v4370_v19  ;;  %4371 = vpow2.f32 %v1427_v42 }
 0x284   : > { %v1378_v13 = vpop.permute.xlu1 %1377 }
 0x285   : > { %v1376_v24 = vpop.permute.xlu0 %1375  ;;  %1394 = vst.msk [vmem:[#allocation3 + $0x1d0] sm:$0xff] %vm778_vm1, %v1378_v13  ;;  %v1536_v36 = vpop.permute.xlu2 %1535 }
 0x286   : > { %1393 = vst.msk [vmem:[#allocation3 + $0x190] sm:$0xff] %vm778_vm1, %v1376_v24 }
 0x287   : > { %1559 = vst.msk [vmem:[#allocation2 + $0x18] sm:$0xff] %vm778_vm1, %v1536_v36  ;;  %v4372_v9 = vpop.eup %4371 }
 0x288   : > { %1436 = vst.msk [vmem:[#allocation2 + $0x1d8] sm:$0xff] %vm647_vm0, %v4372_v9 }
 0x28c   : > { %v1450_v51 = vpop.permute.xlu1 %1449 }
 0x28d   : > { %v1479_v16 = vmul.f32 %v1450_v51, %v5014_v41  ;;  %v1542_v4 = vpop.permute.xlu2 %1541  ;;  %v1445_v55 = vpop.permute.xlu0 %1444  ;;  %v4629_v51 = vmov 8  }
 0x28e   : > { %1562 = vst.msk [vmem:[#allocation2 + $0xd8] sm:$0xff] %vm778_vm1, %v1542_v4  ;;  %v1478_v23 = vmul.f32 %v1445_v55, %v5030_v52  ;;  %4173 = vset.pattern.permute.xlu1 %v4629_v51  ;;  %4174 = vset.pattern.permute.xlu2 %v4629_v51 }
 0x28f   : > { %1487 = vst.msk [vmem:[#allocation3 + $0x98] sm:$0xff] %vm647_vm0, %v1479_v16  ;;  %4172 = vset.pattern.permute.xlu0 %v4629_v51 }
 0x290   : > { %1486 = vst.msk [vmem:[#allocation3 + $0x58] sm:$0xff] %vm647_vm0, %v1478_v23 }
 0x294   : > { %v1460_v61 = vpop.permute.xlu1 %1459 }
 0x295   : > { %v1481_v17 = vmul.f32 %v1460_v61, %v4966_v59  ;;  %v1548_v63 = vpop.permute.xlu2 %1547  ;;  %v1470_v5 = vpop.permute.xlu0 %1469 }
 0x296   : > { %1565 = vst.msk [vmem:[#allocation2 + $0x198] sm:$0xff] %vm778_vm1, %v1548_v63  ;;  %v1483_v14 = vmul.f32 %v1470_v5, %v5069_v30 }
 0x297   : > { %1489 = vst.msk [vmem:[#allocation3 + $0x118] sm:$0xff] %vm647_vm0, %v1481_v17 }
 0x298   : > { %1491 = vst.msk [vmem:[#allocation3 + $0x198] sm:$0xff] %vm647_vm0, %v1483_v14 }
 0x29c   : > { %v1475_v13 = vpop.permute.xlu1 %1474 }
 0x29d   : > { %v1484_v24 = vmul.f32 %v1475_v13, %v5064_v29  ;;  %v1575_v36 = vpop.permute.xlu2 %1574  ;;  %v1538_v39 = vpop.permute.xlu0 %1537  ;;  %v4205_v13 = vld [vmem:[%s4720_s15 + $0x9] ss:$0 sm:$0xff] }
 0x29e   : > { %v1608_v18 = vmul.f32 %v1575_v36, %v5030_v52  ;;  %1560 = vst.msk [vmem:[#allocation2 + $0x58] sm:$0xff] %vm778_vm1, %v1538_v39  ;;  %v1765_v36 = vmul.f32 %v4205_v13, %v4855_v49 }
 0x29f   : > { %1492 = vst.msk [vmem:[#allocation3 + $0x1d8] sm:$0xff] %vm647_vm0, %v1484_v24  ;;  %v1763_v24 = vmul.f32 %v4205_v13, %v4878_v58 }
 0x2a0   : > { %1625 = vrot.lane.b32.xlu2 %v1608_v18, %s4622_s18  ;;  %v1775_v18 = vmul.f32 1.442695, %v1765_v36 }
 0x2a1   : > { %v1771_v39 = vmul.f32 1.442695, %v1763_v24 }
 0x2a3   : > { %4373 = vpow2.f32 %v1771_v39 }
 0x2a4   : > { %v1540_v45 = vpop.permute.xlu1 %1539  ;;  %4375 = vpow2.f32 %v1775_v18 }
 0x2a5   : > { %1561 = vst.msk [vmem:[#allocation2 + $0x98] sm:$0xff] %vm778_vm1, %v1540_v45  ;;  %v1590_v47 = vpop.permute.xlu2 %1589  ;;  %v1544_v50 = vpop.permute.xlu0 %1543  ;;  %v1764_v45 = vmul.f32 %v4205_v13, %v4869_v54 }
 0x2a6   : > { %v1611_v56 = vmul.f32 %v1590_v47, %v4966_v59  ;;  %1563 = vst.msk [vmem:[#allocation2 + $0x118] sm:$0xff] %vm778_vm1, %v1544_v50  ;;  %v1766_v47 = vmul.f32 %v4205_v13, %v4914_v8  ;;  %v1768_v50 = vmul.f32 %v4205_v13, %v4887_v7 }
 0x2a8   : > { %1631 = vrot.lane.b32.xlu2 %v1611_v56, %s4622_s18  ;;  %v1773_v56 = vmul.f32 1.442695, %v1764_v45 }
 0x2aa   : > { %4377 = vpow2.f32 %v1773_v56 }
 0x2ac   : > { %v1546_v16 = vpop.permute.xlu1 %1545 }
 0x2ad   : > { %1564 = vst.msk [vmem:[#allocation2 + $0x158] sm:$0xff] %vm778_vm1, %v1546_v16  ;;  %v1550_v4 = vpop.permute.xlu0 %1549  ;;  %v1600_v63 = vpop.permute.xlu2 %1599  ;;  %v1777_v16 = vmul.f32 1.442695, %v1766_v47 }
 0x2ae   : > { %1566 = vst.msk [vmem:[#allocation2 + $0x1d8] sm:$0xff] %vm778_vm1, %v1550_v4  ;;  %v1613_v14 = vmul.f32 %v1600_v63, %v5069_v30  ;;  %v1781_v4 = vmul.f32 1.442695, %v1768_v50  ;;  %v4206_v50 = vld [vmem:[%s4720_s15 + $0x8] ss:$0 sm:$0xff] }
 0x2af   : > { %4379 = vpow2.f32 %v1777_v16 }
 0x2b0   : > { %4381 = vpow2.f32 %v1781_v4 }
 0x2b4   : > { %v1570_v55 = vpop.permute.xlu1 %1569 }
 0x2b5   : > { %v1607_v23 = vmul.f32 %v1570_v55, %v5018_v44  ;;  %v1580_v57 = vpop.permute.xlu0 %1579  ;;  %v4374_v55 = vpop.eup %4373 }
 0x2b6   : > { %v1609_v38 = vmul.f32 %v1580_v57, %v5014_v41  ;;  %v1767_v57 = vmul.f32 %v4205_v13, %v4898_v21 }
 0x2b7   : > { %1623 = vrot.lane.b32.xlu1 %v1607_v23, %s4622_s18  ;;  %v4376_v23 = vpop.eup %4375 }
 0x2b8   : > { %1627 = vrot.lane.b32.xlu0 %v1609_v38, %s4622_s18  ;;  %v1769_v38 = vmul.f32 %v4205_v13, %v4934_v6 }
 0x2bc   : > { %v1585_v19 = vpop.permute.xlu1 %1584 }
 0x2bd   : > { %v1610_v42 = vmul.f32 %v1585_v19, %v5041_v10  ;;  %v1605_v61 = vpop.permute.xlu0 %1604  ;;  %v4630_v19 = vmov 9  }
 0x2be   : > { %v1614_v17 = vmul.f32 %v1605_v61, %v5064_v29  ;;  %v1783_v61 = vmul.f32 1.442695, %v1769_v38  ;;  %v1666_v38 = vmul.f32 %v4206_v50, %v4869_v54 }
 0x2bf   : > { %1629 = vrot.lane.b32.xlu1 %v1610_v42, %s4622_s18  ;;  %v1779_v42 = vmul.f32 1.442695, %v1767_v57 }
 0x2c0   : > { %1637 = vrot.lane.b32.xlu2 %v1614_v17, %s4622_s18  ;;  %v4378_v17 = vpop.eup %4377 }
 0x2c1   : > { %v4380_v63 = vpop.eup %4379  ;;  %4383 = vpow2.f32 %v1779_v42 }
 0x2c2   : > { %4385 = vpow2.f32 %v1783_v61  ;;  %v1665_v61 = vmul.f32 %v4206_v50, %v4878_v58 }
 0x2c4   : > { %v1595_v5 = vpop.permute.xlu1 %1594 }
 0x2c5   : > { %v1612_v9 = vmul.f32 %v1595_v5, %v4985_v11  ;;  %v4382_v5 = vpop.eup %4381 }
 0x2c7   : > { %1635 = vrot.lane.b32.xlu1 %v1613_v14, %s4622_s18  ;;  %1633 = vrot.lane.b32.xlu0 %v1612_v9, %s4622_s18  ;;  %v1770_v14 = vmul.f32 %v4205_v13, %v4923_v40  ;;  %v4384_v24 = vpop.eup %4383 }
 0x2c8   : > { %1709 = vperm.xlu2 %4174, %v5216_v35   ;;  %v4386_v36 = vpop.eup %4385 }
 0x2c9   : > { %v1785_v9 = vmul.f32 1.442695, %v1770_v14 }
 0x2cb   : > { %4387 = vpow2.f32 %v1785_v9 }
 0x2cf   : > { %1704 = vperm.xlu1 %4173, %v5244_v60   ;;  %1699 = vperm.xlu0 %4172, %v5247_v20  }
 0x2d0   : > { %1719 = vperm.xlu2 %4174, %v5213_v31  }
 0x2d1   : > { %v4388_v13 = vpop.eup %4387 }
 0x2d7   : > { %1714 = vperm.xlu1 %4173, %v5205_v12   ;;  %1724 = vperm.xlu0 %4172, %v5254_v62  }
 0x2d8   : > { %1734 = vperm.xlu2 %4174, %v5225_v32  }
 0x2df   : > { %1729 = vperm.xlu1 %4173, %v5261_v28   ;;  %1795 = vrot.lane.b32.xlu0 %v4374_v55, %s4622_s18 }
 0x2e0   : > { %1799 = vrot.lane.b32.xlu2 %v4376_v23, %s4622_s18  ;;  %4176 = vset.pattern.permute.xlu0 %v4630_v19 }
 0x2e1   : > { %4175 = vset.pattern.permute.xlu2 %v4630_v19 }
 0x2e7   : > { %1797 = vrot.lane.b32.xlu1 %v4378_v17, %s4622_s18  ;;  %1801 = vrot.lane.b32.xlu0 %v4380_v63, %s4622_s18  ;;  %v1675_v17 = vmul.f32 1.442695, %v1666_v38 }
 0x2e8   : > { %1805 = vrot.lane.b32.xlu2 %v4382_v5, %s4622_s18  ;;  %4177 = vset.pattern.permute.xlu1 %v4630_v19  ;;  %v1673_v5 = vmul.f32 1.442695, %v1665_v61 }
 0x2ef   : > { %1803 = vrot.lane.b32.xlu1 %v4384_v24, %s4622_s18  ;;  %1807 = vrot.lane.b32.xlu0 %v4386_v36, %s4622_s18  ;;  %v1668_v36 = vmul.f32 %v4206_v50, %v4914_v8 }
 0x2f0   : > { %1829 = vperm.xlu2 %4175, %v5247_v20  }
 0x2f7   : > { %1809 = vrot.lane.b32.xlu1 %v4388_v13, %s4622_s18  ;;  %1834 = vperm.xlu0 %4176, %v5244_v60   ;;  %v1669_v13 = vmul.f32 %v4206_v50, %v4898_v21 }
 0x2f8   : > { %1844 = vperm.xlu2 %4175, %v5205_v12  }
 0x2fa   : > { %v1626_v39 = vpop.permute.xlu2 %1625 }
 0x2fb   : > { %1648 = vst.msk [vmem:[#allocation3 + $0x58] sm:$0xff] %vm778_vm1, %v1626_v39 }
 0x2ff   : > { %1839 = vperm.xlu1 %4177, %v5216_v35   ;;  %1859 = vperm.xlu0 %4176, %v5261_v28   ;;  %v1667_v35 = vmul.f32 %v4206_v50, %v4855_v49 }
 0x300   : > { %1854 = vperm.xlu2 %4175, %v5254_v62  }
 0x301   : > { %v1677_v28 = vmul.f32 1.442695, %v1667_v35 }
 0x302   : > { %v1632_v18 = vpop.permute.xlu2 %1631 }
 0x303   : > { %1651 = vst.msk [vmem:[#allocation3 + $0x118] sm:$0xff] %vm778_vm1, %v1632_v18  ;;  %4389 = vpow2.f32 %v1677_v28  ;;  %v1679_v18 = vmul.f32 1.442695, %v1668_v36 }
 0x307   : > { %1849 = vperm.xlu1 %4177, %v5213_v31  }
 0x309   : > { %v4390_v55 = vpop.eup %4389 }
 0x30a   : > { %1691 = vst.msk [vmem:[#allocation2 + $0xa0] sm:$0xff] %vm647_vm0, %v4390_v55 }
 0x30f   : > { %1864 = vperm.xlu1 %4177, %v5225_v32   ;;  %v1670_v32 = vmul.f32 %v4206_v50, %v4887_v7 }
 0x311   : > { %v1683_v4 = vmul.f32 1.442695, %v1670_v32 }
 0x313   : > { %4391 = vpow2.f32 %v1683_v4 }
 0x314   : > { %4393 = vpow2.f32 %v1675_v17 }
 0x315   : > { %4395 = vpow2.f32 %v1673_v5 }
 0x316   : > { %4397 = vpow2.f32 %v1679_v18 }
 0x319   : > { %v4392_v63 = vpop.eup %4391 }
 0x31a   : > { %v1638_v45 = vpop.permute.xlu2 %1637  ;;  %1694 = vst.msk [vmem:[#allocation2 + $0x160] sm:$0xff] %vm647_vm0, %v4392_v63  ;;  %v4394_v39 = vpop.eup %4393 }
 0x31b   : > { %1654 = vst.msk [vmem:[#allocation3 + $0x1d8] sm:$0xff] %vm778_vm1, %v1638_v45  ;;  %v1681_v45 = vmul.f32 1.442695, %v1669_v13 }
 0x31c   : > { %1690 = vst.msk [vmem:[#allocation2 + $0x60] sm:$0xff] %vm647_vm0, %v4394_v39 }
 0x31d   : > { %4399 = vpow2.f32 %v1681_v45 }
 0x322   : > { %v1710_v12 = vpop.permute.xlu2 %1709 }
 0x323   : > { %v1739_v47 = vmul.f32 %v1710_v12, %v5014_v41  ;;  %v4396_v12 = vpop.eup %4395 }
 0x324   : > { %1689 = vst.msk [vmem:[#allocation2 + $0x20] sm:$0xff] %vm647_vm0, %v4396_v12  ;;  %v4398_v32 = vpop.eup %4397 }
 0x325   : > { %1747 = vst.msk [vmem:[#allocation3 + $0xa0] sm:$0xff] %vm647_vm0, %v1739_v47 }
 0x326   : > { %1692 = vst.msk [vmem:[#allocation2 + $0xe0] sm:$0xff] %vm647_vm0, %v4398_v32 }
 0x329   : > { %v1624_v62 = vpop.permute.xlu1 %1623 }
 0x32a   : > { %1647 = vst.msk [vmem:[#allocation3 + $0x18] sm:$0xff] %vm778_vm1, %v1624_v62  ;;  %v1628_v56 = vpop.permute.xlu0 %1627  ;;  %v1720_v16 = vpop.permute.xlu2 %1719 }
 0x32b   : > { %1649 = vst.msk [vmem:[#allocation3 + $0x98] sm:$0xff] %vm778_vm1, %v1628_v56  ;;  %v1741_v31 = vmul.f32 %v1720_v16, %v4966_v59  ;;  %v1671_v16 = vmul.f32 %v4206_v50, %v4934_v6 }
 0x32d   : > { %1749 = vst.msk [vmem:[#allocation3 + $0x120] sm:$0xff] %vm647_vm0, %v1741_v31  ;;  %v1672_v31 = vmul.f32 %v4206_v50, %v4923_v40  ;;  %v1685_v4 = vmul.f32 1.442695, %v1671_v16 }
 0x32f   : > { %v1687_v55 = vmul.f32 1.442695, %v1672_v31  ;;  %4401 = vpow2.f32 %v1685_v4 }
 0x331   : > { %v1630_v23 = vpop.permute.xlu1 %1629  ;;  %4403 = vpow2.f32 %v1687_v55 }
 0x332   : > { %1650 = vst.msk [vmem:[#allocation3 + $0xd8] sm:$0xff] %vm778_vm1, %v1630_v23  ;;  %v1735_v57 = vpop.permute.xlu2 %1734  ;;  %v4400_v23 = vpop.eup %4399 }
 0x333   : > { %v1744_v42 = vmul.f32 %v1735_v57, %v5064_v29  ;;  %1693 = vst.msk [vmem:[#allocation2 + $0x120] sm:$0xff] %vm647_vm0, %v4400_v23 }
 0x335   : > { %1752 = vst.msk [vmem:[#allocation3 + $0x1e0] sm:$0xff] %vm647_vm0, %v1744_v42  ;;  %v4402_v63 = vpop.eup %4401 }
 0x336   : > { %1695 = vst.msk [vmem:[#allocation2 + $0x1a0] sm:$0xff] %vm647_vm0, %v4402_v63 }
 0x337   : > { %v4404_v5 = vpop.eup %4403 }
 0x338   : > { %1696 = vst.msk [vmem:[#allocation2 + $0x1e0] sm:$0xff] %vm647_vm0, %v4404_v5  ;;  %v5549_v5 = vld [vmem:[%s4732_s23 + $0x18] sm:$0xff] }
 0x339   : > { %v1634_v14 = vpop.permute.xlu0 %1633  ;;  %v1636_v9 = vpop.permute.xlu1 %1635 }
 0x33a   : > { %1652 = vst.msk [vmem:[#allocation3 + $0x158] sm:$0xff] %vm778_vm1, %v1634_v14  ;;  %v1800_v24 = vpop.permute.xlu2 %1799 }
 0x33b   : > { %1653 = vst.msk [vmem:[#allocation3 + $0x198] sm:$0xff] %vm778_vm1, %v1636_v9 }
 0x33c   : > { %1821 = vst.msk [vmem:[#allocation2 + $0xa0] sm:$0xff] %vm778_vm1, %v1800_v24 }
 0x341   : > { %v1705_v47 = vpop.permute.xlu1 %1704  ;;  %v1700_v35 = vpop.permute.xlu0 %1699 }
 0x342   : > { %v1738_v28 = vmul.f32 %v1705_v47, %v5030_v52  ;;  %v1737_v62 = vmul.f32 %v1700_v35, %v5018_v44  ;;  %v1806_v56 = vpop.permute.xlu2 %1805  ;;  %v4631_v47 = vmov 10  }
 0x343   : > { %1824 = vst.msk [vmem:[#allocation2 + $0x160] sm:$0xff] %vm778_vm1, %v1806_v56  ;;  %4178 = vset.pattern.permute.xlu1 %v4631_v47  ;;  %4179 = vset.pattern.permute.xlu2 %v4631_v47 }
 0x344   : > { %1746 = vst.msk [vmem:[#allocation3 + $0x60] sm:$0xff] %vm647_vm0, %v1738_v28  ;;  %4180 = vset.pattern.permute.xlu0 %v4631_v47 }
 0x345   : > { %1745 = vst.msk [vmem:[#allocation3 + $0x20] sm:$0xff] %vm647_vm0, %v1737_v62 }
 0x349   : > { %v1715_v57 = vpop.permute.xlu1 %1714  ;;  %v1725_v38 = vpop.permute.xlu0 %1724 }
 0x34a   : > { %v1740_v50 = vmul.f32 %v1715_v57, %v5041_v10  ;;  %v1742_v42 = vmul.f32 %v1725_v38, %v4985_v11  ;;  %v1830_v61 = vpop.permute.xlu2 %1829 }
 0x34b   : > { %v1867_v17 = vmul.f32 %v1830_v61, %v5018_v44  ;;  %v4207_v61 = vld [vmem:[%s4720_s15 + $0xb] ss:$0 sm:$0xff] }
 0x34c   : > { %1748 = vst.msk [vmem:[#allocation3 + $0xe0] sm:$0xff] %vm647_vm0, %v1740_v50 }
 0x34d   : > { %1750 = vst.msk [vmem:[#allocation3 + $0x160] sm:$0xff] %vm647_vm0, %v1742_v42  ;;  %1883 = vrot.lane.b32.xlu2 %v1867_v17, %s4622_s18  ;;  %v5541_v42 = vld [vmem:[%s4732_s23 + $0x20] sm:$0xff]  ;;  %v2024_v17 = vmul.f32 %v4207_v61, %v4869_v54 }
 0x34f   : > { %v2033_v63 = vmul.f32 1.442695, %v2024_v17 }
 0x351   : > { %v1730_v14 = vpop.permute.xlu1 %1729  ;;  %v1796_v9 = vpop.permute.xlu0 %1795  ;;  %4405 = vpow2.f32 %v2033_v63 }
 0x352   : > { %v1743_v24 = vmul.f32 %v1730_v14, %v5069_v30  ;;  %1819 = vst.msk [vmem:[#allocation2 + $0x20] sm:$0xff] %vm778_vm1, %v1796_v9  ;;  %v1845_v36 = vpop.permute.xlu2 %1844  ;;  %v2023_v14 = vmul.f32 %v4207_v61, %v4878_v58  ;;  %v2025_v9 = vmul.f32 %v4207_v61, %v4855_v49 }
 0x353   : > { %v1870_v13 = vmul.f32 %v1845_v36, %v5041_v10 }
 0x354   : > { %1751 = vst.msk [vmem:[#allocation3 + $0x1a0] sm:$0xff] %vm647_vm0, %v1743_v24  ;;  %v4504_v24 = vld [vmem:[%s4732_s23 + $0x30] sm:$0xff]  ;;  %v2031_v36 = vmul.f32 1.442695, %v2023_v14 }
 0x355   : > { %1889 = vrot.lane.b32.xlu2 %v1870_v13, %s4622_s18  ;;  %v2035_v13 = vmul.f32 1.442695, %v2025_v9  ;;  %v5581_v9 = vld [vmem:[%s4732_s23] sm:$0xff] }
 0x356   : > { %4407 = vpow2.f32 %v2031_v36  ;;  %v5591_v36 = vld [vmem:[%s4732_s23 + $0x28] sm:$0xff] }
 0x357   : > { %4409 = vpow2.f32 %v2035_v13  ;;  %v5599_v13 = vld [vmem:[%s4732_s23 + $0x30] sm:$0xff] }
 0x359   : > { %v1798_v39 = vpop.permute.xlu1 %1797  ;;  %v1802_v18 = vpop.permute.xlu0 %1801 }
 0x35a   : > { %1820 = vst.msk [vmem:[#allocation2 + $0x60] sm:$0xff] %vm778_vm1, %v1798_v39  ;;  %v1855_v4 = vpop.permute.xlu2 %1854 }
 0x35b   : > { %1822 = vst.msk [vmem:[#allocation2 + $0xe0] sm:$0xff] %vm778_vm1, %v1802_v18  ;;  %v1872_v23 = vmul.f32 %v1855_v4, %v4985_v11  ;;  %v5561_v18 = vld [vmem:[%s4732_s23 + $0x38] sm:$0xff] }
 0x361   : > { %v1804_v45 = vpop.permute.xlu1 %1803  ;;  %v1808_v12 = vpop.permute.xlu0 %1807 }
 0x362   : > { %1823 = vst.msk [vmem:[#allocation2 + $0x120] sm:$0xff] %vm778_vm1, %v1804_v45  ;;  %v4406_v45 = vpop.eup %4405 }
 0x363   : > { %1825 = vst.msk [vmem:[#allocation2 + $0x1a0] sm:$0xff] %vm778_vm1, %v1808_v12  ;;  %v2026_v12 = vmul.f32 %v4207_v61, %v4914_v8 }
 0x369   : > { %v1810_v35 = vpop.permute.xlu1 %1809  ;;  %v1835_v28 = vpop.permute.xlu0 %1834 }
 0x36a   : > { %1826 = vst.msk [vmem:[#allocation2 + $0x1e0] sm:$0xff] %vm778_vm1, %v1810_v35  ;;  %v1868_v62 = vmul.f32 %v1835_v28, %v5030_v52  ;;  %v2028_v35 = vmul.f32 %v4207_v61, %v4887_v7  ;;  %v4505_v28 = vld [vmem:[%s4732_s23 + $0x28] sm:$0xff] }
 0x36c   : > { %1885 = vrot.lane.b32.xlu0 %v1868_v62, %s4622_s18  ;;  %v2030_v62 = vmul.f32 %v4207_v61, %v4923_v40 }
 0x36e   : > { %v2045_v4 = vmul.f32 1.442695, %v2030_v62 }
 0x371   : > { %v1840_v56 = vpop.permute.xlu1 %1839  ;;  %v1860_v16 = vpop.permute.xlu0 %1859 }
 0x372   : > { %v1869_v31 = vmul.f32 %v1840_v56, %v5014_v41  ;;  %v1873_v32 = vmul.f32 %v1860_v16, %v5069_v30  ;;  %v2037_v56 = vmul.f32 1.442695, %v2026_v12  ;;  %v4632_v16 = vmov 11  }
 0x374   : > { %1887 = vrot.lane.b32.xlu1 %v1869_v31, %s4622_s18  ;;  %1895 = vrot.lane.b32.xlu2 %v1873_v32, %s4622_s18  ;;  %v2041_v31 = vmul.f32 1.442695, %v2028_v35  ;;  %v4408_v32 = vpop.eup %4407  ;;  %v4208_v35 = vld [vmem:[%s4720_s15 + $0xa] ss:$0 sm:$0xff] }
 0x379   : > { %v1850_v55 = vpop.permute.xlu1 %1849 }
 0x37a   : > { %v1871_v57 = vmul.f32 %v1850_v55, %v4966_v59  ;;  %v4410_v55 = vpop.eup %4409 }
 0x37c   : > { %1893 = vrot.lane.b32.xlu1 %v1872_v23, %s4622_s18  ;;  %1891 = vrot.lane.b32.xlu0 %v1871_v57, %s4622_s18  ;;  %v2029_v57 = vmul.f32 %v4207_v61, %v4934_v6 }
 0x37d   : > { %1964 = vperm.xlu2 %4179, %v5244_v60   ;;  %v5552_v60 = vld [vmem:[%s4732_s23 + $0x10] sm:$0xff] }
 0x381   : > { %v1865_v38 = vpop.permute.xlu1 %1864 }
 0x382   : > { %v1874_v50 = vmul.f32 %v1865_v38, %v5064_v29  ;;  %v2043_v38 = vmul.f32 1.442695, %v2029_v57 }
 0x384   : > { %1959 = vperm.xlu1 %4178, %v5247_v20   ;;  %1897 = vrot.lane.b32.xlu0 %v1874_v50, %s4622_s18  ;;  %v2027_v20 = vmul.f32 %v4207_v61, %v4898_v21 }
 0x385   : > { %1979 = vperm.xlu2 %4179, %v5541_v42  }
 0x386   : > { %v2039_v39 = vmul.f32 1.442695, %v2027_v20 }
 0x388   : > { %4411 = vpow2.f32 %v2039_v39 }
 0x389   : > { %4413 = vpow2.f32 %v2037_v56 }
 0x38a   : > { %4415 = vpow2.f32 %v2041_v31 }
 0x38b   : > { %4417 = vpow2.f32 %v2045_v4  ;;  %v1929_v4 = vmul.f32 %v4208_v35, %v4898_v21 }
 0x38c   : > { %1974 = vperm.xlu1 %4178, %v5549_v5   ;;  %1969 = vperm.xlu0 %4180, %v5552_v60   ;;  %4419 = vpow2.f32 %v2043_v38 }
 0x38d   : > { %1989 = vperm.xlu2 %4179, %v4504_v24   ;;  %v5588_v24 = vld [vmem:[%s4732_s23 + $0x8] sm:$0xff] }
 0x38e   : > { %v4412_v23 = vpop.eup %4411 }
 0x38f   : > { %v4414_v50 = vpop.eup %4413 }
 0x390   : > { %v4416_v17 = vpop.eup %4415 }
 0x391   : > { %v4418_v63 = vpop.eup %4417 }
 0x392   : > { %v4420_v14 = vpop.eup %4419 }
 0x394   : > { %1984 = vperm.xlu1 %4178, %v4505_v28   ;;  %1994 = vperm.xlu0 %4180, %v5561_v18   ;;  %v1926_v28 = vmul.f32 %v4208_v35, %v4869_v54 }
 0x395   : > { %2057 = vrot.lane.b32.xlu2 %v4406_v45, %s4622_s18 }
 0x396   : > { %4183 = vset.pattern.permute.xlu2 %v4632_v16  ;;  %v1935_v62 = vmul.f32 1.442695, %v1926_v28  ;;  %v1927_v28 = vmul.f32 %v4208_v35, %v4855_v49 }
 0x398   : > { %4421 = vpow2.f32 %v1935_v62  ;;  %v1928_v62 = vmul.f32 %v4208_v35, %v4914_v8 }
 0x39c   : > { %2055 = vrot.lane.b32.xlu1 %v4408_v32, %s4622_s18  ;;  %2059 = vrot.lane.b32.xlu0 %v4410_v55, %s4622_s18  ;;  %v1941_v55 = vmul.f32 1.442695, %v1929_v4 }
 0x39d   : > { %2063 = vrot.lane.b32.xlu2 %v4412_v23, %s4622_s18  ;;  %4182 = vset.pattern.permute.xlu1 %v4632_v16 }
 0x39e   : > { %4181 = vset.pattern.permute.xlu0 %v4632_v16  ;;  %v4422_v23 = vpop.eup %4421  ;;  %4423 = vpow2.f32 %v1941_v55 }
 0x39f   : > { %1950 = vst.msk [vmem:[#allocation2 + $0x68] sm:$0xff] %vm647_vm0, %v4422_v23 }
 0x3a4   : > { %2061 = vrot.lane.b32.xlu1 %v4414_v50, %s4622_s18  ;;  %2065 = vrot.lane.b32.xlu0 %v4416_v17, %s4622_s18  ;;  %v1925_v50 = vmul.f32 %v4208_v35, %v4878_v58 }
 0x3a5   : > { %2069 = vrot.lane.b32.xlu2 %v4418_v63, %s4622_s18  ;;  %v1932_v63 = vmul.f32 %v4208_v35, %v4923_v40 }
 0x3a7   : > { %v1884_v61 = vpop.permute.xlu2 %1883 }
 0x3a8   : > { %1907 = vst.msk [vmem:[#allocation3 + $0x20] sm:$0xff] %vm778_vm1, %v1884_v61  ;;  %v1933_v61 = vmul.f32 1.442695, %v1925_v50  ;;  %v1930_v50 = vmul.f32 %v4208_v35, %v4887_v7 }
 0x3aa   : > { %4425 = vpow2.f32 %v1933_v61  ;;  %v1943_v61 = vmul.f32 1.442695, %v1930_v50 }
 0x3ac   : > { %2067 = vrot.lane.b32.xlu1 %v4420_v14, %s4622_s18  ;;  %2089 = vperm.xlu0 %4181, %v5581_v9   ;;  %v4424_v14 = vpop.eup %4423 }
 0x3ad   : > { %2099 = vperm.xlu2 %4183, %v5552_v60   ;;  %1953 = vst.msk [vmem:[#allocation2 + $0x128] sm:$0xff] %vm647_vm0, %v4424_v14 }
 0x3af   : > { %v1890_v20 = vpop.permute.xlu2 %1889 }
 0x3b0   : > { %1910 = vst.msk [vmem:[#allocation3 + $0xe0] sm:$0xff] %vm778_vm1, %v1890_v20  ;;  %v1947_v20 = vmul.f32 1.442695, %v1932_v63 }
 0x3b2   : > { %4427 = vpow2.f32 %v1947_v20 }
 0x3b4   : > { %2094 = vperm.xlu1 %4182, %v5588_v24   ;;  %2114 = vperm.xlu0 %4181, %v5591_v36  }
 0x3b5   : > { %2109 = vperm.xlu2 %4183, %v5541_v42  }
 0x3bc   : > { %2104 = vperm.xlu1 %4182, %v5549_v5  }
 0x3bd   : > { %2124 = vperm.xlu2 %4183, %v5561_v18  }
 0x3c4   : > { %2119 = vperm.xlu1 %4182, %v5599_v13  }
 0x3ce   : > { %v1896_v39 = vpop.permute.xlu2 %1895 }
 0x3cf   : > { %1913 = vst.msk [vmem:[#allocation3 + $0x1a0] sm:$0xff] %vm778_vm1, %v1896_v39 }
 0x3d7   : > { %v1965_v45 = vpop.permute.xlu2 %1964 }
 0x3d8   : > { %v1998_v12 = vmul.f32 %v1965_v45, %v5030_v52 }
 0x3da   : > { %2006 = vst.msk [vmem:[#allocation3 + $0x68] sm:$0xff] %vm647_vm0, %v1998_v12 }
 0x3de   : > { %v1886_v56 = vpop.permute.xlu0 %1885 }
 0x3df   : > { %1908 = vst.msk [vmem:[#allocation3 + $0x60] sm:$0xff] %vm778_vm1, %v1886_v56  ;;  %v1980_v31 = vpop.permute.xlu2 %1979  ;;  %v4426_v56 = vpop.eup %4425 }
 0x3e0   : > { %v2001_v32 = vmul.f32 %v1980_v31, %v4966_v59  ;;  %v1937_v31 = vmul.f32 1.442695, %v1927_v28  ;;  %1949 = vst.msk [vmem:[#allocation2 + $0x28] sm:$0xff] %vm647_vm0, %v4426_v56  ;;  %v4428_v4 = vpop.eup %4427 }
 0x3e1   : > { %1956 = vst.msk [vmem:[#allocation2 + $0x1e8] sm:$0xff] %vm647_vm0, %v4428_v4 }
 0x3e2   : > { %2009 = vst.msk [vmem:[#allocation3 + $0x128] sm:$0xff] %vm647_vm0, %v2001_v32  ;;  %v1939_v32 = vmul.f32 1.442695, %v1928_v62  ;;  %4429 = vpow2.f32 %v1937_v31 }
 0x3e4   : > { %4431 = vpow2.f32 %v1939_v32 }
 0x3e5   : > { %4433 = vpow2.f32 %v1943_v61  ;;  %v6457_v61 = vmov 12  }
 0x3e6   : > { %v1888_v57 = vpop.permute.xlu1 %1887  ;;  %4184 = vset.pattern.permute.xlu2 %v6457_v61  ;;  %4186 = vset.pattern.permute.xlu1 %v6457_v61 }
 0x3e7   : > { %1909 = vst.msk [vmem:[#allocation3 + $0xa0] sm:$0xff] %vm778_vm1, %v1888_v57  ;;  %v1990_v38 = vpop.permute.xlu2 %1989  ;;  %4185 = vset.pattern.permute.xlu0 %v6457_v61 }
 0x3e8   : > { %v2003_v17 = vmul.f32 %v1990_v38, %v5069_v30  ;;  %v4430_v63 = vpop.eup %4429 }
 0x3e9   : > { %1951 = vst.msk [vmem:[#allocation2 + $0xa8] sm:$0xff] %vm647_vm0, %v4430_v63 }
 0x3ea   : > { %2011 = vst.msk [vmem:[#allocation3 + $0x1a8] sm:$0xff] %vm647_vm0, %v2003_v17  ;;  %v1931_v17 = vmul.f32 %v4208_v35, %v4934_v6  ;;  %v4432_v20 = vpop.eup %4431 }
 0x3eb   : > { %1952 = vst.msk [vmem:[#allocation2 + $0xe8] sm:$0xff] %vm647_vm0, %v4432_v20  ;;  %v4434_v62 = vpop.eup %4433 }
 0x3ec   : > { %v1945_v14 = vmul.f32 1.442695, %v1931_v17  ;;  %1954 = vst.msk [vmem:[#allocation2 + $0x168] sm:$0xff] %vm647_vm0, %v4434_v62 }
 0x3ee   : > { %v1892_v39 = vpop.permute.xlu0 %1891  ;;  %v1894_v45 = vpop.permute.xlu1 %1893  ;;  %4435 = vpow2.f32 %v1945_v14 }
 0x3ef   : > { %1911 = vst.msk [vmem:[#allocation3 + $0x120] sm:$0xff] %vm778_vm1, %v1892_v39  ;;  %v2058_v12 = vpop.permute.xlu2 %2057 }
 0x3f0   : > { %1912 = vst.msk [vmem:[#allocation3 + $0x160] sm:$0xff] %vm778_vm1, %v1894_v45 }
 0x3f1   : > { %2080 = vst.msk [vmem:[#allocation2 + $0x68] sm:$0xff] %vm778_vm1, %v2058_v12 }
 0x3f4   : > { %v4436_v56 = vpop.eup %4435 }
 0x3f5   : > { %1955 = vst.msk [vmem:[#allocation2 + $0x1a8] sm:$0xff] %vm647_vm0, %v4436_v56 }
 0x3f6   : > { %v1898_v55 = vpop.permute.xlu0 %1897  ;;  %v1960_v23 = vpop.permute.xlu1 %1959 }
 0x3f7   : > { %1914 = vst.msk [vmem:[#allocation3 + $0x1e0] sm:$0xff] %vm778_vm1, %v1898_v55  ;;  %v1997_v57 = vmul.f32 %v1960_v23, %v5018_v44  ;;  %v2064_v38 = vpop.permute.xlu2 %2063 }
 0x3f8   : > { %2083 = vst.msk [vmem:[#allocation2 + $0x128] sm:$0xff] %vm778_vm1, %v2064_v38 }
 0x3f9   : > { %2005 = vst.msk [vmem:[#allocation3 + $0x28] sm:$0xff] %vm647_vm0, %v1997_v57 }
 0x3fe   : > { %v1975_v39 = vpop.permute.xlu1 %1974  ;;  %v1970_v45 = vpop.permute.xlu0 %1969 }
 0x3ff   : > { %v2000_v12 = vmul.f32 %v1975_v39, %v5041_v10  ;;  %v1999_v35 = vmul.f32 %v1970_v45, %v5014_v41  ;;  %v2070_v28 = vpop.permute.xlu2 %2069 }
 0x400   : > { %2086 = vst.msk [vmem:[#allocation2 + $0x1e8] sm:$0xff] %vm778_vm1, %v2070_v28 }
 0x401   : > { %2008 = vst.msk [vmem:[#allocation3 + $0xe8] sm:$0xff] %vm647_vm0, %v2000_v12 }
 0x402   : > { %2007 = vst.msk [vmem:[#allocation3 + $0xa8] sm:$0xff] %vm647_vm0, %v1999_v35 }
 0x406   : > { %v1985_v31 = vpop.permute.xlu1 %1984  ;;  %v1995_v32 = vpop.permute.xlu0 %1994 }
 0x407   : > { %v2002_v4 = vmul.f32 %v1985_v31, %v4985_v11  ;;  %v2004_v55 = vmul.f32 %v1995_v32, %v5064_v29  ;;  %v2100_v23 = vpop.permute.xlu2 %2099 }
 0x408   : > { %v2129_v57 = vmul.f32 %v2100_v23, %v5014_v41 }
 0x409   : > { %2010 = vst.msk [vmem:[#allocation3 + $0x168] sm:$0xff] %vm647_vm0, %v2002_v4 }
 0x40a   : > { %2012 = vst.msk [vmem:[#allocation3 + $0x1e8] sm:$0xff] %vm647_vm0, %v2004_v55  ;;  %2147 = vrot.lane.b32.xlu2 %v2129_v57, %s4622_s18  ;;  %v4209_v55 = vld [vmem:[%s4720_s15 + $0xd] ss:$0 sm:$0xff] }
 0x40e   : > { %v2056_v38 = vpop.permute.xlu1 %2055  ;;  %v2060_v50 = vpop.permute.xlu0 %2059 }
 0x40f   : > { %2079 = vst.msk [vmem:[#allocation2 + $0x28] sm:$0xff] %vm778_vm1, %v2056_v38  ;;  %v2110_v62 = vpop.permute.xlu2 %2109 }
 0x410   : > { %2081 = vst.msk [vmem:[#allocation2 + $0xa8] sm:$0xff] %vm778_vm1, %v2060_v50  ;;  %v2131_v31 = vmul.f32 %v2110_v62, %v4966_v59  ;;  %v2283_v50 = vmul.f32 %v4209_v55, %v4878_v58 }
 0x416   : > { %v2062_v17 = vpop.permute.xlu1 %2061  ;;  %v2066_v63 = vpop.permute.xlu0 %2065 }
 0x417   : > { %2082 = vst.msk [vmem:[#allocation2 + $0xe8] sm:$0xff] %vm778_vm1, %v2062_v17  ;;  %v2125_v4 = vpop.permute.xlu2 %2124  ;;  %v2291_v17 = vmul.f32 1.442695, %v2283_v50 }
 0x418   : > { %2084 = vst.msk [vmem:[#allocation2 + $0x168] sm:$0xff] %vm778_vm1, %v2066_v63  ;;  %v2134_v57 = vmul.f32 %v2125_v4, %v5064_v29  ;;  %v2284_v63 = vmul.f32 %v4209_v55, %v4869_v54 }
 0x419   : > { %4437 = vpow2.f32 %v2291_v17 }
 0x41e   : > { %v2068_v14 = vpop.permute.xlu1 %2067  ;;  %v2090_v20 = vpop.permute.xlu0 %2089 }
 0x41f   : > { %2085 = vst.msk [vmem:[#allocation2 + $0x1a8] sm:$0xff] %vm778_vm1, %v2068_v14  ;;  %v2127_v39 = vmul.f32 %v2090_v20, %v5018_v44  ;;  %v2286_v14 = vmul.f32 %v4209_v55, %v4914_v8  ;;  %v2293_v20 = vmul.f32 1.442695, %v2284_v63 }
 0x421   : > { %2143 = vrot.lane.b32.xlu0 %v2127_v39, %s4622_s18  ;;  %v2297_v39 = vmul.f32 1.442695, %v2286_v14  ;;  %4439 = vpow2.f32 %v2293_v20 }
 0x423   : > { %4441 = vpow2.f32 %v2297_v39 }
 0x426   : > { %v2095_v45 = vpop.permute.xlu1 %2094  ;;  %v2115_v12 = vpop.permute.xlu0 %2114 }
 0x427   : > { %v2128_v35 = vmul.f32 %v2095_v45, %v5030_v52  ;;  %v2132_v28 = vmul.f32 %v2115_v12, %v4985_v11  ;;  %v4438_v45 = vpop.eup %4437  ;;  %v2285_v12 = vmul.f32 %v4209_v55, %v4855_v49 }
 0x428   : > { %v4440_v4 = vpop.eup %4439 }
 0x429   : > { %2145 = vrot.lane.b32.xlu1 %v2128_v35, %s4622_s18  ;;  %2153 = vrot.lane.b32.xlu2 %v2132_v28, %s4622_s18  ;;  %v2287_v35 = vmul.f32 %v4209_v55, %v4898_v21  ;;  %v2289_v28 = vmul.f32 %v4209_v55, %v4934_v6  ;;  %v2295_v62 = vmul.f32 1.442695, %v2285_v12 }
 0x42b   : > { %4443 = vpow2.f32 %v2295_v62  ;;  %v4210_v62 = vld [vmem:[%s4720_s15 + $0xc] ss:$0 sm:$0xff] }
 0x42e   : > { %v2105_v56 = vpop.permute.xlu1 %2104 }
 0x42f   : > { %v2130_v32 = vmul.f32 %v2105_v56, %v5041_v10  ;;  %v6455_v56 = vmov 13  }
 0x431   : > { %2151 = vrot.lane.b32.xlu1 %v2131_v31, %s4622_s18  ;;  %2149 = vrot.lane.b32.xlu0 %v2130_v32, %s4622_s18  ;;  %v2299_v31 = vmul.f32 1.442695, %v2287_v35  ;;  %v2303_v32 = vmul.f32 1.442695, %v2289_v28 }
 0x432   : > { %2219 = vperm.xlu2 %4184, %v5581_v9  }
 0x433   : > { %4445 = vpow2.f32 %v2299_v31  ;;  %v2185_v31 = vmul.f32 %v4210_v62, %v4878_v58 }
 0x434   : > { %4447 = vpow2.f32 %v2303_v32 }
 0x435   : > { %v2193_v32 = vmul.f32 1.442695, %v2185_v31  ;;  %v2187_v31 = vmul.f32 %v4210_v62, %v4855_v49 }
 0x436   : > { %v2120_v23 = vpop.permute.xlu1 %2119 }
 0x437   : > { %v2133_v38 = vmul.f32 %v2120_v23, %v5069_v30  ;;  %v4442_v23 = vpop.eup %4441 }
 0x438   : > { %v4444_v63 = vpop.eup %4443 }
 0x439   : > { %2157 = vrot.lane.b32.xlu1 %v2134_v57, %s4622_s18  ;;  %2155 = vrot.lane.b32.xlu0 %v2133_v38, %s4622_s18  ;;  %v2288_v57 = vmul.f32 %v4209_v55, %v4887_v7  ;;  %v2290_v38 = vmul.f32 %v4209_v55, %v4923_v40  ;;  %v4446_v14 = vpop.eup %4445 }
 0x43a   : > { %2234 = vperm.xlu2 %4184, %v5549_v5   ;;  %v4448_v20 = vpop.eup %4447 }
 0x43b   : > { %v2301_v50 = vmul.f32 1.442695, %v2288_v57  ;;  %v2305_v17 = vmul.f32 1.442695, %v2290_v38  ;;  %v2188_v38 = vmul.f32 %v4210_v62, %v4914_v8 }
 0x43d   : > { %4449 = vpow2.f32 %v2301_v50  ;;  %v2199_v50 = vmul.f32 1.442695, %v2188_v38 }
 0x43e   : > { %4451 = vpow2.f32 %v2305_v17 }
 0x43f   : > { %4453 = vpow2.f32 %v2193_v32  ;;  %v2186_v32 = vmul.f32 %v4210_v62, %v4869_v54 }
 0x440   : > { %4455 = vpow2.f32 %v2199_v50 }
 0x441   : > { %2229 = vperm.xlu1 %4186, %v5552_v60   ;;  %2224 = vperm.xlu0 %4185, %v5588_v24  }
 0x442   : > { %2244 = vperm.xlu2 %4184, %v5591_v36  }
 0x443   : > { %v4450_v55 = vpop.eup %4449 }
 0x444   : > { %v4452_v39 = vpop.eup %4451 }
 0x445   : > { %v4454_v17 = vpop.eup %4453 }
 0x446   : > { %2209 = vst.msk [vmem:[#allocation2 + $0x30] sm:$0xff] %vm647_vm0, %v4454_v17 }
 0x449   : > { %2239 = vperm.xlu1 %4186, %v5541_v42   ;;  %2249 = vperm.xlu0 %4185, %v5599_v13  }
 0x44a   : > { %2315 = vrot.lane.b32.xlu2 %v4438_v45, %s4622_s18 }
 0x44b   : > { %4188 = vset.pattern.permute.xlu2 %v6455_v56 }
 0x451   : > { %2254 = vperm.xlu1 %4186, %v5561_v18   ;;  %2317 = vrot.lane.b32.xlu0 %v4440_v4, %s4622_s18 }
 0x452   : > { %2321 = vrot.lane.b32.xlu2 %v4442_v23, %s4622_s18  ;;  %4189 = vset.pattern.permute.xlu0 %v6455_v56 }
 0x459   : > { %2319 = vrot.lane.b32.xlu1 %v4444_v63, %s4622_s18  ;;  %2323 = vrot.lane.b32.xlu0 %v4446_v14, %s4622_s18 }
 0x45a   : > { %4187 = vset.pattern.permute.xlu1 %v6455_v56  ;;  %2327 = vrot.lane.b32.xlu2 %v4448_v20, %s4622_s18 }
 0x461   : > { %2325 = vrot.lane.b32.xlu1 %v4450_v55, %s4622_s18  ;;  %2329 = vrot.lane.b32.xlu0 %v4452_v39, %s4622_s18  ;;  %v2191_v55 = vmul.f32 %v4210_v62, %v4934_v6  ;;  %v4456_v39 = vpop.eup %4455 }
 0x462   : > { %2354 = vperm.xlu2 %4188, %v5588_v24   ;;  %2212 = vst.msk [vmem:[#allocation2 + $0xf0] sm:$0xff] %vm647_vm0, %v4456_v39 }
 0x464   : > { %v2148_v45 = vpop.permute.xlu2 %2147 }
 0x465   : > { %2169 = vst.msk [vmem:[#allocation3 + $0xa8] sm:$0xff] %vm778_vm1, %v2148_v45  ;;  %v2205_v45 = vmul.f32 1.442695, %v2191_v55 }
 0x467   : > { %4457 = vpow2.f32 %v2205_v45 }
 0x469   : > { %2349 = vperm.xlu1 %4187, %v5581_v9   ;;  %2359 = vperm.xlu0 %4189, %v5552_v60  }
 0x46a   : > { %2369 = vperm.xlu2 %4188, %v5541_v42  }
 0x471   : > { %2364 = vperm.xlu1 %4187, %v5549_v5   ;;  %2384 = vperm.xlu0 %4189, %v5561_v18  }
 0x472   : > { %2379 = vperm.xlu2 %4188, %v5599_v13  }
 0x479   : > { %2374 = vperm.xlu1 %4187, %v5591_v36  }
 0x483   : > { %v2154_v12 = vpop.permute.xlu2 %2153 }
 0x484   : > { %2172 = vst.msk [vmem:[#allocation3 + $0x168] sm:$0xff] %vm778_vm1, %v2154_v12 }
 0x48c   : > { %v2220_v35 = vpop.permute.xlu2 %2219 }
 0x48d   : > { %v2257_v28 = vmul.f32 %v2220_v35, %v5018_v44 }
 0x48f   : > { %2265 = vst.msk [vmem:[#allocation3 + $0x30] sm:$0xff] %vm647_vm0, %v2257_v28 }
 0x493   : > { %v2144_v4 = vpop.permute.xlu0 %2143 }
 0x494   : > { %2167 = vst.msk [vmem:[#allocation3 + $0x28] sm:$0xff] %vm778_vm1, %v2144_v4  ;;  %v2235_v23 = vpop.permute.xlu2 %2234  ;;  %v2197_v4 = vmul.f32 1.442695, %v2187_v31 }
 0x495   : > { %v2260_v57 = vmul.f32 %v2235_v23, %v5041_v10  ;;  %v4458_v23 = vpop.eup %4457 }
 0x496   : > { %4459 = vpow2.f32 %v2197_v4  ;;  %2215 = vst.msk [vmem:[#allocation2 + $0x1b0] sm:$0xff] %vm647_vm0, %v4458_v23  ;;  %v2192_v4 = vmul.f32 %v4210_v62, %v4923_v40 }
 0x497   : > { %2268 = vst.msk [vmem:[#allocation3 + $0xf0] sm:$0xff] %vm647_vm0, %v2260_v57  ;;  %v2195_v57 = vmul.f32 1.442695, %v2186_v32 }
 0x499   : > { %4461 = vpow2.f32 %v2195_v57  ;;  %v2207_v57 = vmul.f32 1.442695, %v2192_v4  ;;  %v6451_v4 = vmov 14  }
 0x49a   : > { %4191 = vset.pattern.permute.xlu1 %v6451_v4  ;;  %4192 = vset.pattern.permute.xlu2 %v6451_v4 }
 0x49b   : > { %v2146_v63 = vpop.permute.xlu1 %2145  ;;  %4190 = vset.pattern.permute.xlu0 %v6451_v4 }
 0x49c   : > { %2168 = vst.msk [vmem:[#allocation3 + $0x68] sm:$0xff] %vm778_vm1, %v2146_v63  ;;  %v2245_v14 = vpop.permute.xlu2 %2244  ;;  %v2189_v63 = vmul.f32 %v4210_v62, %v4898_v21 }
 0x49d   : > { %v2262_v20 = vmul.f32 %v2245_v14, %v4985_v11  ;;  %v2190_v14 = vmul.f32 %v4210_v62, %v4887_v7 }
 0x49e   : > { %v2201_v55 = vmul.f32 1.442695, %v2189_v63 }
 0x49f   : > { %2270 = vst.msk [vmem:[#allocation3 + $0x170] sm:$0xff] %vm647_vm0, %v2262_v20  ;;  %v4460_v20 = vpop.eup %4459  ;;  %v2203_v39 = vmul.f32 1.442695, %v2190_v14 }
 0x4a0   : > { %2211 = vst.msk [vmem:[#allocation2 + $0xb0] sm:$0xff] %vm647_vm0, %v4460_v20  ;;  %v4462_v45 = vpop.eup %4461  ;;  %4463 = vpow2.f32 %v2201_v55 }
 0x4a1   : > { %2210 = vst.msk [vmem:[#allocation2 + $0x70] sm:$0xff] %vm647_vm0, %v4462_v45  ;;  %4465 = vpow2.f32 %v2203_v39 }
 0x4a2   : > { %4467 = vpow2.f32 %v2207_v57 }
 0x4a3   : > { %v2150_v12 = vpop.permute.xlu0 %2149  ;;  %v2152_v35 = vpop.permute.xlu1 %2151 }
 0x4a4   : > { %2170 = vst.msk [vmem:[#allocation3 + $0xe8] sm:$0xff] %vm778_vm1, %v2150_v12  ;;  %v2316_v28 = vpop.permute.xlu2 %2315 }
 0x4a5   : > { %2171 = vst.msk [vmem:[#allocation3 + $0x128] sm:$0xff] %vm778_vm1, %v2152_v35 }
 0x4a6   : > { %2339 = vst.msk [vmem:[#allocation2 + $0x30] sm:$0xff] %vm778_vm1, %v2316_v28  ;;  %v4464_v23 = vpop.eup %4463 }
 0x4a7   : > { %2213 = vst.msk [vmem:[#allocation2 + $0x130] sm:$0xff] %vm647_vm0, %v4464_v23 }
 0x4ab   : > { %v2156_v38 = vpop.permute.xlu0 %2155  ;;  %v2158_v50 = vpop.permute.xlu1 %2157 }
 0x4ac   : > { %2173 = vst.msk [vmem:[#allocation3 + $0x1a8] sm:$0xff] %vm778_vm1, %v2156_v38  ;;  %v2322_v17 = vpop.permute.xlu2 %2321  ;;  %v4466_v38 = vpop.eup %4465 }
 0x4ad   : > { %2174 = vst.msk [vmem:[#allocation3 + $0x1e8] sm:$0xff] %vm778_vm1, %v2158_v50  ;;  %v4468_v55 = vpop.eup %4467 }
 0x4ae   : > { %2342 = vst.msk [vmem:[#allocation2 + $0xf0] sm:$0xff] %vm778_vm1, %v2322_v17 }
 0x4af   : > { %2214 = vst.msk [vmem:[#allocation2 + $0x170] sm:$0xff] %vm647_vm0, %v4466_v38 }
 0x4b0   : > { %2216 = vst.msk [vmem:[#allocation2 + $0x1f0] sm:$0xff] %vm647_vm0, %v4468_v55 }
 0x4b3   : > { %v2230_v12 = vpop.permute.xlu1 %2229  ;;  %v2225_v35 = vpop.permute.xlu0 %2224 }
 0x4b4   : > { %v2259_v28 = vmul.f32 %v2230_v12, %v5014_v41  ;;  %v2258_v31 = vmul.f32 %v2225_v35, %v5030_v52  ;;  %v2328_v32 = vpop.permute.xlu2 %2327 }
 0x4b5   : > { %2345 = vst.msk [vmem:[#allocation2 + $0x1b0] sm:$0xff] %vm778_vm1, %v2328_v32 }
 0x4b6   : > { %2267 = vst.msk [vmem:[#allocation3 + $0xb0] sm:$0xff] %vm647_vm0, %v2259_v28 }
 0x4b7   : > { %2266 = vst.msk [vmem:[#allocation3 + $0x70] sm:$0xff] %vm647_vm0, %v2258_v31 }
 0x4bb   : > { %v2240_v50 = vpop.permute.xlu1 %2239  ;;  %v2250_v17 = vpop.permute.xlu0 %2249 }
 0x4bc   : > { %v2261_v63 = vmul.f32 %v2240_v50, %v4966_v59  ;;  %v2263_v62 = vmul.f32 %v2250_v17, %v5069_v30  ;;  %v2355_v14 = vpop.permute.xlu2 %2354 }
 0x4bd   : > { %v2388_v20 = vmul.f32 %v2355_v14, %v5030_v52 }
 0x4be   : > { %2269 = vst.msk [vmem:[#allocation3 + $0x130] sm:$0xff] %vm647_vm0, %v2261_v63 }
 0x4bf   : > { %2271 = vst.msk [vmem:[#allocation3 + $0x1b0] sm:$0xff] %vm647_vm0, %v2263_v62  ;;  %2405 = vrot.lane.b32.xlu2 %v2388_v20, %s4622_s18 }
 0x4c3   : > { %v2255_v39 = vpop.permute.xlu1 %2254  ;;  %v2318_v45 = vpop.permute.xlu0 %2317 }
 0x4c4   : > { %v2264_v12 = vmul.f32 %v2255_v39, %v5064_v29  ;;  %2340 = vst.msk [vmem:[#allocation2 + $0x70] sm:$0xff] %vm778_vm1, %v2318_v45  ;;  %v2370_v35 = vpop.permute.xlu2 %2369 }
 0x4c5   : > { %v2391_v28 = vmul.f32 %v2370_v35, %v4966_v59 }
 0x4c6   : > { %2272 = vst.msk [vmem:[#allocation3 + $0x1f0] sm:$0xff] %vm647_vm0, %v2264_v12 }
 0x4c7   : > { %2411 = vrot.lane.b32.xlu2 %v2391_v28, %s4622_s18  ;;  %v5774_v28 = vld [vmem:[%s4720_s15 + $0xf] ss:$0 sm:$0xff] }
 0x4cb   : > { %v2320_v31 = vpop.permute.xlu1 %2319  ;;  %v2324_v32 = vpop.permute.xlu0 %2323 }
 0x4cc   : > { %2341 = vst.msk [vmem:[#allocation2 + $0xb0] sm:$0xff] %vm778_vm1, %v2320_v31  ;;  %v2380_v39 = vpop.permute.xlu2 %2379  ;;  %v2543_v31 = vmul.f32 %v5774_v28, %v4878_v58 }
 0x4cd   : > { %2343 = vst.msk [vmem:[#allocation2 + $0x130] sm:$0xff] %vm778_vm1, %v2324_v32  ;;  %v2393_v12 = vmul.f32 %v2380_v39, %v5069_v30  ;;  %v2545_v32 = vmul.f32 %v5774_v28, %v4855_v49  ;;  %v2547_v39 = vmul.f32 %v5774_v28, %v4898_v21 }
 0x4d3   : > { %v2326_v23 = vpop.permute.xlu1 %2325  ;;  %v2330_v57 = vpop.permute.xlu0 %2329 }
 0x4d4   : > { %2344 = vst.msk [vmem:[#allocation2 + $0x170] sm:$0xff] %vm778_vm1, %v2326_v23  ;;  %v2551_v23 = vmul.f32 1.442695, %v2543_v31 }
 0x4d5   : > { %2346 = vst.msk [vmem:[#allocation2 + $0x1f0] sm:$0xff] %vm778_vm1, %v2330_v57  ;;  %v2555_v57 = vmul.f32 1.442695, %v2545_v32 }
 0x4d6   : > { %4469 = vpow2.f32 %v2551_v23 }
 0x4d7   : > { %4471 = vpow2.f32 %v2555_v57 }
 0x4db   : > { %v2350_v38 = vpop.permute.xlu1 %2349  ;;  %v2360_v50 = vpop.permute.xlu0 %2359 }
 0x4dc   : > { %v2387_v17 = vmul.f32 %v2350_v38, %v5018_v44  ;;  %v2389_v63 = vmul.f32 %v2360_v50, %v5014_v41  ;;  %v2544_v38 = vmul.f32 %v5774_v28, %v4869_v54  ;;  %v2546_v50 = vmul.f32 %v5774_v28, %v4914_v8 }
 0x4de   : > { %2403 = vrot.lane.b32.xlu1 %v2387_v17, %s4622_s18  ;;  %2407 = vrot.lane.b32.xlu0 %v2389_v63, %s4622_s18  ;;  %v2548_v17 = vmul.f32 %v5774_v28, %v4887_v7  ;;  %v2553_v63 = vmul.f32 1.442695, %v2544_v38 }
 0x4e0   : > { %4473 = vpow2.f32 %v2553_v63 }
 0x4e3   : > { %v2365_v62 = vpop.permute.xlu1 %2364  ;;  %v2385_v14 = vpop.permute.xlu0 %2384 }
 0x4e4   : > { %v2390_v20 = vmul.f32 %v2365_v62, %v5041_v10  ;;  %v2394_v55 = vmul.f32 %v2385_v14, %v5064_v29  ;;  %v2557_v62 = vmul.f32 1.442695, %v2546_v50  ;;  %v2561_v14 = vmul.f32 1.442695, %v2548_v17 }
 0x4e6   : > { %2409 = vrot.lane.b32.xlu1 %v2390_v20, %s4622_s18  ;;  %2417 = vrot.lane.b32.xlu2 %v2394_v55, %s4622_s18  ;;  %v4470_v20 = vpop.eup %4469  ;;  %4475 = vpow2.f32 %v2557_v62 }
 0x4e7   : > { %v4472_v55 = vpop.eup %4471  ;;  %4477 = vpow2.f32 %v2561_v14 }
 0x4eb   : > { %v2375_v45 = vpop.permute.xlu1 %2374 }
 0x4ec   : > { %v2392_v35 = vmul.f32 %v2375_v45, %v4985_v11  ;;  %v6453_v45 = vmov 15  }
 0x4ee   : > { %2415 = vrot.lane.b32.xlu1 %v2393_v12, %s4622_s18  ;;  %2413 = vrot.lane.b32.xlu0 %v2392_v35, %s4622_s18  ;;  %v2559_v12 = vmul.f32 1.442695, %v2547_v39  ;;  %v4474_v35 = vpop.eup %4473 }
 0x4ef   : > { %2489 = vperm.xlu2 %4192, %v5552_v60   ;;  %v4476_v31 = vpop.eup %4475 }
 0x4f0   : > { %v4478_v32 = vpop.eup %4477  ;;  %4479 = vpow2.f32 %v2559_v12 }
 0x4f6   : > { %2484 = vperm.xlu1 %4191, %v5588_v24   ;;  %2479 = vperm.xlu0 %4190, %v5581_v9   ;;  %v4480_v23 = vpop.eup %4479 }
 0x4f7   : > { %2499 = vperm.xlu2 %4192, %v5541_v42  }
 0x4fe   : > { %2494 = vperm.xlu1 %4191, %v5549_v5   ;;  %2504 = vperm.xlu0 %4190, %v5591_v36  }
 0x4ff   : > { %2514 = vperm.xlu2 %4192, %v5561_v18  }
 0x506   : > { %2509 = vperm.xlu1 %4191, %v5599_v13   ;;  %2575 = vrot.lane.b32.xlu0 %v4470_v20, %s4622_s18 }
 0x507   : > { %2579 = vrot.lane.b32.xlu2 %v4472_v55, %s4622_s18  ;;  %4193 = vset.pattern.permute.xlu0 %v6453_v45 }
 0x508   : > { %4195 = vset.pattern.permute.xlu2 %v6453_v45 }
 0x50e   : > { %2577 = vrot.lane.b32.xlu1 %v4474_v35, %s4622_s18  ;;  %2581 = vrot.lane.b32.xlu0 %v4476_v31, %s4622_s18 }
 0x50f   : > { %4194 = vset.pattern.permute.xlu1 %v6453_v45  ;;  %2585 = vrot.lane.b32.xlu2 %v4478_v32, %s4622_s18 }
 0x516   : > { %2583 = vrot.lane.b32.xlu1 %v4480_v23, %s4622_s18  ;;  %2609 = vperm.xlu0 %4193, %v5581_v9  }
 0x517   : > { %2619 = vperm.xlu2 %4195, %v5552_v60  }
 0x519   : > { %v2406_v57 = vpop.permute.xlu2 %2405 }
 0x51a   : > { %2428 = vst.msk [vmem:[#allocation3 + $0x70] sm:$0xff] %vm778_vm1, %v2406_v57 }
 0x51e   : > { %2614 = vperm.xlu1 %4194, %v5588_v24   ;;  %2634 = vperm.xlu0 %4193, %v5591_v36   ;;  %v5817_v24 = vld [vmem:[%s4720_s15 + $0xe] ss:$0 sm:$0xff]  ;;  %s4616_s15 = smov 0  }
 0x51f   : > { %2629 = vperm.xlu2 %4195, %v5541_v42   ;;  %v2447_v42 = vmul.f32 %v5817_v24, %v4855_v49  ;;  %v2450_v63 = vmul.f32 %v5817_v24, %v4887_v7  ;;  %v2446_v55 = vmul.f32 %v5817_v24, %v4869_v54  ;;  %v2445_v12 = vmul.f32 %v5817_v24, %v4878_v58 }
 0x520   : > { %v2448_v54 = vmul.f32 %v5817_v24, %v4914_v8  ;;  %v2449_v58 = vmul.f32 %v5817_v24, %v4898_v21 }
 0x521   : > { %v2412_v38 = vpop.permute.xlu2 %2411  ;;  %v2457_v36 = vmul.f32 1.442695, %v2447_v42  ;;  %v2463_v62 = vmul.f32 1.442695, %v2450_v63  ;;  %v2455_v7 = vmul.f32 1.442695, %v2446_v55  ;;  %v2549_v42 = vmul.f32 %v5774_v28, %v4934_v6 }
 0x522   : > { %2431 = vst.msk [vmem:[#allocation3 + $0x130] sm:$0xff] %vm778_vm1, %v2412_v38  ;;  %v2453_v31 = vmul.f32 1.442695, %v2445_v12 }
 0x523   : > { %4481 = vpow2.f32 %v2457_v36  ;;  %v2563_v8 = vmul.f32 1.442695, %v2549_v42 }
 0x524   : > { %4483 = vpow2.f32 %v2463_v62 }
 0x525   : > { %4485 = vpow2.f32 %v2455_v7 }
 0x526   : > { %2624 = vperm.xlu1 %4194, %v5549_v5   ;;  %4487 = vpow2.f32 %v2453_v31 }
 0x527   : > { %2644 = vperm.xlu2 %4195, %v5561_v18  }
 0x529   : > { %v4482_v14 = vpop.eup %4481 }
 0x52a   : > { %2471 = vst.msk [vmem:[#allocation2 + $0xb8] sm:$0xff] %vm647_vm0, %v4482_v14  ;;  %v4484_v35 = vpop.eup %4483 }
 0x52b   : > { %2474 = vst.msk [vmem:[#allocation2 + $0x178] sm:$0xff] %vm647_vm0, %v4484_v35  ;;  %v4486_v38 = vpop.eup %4485 }
 0x52c   : > { %2470 = vst.msk [vmem:[#allocation2 + $0x78] sm:$0xff] %vm647_vm0, %v4486_v38  ;;  %v4488_v36 = vpop.eup %4487 }
 0x52d   : > { %2469 = vst.msk [vmem:[#allocation2 + $0x38] sm:$0xff] %vm647_vm0, %v4488_v36 }
 0x52e   : > { %2639 = vperm.xlu1 %4194, %v5599_v13  }
 0x540   : > { %v2418_v9 = vpop.permute.xlu2 %2417 }
 0x541   : > { %2434 = vst.msk [vmem:[#allocation3 + $0x1f0] sm:$0xff] %vm778_vm1, %v2418_v9  ;;  %v2459_v9 = vmul.f32 1.442695, %v2448_v54 }
 0x543   : > { %4489 = vpow2.f32 %v2459_v9 }
 0x549   : > { %v2490_v60 = vpop.permute.xlu2 %2489  ;;  %v4490_v62 = vpop.eup %4489 }
 0x54a   : > { %v2519_v50 = vmul.f32 %v2490_v60, %v5014_v41  ;;  %v2461_v60 = vmul.f32 1.442695, %v2449_v58  ;;  %2472 = vst.msk [vmem:[#allocation2 + $0xf8] sm:$0xff] %vm647_vm0, %v4490_v62 }
 0x54c   : > { %2527 = vst.msk [vmem:[#allocation3 + $0xb8] sm:$0xff] %vm647_vm0, %v2519_v50  ;;  %v2550_v50 = vmul.f32 %v5774_v28, %v4923_v40  ;;  %4491 = vpow2.f32 %v2461_v60 }
 0x54e   : > { %v2565_v21 = vmul.f32 1.442695, %v2550_v50 }
 0x550   : > { %v2404_v17 = vpop.permute.xlu1 %2403  ;;  %v2408_v5 = vpop.permute.xlu0 %2407  ;;  %4493 = vpow2.f32 %v2565_v21 }
 0x551   : > { %2427 = vst.msk [vmem:[#allocation3 + $0x30] sm:$0xff] %vm778_vm1, %v2404_v17  ;;  %v2500_v18 = vpop.permute.xlu2 %2499  ;;  %4495 = vpow2.f32 %v2563_v8 }
 0x552   : > { %2429 = vst.msk [vmem:[#allocation3 + $0xb0] sm:$0xff] %vm778_vm1, %v2408_v5  ;;  %v2521_v13 = vmul.f32 %v2500_v18, %v4966_v59  ;;  %v4492_v28 = vpop.eup %4491 }
 0x553   : > { %2473 = vst.msk [vmem:[#allocation2 + $0x138] sm:$0xff] %vm647_vm0, %v4492_v28 }
 0x554   : > { %2529 = vst.msk [vmem:[#allocation3 + $0x138] sm:$0xff] %vm647_vm0, %v2521_v13 }
 0x556   : > { %v4494_v14 = vpop.eup %4493 }
 0x557   : > { %2589 = vrot.lane.b32.xlu1 %v4494_v14, %s4622_s18 }
 0x558   : > { %v2410_v49 = vpop.permute.xlu1 %2409 }
 0x559   : > { %2430 = vst.msk [vmem:[#allocation3 + $0xf0] sm:$0xff] %vm778_vm1, %v2410_v49  ;;  %v2515_v20 = vpop.permute.xlu2 %2514  ;;  %v4496_v49 = vpop.eup %4495 }
 0x55a   : > { %v2524_v39 = vmul.f32 %v2515_v20, %v5064_v29  ;;  %2587 = vrot.lane.b32.xlu0 %v4496_v49, %s4622_s18 }
 0x55c   : > { %2532 = vst.msk [vmem:[#allocation3 + $0x1f8] sm:$0xff] %vm647_vm0, %v2524_v39 }
 0x560   : > { %v2414_v32 = vpop.permute.xlu0 %2413  ;;  %v2416_v23 = vpop.permute.xlu1 %2415 }
 0x561   : > { %2432 = vst.msk [vmem:[#allocation3 + $0x170] sm:$0xff] %vm778_vm1, %v2414_v32  ;;  %v2580_v57 = vpop.permute.xlu2 %2579 }
 0x562   : > { %2433 = vst.msk [vmem:[#allocation3 + $0x1b0] sm:$0xff] %vm778_vm1, %v2416_v23 }
 0x563   : > { %2601 = vst.msk [vmem:[#allocation2 + $0xb8] sm:$0xff] %vm778_vm1, %v2580_v57 }
 0x568   : > { %v2485_v17 = vpop.permute.xlu1 %2484  ;;  %v2480_v5 = vpop.permute.xlu0 %2479 }
 0x569   : > { %v2518_v18 = vmul.f32 %v2485_v17, %v5030_v52  ;;  %v2517_v13 = vmul.f32 %v2480_v5, %v5018_v44  ;;  %v2586_v63 = vpop.permute.xlu2 %2585 }
 0x56a   : > { %2604 = vst.msk [vmem:[#allocation2 + $0x178] sm:$0xff] %vm778_vm1, %v2586_v63 }
 0x56b   : > { %2526 = vst.msk [vmem:[#allocation3 + $0x78] sm:$0xff] %vm647_vm0, %v2518_v18  ;;  %v2451_v18 = vmul.f32 %v5817_v24, %v4934_v6 }
 0x56c   : > { %2525 = vst.msk [vmem:[#allocation3 + $0x38] sm:$0xff] %vm647_vm0, %v2517_v13 }
 0x570   : > { %v2495_v20 = vpop.permute.xlu1 %2494  ;;  %v2505_v55 = vpop.permute.xlu0 %2504 }
 0x571   : > { %v2520_v39 = vmul.f32 %v2495_v20, %v5041_v10  ;;  %v2522_v12 = vmul.f32 %v2505_v55, %v4985_v11  ;;  %v2620_v7 = vpop.permute.xlu2 %2619 }
 0x572   : > { %v2649_v35 = vmul.f32 %v2620_v7, %v5014_v41 }
 0x573   : > { %2528 = vst.msk [vmem:[#allocation3 + $0xf8] sm:$0xff] %vm647_vm0, %v2520_v39  ;;  %v4612_v39 = vmov 0.0  }
 0x574   : > { %2530 = vst.msk [vmem:[#allocation3 + $0x178] sm:$0xff] %vm647_vm0, %v2522_v12  ;;  %2667 = vrot.lane.b32.xlu1 %v2649_v35, %s4622_s18 }
 0x578   : > { %v2510_v31 = vpop.permute.xlu1 %2509  ;;  %v2576_v32 = vpop.permute.xlu0 %2575 }
 0x579   : > { %v2523_v23 = vmul.f32 %v2510_v31, %v5069_v30  ;;  %2599 = vst.msk [vmem:[#allocation2 + $0x38] sm:$0xff] %vm778_vm1, %v2576_v32  ;;  %v2630_v36 = vpop.permute.xlu2 %2629 }
 0x57a   : > { %v2651_v8 = vmul.f32 %v2630_v36, %v4966_v59  ;;  %v2465_v59 = vmul.f32 1.442695, %v2451_v18 }
 0x57b   : > { %2531 = vst.msk [vmem:[#allocation3 + $0x1b8] sm:$0xff] %vm647_vm0, %v2523_v23 }
 0x57c   : > { %4497 = vpow2.f32 %v2465_v59 }
 0x580   : > { %v2578_v57 = vpop.permute.xlu1 %2577  ;;  %v2582_v54 = vpop.permute.xlu0 %2581 }
 0x581   : > { %2600 = vst.msk [vmem:[#allocation2 + $0x78] sm:$0xff] %vm778_vm1, %v2578_v57 }
 0x582   : > { %2602 = vst.msk [vmem:[#allocation2 + $0xf8] sm:$0xff] %vm778_vm1, %v2582_v54  ;;  %v4498_v13 = vpop.eup %4497 }
 0x583   : > { %2475 = vst.msk [vmem:[#allocation2 + $0x1b8] sm:$0xff] %vm647_vm0, %v4498_v13 }
 0x588   : > { %v2584_v58 = vpop.permute.xlu1 %2583  ;;  %v2610_v41 = vpop.permute.xlu0 %2609 }
 0x589   : > { %2603 = vst.msk [vmem:[#allocation2 + $0x138] sm:$0xff] %vm778_vm1, %v2584_v58  ;;  %v2647_v38 = vmul.f32 %v2610_v41, %v5018_v44  ;;  %v2645_v44 = vpop.permute.xlu2 %2644 }
 0x58b   : > { %2663 = vrot.lane.b32.xlu2 %v2647_v38, %s4622_s18 }
 0x590   : > { %v2615_v9 = vpop.permute.xlu1 %2614  ;;  %v2635_v60 = vpop.permute.xlu0 %2634 }
 0x591   : > { %v2648_v50 = vmul.f32 %v2615_v9, %v5030_v52  ;;  %v2652_v42 = vmul.f32 %v2635_v60, %v4985_v11  ;;  %v2654_v52 = vmul.f32 %v2645_v44, %v5064_v29 }
 0x593   : > { %2665 = vrot.lane.b32.xlu0 %v2648_v50, %s4622_s18  ;;  %2673 = vrot.lane.b32.xlu1 %v2652_v42, %s4622_s18 }
 0x598   : > { %v2625_v21 = vpop.permute.xlu1 %2624 }
 0x599   : > { %v2650_v17 = vmul.f32 %v2625_v21, %v5041_v10  ;;  %v2452_v10 = vmul.f32 %v5817_v24, %v4923_v40 }
 0x59b   : > { %2671 = vrot.lane.b32.xlu0 %v2651_v8, %s4622_s18  ;;  %2669 = vrot.lane.b32.xlu2 %v2650_v17, %s4622_s18  ;;  %v2467_v63 = vmul.f32 1.442695, %v2452_v10 }
 0x59d   : > { %4499 = vpow2.f32 %v2467_v63 }
 0x5a0   : > { %v2640_v5 = vpop.permute.xlu1 %2639 }
 0x5a1   : > { %v2653_v11 = vmul.f32 %v2640_v5, %v5069_v30 }
 0x5a3   : > { %2677 = vrot.lane.b32.xlu0 %v2654_v52, %s4622_s18  ;;  %2675 = vrot.lane.b32.xlu2 %v2653_v11, %s4622_s18  ;;  %v4500_v28 = vpop.eup %4499 }
 0x5a4   : > { %2476 = vst.msk [vmem:[#allocation2 + $0x1f8] sm:$0xff] %vm647_vm0, %v4500_v28 }
 0x5c9   : > { %v2590_v62 = vpop.permute.xlu1 %2589 }
 0x5ca   : > { %2606 = vst.msk [vmem:[#allocation2 + $0x1f8] sm:$0xff] %vm778_vm1, %v2590_v62 }
 0x5cc   : > { %v2588_v29 = vpop.permute.xlu0 %2587 }
 0x5cd   : > { %2605 = vst.msk [vmem:[#allocation2 + $0x1b8] sm:$0xff] %vm778_vm1, %v2588_v29 }
 0x5e5   : > { %v2664_v30 = vpop.permute.xlu2 %2663 }
 0x5e6   : > { %2687 = vst.msk [vmem:[#allocation3 + $0x38] sm:$0xff] %vm778_vm1, %v2664_v30  ;;  %v2668_v6 = vpop.permute.xlu1 %2667 }
 0x5e7   : > { %2689 = vst.msk [vmem:[#allocation3 + $0xb8] sm:$0xff] %vm778_vm1, %v2668_v6 }
 0x5f5   : > { %v2670_v40 = vpop.permute.xlu2 %2669 }
 0x5f6   : > { %2690 = vst.msk [vmem:[#allocation3 + $0xf8] sm:$0xff] %vm778_vm1, %v2670_v40 }
 0x5fd   : > { %v2676_v24 = vpop.permute.xlu2 %2675 }
 0x5fe   : > { %2693 = vst.msk [vmem:[#allocation3 + $0x1b8] sm:$0xff] %vm778_vm1, %v2676_v24 }
 0x605   : > { %v2666_v14 = vpop.permute.xlu0 %2665  ;;  %v2674_v49 = vpop.permute.xlu1 %2673 }
 0x606   : > { %2688 = vst.msk [vmem:[#allocation3 + $0x78] sm:$0xff] %vm778_vm1, %v2666_v14 }
 0x607   : > { %2692 = vst.msk [vmem:[#allocation3 + $0x178] sm:$0xff] %vm778_vm1, %v2674_v49 }
 0x60d   : > { %v2672_v20 = vpop.permute.xlu0 %2671 }
 0x60e   : > { %2691 = vst.msk [vmem:[#allocation3 + $0x138] sm:$0xff] %vm778_vm1, %v2672_v20 }
 0x615   : > { %v2678_v55 = vpop.permute.xlu0 %2677 }
 0x616   : > { %2694 = vst.msk [vmem:[#allocation3 + $0x1f8] sm:$0xff] %vm778_vm1, %v2678_v55 }
 0x617 LB: >> { %s2702_s20 = sshra.s32 %s4618_s15, 3  ;;  %s2705_s23 = sand.u32 7, %s4618_s15  ;;  %s4618_s15 = sphi %s4616_s15, %s2700_s15   ;;  %v4614_v39 = vphi %v4612_v39, %v2718_v39  }
 0x618   : >> { %s4074_s24 = sshll.u32 %s2702_s20, 6  ;;  %s2700_s15 = sadd.s32 1, %s4618_s15  }
 0x619   : >> { %s2708_s9 = sadd.s32 %s4074_s24, %s2705_s23  ;;  %p2697_p7 = scmp.ge.s32.totalorder %s2700_s15, 64  }
 0x61a   : >> { %s2709_s10 = scalar_lea.vmem [#allocation2], %s2708_s9  ;;  %s2714_s12 = scalar_lea.vmem [#allocation3], %s2708_s9  ;;  %4508 = vset.pattern.permute.xlu2 (%p2697_p7), %v4620_v0  ;;  %4507 = vset.pattern.permute.xlu1 (%p2697_p7), %v4620_v0  ;;  %v5904_v54 = vld [vmem:[%s4738_s8 + $0x20] sm:$0xff] (%p2697_p7)  ;;  %v5907_v58 = vld [vmem:[%s4738_s8 + $0x10] sm:$0xff] (%p2697_p7)  ;;  %v5917_v38 = vld [vmem:[%s4738_s8 + $0x28] sm:$0xff] (%p2697_p7) }
 0x61b   : >> { %v2710_v12 = vld [vmem:[%s2709_s10] ss:$8 sm:$0xf]  ;;  %4506 = vset.pattern.permute.xlu0 (%p2697_p7), %v4620_v0  ;;  %2771 = vperm.xlu2 (%p2697_p7), %4508, %v5904_v54  }
 0x61c   : >> { %v2711_v7 = vld [vmem:[%s2709_s10] ss:$8 sm:$0xf0]  ;;  %2761 = vperm.xlu1 (%p2697_p7), %4507, %v5907_v58  }
 0x61d   : >> { %v2712_v35 = vor.u32 %v2711_v7, %v2710_v12  ;;  %v2715_v31 = vld [vmem:[%s2714_s12] ss:$8 sm:$0xf] }
 0x61e   : >> { %v2716_v32 = vld [vmem:[%s2714_s12] ss:$8 sm:$0xf0] }
 0x61f   : >> { %v2717_v23 = vor.u32 %v2716_v32, %v2715_v31  ;;  %v2713_v57 = vmul.f32 %v4614_v39, %v2712_v35  ;;  %v5910_v41 = vld [vmem:[%s4738_s8] sm:$0xff] (%p2697_p7)  ;;  %v5920_v9 = vld [vmem:[%s4738_s8 + $0x18] sm:$0xff] (%p2697_p7)  ;;  %v5923_v60 = vld [vmem:[%s4738_s8 + $0x8] sm:$0xff] (%p2697_p7) }
 0x620   : > { %2699 = sbr.rel (!%p2697_p7) target bundleno = 1559 (0x617), region = 105  ;;  %2751 = vperm.xlu0 (%p2697_p7), %4506, %v5910_v41   ;;  %v5929_v50 = vld [vmem:[%s4738_s8 + $0x38] sm:$0xff] (%p2697_p7)  ;;  %v5932_v0 = vld [vmem:[%s4738_s8 + $0x30] sm:$0xff] (%p2697_p7) }
 0x621   : >> { %v2718_v39 = vadd.f32 %v2717_v23, %v2713_v57  }
 0x623   : >> { %2719 = vst [vmem:[%s2714_s12] ss:$8 sm:$0xf] %v2718_v39  ;;  %2776 = vperm.xlu2 (%p2697_p7), %4508, %v5917_v38  }
 0x624   : >> { %2720 = vst [vmem:[%s2714_s12] ss:$8 sm:$0xf0] %v2718_v39  ;;  %2766 = vperm.xlu1 (%p2697_p7), %4507, %v5920_v9  }
 0x628   : > { %2756 = vperm.xlu0 %4506, %v5923_v60  }
 0x62b   : > { %4509 = vset.pattern.permute.xlu2 %v4621_v48  ;;  %v5980_v21 = vld [vmem:[#allocation3 + $0xc0] sm:$0xff]  ;;  %v6024_v31 = vld [vmem:[#allocation3 + $0x48] sm:$0xff] }
 0x62c   : > { %2786 = vperm.xlu1 %4507, %v5929_v50   ;;  %2806 = vperm.xlu2 %4509, %v5910_v41   ;;  %v5998_v13 = vld [vmem:[#allocation3 + $0x40] sm:$0xff]  ;;  %v2887_v57 = vld [vmem:[#allocation3 + $0x88] sm:$0xff] }
 0x62d   : > { %v6000_v63 = vld [vmem:[#allocation3 + $0x80] sm:$0xff]  ;;  %v2890_v56 = vld [vmem:[#allocation3 + $0x148] sm:$0xff] }
 0x62e   : > { %v6008_v40 = vld [vmem:[#allocation3 + $0x180] sm:$0xff] }
 0x62f   : > { %v6010_v24 = vld [vmem:[#allocation3 + $0x100] sm:$0xff] }
 0x630   : > { %2781 = vperm.xlu0 %4506, %v5932_v0   ;;  %v6012_v14 = vld [vmem:[#allocation3 + $0x140] sm:$0xff] }
 0x631   : > { %v6022_v35 = vld [vmem:[#allocation3 + $0x1c0] sm:$0xff] }
 0x634   : > { %4511 = vset.pattern.permute.xlu1 %v4621_v48  ;;  %2818 = vperm.xlu2 %4509, %v5920_v9  }
 0x635   : > { %2814 = vperm.xlu1 %4511, %v5907_v58  }
 0x638   : > { %4510 = vset.pattern.permute.xlu0 %v4621_v48 }
 0x639   : > { %2810 = vperm.xlu0 %4510, %v5923_v60  }
 0x63c   : > { %2826 = vperm.xlu2 %4509, %v5917_v38  }
 0x63d   : > { %2822 = vperm.xlu1 %4511, %v5904_v54  }
 0x641   : > { %2830 = vperm.xlu0 %4510, %v5932_v0  }
 0x644   : > { %4513 = vset.pattern.permute.xlu2 %v4623_v34 }
 0x645   : > { %2834 = vperm.xlu1 %4511, %v5929_v50   ;;  %2898 = vperm.xlu2 %4513, %v5923_v60  }
 0x649   : > { %4514 = vset.pattern.permute.xlu0 %v4623_v34 }
 0x64a   : > { %2902 = vperm.xlu0 %4514, %v5907_v58  }
 0x64d   : > { %4512 = vset.pattern.permute.xlu1 %v4623_v34  ;;  %2910 = vperm.xlu2 %4513, %v5904_v54  }
 0x64e   : > { %2894 = vperm.xlu1 %4512, %v5910_v41  }
 0x652   : > { %2922 = vperm.xlu0 %4514, %v5929_v50  }
 0x655   : > { %2918 = vperm.xlu2 %4513, %v5932_v0  }
 0x656   : > { %2906 = vperm.xlu1 %4512, %v5920_v9  }
 0x65a   : > { %4517 = vset.pattern.permute.xlu0 %v4624_v25 }
 0x65b   : > { %2950 = vperm.xlu0 %4517, %v5907_v58  }
 0x65d   : > { %4516 = vset.pattern.permute.xlu2 %v4624_v25 }
 0x65e   : > { %2914 = vperm.xlu1 %4512, %v5917_v38   ;;  %2946 = vperm.xlu2 %4516, %v5923_v60  }
 0x663   : > { %2970 = vperm.xlu0 %4517, %v5929_v50  }
 0x666   : > { %4515 = vset.pattern.permute.xlu1 %v4624_v25  ;;  %2958 = vperm.xlu2 %4516, %v5904_v54   ;;  %v5976_v25 = vld [vmem:[#allocation3] sm:$0xff] }
 0x667   : > { %2942 = vperm.xlu1 %4515, %v5910_v41  }
 0x66b   : > { %4518 = vset.pattern.permute.xlu0 %v4625_v2 }
 0x66e   : > { %2966 = vperm.xlu2 %4516, %v5932_v0  }
 0x66f   : > { %2954 = vperm.xlu1 %4515, %v5920_v9  }
 0x675   : > { %v5969_v48 = vpop.permute.xlu2 %2771 }
 0x676   : > { %4520 = vset.pattern.permute.xlu2 %v4625_v2 }
 0x677   : > { %2962 = vperm.xlu1 %4515, %v5917_v38  }
 0x67d   : > { %v5973_v34 = vpop.permute.xlu2 %2776 }
 0x67f   : > { %4519 = vset.pattern.permute.xlu1 %v4625_v2 }
 0x686   : > { %v2807_v42 = vpop.permute.xlu2 %2806 }
 0x687   : > { %v2837_v36 = vmul.f32 %v2807_v42, %v5976_v25 }
 0x689   : > { %2853 = vrot.lane.b32.xlu2 %v2837_v36, %s4622_s18 }
 0x68e   : > { %v5982_v8 = vpop.permute.xlu1 %2761  ;;  %v2819_v44 = vpop.permute.xlu2 %2818 }
 0x68f   : > { %v2840_v5 = vmul.f32 %v2819_v44, %v5980_v21 }
 0x691   : > { %2859 = vrot.lane.b32.xlu2 %v2840_v5, %s4622_s18 }
 0x692   : > { %v5984_v17 = vpop.permute.xlu0 %2751 }
 0x696   : > { %v5988_v52 = vpop.permute.xlu1 %2766  ;;  %v2827_v11 = vpop.permute.xlu2 %2826 }
 0x697   : > { %v2842_v55 = vmul.f32 %v2827_v11, %v6012_v14  ;;  %v2792_v45 = vmul.f32 %v5988_v52, %v5980_v21 }
 0x69a   : > { %v5990_v2 = vpop.permute.xlu0 %2756 }
 0x69e   : > { %v5992_v18 = vpop.permute.xlu1 %2786 }
 0x69f   : > { %v5996_v10 = vpop.permute.xlu2 %2898 }
 0x6a2   : > { %v5994_v59 = vpop.permute.xlu0 %2781 }
 0x6a7   : > { %v2815_v62 = vpop.permute.xlu1 %2814  ;;  %v6003_v28 = vpop.permute.xlu2 %2910 }
 0x6a8   : > { %v2839_v30 = vmul.f32 %v2815_v62, %v6000_v63  ;;  %v6032_v62 = vld [vmem:[#allocation3 + $0x108] sm:$0xff] }
 0x6aa   : > { %2857 = vrot.lane.b32.xlu1 %v2839_v30, %s4622_s18 }
 0x6ab   : > { %v2811_v29 = vpop.permute.xlu0 %2810 }
 0x6ac   : > { %v2838_v6 = vmul.f32 %v2811_v29, %v5998_v13  ;;  %v2892_v29 = vld [vmem:[#allocation3 + $0x1c8] sm:$0xff] }
 0x6ae   : > { %2855 = vrot.lane.b32.xlu0 %v2838_v6, %s4622_s18 }
 0x6af   : > { %v2823_v49 = vpop.permute.xlu1 %2822  ;;  %v6016_v12 = vpop.permute.xlu2 %2918 }
 0x6b0   : > { %v2841_v39 = vmul.f32 %v2823_v49, %v6010_v24 }
 0x6b2   : > { %2863 = vrot.lane.b32.xlu1 %v2842_v55, %s4622_s18 }
 0x6b3   : > { %v2831_v20 = vpop.permute.xlu0 %2830 }
 0x6b4   : > { %v2843_v7 = vmul.f32 %v2831_v20, %v6008_v40 }
 0x6b6   : > { %2861 = vrot.lane.b32.xlu0 %v2841_v39, %s4622_s18  ;;  %2865 = vrot.lane.b32.xlu2 %v2843_v7, %s4622_s18 }
 0x6b7   : > { %v2835_v32 = vpop.permute.xlu1 %2834 }
 0x6b8   : > { %v2844_v23 = vmul.f32 %v2835_v32, %v6022_v35  ;;  %v2947_v36 = vpop.permute.xlu2 %2946 }
 0x6b9   : > { %v2974_v5 = vmul.f32 %v2947_v36, %v6024_v31  ;;  %v2885_v36 = vld [vmem:[#allocation3 + $0x8] sm:$0xff] }
 0x6bc   : > { %v2903_v42 = vpop.permute.xlu0 %2902 }
 0x6bd   : > { %v6027_v44 = vmul.f32 %v2903_v42, %v2887_v57 }
 0x6be   : > { %2867 = vrot.lane.b32.xlu0 %v2844_v23, %s4622_s18  ;;  %2991 = vrot.lane.b32.xlu2 %v2974_v5, %s4622_s18 }
 0x6c0   : > { %v2895_v11 = vpop.permute.xlu1 %2894  ;;  %v2959_v6 = vpop.permute.xlu2 %2958 }
 0x6c1   : > { %v2977_v20 = vmul.f32 %v2959_v6, %v6032_v62  ;;  %v2789_v6 = vmul.f32 %v5984_v17, %v5976_v25 }
 0x6c4   : > { %v2923_v30 = vpop.permute.xlu0 %2922 }
 0x6c5   : > { %v6034_v49 = vmul.f32 %v2923_v30, %v2892_v29 }
 0x6c6   : > { %2997 = vrot.lane.b32.xlu2 %v2977_v20, %s4622_s18  ;;  %v2888_v20 = vld [vmem:[#allocation3 + $0xc8] sm:$0xff] }
 0x6c8   : > { %v2907_v55 = vpop.permute.xlu1 %2906  ;;  %v2967_v4 = vpop.permute.xlu2 %2966 }
 0x6cd   : > { %v2951_v39 = vpop.permute.xlu0 %2950 }
 0x6ce   : > { %v2975_v7 = vmul.f32 %v2951_v39, %v2887_v57  ;;  %v6049_v57 = vld [vmem:[%s452_s11] ss:$0 sm:$0xff] }
 0x6cf   : > { %v2728_v25 = vmul.f32 %v6049_v57, %v5033_v53  ;;  %v2795_v53 = vmul.f32 %v5994_v59, %v6008_v40  ;;  %v2790_v59 = vmul.f32 %v5990_v2, %v5998_v13  ;;  %v2726_v40 = vmul.f32 %v6049_v57, %v5022_v46 }
 0x6d0   : > { %2993 = vrot.lane.b32.xlu0 %v2975_v7, %s4622_s18  ;;  %v6039_v32 = vpop.permute.xlu1 %2914  ;;  %v2730_v2 = vmul.f32 %v6049_v57, %v4978_v1  ;;  %v2793_v13 = vmul.f32 %v5969_v48, %v6010_v24  ;;  %v2929_v1 = vmul.f32 %v6003_v28, %v6032_v62  ;;  %v2796_v48 = vmul.f32 %v5992_v18, %v6022_v35 }
 0x6d5   : > { %v2971_v23 = vpop.permute.xlu0 %2970 }
 0x6d6   : > { %v2980_v42 = vmul.f32 %v2971_v23, %v2892_v29  ;;  %v2725_v29 = vmul.f32 %v6049_v57, %v5009_v37  ;;  %v2891_v37 = vld [vmem:[#allocation3 + $0x188] sm:$0xff] }
 0x6d7   : > { %v2931_v52 = vmul.f32 %v6016_v12, %v2891_v37 }
 0x6d8   : > { %3003 = vrot.lane.b32.xlu2 %v2980_v42, %s4622_s18  ;;  %v2797_v23 = vadd.f32 %v2789_v6, %v2725_v29  ;;  %v2800_v29 = vadd.f32 %v2792_v45, %v2728_v25 }
 0x6d9   : > { %v2943_v5 = vpop.permute.xlu1 %2942 }
 0x6da   : > { %v2973_v30 = vmul.f32 %v2943_v5, %v2885_v36  ;;  %v2925_v5 = vmul.f32 %v2895_v11, %v2885_v36  ;;  %v2928_v36 = vmul.f32 %v2907_v55, %v2888_v20 }
 0x6dc   : > { %2989 = vrot.lane.b32.xlu1 %v2973_v30, %s4622_s18 }
 0x6e0   : > { %3038 = vperm.xlu2 %4520, %v5907_v58  }
 0x6e1   : > { %v2955_v39 = vpop.permute.xlu1 %2954 }
 0x6e2   : > { %v2976_v7 = vmul.f32 %v2955_v39, %v2888_v20  ;;  %v2979_v39 = vmul.f32 %v2967_v4, %v2891_v37 }
 0x6e3   : > { %v2854_v42 = vpop.permute.xlu2 %2853 }
 0x6e4   : > { %2995 = vrot.lane.b32.xlu1 %v2976_v7, %s4622_s18  ;;  %v2877_v30 = vadd.f32 %v2854_v42, %v2797_v23 }
 0x6e6   : > { %v6061_v17 = vadd.f32 %v2925_v5, %v2877_v30  ;;  %v2798_v5 = vadd.f32 %v2790_v59, %v2726_v40 }
 0x6e8   : > { %3046 = vperm.xlu2 %4520, %v5904_v54  }
 0x6e9   : > { %v2963_v61 = vpop.permute.xlu1 %2962 }
 0x6ea   : > { %v2978_v6 = vmul.f32 %v2963_v61, %v2890_v56  ;;  %v2731_v61 = vmul.f32 %v6049_v57, %v5057_v27  ;;  %v2791_v27 = vmul.f32 %v5982_v8, %v6000_v63  ;;  %v2926_v8 = vmul.f32 %v5996_v10, %v6024_v31 }
 0x6eb   : > { %v2860_v11 = vpop.permute.xlu2 %2859  ;;  %v2930_v10 = vmul.f32 %v6039_v32, %v2890_v56 }
 0x6ec   : > { %3001 = vrot.lane.b32.xlu1 %v2979_v39, %s4622_s18  ;;  %2999 = vrot.lane.b32.xlu0 %v2978_v6, %s4622_s18  ;;  %v2880_v7 = vadd.f32 %v2860_v11, %v2800_v29  ;;  %v2803_v4 = vadd.f32 %v2795_v53, %v2731_v61  ;;  %v2729_v39 = vmul.f32 %v6049_v57, %v4962_v26 }
 0x6ed   : > { %v2732_v26 = vmul.f32 %v6049_v57, %v5051_v22  ;;  %v3028_v22 = vld [vmem:[#allocation3 + $0x1d0] sm:$0xff] }
 0x6ee   : > { %v6066_v21 = vadd.f32 %v2928_v36, %v2880_v7  ;;  %v2801_v11 = vadd.f32 %v2793_v13, %v2729_v39 }
 0x6ef   : > { %v2804_v7 = vadd.f32 %v2796_v48, %v2732_v26 }
 0x6f0   : > { %3058 = vperm.xlu2 %4520, %v5929_v50  }
 0x6f4   : > { %3034 = vperm.xlu1 %4519, %v5923_v60   ;;  %3030 = vperm.xlu0 %4518, %v5910_v41  }
 0x6f8   : > { %4523 = vset.pattern.permute.xlu2 %v4626_v3 }
 0x6f9   : > { %3086 = vperm.xlu2 %4523, %v5907_v58  }
 0x6fc   : > { %3042 = vperm.xlu1 %4519, %v5920_v9   ;;  %3050 = vperm.xlu0 %4518, %v5917_v38  }
 0x701   : > { %3094 = vperm.xlu2 %4523, %v5904_v54  }
 0x704   : > { %3054 = vperm.xlu1 %4519, %v5932_v0   ;;  %4521 = vset.pattern.permute.xlu0 %v4626_v3 }
 0x705   : > { %3078 = vperm.xlu0 %4521, %v5910_v41  }
 0x709   : > { %3106 = vperm.xlu2 %4523, %v5929_v50  }
 0x70c   : > { %4522 = vset.pattern.permute.xlu1 %v4626_v3  ;;  %v2727_v3 = vmul.f32 %v6049_v57, %v5003_v33  ;;  %v2794_v33 = vmul.f32 %v5973_v34, %v6012_v14 }
 0x70d   : > { %3082 = vperm.xlu1 %4522, %v5923_v60   ;;  %3098 = vperm.xlu0 %4521, %v5917_v38  }
 0x70e   : > { %v2799_v12 = vadd.f32 %v2791_v27, %v2727_v3  ;;  %v2802_v6 = vadd.f32 %v2794_v33, %v2730_v2  ;;  %v3021_v33 = vld [vmem:[#allocation3 + $0x10] sm:$0xff] }
 0x70f   : > { %v3022_v2 = vld [vmem:[#allocation3 + $0x50] sm:$0xff] }
 0x710   : > { %v2866_v45 = vpop.permute.xlu2 %2865 }
 0x711   : > { %v2883_v55 = vadd.f32 %v2866_v45, %v2803_v4  ;;  %4524 = vset.pattern.permute.xlu2 %v4627_v43  ;;  %v3025_v45 = vld [vmem:[#allocation3 + $0x110] sm:$0xff] }
 0x713   : > { %v6088_v20 = vadd.f32 %v2931_v52, %v2883_v55 }
 0x715   : > { %3090 = vperm.xlu1 %4522, %v5920_v9   ;;  %4525 = vset.pattern.permute.xlu0 %v4627_v43 }
 0x718   : > { %v2992_v23 = vpop.permute.xlu2 %2991 }
 0x71c   : > { %v2858_v42 = vpop.permute.xlu1 %2857 }
 0x71d   : > { %v2879_v30 = vadd.f32 %v2858_v42, %v2799_v12  ;;  %3102 = vperm.xlu1 %4522, %v5932_v0  }
 0x71f   : > { %v2935_v46 = vadd.f32 %v6027_v44, %v2879_v30 }
 0x720   : > { %v2856_v25 = vpop.permute.xlu0 %2855  ;;  %v2998_v34 = vpop.permute.xlu2 %2997 }
 0x721   : > { %v2878_v63 = vadd.f32 %v2856_v25, %v2798_v5 }
 0x723   : > { %v2934_v37 = vadd.f32 %v2926_v8, %v2878_v63 }
 0x724   : > { %v2864_v29 = vpop.permute.xlu1 %2863 }
 0x725   : > { %v2882_v31 = vadd.f32 %v2864_v29, %v2802_v6  ;;  %4526 = vset.pattern.permute.xlu1 %v4627_v43  ;;  %v3023_v43 = vld [vmem:[#allocation3 + $0x90] sm:$0xff]  ;;  %v3014_v39 = vadd.f32 %v2992_v23, %v2934_v37 }
 0x726   : > { %v3027_v23 = vld [vmem:[#allocation3 + $0x190] sm:$0xff] }
 0x727   : > { %v2938_v44 = vadd.f32 %v2930_v10, %v2882_v31 }
 0x728   : > { %v2862_v36 = vpop.permute.xlu0 %2861 }
 0x729   : > { %v2881_v14 = vadd.f32 %v2862_v36, %v2801_v11  ;;  %v3026_v36 = vld [vmem:[#allocation3 + $0x150] sm:$0xff] }
 0x72b   : > { %v2937_v24 = vadd.f32 %v2929_v1, %v2881_v14 }
 0x72d   : > { %v3017_v55 = vadd.f32 %v2998_v34, %v2937_v24  ;;  %v3024_v34 = vld [vmem:[#allocation3 + $0xd0] sm:$0xff] }
 0x730   : > { %v2868_v53 = vpop.permute.xlu0 %2867 }
 0x731   : > { %v2884_v56 = vadd.f32 %v2868_v53, %v2804_v7 }
 0x732   : > { %v3004_v32 = vpop.permute.xlu2 %3003 }
 0x733   : > { %v2940_v61 = vadd.f32 %v6034_v49, %v2884_v56 }
 0x735   : > { %v3020_v59 = vadd.f32 %v3004_v32, %v2940_v61 }
 0x73a   : > { %v3039_v4 = vpop.permute.xlu2 %3038 }
 0x73b   : > { %v3063_v52 = vmul.f32 %v3039_v4, %v3023_v43 }
 0x742   : > { %v3047_v28 = vpop.permute.xlu2 %3046  ;;  %v2994_v62 = vpop.permute.xlu0 %2993 }
 0x743   : > { %v3015_v27 = vadd.f32 %v2994_v62, %v2935_v46  ;;  %v3065_v3 = vmul.f32 %v3047_v28, %v3025_v45 }
 0x745   : > { %v6121_v18 = vadd.f32 %v3063_v52, %v3015_v27  ;;  %v6123_v35 = vadd.f32 %v3065_v3, %v3017_v55 }
 0x74a   : > { %v3059_v57 = vpop.permute.xlu2 %3058 }
 0x74b   : > { %v3068_v40 = vmul.f32 %v3059_v57, %v3028_v22 }
 0x74d   : > { %v6125_v12 = vadd.f32 %v3068_v40, %v3020_v59 }
 0x74e   : > { %v2990_v49 = vpop.permute.xlu1 %2989 }
 0x74f   : > { %v3013_v6 = vadd.f32 %v2990_v49, %v6061_v17  ;;  %v3157_v49 = vld [vmem:[#allocation3 + $0x18] sm:$0xff] }
 0x753   : > { %v3087_v42 = vpop.permute.xlu2 %3086 }
 0x754   : > { %v3111_v5 = vmul.f32 %v3087_v42, %v3023_v43 }
 0x756   : > { %3129 = vrot.lane.b32.xlu2 %v3111_v5, %s4622_s18  ;;  %v2996_v30 = vpop.permute.xlu1 %2995  ;;  %v3160_v5 = vld [vmem:[#allocation3 + $0xd8] sm:$0xff] }
 0x757   : > { %v3016_v48 = vadd.f32 %v2996_v30, %v6066_v21 }
 0x75b   : > { %v3095_v28 = vpop.permute.xlu2 %3094 }
 0x75c   : > { %v3113_v55 = vmul.f32 %v3095_v28, %v3025_v45 }
 0x75e   : > { %v3002_v25 = vpop.permute.xlu1 %3001  ;;  %v3000_v8 = vpop.permute.xlu0 %2999 }
 0x75f   : > { %v3018_v63 = vadd.f32 %v3000_v8, %v2938_v44  ;;  %v3019_v17 = vadd.f32 %v3002_v25, %v6088_v20 }
 0x763   : > { %v3107_v20 = vpop.permute.xlu2 %3106 }
 0x764   : > { %v3116_v57 = vmul.f32 %v3107_v20, %v3028_v22 }
 0x766   : > { %v3035_v46 = vpop.permute.xlu1 %3034  ;;  %v3031_v13 = vpop.permute.xlu0 %3030 }
 0x767   : > { %v3061_v29 = vmul.f32 %v3031_v13, %v3021_v33  ;;  %v3062_v11 = vmul.f32 %v3035_v46, %v3022_v2 }
 0x769   : > { %v6129_v10 = vadd.f32 %v3061_v29, %v3013_v6  ;;  %v6131_v31 = vadd.f32 %v3062_v11, %v3014_v39 }
 0x76e   : > { %v3043_v1 = vpop.permute.xlu1 %3042  ;;  %v3051_v14 = vpop.permute.xlu0 %3050 }
 0x76f   : > { %v3066_v44 = vmul.f32 %v3051_v14, %v3026_v36  ;;  %v3064_v24 = vmul.f32 %v3043_v1, %v3024_v34 }
 0x771   : > { %v3074_v26 = vadd.f32 %v3066_v44, %v3018_v63  ;;  %v6134_v7 = vadd.f32 %v3064_v24, %v3016_v48 }
 0x776   : > { %v3055_v37 = vpop.permute.xlu1 %3054 }
 0x777   : > { %v3079_v53 = vpop.permute.xlu0 %3078  ;;  %v3067_v56 = vmul.f32 %v3055_v37, %v3027_v23  ;;  %v3159_v37 = vld [vmem:[#allocation3 + $0x98] sm:$0xff] }
 0x778   : > { %v3109_v32 = vmul.f32 %v3079_v53, %v3021_v33 }
 0x779   : > { %v6137_v61 = vadd.f32 %v3067_v56, %v3019_v17 }
 0x77a   : > { %3125 = vrot.lane.b32.xlu0 %v3109_v32, %s4622_s18 }
 0x77f   : > { %v3083_v4 = vpop.permute.xlu1 %3082  ;;  %v3099_v43 = vpop.permute.xlu0 %3098 }
 0x780   : > { %v3110_v52 = vmul.f32 %v3083_v4, %v3022_v2  ;;  %v3114_v21 = vmul.f32 %v3099_v43, %v3026_v36  ;;  %v3162_v2 = vld [vmem:[#allocation3 + $0x158] sm:$0xff] }
 0x781   : > { %v3161_v43 = vld [vmem:[#allocation3 + $0x118] sm:$0xff] }
 0x782   : > { %3127 = vrot.lane.b32.xlu1 %v3110_v52, %s4622_s18  ;;  %3135 = vrot.lane.b32.xlu2 %v3114_v21, %s4622_s18  ;;  %v3163_v52 = vld [vmem:[#allocation3 + $0x198] sm:$0xff] }
 0x787   : > { %v3091_v62 = vpop.permute.xlu1 %3090 }
 0x788   : > { %v3112_v27 = vmul.f32 %v3091_v62, %v3024_v34 }
 0x78a   : > { %3133 = vrot.lane.b32.xlu1 %v3113_v55, %s4622_s18  ;;  %3131 = vrot.lane.b32.xlu0 %v3112_v27, %s4622_s18  ;;  %v3164_v27 = vld [vmem:[#allocation3 + $0x1d8] sm:$0xff] }
 0x78b   : > { %3166 = vperm.xlu2 %4524, %v5910_v41  }
 0x78f   : > { %v3103_v3 = vpop.permute.xlu1 %3102 }
 0x790   : > { %v3115_v59 = vmul.f32 %v3103_v3, %v3027_v23 }
 0x792   : > { %3139 = vrot.lane.b32.xlu1 %v3116_v57, %s4622_s18  ;;  %3137 = vrot.lane.b32.xlu0 %v3115_v59, %s4622_s18 }
 0x793   : > { %3178 = vperm.xlu2 %4524, %v5920_v9  }
 0x79a   : > { %3174 = vperm.xlu1 %4526, %v5907_v58   ;;  %3170 = vperm.xlu0 %4525, %v5923_v60  }
 0x79b   : > { %3186 = vperm.xlu2 %4524, %v5917_v38  }
 0x7a2   : > { %3182 = vperm.xlu1 %4526, %v5904_v54   ;;  %3190 = vperm.xlu0 %4525, %v5932_v0  }
 0x7a3   : > { %4527 = vset.pattern.permute.xlu2 %v4628_v15 }
 0x7a4   : > { %3214 = vperm.xlu2 %4527, %v5910_v41  }
 0x7aa   : > { %3194 = vperm.xlu1 %4526, %v5929_v50   ;;  %4528 = vset.pattern.permute.xlu0 %v4628_v15 }
 0x7ab   : > { %3218 = vperm.xlu0 %4528, %v5923_v60  }
 0x7ac   : > { %3226 = vperm.xlu2 %4527, %v5920_v9  }
 0x7b0   : > { %v3130_v45 = vpop.permute.xlu2 %3129 }
 0x7b1   : > { %v3151_v22 = vadd.f32 %v3130_v45, %v6121_v18 }
 0x7b2   : > { %4529 = vset.pattern.permute.xlu1 %v4628_v15 }
 0x7b3   : > { %3222 = vperm.xlu1 %4529, %v5907_v58   ;;  %3238 = vperm.xlu0 %4528, %v5932_v0  }
 0x7b4   : > { %3234 = vperm.xlu2 %4527, %v5917_v38  }
 0x7bb   : > { %3230 = vperm.xlu1 %4529, %v5904_v54   ;;  %4532 = vset.pattern.permute.xlu0 %v4629_v51 }
 0x7bc   : > { %4531 = vset.pattern.permute.xlu2 %v4629_v51 }
 0x7c3   : > { %3242 = vperm.xlu1 %4529, %v5929_v50  }
 0x7cb   : > { %4530 = vset.pattern.permute.xlu1 %v4629_v51 }
 0x7dc   : > { %v3136_v40 = vpop.permute.xlu2 %3135 }
 0x7dd   : > { %v3154_v18 = vadd.f32 %v3136_v40, %v3074_v26 }
 0x7e5   : > { %v3167_v15 = vpop.permute.xlu2 %3166 }
 0x7e6   : > { %v3197_v42 = vmul.f32 %v3167_v15, %v3157_v49 }
 0x7ec   : > { %v3126_v30 = vpop.permute.xlu0 %3125 }
 0x7ed   : > { %v3179_v25 = vpop.permute.xlu2 %3178  ;;  %v3149_v8 = vadd.f32 %v3126_v30, %v6129_v10 }
 0x7ee   : > { %v3200_v63 = vmul.f32 %v3179_v25, %v3160_v5 }
 0x7ef   : > { %v6170_v33 = vadd.f32 %v3197_v42, %v3149_v8 }
 0x7f4   : > { %v3128_v46 = vpop.permute.xlu1 %3127 }
 0x7f5   : > { %v3150_v13 = vadd.f32 %v3128_v46, %v6131_v31  ;;  %v3187_v39 = vpop.permute.xlu2 %3186 }
 0x7f6   : > { %v3202_v6 = vmul.f32 %v3187_v39, %v3162_v2 }
 0x7f8   : > { %v6173_v51 = vadd.f32 %v3202_v6, %v3154_v18  ;;  %v3294_v6 = vld [vmem:[#allocation3 + $0x60] sm:$0xff] }
 0x7fc   : > { %v3134_v29 = vpop.permute.xlu1 %3133  ;;  %v3132_v11 = vpop.permute.xlu0 %3131 }
 0x7fd   : > { %v3153_v36 = vadd.f32 %v3134_v29, %v6123_v35  ;;  %v3152_v34 = vadd.f32 %v3132_v11, %v6134_v7  ;;  %v3158_v35 = vld [vmem:[#allocation3 + $0x58] sm:$0xff] }
 0x7fe   : > { %v3215_v1 = vpop.permute.xlu2 %3214 }
 0x7ff   : > { %v3245_v14 = vmul.f32 %v3215_v1, %v3157_v49  ;;  %v6177_v10 = vadd.f32 %v3200_v63, %v3152_v34 }
 0x801   : > { %3261 = vrot.lane.b32.xlu2 %v3245_v14, %s4622_s18 }
 0x804   : > { %v3140_v48 = vpop.permute.xlu1 %3139  ;;  %v3138_v44 = vpop.permute.xlu0 %3137 }
 0x805   : > { %v3156_v31 = vadd.f32 %v3140_v48, %v6125_v12  ;;  %v3155_v24 = vadd.f32 %v3138_v44, %v6137_v61  ;;  %v3299_v44 = vld [vmem:[#allocation3 + $0x1a0] sm:$0xff] }
 0x806   : > { %v3227_v26 = vpop.permute.xlu2 %3226 }
 0x807   : > { %v3248_v23 = vmul.f32 %v3227_v26, %v3160_v5 }
 0x809   : > { %3267 = vrot.lane.b32.xlu2 %v3248_v23, %s4622_s18 }
 0x80c   : > { %v3175_v17 = vpop.permute.xlu1 %3174  ;;  %v3171_v7 = vpop.permute.xlu0 %3170 }
 0x80d   : > { %v3199_v53 = vmul.f32 %v3175_v17, %v3159_v37  ;;  %v3198_v56 = vmul.f32 %v3171_v7, %v3158_v35 }
 0x80e   : > { %v3235_v15 = vpop.permute.xlu2 %3234 }
 0x80f   : > { %v6183_v32 = vadd.f32 %v3198_v56, %v3150_v13  ;;  %v6185_v4 = vadd.f32 %v3199_v53, %v3151_v22  ;;  %v3250_v5 = vmul.f32 %v3235_v15, %v3162_v2 }
 0x814   : > { %v3183_v21 = vpop.permute.xlu1 %3182  ;;  %v3191_v12 = vpop.permute.xlu0 %3190 }
 0x815   : > { %v3201_v28 = vmul.f32 %v3183_v21, %v3161_v43  ;;  %v3203_v61 = vmul.f32 %v3191_v12, %v3163_v52 }
 0x817   : > { %v3211_v62 = vadd.f32 %v3203_v61, %v3155_v24  ;;  %v6187_v55 = vadd.f32 %v3201_v28, %v3153_v36  ;;  %v3297_v36 = vld [vmem:[#allocation3 + $0x120] sm:$0xff] }
 0x81c   : > { %v3195_v20 = vpop.permute.xlu1 %3194 }
 0x81d   : > { %v3204_v3 = vmul.f32 %v3195_v20, %v3164_v27  ;;  %v3219_v57 = vpop.permute.xlu0 %3218 }
 0x81e   : > { %v3246_v59 = vmul.f32 %v3219_v57, %v3158_v35 }
 0x81f   : > { %v6189_v45 = vadd.f32 %v3204_v3, %v3156_v31 }
 0x820   : > { %3263 = vrot.lane.b32.xlu0 %v3246_v59, %s4622_s18 }
 0x825   : > { %v3223_v22 = vpop.permute.xlu1 %3222  ;;  %v3239_v40 = vpop.permute.xlu0 %3238 }
 0x826   : > { %v3247_v18 = vmul.f32 %v3223_v22, %v3159_v37  ;;  %v3251_v49 = vmul.f32 %v3239_v40, %v3163_v52  ;;  %v3298_v22 = vld [vmem:[#allocation3 + $0x160] sm:$0xff] }
 0x827   : > { %v3300_v40 = vld [vmem:[#allocation3 + $0x1e0] sm:$0xff] }
 0x828   : > { %3265 = vrot.lane.b32.xlu1 %v3247_v18, %s4622_s18  ;;  %3273 = vrot.lane.b32.xlu2 %v3251_v49, %s4622_s18 }
 0x82d   : > { %v3231_v42 = vpop.permute.xlu1 %3230 }
 0x82e   : > { %v3249_v30 = vmul.f32 %v3231_v42, %v3161_v43 }
 0x830   : > { %3271 = vrot.lane.b32.xlu1 %v3250_v5, %s4622_s18  ;;  %3269 = vrot.lane.b32.xlu0 %v3249_v30, %s4622_s18 }
 0x831   : > { %3306 = vperm.xlu2 %4531, %v5923_v60  }
 0x835   : > { %v3243_v25 = vpop.permute.xlu1 %3242 }
 0x836   : > { %v3252_v8 = vmul.f32 %v3243_v25, %v3164_v27 }
 0x838   : > { %3302 = vperm.xlu1 %4530, %v5910_v41   ;;  %3275 = vrot.lane.b32.xlu0 %v3252_v8, %s4622_s18 }
 0x839   : > { %3318 = vperm.xlu2 %4531, %v5904_v54  }
 0x840   : > { %3314 = vperm.xlu1 %4530, %v5920_v9   ;;  %3310 = vperm.xlu0 %4532, %v5907_v58  }
 0x841   : > { %3326 = vperm.xlu2 %4531, %v5932_v0  }
 0x848   : > { %3322 = vperm.xlu1 %4530, %v5917_v38   ;;  %3330 = vperm.xlu0 %4532, %v5929_v50  }
 0x849   : > { %4534 = vset.pattern.permute.xlu2 %v4630_v19 }
 0x84a   : > { %3354 = vperm.xlu2 %4534, %v5923_v60  }
 0x850   : > { %4533 = vset.pattern.permute.xlu1 %v4630_v19  ;;  %4535 = vset.pattern.permute.xlu0 %v4630_v19 }
 0x851   : > { %3350 = vperm.xlu1 %4533, %v5910_v41   ;;  %3358 = vperm.xlu0 %4535, %v5907_v58  }
 0x852   : > { %3366 = vperm.xlu2 %4534, %v5904_v54  }
 0x859   : > { %3362 = vperm.xlu1 %4533, %v5920_v9   ;;  %3378 = vperm.xlu0 %4535, %v5929_v50  }
 0x85a   : > { %3374 = vperm.xlu2 %4534, %v5932_v0  }
 0x85b   : > { %v3262_v63 = vpop.permute.xlu2 %3261 }
 0x85c   : > { %v3285_v2 = vadd.f32 %v3262_v63, %v6170_v33 }
 0x861   : > { %3370 = vperm.xlu1 %4533, %v5917_v38   ;;  %4536 = vset.pattern.permute.xlu0 %v4631_v47 }
 0x862   : > { %4538 = vset.pattern.permute.xlu2 %v4631_v47 }
 0x863   : > { %v3268_v19 = vpop.permute.xlu2 %3267 }
 0x864   : > { %v3288_v46 = vadd.f32 %v3268_v19, %v6177_v10 }
 0x869   : > { %4537 = vset.pattern.permute.xlu1 %v4631_v47 }
 0x882   : > { %v3274_v13 = vpop.permute.xlu2 %3273 }
 0x883   : > { %v3291_v39 = vadd.f32 %v3274_v13, %v3211_v62  ;;  %v3295_v62 = vld [vmem:[#allocation3 + $0xa0] sm:$0xff] }
 0x88b   : > { %v3307_v29 = vpop.permute.xlu2 %3306 }
 0x88c   : > { %v3334_v11 = vmul.f32 %v3307_v29, %v3294_v6 }
 0x892   : > { %v3264_v34 = vpop.permute.xlu0 %3263 }
 0x893   : > { %v3319_v1 = vpop.permute.xlu2 %3318  ;;  %v3286_v33 = vadd.f32 %v3264_v34, %v6183_v32  ;;  %v3293_v32 = vld [vmem:[#allocation3 + $0x20] sm:$0xff] }
 0x894   : > { %v3337_v14 = vmul.f32 %v3319_v1, %v3297_v36 }
 0x895   : > { %v6222_v48 = vadd.f32 %v3334_v11, %v3286_v33  ;;  %v3433_v33 = vld [vmem:[#allocation3 + $0x128] sm:$0xff] }
 0x89a   : > { %v3266_v31 = vpop.permute.xlu1 %3265 }
 0x89b   : > { %v3287_v24 = vadd.f32 %v3266_v31, %v6185_v4  ;;  %v3327_v10 = vpop.permute.xlu2 %3326 }
 0x89c   : > { %v3339_v26 = vmul.f32 %v3327_v10, %v3299_v44 }
 0x89e   : > { %v6225_v47 = vadd.f32 %v3339_v26, %v3291_v39  ;;  %v3436_v26 = vld [vmem:[#allocation3 + $0x1e8] sm:$0xff] }
 0x8a2   : > { %v3272_v23 = vpop.permute.xlu1 %3271  ;;  %v3270_v37 = vpop.permute.xlu0 %3269 }
 0x8a3   : > { %v3290_v35 = vadd.f32 %v3272_v23, %v6173_v51  ;;  %v3289_v17 = vadd.f32 %v3270_v37, %v6187_v55  ;;  %v3296_v51 = vld [vmem:[#allocation3 + $0xe0] sm:$0xff] }
 0x8a4   : > { %v3355_v7 = vpop.permute.xlu2 %3354 }
 0x8a5   : > { %v3382_v53 = vmul.f32 %v3355_v7, %v3294_v6  ;;  %v6229_v56 = vadd.f32 %v3337_v14, %v3289_v17 }
 0x8a7   : > { %3399 = vrot.lane.b32.xlu2 %v3382_v53, %s4622_s18 }
 0x8aa   : > { %v3303_v43 = vpop.permute.xlu1 %3302  ;;  %v3276_v52 = vpop.permute.xlu0 %3275 }
 0x8ab   : > { %v3333_v4 = vmul.f32 %v3303_v43, %v3293_v32  ;;  %v3292_v21 = vadd.f32 %v3276_v52, %v6189_v45 }
 0x8ac   : > { %v3367_v12 = vpop.permute.xlu2 %3366 }
 0x8ad   : > { %v3385_v28 = vmul.f32 %v3367_v12, %v3297_v36  ;;  %v6233_v61 = vadd.f32 %v3333_v4, %v3285_v2  ;;  %v6473_v36 = vmov 12   ;;  %v3429_v12 = vld [vmem:[#allocation3 + $0x28] sm:$0xff] }
 0x8af   : > { %3405 = vrot.lane.b32.xlu2 %v3385_v28, %s4622_s18 }
 0x8b2   : > { %v3315_v55 = vpop.permute.xlu1 %3314  ;;  %v3311_v27 = vpop.permute.xlu0 %3310 }
 0x8b3   : > { %v3336_v20 = vmul.f32 %v3315_v55, %v3296_v51  ;;  %v3335_v3 = vmul.f32 %v3311_v27, %v3295_v62 }
 0x8b4   : > { %v3375_v39 = vpop.permute.xlu2 %3374 }
 0x8b5   : > { %v6236_v57 = vadd.f32 %v3335_v3, %v3287_v24  ;;  %v6238_v59 = vadd.f32 %v3336_v20, %v3288_v46  ;;  %v3387_v29 = vmul.f32 %v3375_v39, %v3299_v44  ;;  %v3432_v20 = vld [vmem:[#allocation3 + $0xe8] sm:$0xff] }
 0x8b6   : > { %v3434_v3 = vld [vmem:[#allocation3 + $0x168] sm:$0xff] }
 0x8ba   : > { %v3323_v18 = vpop.permute.xlu1 %3322  ;;  %v3331_v45 = vpop.permute.xlu0 %3330 }
 0x8bb   : > { %v3338_v49 = vmul.f32 %v3323_v18, %v3298_v22  ;;  %v3340_v15 = vmul.f32 %v3331_v45, %v3300_v40  ;;  %v3435_v45 = vld [vmem:[#allocation3 + $0x1a8] sm:$0xff] }
 0x8bd   : > { %v3348_v42 = vadd.f32 %v3340_v15, %v3292_v21  ;;  %v6240_v5 = vadd.f32 %v3338_v49, %v3290_v35  ;;  %v3430_v21 = vld [vmem:[#allocation3 + $0x68] sm:$0xff] }
 0x8c3   : > { %v3351_v30 = vpop.permute.xlu1 %3350  ;;  %v3359_v25 = vpop.permute.xlu0 %3358 }
 0x8c4   : > { %v3381_v8 = vmul.f32 %v3351_v30, %v3293_v32  ;;  %v3383_v63 = vmul.f32 %v3359_v25, %v3295_v62 }
 0x8c6   : > { %3397 = vrot.lane.b32.xlu1 %v3381_v8, %s4622_s18  ;;  %3401 = vrot.lane.b32.xlu0 %v3383_v63, %s4622_s18 }
 0x8cb   : > { %v3363_v2 = vpop.permute.xlu1 %3362  ;;  %v3379_v19 = vpop.permute.xlu0 %3378 }
 0x8cc   : > { %v3384_v46 = vmul.f32 %v3363_v2, %v3296_v51  ;;  %v3388_v13 = vmul.f32 %v3379_v19, %v3300_v40 }
 0x8ce   : > { %3403 = vrot.lane.b32.xlu1 %v3384_v46, %s4622_s18  ;;  %3411 = vrot.lane.b32.xlu2 %v3388_v13, %s4622_s18 }
 0x8d3   : > { %v3371_v6 = vpop.permute.xlu1 %3370 }
 0x8d4   : > { %v3386_v11 = vmul.f32 %v3371_v6, %v3298_v22  ;;  %v6298_v6 = vld [vmem:[%s4738_s8] sm:$0xff] }
 0x8d6   : > { %3409 = vrot.lane.b32.xlu1 %v3387_v29, %s4622_s18  ;;  %3407 = vrot.lane.b32.xlu0 %v3386_v11, %s4622_s18 }
 0x8d7   : > { %3446 = vperm.xlu2 %4538, %v5907_v58  }
 0x8de   : > { %3442 = vperm.xlu1 %4537, %v5923_v60   ;;  %3438 = vperm.xlu0 %4536, %v5910_v41  }
 0x8df   : > { %3454 = vperm.xlu2 %4538, %v5904_v54  }
 0x8e6   : > { %3450 = vperm.xlu1 %4537, %v5920_v9   ;;  %3458 = vperm.xlu0 %4536, %v5917_v38  }
 0x8e7   : > { %3466 = vperm.xlu2 %4538, %v5929_v50  }
 0x8ee   : > { %3462 = vperm.xlu1 %4537, %v5932_v0   ;;  %4539 = vset.pattern.permute.xlu0 %v4632_v16 }
 0x8ef   : > { %4541 = vset.pattern.permute.xlu2 %v4632_v16  ;;  %3486 = vperm.xlu0 %4539, %v5910_v41  }
 0x8f0   : > { %3494 = vperm.xlu2 %4541, %v5907_v58  }
 0x8f6   : > { %4540 = vset.pattern.permute.xlu1 %v4632_v16 }
 0x8f7   : > { %3490 = vperm.xlu1 %4540, %v5923_v60   ;;  %3506 = vperm.xlu0 %4539, %v5917_v38   ;;  %v3431_v38 = vld [vmem:[#allocation3 + $0xa8] sm:$0xff] }
 0x8f8   : > { %3502 = vperm.xlu2 %4541, %v5904_v54  }
 0x8ff   : > { %3498 = vperm.xlu1 %4540, %v5920_v9   ;;  %4543 = vset.pattern.permute.xlu0 %v6473_v36 }
 0x900   : > { %3514 = vperm.xlu2 %4541, %v5929_v50  }
 0x901   : > { %v3400_v34 = vpop.permute.xlu2 %3399 }
 0x902   : > { %v3422_v1 = vadd.f32 %v3400_v34, %v6222_v48 }
 0x907   : > { %3510 = vperm.xlu1 %4540, %v5932_v0  }
 0x908   : > { %4542 = vset.pattern.permute.xlu2 %v6473_v36 }
 0x909   : > { %v3406_v16 = vpop.permute.xlu2 %3405 }
 0x90a   : > { %v3425_v58 = vadd.f32 %v3406_v16, %v6229_v56  ;;  %v6308_v16 = vld [vmem:[%s4738_s8 + $0x10] sm:$0xff] }
 0x90f   : > { %4544 = vset.pattern.permute.xlu1 %v6473_v36 }
 0x928   : > { %v3412_v41 = vpop.permute.xlu2 %3411 }
 0x929   : > { %v3428_v54 = vadd.f32 %v3412_v41, %v3348_v42  ;;  %v6316_v41 = vld [vmem:[%s4738_s8 + $0x28] sm:$0xff] }
 0x931   : > { %v3447_v9 = vpop.permute.xlu2 %3446 }
 0x932   : > { %v3471_v60 = vmul.f32 %v3447_v9, %v3431_v38  ;;  %v6474_v9 = vmov 13  }
 0x938   : > { %v3398_v14 = vpop.permute.xlu1 %3397  ;;  %v3402_v50 = vpop.permute.xlu0 %3401 }
 0x939   : > { %v3421_v44 = vadd.f32 %v3398_v14, %v6233_v61  ;;  %v3455_v48 = vpop.permute.xlu2 %3454  ;;  %v3423_v0 = vadd.f32 %v3402_v50, %v6236_v57  ;;  %v6476_v14 = vmov 14  }
 0x93a   : > { %v3473_v31 = vmul.f32 %v3455_v48, %v3433_v33 }
 0x93b   : > { %v6274_v24 = vadd.f32 %v3471_v60, %v3423_v0  ;;  %v6330_v60 = vld [vmem:[%s4738_s8 + $0x38] sm:$0xff] }
 0x93c   : > { %v6276_v10 = vadd.f32 %v3473_v31, %v3425_v58  ;;  %v6312_v58 = vld [vmem:[%s4738_s8 + $0x8] sm:$0xff]  ;;  %v3565_v31 = vld [vmem:[#allocation3 + $0x30] sm:$0xff] }
 0x940   : > { %v3404_v23 = vpop.permute.xlu1 %3403 }
 0x941   : > { %v3424_v37 = vadd.f32 %v3404_v23, %v6238_v59  ;;  %v3467_v35 = vpop.permute.xlu2 %3466 }
 0x942   : > { %v3476_v17 = vmul.f32 %v3467_v35, %v3436_v26 }
 0x944   : > { %v6279_v7 = vadd.f32 %v3476_v17, %v3428_v54  ;;  %v6320_v54 = vld [vmem:[%s4738_s8 + $0x20] sm:$0xff] }
 0x948   : > { %v3410_v53 = vpop.permute.xlu1 %3409  ;;  %v3408_v56 = vpop.permute.xlu0 %3407 }
 0x949   : > { %v3427_v32 = vadd.f32 %v3410_v53, %v6225_v47  ;;  %v3426_v43 = vadd.f32 %v3408_v56, %v6240_v5 }
 0x94a   : > { %v3495_v52 = vpop.permute.xlu2 %3494 }
 0x94b   : > { %v3519_v4 = vmul.f32 %v3495_v52, %v3431_v38  ;;  %v6324_v38 = vld [vmem:[%s4738_s8 + $0x30] sm:$0xff] }
 0x94d   : > { %3537 = vrot.lane.b32.xlu2 %v3519_v4, %s4622_s18 }
 0x950   : > { %v3443_v28 = vpop.permute.xlu1 %3442  ;;  %v3439_v61 = vpop.permute.xlu0 %3438 }
 0x951   : > { %v3470_v51 = vmul.f32 %v3443_v28, %v3430_v21  ;;  %v3469_v62 = vmul.f32 %v3439_v61, %v3429_v12 }
 0x952   : > { %v3503_v19 = vpop.permute.xlu2 %3502 }
 0x953   : > { %v6284_v55 = vadd.f32 %v3469_v62, %v3421_v44  ;;  %v6286_v27 = vadd.f32 %v3470_v51, %v3422_v1  ;;  %v3521_v13 = vmul.f32 %v3503_v19, %v3433_v33  ;;  %v6304_v1 = vld [vmem:[%s4738_s8 + $0x18] sm:$0xff]  ;;  %v6475_v33 = vmov 15  }
 0x958   : > { %v3451_v57 = vpop.permute.xlu1 %3450  ;;  %v3459_v47 = vpop.permute.xlu0 %3458 }
 0x959   : > { %v3472_v59 = vmul.f32 %v3451_v57, %v3432_v20  ;;  %v3474_v22 = vmul.f32 %v3459_v47, %v3434_v3 }
 0x95a   : > { %v3515_v29 = vpop.permute.xlu2 %3514 }
 0x95b   : > { %v3482_v40 = vadd.f32 %v3474_v22, %v3426_v43  ;;  %v6288_v18 = vadd.f32 %v3472_v59, %v3424_v37  ;;  %v3524_v36 = vmul.f32 %v3515_v29, %v3436_v26  ;;  %v3568_v37 = vld [vmem:[#allocation3 + $0xf0] sm:$0xff] }
 0x95c   : > { %v3570_v43 = vld [vmem:[#allocation3 + $0x170] sm:$0xff] }
 0x960   : > { %v3463_v49 = vpop.permute.xlu1 %3462 }
 0x961   : > { %v3475_v15 = vmul.f32 %v3463_v49, %v3435_v45  ;;  %v3487_v42 = vpop.permute.xlu0 %3486 }
 0x962   : > { %v3517_v5 = vmul.f32 %v3487_v42, %v3429_v12 }
 0x963   : > { %v6290_v30 = vadd.f32 %v3475_v15, %v3427_v32 }
 0x964   : > { %3533 = vrot.lane.b32.xlu0 %v3517_v5, %s4622_s18 }
 0x969   : > { %v3491_v25 = vpop.permute.xlu1 %3490  ;;  %v3507_v8 = vpop.permute.xlu0 %3506 }
 0x96a   : > { %v3518_v63 = vmul.f32 %v3491_v25, %v3430_v21  ;;  %v3522_v2 = vmul.f32 %v3507_v8, %v3434_v3  ;;  %v3569_v8 = vld [vmem:[#allocation3 + $0x130] sm:$0xff] }
 0x96c   : > { %3535 = vrot.lane.b32.xlu1 %v3518_v63, %s4622_s18  ;;  %3543 = vrot.lane.b32.xlu2 %v3522_v2, %s4622_s18  ;;  %v3571_v63 = vld [vmem:[#allocation3 + $0x1b0] sm:$0xff] }
 0x971   : > { %v3499_v46 = vpop.permute.xlu1 %3498 }
 0x972   : > { %v3520_v39 = vmul.f32 %v3499_v46, %v3432_v20 }
 0x974   : > { %3541 = vrot.lane.b32.xlu1 %v3521_v13, %s4622_s18  ;;  %3539 = vrot.lane.b32.xlu0 %v3520_v39, %s4622_s18  ;;  %v3572_v39 = vld [vmem:[#allocation3 + $0x1f0] sm:$0xff] }
 0x975   : > { %3574 = vperm.xlu2 %4542, %v6298_v6  }
 0x979   : > { %v3511_v11 = vpop.permute.xlu1 %3510 }
 0x97a   : > { %v3523_v34 = vmul.f32 %v3511_v11, %v3435_v45  ;;  %v3567_v45 = vld [vmem:[#allocation3 + $0xb0] sm:$0xff] }
 0x97c   : > { %3547 = vrot.lane.b32.xlu1 %v3524_v36, %s4622_s18  ;;  %3545 = vrot.lane.b32.xlu0 %v3523_v34, %s4622_s18 }
 0x97d   : > { %3586 = vperm.xlu2 %4542, %v6304_v1  }
 0x984   : > { %3582 = vperm.xlu1 %4544, %v6308_v16   ;;  %3578 = vperm.xlu0 %4543, %v6312_v58  }
 0x985   : > { %3594 = vperm.xlu2 %4542, %v6316_v41  }
 0x98c   : > { %3590 = vperm.xlu1 %4544, %v6320_v54   ;;  %3598 = vperm.xlu0 %4543, %v6324_v38  }
 0x98d   : > { %4545 = vset.pattern.permute.xlu2 %v6474_v9 }
 0x98e   : > { %3622 = vperm.xlu2 %4545, %v6298_v6  }
 0x994   : > { %3602 = vperm.xlu1 %4544, %v6330_v60   ;;  %4546 = vset.pattern.permute.xlu0 %v6474_v9 }
 0x995   : > { %3626 = vperm.xlu0 %4546, %v6312_v58  }
 0x996   : > { %3634 = vperm.xlu2 %4545, %v6304_v1  }
 0x99c   : > { %4547 = vset.pattern.permute.xlu1 %v6474_v9 }
 0x99d   : > { %3630 = vperm.xlu1 %4547, %v6308_v16   ;;  %3646 = vperm.xlu0 %4546, %v6324_v38  }
 0x99e   : > { %3642 = vperm.xlu2 %4545, %v6316_v41  }
 0x9a5   : > { %3638 = vperm.xlu1 %4547, %v6320_v54   ;;  %4550 = vset.pattern.permute.xlu0 %v6475_v33 }
 0x9a6   : > { %4549 = vset.pattern.permute.xlu2 %v6476_v14 }
 0x9a7   : > { %v3538_v50 = vpop.permute.xlu2 %3537 }
 0x9a8   : > { %v3559_v44 = vadd.f32 %v3538_v50, %v6274_v24 }
 0x9ad   : > { %3650 = vperm.xlu1 %4547, %v6330_v60  }
 0x9b5   : > { %4548 = vset.pattern.permute.xlu1 %v6476_v14 }
 0x9c6   : > { %v3544_v48 = vpop.permute.xlu2 %3543 }
 0x9c7   : > { %v3562_v0 = vadd.f32 %v3544_v48, %v3482_v40 }
 0x9cf   : > { %v3575_v26 = vpop.permute.xlu2 %3574 }
 0x9d0   : > { %v3605_v23 = vmul.f32 %v3575_v26, %v3565_v31 }
 0x9d6   : > { %v3534_v35 = vpop.permute.xlu0 %3533 }
 0x9d7   : > { %v3587_v17 = vpop.permute.xlu2 %3586  ;;  %v3557_v53 = vadd.f32 %v3534_v35, %v6284_v55 }
 0x9d8   : > { %v3608_v56 = vmul.f32 %v3587_v17, %v3568_v37 }
 0x9d9   : > { %v6347_v32 = vadd.f32 %v3605_v23, %v3557_v53 }
 0x9de   : > { %v3536_v52 = vpop.permute.xlu1 %3535 }
 0x9df   : > { %v3558_v24 = vadd.f32 %v3536_v52, %v6286_v27  ;;  %v3595_v4 = vpop.permute.xlu2 %3594 }
 0x9e0   : > { %v3610_v21 = vmul.f32 %v3595_v4, %v3570_v43 }
 0x9e2   : > { %v6350_v12 = vadd.f32 %v3610_v21, %v3562_v0 }
 0x9e6   : > { %v3542_v28 = vpop.permute.xlu1 %3541  ;;  %v3540_v61 = vpop.permute.xlu0 %3539 }
 0x9e7   : > { %v3561_v51 = vadd.f32 %v3542_v28, %v6276_v10  ;;  %v3560_v62 = vadd.f32 %v3540_v61, %v6288_v18  ;;  %v3566_v10 = vld [vmem:[#allocation3 + $0x70] sm:$0xff] }
 0x9e8   : > { %v3623_v20 = vpop.permute.xlu2 %3622 }
 0x9e9   : > { %v3653_v3 = vmul.f32 %v3623_v20, %v3565_v31  ;;  %v6354_v55 = vadd.f32 %v3608_v56, %v3560_v62  ;;  %v3702_v56 = vld [vmem:[#allocation3 + $0x78] sm:$0xff] }
 0x9eb   : > { %3669 = vrot.lane.b32.xlu2 %v3653_v3, %s4622_s18 }
 0x9ee   : > { %v3548_v57 = vpop.permute.xlu1 %3547  ;;  %v3546_v47 = vpop.permute.xlu0 %3545 }
 0x9ef   : > { %v3564_v27 = vadd.f32 %v3548_v57, %v6279_v7  ;;  %v3563_v59 = vadd.f32 %v3546_v47, %v6290_v30 }
 0x9f0   : > { %v3635_v22 = vpop.permute.xlu2 %3634 }
 0x9f1   : > { %v3656_v40 = vmul.f32 %v3635_v22, %v3568_v37 }
 0x9f3   : > { %3675 = vrot.lane.b32.xlu2 %v3656_v40, %s4622_s18 }
 0x9f6   : > { %v3583_v49 = vpop.permute.xlu1 %3582  ;;  %v3579_v18 = vpop.permute.xlu0 %3578 }
 0x9f7   : > { %v3607_v15 = vmul.f32 %v3583_v49, %v3567_v45  ;;  %v3606_v42 = vmul.f32 %v3579_v18, %v3566_v10 }
 0x9f8   : > { %v3643_v31 = vpop.permute.xlu2 %3642 }
 0x9f9   : > { %v6360_v5 = vadd.f32 %v3606_v42, %v3558_v24  ;;  %v6362_v25 = vadd.f32 %v3607_v15, %v3559_v44  ;;  %v3658_v23 = vmul.f32 %v3643_v31, %v3570_v43  ;;  %v3704_v15 = vld [vmem:[#allocation3 + $0xf8] sm:$0xff] }
 0x9fe   : > { %v3591_v2 = vpop.permute.xlu1 %3590  ;;  %v3599_v7 = vpop.permute.xlu0 %3598 }
 0x9ff   : > { %v3609_v19 = vmul.f32 %v3591_v2, %v3569_v8  ;;  %v3611_v30 = vmul.f32 %v3599_v7, %v3571_v63 }
 0xa01   : > { %v3619_v46 = vadd.f32 %v3611_v30, %v3563_v59  ;;  %v6364_v13 = vadd.f32 %v3609_v19, %v3561_v51  ;;  %v3703_v19 = vld [vmem:[#allocation3 + $0xb8] sm:$0xff] }
 0xa02   : > { %v3706_v30 = vld [vmem:[#allocation3 + $0x178] sm:$0xff] }
 0xa06   : > { %v3603_v29 = vpop.permute.xlu1 %3602 }
 0xa07   : > { %v3612_v11 = vmul.f32 %v3603_v29, %v3572_v39  ;;  %v3627_v36 = vpop.permute.xlu0 %3626 }
 0xa08   : > { %v3654_v34 = vmul.f32 %v3627_v36, %v3566_v10 }
 0xa09   : > { %v6366_v9 = vadd.f32 %v3612_v11, %v3564_v27  ;;  %v3701_v27 = vld [vmem:[#allocation3 + $0x38] sm:$0xff] }
 0xa0a   : > { %3671 = vrot.lane.b32.xlu0 %v3654_v34, %s4622_s18 }
 0xa0f   : > { %v3631_v50 = vpop.permute.xlu1 %3630  ;;  %v3647_v44 = vpop.permute.xlu0 %3646 }
 0xa10   : > { %v3655_v48 = vmul.f32 %v3631_v50, %v3567_v45  ;;  %v3659_v0 = vmul.f32 %v3647_v44, %v3571_v63 }
 0xa12   : > { %3673 = vrot.lane.b32.xlu1 %v3655_v48, %s4622_s18  ;;  %3681 = vrot.lane.b32.xlu2 %v3659_v0, %s4622_s18 }
 0xa17   : > { %v3639_v26 = vpop.permute.xlu1 %3638 }
 0xa18   : > { %v3657_v37 = vmul.f32 %v3639_v26, %v3569_v8 }
 0xa1a   : > { %3679 = vrot.lane.b32.xlu1 %v3658_v23, %s4622_s18  ;;  %3677 = vrot.lane.b32.xlu0 %v3657_v37, %s4622_s18 }
 0xa1b   : > { %3714 = vperm.xlu2 %4549, %v6312_v58  }
 0xa1f   : > { %v3651_v35 = vpop.permute.xlu1 %3650 }
 0xa20   : > { %v3660_v17 = vmul.f32 %v3651_v35, %v3572_v39 }
 0xa22   : > { %3710 = vperm.xlu1 %4548, %v6298_v6   ;;  %3683 = vrot.lane.b32.xlu0 %v3660_v17, %s4622_s18 }
 0xa23   : > { %3726 = vperm.xlu2 %4549, %v6320_v54  }
 0xa2a   : > { %3722 = vperm.xlu1 %4548, %v6304_v1   ;;  %3758 = vperm.xlu0 %4550, %v6298_v6  }
 0xa2b   : > { %3734 = vperm.xlu2 %4549, %v6324_v38  }
 0xa32   : > { %3730 = vperm.xlu1 %4548, %v6316_v41   ;;  %3778 = vperm.xlu0 %4550, %v6316_v41  }
 0xa33   : > { %4552 = vset.pattern.permute.xlu2 %v6475_v33 }
 0xa34   : > { %3766 = vperm.xlu2 %4552, %v6308_v16  }
 0xa3a   : > { %4551 = vset.pattern.permute.xlu1 %v6475_v33  ;;  %4553 = vset.pattern.permute.xlu0 %v6476_v14 }
 0xa3b   : > { %3762 = vperm.xlu1 %4551, %v6312_v58   ;;  %3718 = vperm.xlu0 %4553, %v6308_v16  }
 0xa3c   : > { %3774 = vperm.xlu2 %4552, %v6320_v54  }
 0xa43   : > { %3770 = vperm.xlu1 %4551, %v6304_v1   ;;  %3738 = vperm.xlu0 %4553, %v6330_v60   ;;  %v3705_v1 = vld [vmem:[#allocation3 + $0x138] sm:$0xff] }
 0xa44   : > { %3786 = vperm.xlu2 %4552, %v6330_v60  }
 0xa45   : > { %v3670_v6 = vpop.permute.xlu2 %3669 }
 0xa46   : > { %v3693_v41 = vadd.f32 %v3670_v6, %v6347_v32  ;;  %v3707_v32 = vld [vmem:[#allocation3 + $0x1b8] sm:$0xff] }
 0xa4b   : > { %3782 = vperm.xlu1 %4551, %v6324_v38   ;;  %4554 = vset.pattern.permute.xlu0 %v6475_v33 }
 0xa4d   : > { %v3676_v14 = vpop.permute.xlu2 %3675 }
 0xa4e   : > { %v3696_v58 = vadd.f32 %v3676_v14, %v6354_v55 }
 0xa6c   : > { %v3682_v53 = vpop.permute.xlu2 %3681 }
 0xa6d   : > { %v3699_v16 = vadd.f32 %v3682_v53, %v3619_v46 }
 0xa75   : > { %v3715_v54 = vpop.permute.xlu2 %3714 }
 0xa76   : > { %v3742_v43 = vmul.f32 %v3715_v54, %v3702_v56 }
 0xa7c   : > { %v3672_v52 = vpop.permute.xlu0 %3671 }
 0xa7d   : > { %v3727_v24 = vpop.permute.xlu2 %3726  ;;  %v3694_v60 = vadd.f32 %v3672_v52, %v6360_v5 }
 0xa7e   : > { %v3745_v4 = vmul.f32 %v3727_v24, %v3705_v1 }
 0xa7f   : > { %v3750_v21 = vadd.f32 %v3742_v43, %v3694_v60 }
 0xa84   : > { %v3674_v28 = vpop.permute.xlu1 %3673 }
 0xa85   : > { %v3695_v38 = vadd.f32 %v3674_v28, %v6362_v25  ;;  %v3735_v33 = vpop.permute.xlu2 %3734  ;;  %v3708_v25 = vld [vmem:[#allocation3 + $0x1f8] sm:$0xff] }
 0xa86   : > { %v3747_v61 = vmul.f32 %v3735_v33, %v3707_v32 }
 0xa88   : > { %v6398_v51 = vadd.f32 %v3747_v61, %v3699_v16 }
 0xa8c   : > { %v3680_v62 = vpop.permute.xlu1 %3679  ;;  %v3678_v20 = vpop.permute.xlu0 %3677 }
 0xa8d   : > { %v3698_v3 = vadd.f32 %v3680_v62, %v6350_v12  ;;  %v3697_v55 = vadd.f32 %v3678_v20, %v6364_v13 }
 0xa8e   : > { %v3767_v57 = vpop.permute.xlu2 %3766 }
 0xa8f   : > { %v3753_v47 = vadd.f32 %v3745_v4, %v3697_v55  ;;  %v3791_v39 = vmul.f32 %v3767_v57, %v3703_v19 }
 0xa94   : > { %v3711_v59 = vpop.permute.xlu1 %3710  ;;  %v3684_v22 = vpop.permute.xlu0 %3683 }
 0xa95   : > { %v3741_v40 = vmul.f32 %v3711_v59, %v3701_v27  ;;  %v3700_v45 = vadd.f32 %v3684_v22, %v6366_v9 }
 0xa96   : > { %v3775_v10 = vpop.permute.xlu2 %3774 }
 0xa97   : > { %v3793_v49 = vmul.f32 %v3775_v10, %v3705_v1  ;;  %v3749_v18 = vadd.f32 %v3741_v40, %v3693_v41 }
 0xa99   : > { %3813 = vrot.lane.b32.xlu0 %v3793_v49, %s4622_s18 }
 0xa9c   : > { %v3723_v42 = vpop.permute.xlu1 %3722  ;;  %v3759_v5 = vpop.permute.xlu0 %3758 }
 0xa9d   : > { %v3744_v12 = vmul.f32 %v3723_v42, %v3704_v15  ;;  %v3789_v8 = vmul.f32 %v3759_v5, %v3701_v27 }
 0xa9e   : > { %v3787_v63 = vpop.permute.xlu2 %3786 }
 0xa9f   : > { %v3796_v2 = vmul.f32 %v3787_v63, %v3708_v25  ;;  %3805 = vrot.lane.b32.xlu1 %v3789_v8, %s4622_s18  ;;  %v3752_v7 = vadd.f32 %v3744_v12, %v3696_v58 }
 0xaa1   : > { %3819 = vrot.lane.b32.xlu0 %v3796_v2, %s4622_s18 }
 0xaa4   : > { %v3731_v46 = vpop.permute.xlu1 %3730  ;;  %v3779_v13 = vpop.permute.xlu0 %3778 }
 0xaa5   : > { %v3746_v29 = vmul.f32 %v3731_v46, %v3706_v30  ;;  %v3794_v36 = vmul.f32 %v3779_v13, %v3706_v30 }
 0xaa7   : > { %3809 = vrot.lane.b32.xlu1 %v3791_v39, %s4622_s18  ;;  %v3754_v11 = vadd.f32 %v3746_v29, %v3698_v3 }
 0xaad   : > { %v3763_v34 = vpop.permute.xlu1 %3762  ;;  %v3719_v9 = vpop.permute.xlu0 %3718 }
 0xaae   : > { %v3790_v50 = vmul.f32 %v3763_v34, %v3702_v56  ;;  %v3743_v44 = vmul.f32 %v3719_v9, %v3703_v19 }
 0xaaf   : > { %3815 = vrot.lane.b32.xlu1 %v3794_v36, %s4622_s18 }
 0xab0   : > { %3807 = vrot.lane.b32.xlu2 %v3790_v50, %s4622_s18  ;;  %v3751_v48 = vadd.f32 %v3743_v44, %v3695_v38 }
 0xab5   : > { %v3771_v0 = vpop.permute.xlu1 %3770  ;;  %v3739_v31 = vpop.permute.xlu0 %3738 }
 0xab6   : > { %v3792_v26 = vmul.f32 %v3771_v0, %v3704_v15  ;;  %v3748_v23 = vmul.f32 %v3739_v31, %v3708_v25 }
 0xab8   : > { %3811 = vrot.lane.b32.xlu2 %v3792_v26, %s4622_s18  ;;  %v3756_v37 = vadd.f32 %v3748_v23, %v3700_v45 }
 0xabd   : > { %v3783_v35 = vpop.permute.xlu1 %3782 }
 0xabe   : > { %v3795_v17 = vmul.f32 %v3783_v35, %v3707_v32 }
 0xac0   : > { %3817 = vrot.lane.b32.xlu2 %v3795_v17, %s4622_s18 }
 0xb0a   : > { %v3808_v6 = vpop.permute.xlu2 %3807 }
 0xb0b   : > { %v3830_v41 = vadd.f32 %v3808_v6, %v3750_v21  ;;  %v3814_v14 = vpop.permute.xlu0 %3813 }
 0xb0c   : > { %v3833_v58 = vadd.f32 %v3814_v14, %v3753_v47 }
 0xb0d   : > { %3838 = vst.msk [vmem:[%s4744_s13 + $0x8] sm:$0xff] %vm647_vm0, %v3830_v41 }
 0xb0e   : > { %3841 = vst.msk [vmem:[%s4744_s13 + $0x20] sm:$0xff] %vm647_vm0, %v3833_v58 }
 0xb11   : > { %v3806_v53 = vpop.permute.xlu1 %3805 }
 0xb12   : > { %v3829_v16 = vadd.f32 %v3806_v53, %v3749_v18  ;;  %v3812_v56 = vpop.permute.xlu2 %3811 }
 0xb13   : > { %v3832_v54 = vadd.f32 %v3812_v56, %v3752_v7  ;;  %v3820_v43 = vpop.permute.xlu0 %3819 }
 0xb14   : > { %3837 = vst.msk [vmem:[%s4744_s13] sm:$0xff] %vm647_vm0, %v3829_v16  ;;  %v3836_v1 = vadd.f32 %v3820_v43, %v3756_v37 }
 0xb15   : > { %3840 = vst.msk [vmem:[%s4744_s13 + $0x18] sm:$0xff] %vm647_vm0, %v3832_v54 }
 0xb16   : > { %3844 = vst.msk [vmem:[%s4744_s13 + $0x38] sm:$0xff] %vm647_vm0, %v3836_v1 }
 0xb19   : > { %v3810_v52 = vpop.permute.xlu1 %3809 }
 0xb1a   : > { %v3831_v24 = vadd.f32 %v3810_v52, %v3751_v48  ;;  %v3818_v60 = vpop.permute.xlu2 %3817 }
 0xb1b   : > { %v3835_v4 = vadd.f32 %v3818_v60, %v6398_v51 }
 0xb1c   : > { %3839 = vst.msk [vmem:[%s4744_s13 + $0x10] sm:$0xff] %vm647_vm0, %v3831_v24 }
 0xb1d   : > { %3843 = vst.msk [vmem:[%s4744_s13 + $0x30] sm:$0xff] %vm647_vm0, %v3835_v4 }
 0xb21   : > { %v3816_v21 = vpop.permute.xlu1 %3815 }
 0xb22   : > { %v3834_v32 = vadd.f32 %v3816_v21, %v3754_v11 }
 0xb24   : > { %3842 = vst.msk [vmem:[%s4744_s13 + $0x28] sm:$0xff] %vm647_vm0, %v3834_v32 }
 0xb25 PF: > { %s17_s28 = sadd.s32 1, %s4610_s28   ;;  %s6477_s24 = smov %s4602_s26 }
 0xb26   : > { %p14_p8 = scmp.ge.s32.totalorder %s17_s28, 10   ;;  %s6478_s25 = smov %s4606_s27 }
 0xb27   : > { %s6479_s26 = smov %s6482_s29  ;;  %s6480_s27 = smov %s6486_s30 }
 0xb28   :  { %16 = sbr.rel (!%p14_p8) target bundleno = 3 (0x3), region = 116 }

</bundles_post_ra>
